<compile_context>
chip_gen: v7x
topology: tpu7x:2x2x1
jax: 0.10.0
libtpu: 0.0.40
codegen_flags: <defaults>
</compile_context>

<pallas_src>
import jax
import jax.numpy as jnp
from jax.experimental import pallas as pl
from jax.experimental.pallas import tpu as pltpu

C_OUT = 32      # conv out channels == GRU sequence length
HID = 64        # GRU hidden size == GRU input size (conv output width)
NEG_SLOPE = 0.1


def _leaky(v):
    return jnp.where(v >= 0, v, NEG_SLOPE * v)


def _generator_kernel(xc_ref, wc_ref,
                      wir_ref, wiz_ref, win_ref,
                      whr_ref, whz_ref, whn_ref,
                      br_ref, bz_ref, bni_ref, bnh_ref,
                      l1w_ref, l1b_ref, l2w_ref, l2b_ref, l3w_ref, l3b_ref,
                      out_ref):
    Bb = out_ref.shape[0]          # batch tile
    T = wc_ref.shape[0]            # 32 GRU timesteps (= conv channels)
    F2 = wc_ref.shape[1]           # 2 * feature_size (both conv taps stacked)

    # ---- Conv1d(k=2, stride=1, pad=1, bias=False) + LeakyReLU, whole batch tile.
    # xc_ref: (Bb, 2F, 64) with the two shifted tap windows stacked on features.
    wc_b = jnp.broadcast_to(wc_ref[...][None], (Bb, T, F2))          # (Bb, 32, 2F)
    conv = jnp.einsum("bof,bfp->bop", wc_b, xc_ref[...],
                      preferred_element_type=jnp.float32)            # (Bb, 32, 64)
    conv = _leaky(conv)

    # ---- GRU input projection hoisted out of the recurrence (one matmul/gate).
    conv_flat = conv.reshape(Bb * T, HID)                            # rows = (b, t)
    gi_r = (jnp.dot(conv_flat, wir_ref[...], preferred_element_type=jnp.float32)
            + br_ref[...]).reshape(Bb, T, HID)
    gi_z = (jnp.dot(conv_flat, wiz_ref[...], preferred_element_type=jnp.float32)
            + bz_ref[...]).reshape(Bb, T, HID)
    gi_n = (jnp.dot(conv_flat, win_ref[...], preferred_element_type=jnp.float32)
            + bni_ref[...]).reshape(Bb, T, HID)

    whr = whr_ref[...]
    whz = whz_ref[...]
    whn = whn_ref[...]
    bnh = bnh_ref[...]

    # ---- Batched GRU recurrence, PyTorch gate order [r, z, n], h0 = 0.
    h = jnp.zeros((Bb, HID), jnp.float32)
    for t in range(T):             # fully unrolled: T = 32 is static
        gh_r = jnp.dot(h, whr, preferred_element_type=jnp.float32)
        gh_z = jnp.dot(h, whz, preferred_element_type=jnp.float32)
        gh_n = jnp.dot(h, whn, preferred_element_type=jnp.float32) + bnh
        r = jax.nn.sigmoid(gi_r[:, t, :] + gh_r)
        z = jax.nn.sigmoid(gi_z[:, t, :] + gh_z)
        n = jnp.tanh(gi_n[:, t, :] + r * gh_n)
        h = (1.0 - z) * n + z * h

    # ---- MLP head: Linear(64,64)+LReLU -> Linear(64,32)+LReLU -> Linear(32,out)
    h1 = _leaky(jnp.dot(h, l1w_ref[...], preferred_element_type=jnp.float32)
                + l1b_ref[...])
    h2 = _leaky(jnp.dot(h1, l2w_ref[...], preferred_element_type=jnp.float32)
                + l2b_ref[...])
    out_ref[...] = (jnp.dot(h2, l3w_ref[...], preferred_element_type=jnp.float32)
                    + l3b_ref[...])


def _pick_block_b(batch, cap=256):
    """Largest batch tile <= cap satisfying B % tile == 0 and Pallas (8,128) rules."""
    if batch <= cap:
        return batch
    best = batch                       # fallback: whole batch in one grid step
    for cand in range(8, cap + 1, 8):
        if batch % cand == 0:
            best = cand
    return best


def generator_forward(x, params):
    """x: (B, feature_size, L) with L == 63 (NCW, PyTorch Conv1d layout)."""
    B, F, L = x.shape
    assert L + 1 == HID, "conv output width (L+1) must equal GRU input_size=64"

    out_dim = params["l3_w"].shape[0]
    out_pad = ((out_dim + 127) // 128) * 128          # lane-dense output slab

    # Conv1d padding folded into two shifted tap windows stacked on the feature axis.
    x_pad = jnp.pad(x, ((0, 0), (0, 0), (1, 1)))                     # (B, F, L+2)
    xc = jnp.concatenate([x_pad[:, :, 0:HID], x_pad[:, :, 1:HID + 1]],
                         axis=1).astype(jnp.float32)                 # (B, 2F, 64)

    cw = params["conv_w"]                                            # (32, F, 2)
    wc = jnp.concatenate([cw[:, :, 0], cw[:, :, 1]], axis=1)         # (32, 2F)

    # GRU weights, PyTorch layout (3*H, in), gate order [r, z, n].
    wih, whh = params["gru_wih"], params["gru_whh"]
    bih, bhh = params["gru_bih"], params["gru_bhh"]
    wir, wiz, win = wih[0:HID].T, wih[HID:2 * HID].T, wih[2 * HID:].T
    whr, whz, whn = whh[0:HID].T, whh[HID:2 * HID].T, whh[2 * HID:].T
    b_r = (bih[0:HID] + bhh[0:HID])[None, :]          # r/z gates: ih+hh biases fold
    b_z = (bih[HID:2 * HID] + bhh[HID:2 * HID])[None, :]
    b_ni = bih[2 * HID:][None, :]                     # n gate: bhh_n stays inside r*(...)
    b_nh = bhh[2 * HID:][None, :]

    l1w, l1b = params["l1_w"].T, params["l1_b"][None, :]
    l2w, l2b = params["l2_w"].T, params["l2_b"][None, :]
    l3w = jnp.zeros((32, out_pad), jnp.float32).at[:, :out_dim].set(params["l3_w"].T)
    l3b = jnp.zeros((1, out_pad), jnp.float32).at[:, :out_dim].set(params["l3_b"][None, :])

    block_b = _pick_block_b(B)
    grid = (B // block_b,)

    weights = (wc, wir, wiz, win, whr, whz, whn,
               b_r, b_z, b_ni, b_nh, l1w, l1b, l2w, l2b, l3w, l3b)
    w_specs = [pl.BlockSpec(w.shape, lambda i: (0, 0)) for w in weights]

    out = pl.pallas_call(
        _generator_kernel,
        out_shape=jax.ShapeDtypeStruct((B, out_pad), jnp.float32),
        grid=grid,
        in_specs=[pl.BlockSpec((block_b, 2 * F, HID), lambda i: (i, 0, 0))] + w_specs,
        out_specs=pl.BlockSpec((block_b, out_pad), lambda i: (i, 0)),
        compiler_params=pltpu.CompilerParams(
            dimension_semantics=("parallel",)),
    )(xc, *weights)
    return out[:, :out_dim]


def init_params(key, feature_size, output_dim):
    """Deterministic synthetic parameters (PyTorch-style uniform fan-in init)."""
    ks = jax.random.split(key, 11)

    def unif(k, shape, fan_in):
        bound = 1.0 / float(fan_in) ** 0.5
        return jax.random.uniform(k, shape, jnp.float32, -bound, bound)

    return {
        "conv_w": unif(ks[0], (C_OUT, feature_size, 2), feature_size * 2),
        "gru_wih": unif(ks[1], (3 * HID, HID), HID),    # (192, 64) gates [r,z,n]
        "gru_whh": unif(ks[2], (3 * HID, HID), HID),
        "gru_bih": unif(ks[3], (3 * HID,), HID),
        "gru_bhh": unif(ks[4], (3 * HID,), HID),
        "l1_w": unif(ks[5], (64, 64), 64),
        "l1_b": unif(ks[6], (64,), 64),
        "l2_w": unif(ks[7], (32, 64), 64),
        "l2_b": unif(ks[8], (32,), 64),
        "l3_w": unif(ks[9], (output_dim, 32), 32),
        "l3_b": unif(ks[10], (output_dim,), 32),
    }


if __name__ == "__main__":
    B, feature_size, L = 2, 4, 63      # L=63 -> conv output width 64 == GRU input_size
    output_dim = 16                    # input_dim of the PyTorch module is unused
    key = jax.random.PRNGKey(0)
    kx, kp = jax.random.split(key)
    x = jax.random.normal(kx, (B, feature_size, L), jnp.float32)
    params = init_params(kp, feature_size, output_dim)

    out = jax.jit(generator_forward)(x, params)
    jax.block_until_ready(out)
    assert out.shape == (B, output_dim) and out.dtype == jnp.float32
    print("KERNEL_OK")
</pallas_src>

<mosaic_0001>
module attributes {stable_mosaic.version = 11 : i64} {
  func.func @_generator_kernel(%arg0: i32, %arg1: memref<2x8x64xf32, #tpu.memory_space<vmem>>, %arg2: memref<32x8xf32, #tpu.memory_space<vmem>>, %arg3: memref<64x64xf32, #tpu.memory_space<vmem>>, %arg4: memref<64x64xf32, #tpu.memory_space<vmem>>, %arg5: memref<64x64xf32, #tpu.memory_space<vmem>>, %arg6: memref<64x64xf32, #tpu.memory_space<vmem>>, %arg7: memref<64x64xf32, #tpu.memory_space<vmem>>, %arg8: memref<64x64xf32, #tpu.memory_space<vmem>>, %arg9: memref<1x64xf32, #tpu.memory_space<vmem>>, %arg10: memref<1x64xf32, #tpu.memory_space<vmem>>, %arg11: memref<1x64xf32, #tpu.memory_space<vmem>>, %arg12: memref<1x64xf32, #tpu.memory_space<vmem>>, %arg13: memref<64x64xf32, #tpu.memory_space<vmem>>, %arg14: memref<1x64xf32, #tpu.memory_space<vmem>>, %arg15: memref<64x32xf32, #tpu.memory_space<vmem>>, %arg16: memref<1x32xf32, #tpu.memory_space<vmem>>, %arg17: memref<32x128xf32, #tpu.memory_space<vmem>>, %arg18: memref<1x128xf32, #tpu.memory_space<vmem>>, %arg19: memref<2x128xf32, #tpu.memory_space<vmem>>) attributes {dimension_semantics = [#tpu.dimension_semantics<parallel>], iteration_bounds = array<i64: 1>, scalar_prefetch = 0 : i64, scratch_operands = 0 : i64, tpu.core_type = #tpu.core_type<tc>, window_params = [{transform_indices = @transform_0, window_bounds = array<i64: 2, 8, 64>}, {pipeline_mode = #tpu.pipeline_mode<synchronous>, transform_indices = @transform_1, window_bounds = array<i64: 32, 8>}, {pipeline_mode = #tpu.pipeline_mode<synchronous>, transform_indices = @transform_2, window_bounds = array<i64: 64, 64>}, {pipeline_mode = #tpu.pipeline_mode<synchronous>, transform_indices = @transform_3, window_bounds = array<i64: 64, 64>}, {pipeline_mode = #tpu.pipeline_mode<synchronous>, transform_indices = @transform_4, window_bounds = array<i64: 64, 64>}, {pipeline_mode = #tpu.pipeline_mode<synchronous>, transform_indices = @transform_5, window_bounds = array<i64: 64, 64>}, {pipeline_mode = #tpu.pipeline_mode<synchronous>, transform_indices = @transform_6, window_bounds = array<i64: 64, 64>}, {pipeline_mode = #tpu.pipeline_mode<synchronous>, transform_indices = @transform_7, window_bounds = array<i64: 64, 64>}, {pipeline_mode = #tpu.pipeline_mode<synchronous>, transform_indices = @transform_8, window_bounds = array<i64: 1, 64>}, {pipeline_mode = #tpu.pipeline_mode<synchronous>, transform_indices = @transform_9, window_bounds = array<i64: 1, 64>}, {pipeline_mode = #tpu.pipeline_mode<synchronous>, transform_indices = @transform_10, window_bounds = array<i64: 1, 64>}, {pipeline_mode = #tpu.pipeline_mode<synchronous>, transform_indices = @transform_11, window_bounds = array<i64: 1, 64>}, {pipeline_mode = #tpu.pipeline_mode<synchronous>, transform_indices = @transform_12, window_bounds = array<i64: 64, 64>}, {pipeline_mode = #tpu.pipeline_mode<synchronous>, transform_indices = @transform_13, window_bounds = array<i64: 1, 64>}, {pipeline_mode = #tpu.pipeline_mode<synchronous>, transform_indices = @transform_14, window_bounds = array<i64: 64, 32>}, {pipeline_mode = #tpu.pipeline_mode<synchronous>, transform_indices = @transform_15, window_bounds = array<i64: 1, 32>}, {pipeline_mode = #tpu.pipeline_mode<synchronous>, transform_indices = @transform_16, window_bounds = array<i64: 32, 128>}, {pipeline_mode = #tpu.pipeline_mode<synchronous>, transform_indices = @transform_17, window_bounds = array<i64: 1, 128>}, {transform_indices = @transform_18, window_bounds = array<i64: 2, 128>}]} {
    %c0 = arith.constant 0 : index
    %c0_0 = arith.constant 0 : index
    %0 = vector.load %arg2[%c0, %c0_0] : memref<32x8xf32, #tpu.memory_space<vmem>>, vector<32x8xf32>
    %1 = vector.shape_cast %0 : vector<32x8xf32> to vector<1x32x8xf32>
    %2 = vector.shape_cast %1 : vector<1x32x8xf32> to vector<1x32x8xf32>
    %3 = vector.broadcast %2 : vector<1x32x8xf32> to vector<2x32x8xf32>
    %c0_1 = arith.constant 0 : index
    %c0_2 = arith.constant 0 : index
    %c0_3 = arith.constant 0 : index
    %4 = vector.load %arg1[%c0_1, %c0_2, %c0_3] : memref<2x8x64xf32, #tpu.memory_space<vmem>>, vector<2x8x64xf32>
    "tpu.trace_start"() <{level = 10 : i32, message = "bof,bfp->bop"}> : () -> ()
    %cst = arith.constant dense<0.000000e+00> : vector<2x32x64xf32>
    %5 = tpu.matmul %3, %4, %cst {dimension_numbers = #tpu.dot_dimension_numbers<[2], [1], [1], [2], [0, 0, 0, 1, 1, 2], [0], [0]>} : vector<2x32x8xf32>, vector<2x8x64xf32>, vector<2x32x64xf32> -> vector<2x32x64xf32>
    %cst_4 = arith.constant 0.000000e+00 : f32
    "tpu.trace_stop"() : () -> ()
    %6 = vector.broadcast %cst_4 : f32 to vector<2x32x64xf32>
    %7 = arith.cmpf oge, %5, %6 : vector<2x32x64xf32>
    %cst_5 = arith.constant 1.000000e-01 : f32
    %8 = vector.broadcast %cst_5 : f32 to vector<2x32x64xf32>
    %9 = arith.mulf %8, %5 : vector<2x32x64xf32>
    %10 = arith.select %7, %5, %9 : vector<2x32x64xi1>, vector<2x32x64xf32>
    %11 = vector.shape_cast %10 : vector<2x32x64xf32> to vector<64x64xf32>
    %c0_6 = arith.constant 0 : index
    %c0_7 = arith.constant 0 : index
    %12 = vector.load %arg3[%c0_6, %c0_7] : memref<64x64xf32, #tpu.memory_space<vmem>>, vector<64x64xf32>
    %cst_8 = arith.constant dense<0.000000e+00> : vector<64x64xf32>
    %13 = tpu.matmul %11, %12, %cst_8 {dimension_numbers = #tpu.dot_dimension_numbers<[1], [0], [0], [1], [0, 0, 1, 1], [], []>} : vector<64x64xf32>, vector<64x64xf32>, vector<64x64xf32> -> vector<64x64xf32>
    %c0_9 = arith.constant 0 : index
    %c0_10 = arith.constant 0 : index
    %14 = vector.load %arg9[%c0_9, %c0_10] : memref<1x64xf32, #tpu.memory_space<vmem>>, vector<1x64xf32>
    %15 = vector.broadcast %14 : vector<1x64xf32> to vector<64x64xf32>
    %16 = arith.addf %13, %15 : vector<64x64xf32>
    %17 = vector.shape_cast %16 : vector<64x64xf32> to vector<2x32x64xf32>
    %c0_11 = arith.constant 0 : index
    %c0_12 = arith.constant 0 : index
    %18 = vector.load %arg4[%c0_11, %c0_12] : memref<64x64xf32, #tpu.memory_space<vmem>>, vector<64x64xf32>
    %cst_13 = arith.constant dense<0.000000e+00> : vector<64x64xf32>
    %19 = tpu.matmul %11, %18, %cst_13 {dimension_numbers = #tpu.dot_dimension_numbers<[1], [0], [0], [1], [0, 0, 1, 1], [], []>} : vector<64x64xf32>, vector<64x64xf32>, vector<64x64xf32> -> vector<64x64xf32>
    %c0_14 = arith.constant 0 : index
    %c0_15 = arith.constant 0 : index
    %20 = vector.load %arg10[%c0_14, %c0_15] : memref<1x64xf32, #tpu.memory_space<vmem>>, vector<1x64xf32>
    %21 = vector.broadcast %20 : vector<1x64xf32> to vector<64x64xf32>
    %22 = arith.addf %19, %21 : vector<64x64xf32>
    %23 = vector.shape_cast %22 : vector<64x64xf32> to vector<2x32x64xf32>
    %c0_16 = arith.constant 0 : index
    %c0_17 = arith.constant 0 : index
    %24 = vector.load %arg5[%c0_16, %c0_17] : memref<64x64xf32, #tpu.memory_space<vmem>>, vector<64x64xf32>
    %cst_18 = arith.constant dense<0.000000e+00> : vector<64x64xf32>
    %25 = tpu.matmul %11, %24, %cst_18 {dimension_numbers = #tpu.dot_dimension_numbers<[1], [0], [0], [1], [0, 0, 1, 1], [], []>} : vector<64x64xf32>, vector<64x64xf32>, vector<64x64xf32> -> vector<64x64xf32>
    %c0_19 = arith.constant 0 : index
    %c0_20 = arith.constant 0 : index
    %26 = vector.load %arg11[%c0_19, %c0_20] : memref<1x64xf32, #tpu.memory_space<vmem>>, vector<1x64xf32>
    %27 = vector.broadcast %26 : vector<1x64xf32> to vector<64x64xf32>
    %28 = arith.addf %25, %27 : vector<64x64xf32>
    %29 = vector.shape_cast %28 : vector<64x64xf32> to vector<2x32x64xf32>
    %c0_21 = arith.constant 0 : index
    %c0_22 = arith.constant 0 : index
    %30 = vector.load %arg6[%c0_21, %c0_22] : memref<64x64xf32, #tpu.memory_space<vmem>>, vector<64x64xf32>
    %c0_23 = arith.constant 0 : index
    %c0_24 = arith.constant 0 : index
    %31 = vector.load %arg7[%c0_23, %c0_24] : memref<64x64xf32, #tpu.memory_space<vmem>>, vector<64x64xf32>
    %c0_25 = arith.constant 0 : index
    %c0_26 = arith.constant 0 : index
    %32 = vector.load %arg8[%c0_25, %c0_26] : memref<64x64xf32, #tpu.memory_space<vmem>>, vector<64x64xf32>
    %c0_27 = arith.constant 0 : index
    %c0_28 = arith.constant 0 : index
    %33 = vector.load %arg12[%c0_27, %c0_28] : memref<1x64xf32, #tpu.memory_space<vmem>>, vector<1x64xf32>
    %cst_29 = arith.constant 0.000000e+00 : f32
    %34 = vector.broadcast %cst_29 : f32 to vector<2x64xf32>
    %cst_30 = arith.constant dense<0.000000e+00> : vector<2x64xf32>
    %35 = tpu.matmul %34, %30, %cst_30 {dimension_numbers = #tpu.dot_dimension_numbers<[1], [0], [0], [1], [0, 0, 1, 1], [], []>} : vector<2x64xf32>, vector<64x64xf32>, vector<2x64xf32> -> vector<2x64xf32>
    %cst_31 = arith.constant dense<0.000000e+00> : vector<2x64xf32>
    %36 = tpu.matmul %34, %31, %cst_31 {dimension_numbers = #tpu.dot_dimension_numbers<[1], [0], [0], [1], [0, 0, 1, 1], [], []>} : vector<2x64xf32>, vector<64x64xf32>, vector<2x64xf32> -> vector<2x64xf32>
    %cst_32 = arith.constant dense<0.000000e+00> : vector<2x64xf32>
    %37 = tpu.matmul %34, %32, %cst_32 {dimension_numbers = #tpu.dot_dimension_numbers<[1], [0], [0], [1], [0, 0, 1, 1], [], []>} : vector<2x64xf32>, vector<64x64xf32>, vector<2x64xf32> -> vector<2x64xf32>
    %38 = vector.broadcast %33 : vector<1x64xf32> to vector<2x64xf32>
    %39 = arith.addf %37, %38 : vector<2x64xf32>
    %40 = vector.extract_strided_slice %17 {offsets = [0, 0, 0], sizes = [2, 1, 64], strides = [1, 1, 1]} : vector<2x32x64xf32> to vector<2x1x64xf32>
    %41 = vector.shape_cast %40 : vector<2x1x64xf32> to vector<2x64xf32>
    %42 = arith.addf %41, %35 : vector<2x64xf32>
    %43 = arith.negf %42 : vector<2x64xf32>
    %44 = math.exp %43 : vector<2x64xf32>
    %cst_33 = arith.constant 1.000000e+00 : f32
    %45 = vector.broadcast %cst_33 : f32 to vector<2x64xf32>
    %46 = arith.addf %45, %44 : vector<2x64xf32>
    %47 = arith.divf %45, %46 : vector<2x64xf32>
    %48 = vector.extract_strided_slice %23 {offsets = [0, 0, 0], sizes = [2, 1, 64], strides = [1, 1, 1]} : vector<2x32x64xf32> to vector<2x1x64xf32>
    %49 = vector.shape_cast %48 : vector<2x1x64xf32> to vector<2x64xf32>
    %50 = arith.addf %49, %36 : vector<2x64xf32>
    %51 = arith.negf %50 : vector<2x64xf32>
    %52 = math.exp %51 : vector<2x64xf32>
    %cst_34 = arith.constant 1.000000e+00 : f32
    %53 = vector.broadcast %cst_34 : f32 to vector<2x64xf32>
    %54 = arith.addf %53, %52 : vector<2x64xf32>
    %55 = arith.divf %53, %54 : vector<2x64xf32>
    %56 = vector.extract_strided_slice %29 {offsets = [0, 0, 0], sizes = [2, 1, 64], strides = [1, 1, 1]} : vector<2x32x64xf32> to vector<2x1x64xf32>
    %57 = vector.shape_cast %56 : vector<2x1x64xf32> to vector<2x64xf32>
    %58 = arith.mulf %47, %39 : vector<2x64xf32>
    %59 = arith.addf %57, %58 : vector<2x64xf32>
    %60 = math.tanh %59 : vector<2x64xf32>
    %cst_35 = arith.constant 1.000000e+00 : f32
    %61 = vector.broadcast %cst_35 : f32 to vector<2x64xf32>
    %62 = arith.subf %61, %55 : vector<2x64xf32>
    %63 = arith.mulf %62, %60 : vector<2x64xf32>
    %64 = arith.mulf %55, %34 : vector<2x64xf32>
    %65 = arith.addf %63, %64 : vector<2x64xf32>
    %cst_36 = arith.constant dense<0.000000e+00> : vector<2x64xf32>
    %66 = tpu.matmul %65, %30, %cst_36 {dimension_numbers = #tpu.dot_dimension_numbers<[1], [0], [0], [1], [0, 0, 1, 1], [], []>} : vector<2x64xf32>, vector<64x64xf32>, vector<2x64xf32> -> vector<2x64xf32>
    %cst_37 = arith.constant dense<0.000000e+00> : vector<2x64xf32>
    %67 = tpu.matmul %65, %31, %cst_37 {dimension_numbers = #tpu.dot_dimension_numbers<[1], [0], [0], [1], [0, 0, 1, 1], [], []>} : vector<2x64xf32>, vector<64x64xf32>, vector<2x64xf32> -> vector<2x64xf32>
    %cst_38 = arith.constant dense<0.000000e+00> : vector<2x64xf32>
    %68 = tpu.matmul %65, %32, %cst_38 {dimension_numbers = #tpu.dot_dimension_numbers<[1], [0], [0], [1], [0, 0, 1, 1], [], []>} : vector<2x64xf32>, vector<64x64xf32>, vector<2x64xf32> -> vector<2x64xf32>
    %69 = vector.broadcast %33 : vector<1x64xf32> to vector<2x64xf32>
    %70 = arith.addf %68, %69 : vector<2x64xf32>
    %71 = vector.extract_strided_slice %17 {offsets = [0, 1, 0], sizes = [2, 1, 64], strides = [1, 1, 1]} : vector<2x32x64xf32> to vector<2x1x64xf32>
    %72 = vector.shape_cast %71 : vector<2x1x64xf32> to vector<2x64xf32>
    %73 = arith.addf %72, %66 : vector<2x64xf32>
    %74 = arith.negf %73 : vector<2x64xf32>
    %75 = math.exp %74 : vector<2x64xf32>
    %cst_39 = arith.constant 1.000000e+00 : f32
    %76 = vector.broadcast %cst_39 : f32 to vector<2x64xf32>
    %77 = arith.addf %76, %75 : vector<2x64xf32>
    %78 = arith.divf %76, %77 : vector<2x64xf32>
    %79 = vector.extract_strided_slice %23 {offsets = [0, 1, 0], sizes = [2, 1, 64], strides = [1, 1, 1]} : vector<2x32x64xf32> to vector<2x1x64xf32>
    %80 = vector.shape_cast %79 : vector<2x1x64xf32> to vector<2x64xf32>
    %81 = arith.addf %80, %67 : vector<2x64xf32>
    %82 = arith.negf %81 : vector<2x64xf32>
    %83 = math.exp %82 : vector<2x64xf32>
    %cst_40 = arith.constant 1.000000e+00 : f32
    %84 = vector.broadcast %cst_40 : f32 to vector<2x64xf32>
    %85 = arith.addf %84, %83 : vector<2x64xf32>
    %86 = arith.divf %84, %85 : vector<2x64xf32>
    %87 = vector.extract_strided_slice %29 {offsets = [0, 1, 0], sizes = [2, 1, 64], strides = [1, 1, 1]} : vector<2x32x64xf32> to vector<2x1x64xf32>
    %88 = vector.shape_cast %87 : vector<2x1x64xf32> to vector<2x64xf32>
    %89 = arith.mulf %78, %70 : vector<2x64xf32>
    %90 = arith.addf %88, %89 : vector<2x64xf32>
    %91 = math.tanh %90 : vector<2x64xf32>
    %cst_41 = arith.constant 1.000000e+00 : f32
    %92 = vector.broadcast %cst_41 : f32 to vector<2x64xf32>
    %93 = arith.subf %92, %86 : vector<2x64xf32>
    %94 = arith.mulf %93, %91 : vector<2x64xf32>
    %95 = arith.mulf %86, %65 : vector<2x64xf32>
    %96 = arith.addf %94, %95 : vector<2x64xf32>
    %cst_42 = arith.constant dense<0.000000e+00> : vector<2x64xf32>
    %97 = tpu.matmul %96, %30, %cst_42 {dimension_numbers = #tpu.dot_dimension_numbers<[1], [0], [0], [1], [0, 0, 1, 1], [], []>} : vector<2x64xf32>, vector<64x64xf32>, vector<2x64xf32> -> vector<2x64xf32>
    %cst_43 = arith.constant dense<0.000000e+00> : vector<2x64xf32>
    %98 = tpu.matmul %96, %31, %cst_43 {dimension_numbers = #tpu.dot_dimension_numbers<[1], [0], [0], [1], [0, 0, 1, 1], [], []>} : vector<2x64xf32>, vector<64x64xf32>, vector<2x64xf32> -> vector<2x64xf32>
    %cst_44 = arith.constant dense<0.000000e+00> : vector<2x64xf32>
    %99 = tpu.matmul %96, %32, %cst_44 {dimension_numbers = #tpu.dot_dimension_numbers<[1], [0], [0], [1], [0, 0, 1, 1], [], []>} : vector<2x64xf32>, vector<64x64xf32>, vector<2x64xf32> -> vector<2x64xf32>
    %100 = vector.broadcast %33 : vector<1x64xf32> to vector<2x64xf32>
    %101 = arith.addf %99, %100 : vector<2x64xf32>
    %102 = vector.extract_strided_slice %17 {offsets = [0, 2, 0], sizes = [2, 1, 64], strides = [1, 1, 1]} : vector<2x32x64xf32> to vector<2x1x64xf32>
    %103 = vector.shape_cast %102 : vector<2x1x64xf32> to vector<2x64xf32>
    %104 = arith.addf %103, %97 : vector<2x64xf32>
    %105 = arith.negf %104 : vector<2x64xf32>
    %106 = math.exp %105 : vector<2x64xf32>
    %cst_45 = arith.constant 1.000000e+00 : f32
    %107 = vector.broadcast %cst_45 : f32 to vector<2x64xf32>
    %108 = arith.addf %107, %106 : vector<2x64xf32>
    %109 = arith.divf %107, %108 : vector<2x64xf32>
    %110 = vector.extract_strided_slice %23 {offsets = [0, 2, 0], sizes = [2, 1, 64], strides = [1, 1, 1]} : vector<2x32x64xf32> to vector<2x1x64xf32>
    %111 = vector.shape_cast %110 : vector<2x1x64xf32> to vector<2x64xf32>
    %112 = arith.addf %111, %98 : vector<2x64xf32>
    %113 = arith.negf %112 : vector<2x64xf32>
    %114 = math.exp %113 : vector<2x64xf32>
    %cst_46 = arith.constant 1.000000e+00 : f32
    %115 = vector.broadcast %cst_46 : f32 to vector<2x64xf32>
    %116 = arith.addf %115, %114 : vector<2x64xf32>
    %117 = arith.divf %115, %116 : vector<2x64xf32>
    %118 = vector.extract_strided_slice %29 {offsets = [0, 2, 0], sizes = [2, 1, 64], strides = [1, 1, 1]} : vector<2x32x64xf32> to vector<2x1x64xf32>
    %119 = vector.shape_cast %118 : vector<2x1x64xf32> to vector<2x64xf32>
    %120 = arith.mulf %109, %101 : vector<2x64xf32>
    %121 = arith.addf %119, %120 : vector<2x64xf32>
    %122 = math.tanh %121 : vector<2x64xf32>
    %cst_47 = arith.constant 1.000000e+00 : f32
    %123 = vector.broadcast %cst_47 : f32 to vector<2x64xf32>
    %124 = arith.subf %123, %117 : vector<2x64xf32>
    %125 = arith.mulf %124, %122 : vector<2x64xf32>
    %126 = arith.mulf %117, %96 : vector<2x64xf32>
    %127 = arith.addf %125, %126 : vector<2x64xf32>
    %cst_48 = arith.constant dense<0.000000e+00> : vector<2x64xf32>
    %128 = tpu.matmul %127, %30, %cst_48 {dimension_numbers = #tpu.dot_dimension_numbers<[1], [0], [0], [1], [0, 0, 1, 1], [], []>} : vector<2x64xf32>, vector<64x64xf32>, vector<2x64xf32> -> vector<2x64xf32>
    %cst_49 = arith.constant dense<0.000000e+00> : vector<2x64xf32>
    %129 = tpu.matmul %127, %31, %cst_49 {dimension_numbers = #tpu.dot_dimension_numbers<[1], [0], [0], [1], [0, 0, 1, 1], [], []>} : vector<2x64xf32>, vector<64x64xf32>, vector<2x64xf32> -> vector<2x64xf32>
    %cst_50 = arith.constant dense<0.000000e+00> : vector<2x64xf32>
    %130 = tpu.matmul %127, %32, %cst_50 {dimension_numbers = #tpu.dot_dimension_numbers<[1], [0], [0], [1], [0, 0, 1, 1], [], []>} : vector<2x64xf32>, vector<64x64xf32>, vector<2x64xf32> -> vector<2x64xf32>
    %131 = vector.broadcast %33 : vector<1x64xf32> to vector<2x64xf32>
    %132 = arith.addf %130, %131 : vector<2x64xf32>
    %133 = vector.extract_strided_slice %17 {offsets = [0, 3, 0], sizes = [2, 1, 64], strides = [1, 1, 1]} : vector<2x32x64xf32> to vector<2x1x64xf32>
    %134 = vector.shape_cast %133 : vector<2x1x64xf32> to vector<2x64xf32>
    %135 = arith.addf %134, %128 : vector<2x64xf32>
    %136 = arith.negf %135 : vector<2x64xf32>
    %137 = math.exp %136 : vector<2x64xf32>
    %cst_51 = arith.constant 1.000000e+00 : f32
    %138 = vector.broadcast %cst_51 : f32 to vector<2x64xf32>
    %139 = arith.addf %138, %137 : vector<2x64xf32>
    %140 = arith.divf %138, %139 : vector<2x64xf32>
    %141 = vector.extract_strided_slice %23 {offsets = [0, 3, 0], sizes = [2, 1, 64], strides = [1, 1, 1]} : vector<2x32x64xf32> to vector<2x1x64xf32>
    %142 = vector.shape_cast %141 : vector<2x1x64xf32> to vector<2x64xf32>
    %143 = arith.addf %142, %129 : vector<2x64xf32>
    %144 = arith.negf %143 : vector<2x64xf32>
    %145 = math.exp %144 : vector<2x64xf32>
    %cst_52 = arith.constant 1.000000e+00 : f32
    %146 = vector.broadcast %cst_52 : f32 to vector<2x64xf32>
    %147 = arith.addf %146, %145 : vector<2x64xf32>
    %148 = arith.divf %146, %147 : vector<2x64xf32>
    %149 = vector.extract_strided_slice %29 {offsets = [0, 3, 0], sizes = [2, 1, 64], strides = [1, 1, 1]} : vector<2x32x64xf32> to vector<2x1x64xf32>
    %150 = vector.shape_cast %149 : vector<2x1x64xf32> to vector<2x64xf32>
    %151 = arith.mulf %140, %132 : vector<2x64xf32>
    %152 = arith.addf %150, %151 : vector<2x64xf32>
    %153 = math.tanh %152 : vector<2x64xf32>
    %cst_53 = arith.constant 1.000000e+00 : f32
    %154 = vector.broadcast %cst_53 : f32 to vector<2x64xf32>
    %155 = arith.subf %154, %148 : vector<2x64xf32>
    %156 = arith.mulf %155, %153 : vector<2x64xf32>
    %157 = arith.mulf %148, %127 : vector<2x64xf32>
    %158 = arith.addf %156, %157 : vector<2x64xf32>
    %cst_54 = arith.constant dense<0.000000e+00> : vector<2x64xf32>
    %159 = tpu.matmul %158, %30, %cst_54 {dimension_numbers = #tpu.dot_dimension_numbers<[1], [0], [0], [1], [0, 0, 1, 1], [], []>} : vector<2x64xf32>, vector<64x64xf32>, vector<2x64xf32> -> vector<2x64xf32>
    %cst_55 = arith.constant dense<0.000000e+00> : vector<2x64xf32>
    %160 = tpu.matmul %158, %31, %cst_55 {dimension_numbers = #tpu.dot_dimension_numbers<[1], [0], [0], [1], [0, 0, 1, 1], [], []>} : vector<2x64xf32>, vector<64x64xf32>, vector<2x64xf32> -> vector<2x64xf32>
    %cst_56 = arith.constant dense<0.000000e+00> : vector<2x64xf32>
    %161 = tpu.matmul %158, %32, %cst_56 {dimension_numbers = #tpu.dot_dimension_numbers<[1], [0], [0], [1], [0, 0, 1, 1], [], []>} : vector<2x64xf32>, vector<64x64xf32>, vector<2x64xf32> -> vector<2x64xf32>
    %162 = vector.broadcast %33 : vector<1x64xf32> to vector<2x64xf32>
    %163 = arith.addf %161, %162 : vector<2x64xf32>
    %164 = vector.extract_strided_slice %17 {offsets = [0, 4, 0], sizes = [2, 1, 64], strides = [1, 1, 1]} : vector<2x32x64xf32> to vector<2x1x64xf32>
    %165 = vector.shape_cast %164 : vector<2x1x64xf32> to vector<2x64xf32>
    %166 = arith.addf %165, %159 : vector<2x64xf32>
    %167 = arith.negf %166 : vector<2x64xf32>
    %168 = math.exp %167 : vector<2x64xf32>
    %cst_57 = arith.constant 1.000000e+00 : f32
    %169 = vector.broadcast %cst_57 : f32 to vector<2x64xf32>
    %170 = arith.addf %169, %168 : vector<2x64xf32>
    %171 = arith.divf %169, %170 : vector<2x64xf32>
    %172 = vector.extract_strided_slice %23 {offsets = [0, 4, 0], sizes = [2, 1, 64], strides = [1, 1, 1]} : vector<2x32x64xf32> to vector<2x1x64xf32>
    %173 = vector.shape_cast %172 : vector<2x1x64xf32> to vector<2x64xf32>
    %174 = arith.addf %173, %160 : vector<2x64xf32>
    %175 = arith.negf %174 : vector<2x64xf32>
    %176 = math.exp %175 : vector<2x64xf32>
    %cst_58 = arith.constant 1.000000e+00 : f32
    %177 = vector.broadcast %cst_58 : f32 to vector<2x64xf32>
    %178 = arith.addf %177, %176 : vector<2x64xf32>
    %179 = arith.divf %177, %178 : vector<2x64xf32>
    %180 = vector.extract_strided_slice %29 {offsets = [0, 4, 0], sizes = [2, 1, 64], strides = [1, 1, 1]} : vector<2x32x64xf32> to vector<2x1x64xf32>
    %181 = vector.shape_cast %180 : vector<2x1x64xf32> to vector<2x64xf32>
    %182 = arith.mulf %171, %163 : vector<2x64xf32>
    %183 = arith.addf %181, %182 : vector<2x64xf32>
    %184 = math.tanh %183 : vector<2x64xf32>
    %cst_59 = arith.constant 1.000000e+00 : f32
    %185 = vector.broadcast %cst_59 : f32 to vector<2x64xf32>
    %186 = arith.subf %185, %179 : vector<2x64xf32>
    %187 = arith.mulf %186, %184 : vector<2x64xf32>
    %188 = arith.mulf %179, %158 : vector<2x64xf32>
    %189 = arith.addf %187, %188 : vector<2x64xf32>
    %cst_60 = arith.constant dense<0.000000e+00> : vector<2x64xf32>
    %190 = tpu.matmul %189, %30, %cst_60 {dimension_numbers = #tpu.dot_dimension_numbers<[1], [0], [0], [1], [0, 0, 1, 1], [], []>} : vector<2x64xf32>, vector<64x64xf32>, vector<2x64xf32> -> vector<2x64xf32>
    %cst_61 = arith.constant dense<0.000000e+00> : vector<2x64xf32>
    %191 = tpu.matmul %189, %31, %cst_61 {dimension_numbers = #tpu.dot_dimension_numbers<[1], [0], [0], [1], [0, 0, 1, 1], [], []>} : vector<2x64xf32>, vector<64x64xf32>, vector<2x64xf32> -> vector<2x64xf32>
    %cst_62 = arith.constant dense<0.000000e+00> : vector<2x64xf32>
    %192 = tpu.matmul %189, %32, %cst_62 {dimension_numbers = #tpu.dot_dimension_numbers<[1], [0], [0], [1], [0, 0, 1, 1], [], []>} : vector<2x64xf32>, vector<64x64xf32>, vector<2x64xf32> -> vector<2x64xf32>
    %193 = vector.broadcast %33 : vector<1x64xf32> to vector<2x64xf32>
    %194 = arith.addf %192, %193 : vector<2x64xf32>
    %195 = vector.extract_strided_slice %17 {offsets = [0, 5, 0], sizes = [2, 1, 64], strides = [1, 1, 1]} : vector<2x32x64xf32> to vector<2x1x64xf32>
    %196 = vector.shape_cast %195 : vector<2x1x64xf32> to vector<2x64xf32>
    %197 = arith.addf %196, %190 : vector<2x64xf32>
    %198 = arith.negf %197 : vector<2x64xf32>
    %199 = math.exp %198 : vector<2x64xf32>
    %cst_63 = arith.constant 1.000000e+00 : f32
    %200 = vector.broadcast %cst_63 : f32 to vector<2x64xf32>
    %201 = arith.addf %200, %199 : vector<2x64xf32>
    %202 = arith.divf %200, %201 : vector<2x64xf32>
    %203 = vector.extract_strided_slice %23 {offsets = [0, 5, 0], sizes = [2, 1, 64], strides = [1, 1, 1]} : vector<2x32x64xf32> to vector<2x1x64xf32>
    %204 = vector.shape_cast %203 : vector<2x1x64xf32> to vector<2x64xf32>
    %205 = arith.addf %204, %191 : vector<2x64xf32>
    %206 = arith.negf %205 : vector<2x64xf32>
    %207 = math.exp %206 : vector<2x64xf32>
    %cst_64 = arith.constant 1.000000e+00 : f32
    %208 = vector.broadcast %cst_64 : f32 to vector<2x64xf32>
    %209 = arith.addf %208, %207 : vector<2x64xf32>
    %210 = arith.divf %208, %209 : vector<2x64xf32>
    %211 = vector.extract_strided_slice %29 {offsets = [0, 5, 0], sizes = [2, 1, 64], strides = [1, 1, 1]} : vector<2x32x64xf32> to vector<2x1x64xf32>
    %212 = vector.shape_cast %211 : vector<2x1x64xf32> to vector<2x64xf32>
    %213 = arith.mulf %202, %194 : vector<2x64xf32>
    %214 = arith.addf %212, %213 : vector<2x64xf32>
    %215 = math.tanh %214 : vector<2x64xf32>
    %cst_65 = arith.constant 1.000000e+00 : f32
    %216 = vector.broadcast %cst_65 : f32 to vector<2x64xf32>
    %217 = arith.subf %216, %210 : vector<2x64xf32>
    %218 = arith.mulf %217, %215 : vector<2x64xf32>
    %219 = arith.mulf %210, %189 : vector<2x64xf32>
    %220 = arith.addf %218, %219 : vector<2x64xf32>
    %cst_66 = arith.constant dense<0.000000e+00> : vector<2x64xf32>
    %221 = tpu.matmul %220, %30, %cst_66 {dimension_numbers = #tpu.dot_dimension_numbers<[1], [0], [0], [1], [0, 0, 1, 1], [], []>} : vector<2x64xf32>, vector<64x64xf32>, vector<2x64xf32> -> vector<2x64xf32>
    %cst_67 = arith.constant dense<0.000000e+00> : vector<2x64xf32>
    %222 = tpu.matmul %220, %31, %cst_67 {dimension_numbers = #tpu.dot_dimension_numbers<[1], [0], [0], [1], [0, 0, 1, 1], [], []>} : vector<2x64xf32>, vector<64x64xf32>, vector<2x64xf32> -> vector<2x64xf32>
    %cst_68 = arith.constant dense<0.000000e+00> : vector<2x64xf32>
    %223 = tpu.matmul %220, %32, %cst_68 {dimension_numbers = #tpu.dot_dimension_numbers<[1], [0], [0], [1], [0, 0, 1, 1], [], []>} : vector<2x64xf32>, vector<64x64xf32>, vector<2x64xf32> -> vector<2x64xf32>
    %224 = vector.broadcast %33 : vector<1x64xf32> to vector<2x64xf32>
    %225 = arith.addf %223, %224 : vector<2x64xf32>
    %226 = vector.extract_strided_slice %17 {offsets = [0, 6, 0], sizes = [2, 1, 64], strides = [1, 1, 1]} : vector<2x32x64xf32> to vector<2x1x64xf32>
    %227 = vector.shape_cast %226 : vector<2x1x64xf32> to vector<2x64xf32>
    %228 = arith.addf %227, %221 : vector<2x64xf32>
    %229 = arith.negf %228 : vector<2x64xf32>
    %230 = math.exp %229 : vector<2x64xf32>
    %cst_69 = arith.constant 1.000000e+00 : f32
    %231 = vector.broadcast %cst_69 : f32 to vector<2x64xf32>
    %232 = arith.addf %231, %230 : vector<2x64xf32>
    %233 = arith.divf %231, %232 : vector<2x64xf32>
    %234 = vector.extract_strided_slice %23 {offsets = [0, 6, 0], sizes = [2, 1, 64], strides = [1, 1, 1]} : vector<2x32x64xf32> to vector<2x1x64xf32>
    %235 = vector.shape_cast %234 : vector<2x1x64xf32> to vector<2x64xf32>
    %236 = arith.addf %235, %222 : vector<2x64xf32>
    %237 = arith.negf %236 : vector<2x64xf32>
    %238 = math.exp %237 : vector<2x64xf32>
    %cst_70 = arith.constant 1.000000e+00 : f32
    %239 = vector.broadcast %cst_70 : f32 to vector<2x64xf32>
    %240 = arith.addf %239, %238 : vector<2x64xf32>
    %241 = arith.divf %239, %240 : vector<2x64xf32>
    %242 = vector.extract_strided_slice %29 {offsets = [0, 6, 0], sizes = [2, 1, 64], strides = [1, 1, 1]} : vector<2x32x64xf32> to vector<2x1x64xf32>
    %243 = vector.shape_cast %242 : vector<2x1x64xf32> to vector<2x64xf32>
    %244 = arith.mulf %233, %225 : vector<2x64xf32>
    %245 = arith.addf %243, %244 : vector<2x64xf32>
    %246 = math.tanh %245 : vector<2x64xf32>
    %cst_71 = arith.constant 1.000000e+00 : f32
    %247 = vector.broadcast %cst_71 : f32 to vector<2x64xf32>
    %248 = arith.subf %247, %241 : vector<2x64xf32>
    %249 = arith.mulf %248, %246 : vector<2x64xf32>
    %250 = arith.mulf %241, %220 : vector<2x64xf32>
    %251 = arith.addf %249, %250 : vector<2x64xf32>
    %cst_72 = arith.constant dense<0.000000e+00> : vector<2x64xf32>
    %252 = tpu.matmul %251, %30, %cst_72 {dimension_numbers = #tpu.dot_dimension_numbers<[1], [0], [0], [1], [0, 0, 1, 1], [], []>} : vector<2x64xf32>, vector<64x64xf32>, vector<2x64xf32> -> vector<2x64xf32>
    %cst_73 = arith.constant dense<0.000000e+00> : vector<2x64xf32>
    %253 = tpu.matmul %251, %31, %cst_73 {dimension_numbers = #tpu.dot_dimension_numbers<[1], [0], [0], [1], [0, 0, 1, 1], [], []>} : vector<2x64xf32>, vector<64x64xf32>, vector<2x64xf32> -> vector<2x64xf32>
    %cst_74 = arith.constant dense<0.000000e+00> : vector<2x64xf32>
    %254 = tpu.matmul %251, %32, %cst_74 {dimension_numbers = #tpu.dot_dimension_numbers<[1], [0], [0], [1], [0, 0, 1, 1], [], []>} : vector<2x64xf32>, vector<64x64xf32>, vector<2x64xf32> -> vector<2x64xf32>
    %255 = vector.broadcast %33 : vector<1x64xf32> to vector<2x64xf32>
    %256 = arith.addf %254, %255 : vector<2x64xf32>
    %257 = vector.extract_strided_slice %17 {offsets = [0, 7, 0], sizes = [2, 1, 64], strides = [1, 1, 1]} : vector<2x32x64xf32> to vector<2x1x64xf32>
    %258 = vector.shape_cast %257 : vector<2x1x64xf32> to vector<2x64xf32>
    %259 = arith.addf %258, %252 : vector<2x64xf32>
    %260 = arith.negf %259 : vector<2x64xf32>
    %261 = math.exp %260 : vector<2x64xf32>
    %cst_75 = arith.constant 1.000000e+00 : f32
    %262 = vector.broadcast %cst_75 : f32 to vector<2x64xf32>
    %263 = arith.addf %262, %261 : vector<2x64xf32>
    %264 = arith.divf %262, %263 : vector<2x64xf32>
    %265 = vector.extract_strided_slice %23 {offsets = [0, 7, 0], sizes = [2, 1, 64], strides = [1, 1, 1]} : vector<2x32x64xf32> to vector<2x1x64xf32>
    %266 = vector.shape_cast %265 : vector<2x1x64xf32> to vector<2x64xf32>
    %267 = arith.addf %266, %253 : vector<2x64xf32>
    %268 = arith.negf %267 : vector<2x64xf32>
    %269 = math.exp %268 : vector<2x64xf32>
    %cst_76 = arith.constant 1.000000e+00 : f32
    %270 = vector.broadcast %cst_76 : f32 to vector<2x64xf32>
    %271 = arith.addf %270, %269 : vector<2x64xf32>
    %272 = arith.divf %270, %271 : vector<2x64xf32>
    %273 = vector.extract_strided_slice %29 {offsets = [0, 7, 0], sizes = [2, 1, 64], strides = [1, 1, 1]} : vector<2x32x64xf32> to vector<2x1x64xf32>
    %274 = vector.shape_cast %273 : vector<2x1x64xf32> to vector<2x64xf32>
    %275 = arith.mulf %264, %256 : vector<2x64xf32>
    %276 = arith.addf %274, %275 : vector<2x64xf32>
    %277 = math.tanh %276 : vector<2x64xf32>
    %cst_77 = arith.constant 1.000000e+00 : f32
    %278 = vector.broadcast %cst_77 : f32 to vector<2x64xf32>
    %279 = arith.subf %278, %272 : vector<2x64xf32>
    %280 = arith.mulf %279, %277 : vector<2x64xf32>
    %281 = arith.mulf %272, %251 : vector<2x64xf32>
    %282 = arith.addf %280, %281 : vector<2x64xf32>
    %cst_78 = arith.constant dense<0.000000e+00> : vector<2x64xf32>
    %283 = tpu.matmul %282, %30, %cst_78 {dimension_numbers = #tpu.dot_dimension_numbers<[1], [0], [0], [1], [0, 0, 1, 1], [], []>} : vector<2x64xf32>, vector<64x64xf32>, vector<2x64xf32> -> vector<2x64xf32>
    %cst_79 = arith.constant dense<0.000000e+00> : vector<2x64xf32>
    %284 = tpu.matmul %282, %31, %cst_79 {dimension_numbers = #tpu.dot_dimension_numbers<[1], [0], [0], [1], [0, 0, 1, 1], [], []>} : vector<2x64xf32>, vector<64x64xf32>, vector<2x64xf32> -> vector<2x64xf32>
    %cst_80 = arith.constant dense<0.000000e+00> : vector<2x64xf32>
    %285 = tpu.matmul %282, %32, %cst_80 {dimension_numbers = #tpu.dot_dimension_numbers<[1], [0], [0], [1], [0, 0, 1, 1], [], []>} : vector<2x64xf32>, vector<64x64xf32>, vector<2x64xf32> -> vector<2x64xf32>
    %286 = vector.broadcast %33 : vector<1x64xf32> to vector<2x64xf32>
    %287 = arith.addf %285, %286 : vector<2x64xf32>
    %288 = vector.extract_strided_slice %17 {offsets = [0, 8, 0], sizes = [2, 1, 64], strides = [1, 1, 1]} : vector<2x32x64xf32> to vector<2x1x64xf32>
    %289 = vector.shape_cast %288 : vector<2x1x64xf32> to vector<2x64xf32>
    %290 = arith.addf %289, %283 : vector<2x64xf32>
    %291 = arith.negf %290 : vector<2x64xf32>
    %292 = math.exp %291 : vector<2x64xf32>
    %cst_81 = arith.constant 1.000000e+00 : f32
    %293 = vector.broadcast %cst_81 : f32 to vector<2x64xf32>
    %294 = arith.addf %293, %292 : vector<2x64xf32>
    %295 = arith.divf %293, %294 : vector<2x64xf32>
    %296 = vector.extract_strided_slice %23 {offsets = [0, 8, 0], sizes = [2, 1, 64], strides = [1, 1, 1]} : vector<2x32x64xf32> to vector<2x1x64xf32>
    %297 = vector.shape_cast %296 : vector<2x1x64xf32> to vector<2x64xf32>
    %298 = arith.addf %297, %284 : vector<2x64xf32>
    %299 = arith.negf %298 : vector<2x64xf32>
    %300 = math.exp %299 : vector<2x64xf32>
    %cst_82 = arith.constant 1.000000e+00 : f32
    %301 = vector.broadcast %cst_82 : f32 to vector<2x64xf32>
    %302 = arith.addf %301, %300 : vector<2x64xf32>
    %303 = arith.divf %301, %302 : vector<2x64xf32>
    %304 = vector.extract_strided_slice %29 {offsets = [0, 8, 0], sizes = [2, 1, 64], strides = [1, 1, 1]} : vector<2x32x64xf32> to vector<2x1x64xf32>
    %305 = vector.shape_cast %304 : vector<2x1x64xf32> to vector<2x64xf32>
    %306 = arith.mulf %295, %287 : vector<2x64xf32>
    %307 = arith.addf %305, %306 : vector<2x64xf32>
    %308 = math.tanh %307 : vector<2x64xf32>
    %cst_83 = arith.constant 1.000000e+00 : f32
    %309 = vector.broadcast %cst_83 : f32 to vector<2x64xf32>
    %310 = arith.subf %309, %303 : vector<2x64xf32>
    %311 = arith.mulf %310, %308 : vector<2x64xf32>
    %312 = arith.mulf %303, %282 : vector<2x64xf32>
    %313 = arith.addf %311, %312 : vector<2x64xf32>
    %cst_84 = arith.constant dense<0.000000e+00> : vector<2x64xf32>
    %314 = tpu.matmul %313, %30, %cst_84 {dimension_numbers = #tpu.dot_dimension_numbers<[1], [0], [0], [1], [0, 0, 1, 1], [], []>} : vector<2x64xf32>, vector<64x64xf32>, vector<2x64xf32> -> vector<2x64xf32>
    %cst_85 = arith.constant dense<0.000000e+00> : vector<2x64xf32>
    %315 = tpu.matmul %313, %31, %cst_85 {dimension_numbers = #tpu.dot_dimension_numbers<[1], [0], [0], [1], [0, 0, 1, 1], [], []>} : vector<2x64xf32>, vector<64x64xf32>, vector<2x64xf32> -> vector<2x64xf32>
    %cst_86 = arith.constant dense<0.000000e+00> : vector<2x64xf32>
    %316 = tpu.matmul %313, %32, %cst_86 {dimension_numbers = #tpu.dot_dimension_numbers<[1], [0], [0], [1], [0, 0, 1, 1], [], []>} : vector<2x64xf32>, vector<64x64xf32>, vector<2x64xf32> -> vector<2x64xf32>
    %317 = vector.broadcast %33 : vector<1x64xf32> to vector<2x64xf32>
    %318 = arith.addf %316, %317 : vector<2x64xf32>
    %319 = vector.extract_strided_slice %17 {offsets = [0, 9, 0], sizes = [2, 1, 64], strides = [1, 1, 1]} : vector<2x32x64xf32> to vector<2x1x64xf32>
    %320 = vector.shape_cast %319 : vector<2x1x64xf32> to vector<2x64xf32>
    %321 = arith.addf %320, %314 : vector<2x64xf32>
    %322 = arith.negf %321 : vector<2x64xf32>
    %323 = math.exp %322 : vector<2x64xf32>
    %cst_87 = arith.constant 1.000000e+00 : f32
    %324 = vector.broadcast %cst_87 : f32 to vector<2x64xf32>
    %325 = arith.addf %324, %323 : vector<2x64xf32>
    %326 = arith.divf %324, %325 : vector<2x64xf32>
    %327 = vector.extract_strided_slice %23 {offsets = [0, 9, 0], sizes = [2, 1, 64], strides = [1, 1, 1]} : vector<2x32x64xf32> to vector<2x1x64xf32>
    %328 = vector.shape_cast %327 : vector<2x1x64xf32> to vector<2x64xf32>
    %329 = arith.addf %328, %315 : vector<2x64xf32>
    %330 = arith.negf %329 : vector<2x64xf32>
    %331 = math.exp %330 : vector<2x64xf32>
    %cst_88 = arith.constant 1.000000e+00 : f32
    %332 = vector.broadcast %cst_88 : f32 to vector<2x64xf32>
    %333 = arith.addf %332, %331 : vector<2x64xf32>
    %334 = arith.divf %332, %333 : vector<2x64xf32>
    %335 = vector.extract_strided_slice %29 {offsets = [0, 9, 0], sizes = [2, 1, 64], strides = [1, 1, 1]} : vector<2x32x64xf32> to vector<2x1x64xf32>
    %336 = vector.shape_cast %335 : vector<2x1x64xf32> to vector<2x64xf32>
    %337 = arith.mulf %326, %318 : vector<2x64xf32>
    %338 = arith.addf %336, %337 : vector<2x64xf32>
    %339 = math.tanh %338 : vector<2x64xf32>
    %cst_89 = arith.constant 1.000000e+00 : f32
    %340 = vector.broadcast %cst_89 : f32 to vector<2x64xf32>
    %341 = arith.subf %340, %334 : vector<2x64xf32>
    %342 = arith.mulf %341, %339 : vector<2x64xf32>
    %343 = arith.mulf %334, %313 : vector<2x64xf32>
    %344 = arith.addf %342, %343 : vector<2x64xf32>
    %cst_90 = arith.constant dense<0.000000e+00> : vector<2x64xf32>
    %345 = tpu.matmul %344, %30, %cst_90 {dimension_numbers = #tpu.dot_dimension_numbers<[1], [0], [0], [1], [0, 0, 1, 1], [], []>} : vector<2x64xf32>, vector<64x64xf32>, vector<2x64xf32> -> vector<2x64xf32>
    %cst_91 = arith.constant dense<0.000000e+00> : vector<2x64xf32>
    %346 = tpu.matmul %344, %31, %cst_91 {dimension_numbers = #tpu.dot_dimension_numbers<[1], [0], [0], [1], [0, 0, 1, 1], [], []>} : vector<2x64xf32>, vector<64x64xf32>, vector<2x64xf32> -> vector<2x64xf32>
    %cst_92 = arith.constant dense<0.000000e+00> : vector<2x64xf32>
    %347 = tpu.matmul %344, %32, %cst_92 {dimension_numbers = #tpu.dot_dimension_numbers<[1], [0], [0], [1], [0, 0, 1, 1], [], []>} : vector<2x64xf32>, vector<64x64xf32>, vector<2x64xf32> -> vector<2x64xf32>
    %348 = vector.broadcast %33 : vector<1x64xf32> to vector<2x64xf32>
    %349 = arith.addf %347, %348 : vector<2x64xf32>
    %350 = vector.extract_strided_slice %17 {offsets = [0, 10, 0], sizes = [2, 1, 64], strides = [1, 1, 1]} : vector<2x32x64xf32> to vector<2x1x64xf32>
    %351 = vector.shape_cast %350 : vector<2x1x64xf32> to vector<2x64xf32>
    %352 = arith.addf %351, %345 : vector<2x64xf32>
    %353 = arith.negf %352 : vector<2x64xf32>
    %354 = math.exp %353 : vector<2x64xf32>
    %cst_93 = arith.constant 1.000000e+00 : f32
    %355 = vector.broadcast %cst_93 : f32 to vector<2x64xf32>
    %356 = arith.addf %355, %354 : vector<2x64xf32>
    %357 = arith.divf %355, %356 : vector<2x64xf32>
    %358 = vector.extract_strided_slice %23 {offsets = [0, 10, 0], sizes = [2, 1, 64], strides = [1, 1, 1]} : vector<2x32x64xf32> to vector<2x1x64xf32>
    %359 = vector.shape_cast %358 : vector<2x1x64xf32> to vector<2x64xf32>
    %360 = arith.addf %359, %346 : vector<2x64xf32>
    %361 = arith.negf %360 : vector<2x64xf32>
    %362 = math.exp %361 : vector<2x64xf32>
    %cst_94 = arith.constant 1.000000e+00 : f32
    %363 = vector.broadcast %cst_94 : f32 to vector<2x64xf32>
    %364 = arith.addf %363, %362 : vector<2x64xf32>
    %365 = arith.divf %363, %364 : vector<2x64xf32>
    %366 = vector.extract_strided_slice %29 {offsets = [0, 10, 0], sizes = [2, 1, 64], strides = [1, 1, 1]} : vector<2x32x64xf32> to vector<2x1x64xf32>
    %367 = vector.shape_cast %366 : vector<2x1x64xf32> to vector<2x64xf32>
    %368 = arith.mulf %357, %349 : vector<2x64xf32>
    %369 = arith.addf %367, %368 : vector<2x64xf32>
    %370 = math.tanh %369 : vector<2x64xf32>
    %cst_95 = arith.constant 1.000000e+00 : f32
    %371 = vector.broadcast %cst_95 : f32 to vector<2x64xf32>
    %372 = arith.subf %371, %365 : vector<2x64xf32>
    %373 = arith.mulf %372, %370 : vector<2x64xf32>
    %374 = arith.mulf %365, %344 : vector<2x64xf32>
    %375 = arith.addf %373, %374 : vector<2x64xf32>
    %cst_96 = arith.constant dense<0.000000e+00> : vector<2x64xf32>
    %376 = tpu.matmul %375, %30, %cst_96 {dimension_numbers = #tpu.dot_dimension_numbers<[1], [0], [0], [1], [0, 0, 1, 1], [], []>} : vector<2x64xf32>, vector<64x64xf32>, vector<2x64xf32> -> vector<2x64xf32>
    %cst_97 = arith.constant dense<0.000000e+00> : vector<2x64xf32>
    %377 = tpu.matmul %375, %31, %cst_97 {dimension_numbers = #tpu.dot_dimension_numbers<[1], [0], [0], [1], [0, 0, 1, 1], [], []>} : vector<2x64xf32>, vector<64x64xf32>, vector<2x64xf32> -> vector<2x64xf32>
    %cst_98 = arith.constant dense<0.000000e+00> : vector<2x64xf32>
    %378 = tpu.matmul %375, %32, %cst_98 {dimension_numbers = #tpu.dot_dimension_numbers<[1], [0], [0], [1], [0, 0, 1, 1], [], []>} : vector<2x64xf32>, vector<64x64xf32>, vector<2x64xf32> -> vector<2x64xf32>
    %379 = vector.broadcast %33 : vector<1x64xf32> to vector<2x64xf32>
    %380 = arith.addf %378, %379 : vector<2x64xf32>
    %381 = vector.extract_strided_slice %17 {offsets = [0, 11, 0], sizes = [2, 1, 64], strides = [1, 1, 1]} : vector<2x32x64xf32> to vector<2x1x64xf32>
    %382 = vector.shape_cast %381 : vector<2x1x64xf32> to vector<2x64xf32>
    %383 = arith.addf %382, %376 : vector<2x64xf32>
    %384 = arith.negf %383 : vector<2x64xf32>
    %385 = math.exp %384 : vector<2x64xf32>
    %cst_99 = arith.constant 1.000000e+00 : f32
    %386 = vector.broadcast %cst_99 : f32 to vector<2x64xf32>
    %387 = arith.addf %386, %385 : vector<2x64xf32>
    %388 = arith.divf %386, %387 : vector<2x64xf32>
    %389 = vector.extract_strided_slice %23 {offsets = [0, 11, 0], sizes = [2, 1, 64], strides = [1, 1, 1]} : vector<2x32x64xf32> to vector<2x1x64xf32>
    %390 = vector.shape_cast %389 : vector<2x1x64xf32> to vector<2x64xf32>
    %391 = arith.addf %390, %377 : vector<2x64xf32>
    %392 = arith.negf %391 : vector<2x64xf32>
    %393 = math.exp %392 : vector<2x64xf32>
    %cst_100 = arith.constant 1.000000e+00 : f32
    %394 = vector.broadcast %cst_100 : f32 to vector<2x64xf32>
    %395 = arith.addf %394, %393 : vector<2x64xf32>
    %396 = arith.divf %394, %395 : vector<2x64xf32>
    %397 = vector.extract_strided_slice %29 {offsets = [0, 11, 0], sizes = [2, 1, 64], strides = [1, 1, 1]} : vector<2x32x64xf32> to vector<2x1x64xf32>
    %398 = vector.shape_cast %397 : vector<2x1x64xf32> to vector<2x64xf32>
    %399 = arith.mulf %388, %380 : vector<2x64xf32>
    %400 = arith.addf %398, %399 : vector<2x64xf32>
    %401 = math.tanh %400 : vector<2x64xf32>
    %cst_101 = arith.constant 1.000000e+00 : f32
    %402 = vector.broadcast %cst_101 : f32 to vector<2x64xf32>
    %403 = arith.subf %402, %396 : vector<2x64xf32>
    %404 = arith.mulf %403, %401 : vector<2x64xf32>
    %405 = arith.mulf %396, %375 : vector<2x64xf32>
    %406 = arith.addf %404, %405 : vector<2x64xf32>
    %cst_102 = arith.constant dense<0.000000e+00> : vector<2x64xf32>
    %407 = tpu.matmul %406, %30, %cst_102 {dimension_numbers = #tpu.dot_dimension_numbers<[1], [0], [0], [1], [0, 0, 1, 1], [], []>} : vector<2x64xf32>, vector<64x64xf32>, vector<2x64xf32> -> vector<2x64xf32>
    %cst_103 = arith.constant dense<0.000000e+00> : vector<2x64xf32>
    %408 = tpu.matmul %406, %31, %cst_103 {dimension_numbers = #tpu.dot_dimension_numbers<[1], [0], [0], [1], [0, 0, 1, 1], [], []>} : vector<2x64xf32>, vector<64x64xf32>, vector<2x64xf32> -> vector<2x64xf32>
    %cst_104 = arith.constant dense<0.000000e+00> : vector<2x64xf32>
    %409 = tpu.matmul %406, %32, %cst_104 {dimension_numbers = #tpu.dot_dimension_numbers<[1], [0], [0], [1], [0, 0, 1, 1], [], []>} : vector<2x64xf32>, vector<64x64xf32>, vector<2x64xf32> -> vector<2x64xf32>
    %410 = vector.broadcast %33 : vector<1x64xf32> to vector<2x64xf32>
    %411 = arith.addf %409, %410 : vector<2x64xf32>
    %412 = vector.extract_strided_slice %17 {offsets = [0, 12, 0], sizes = [2, 1, 64], strides = [1, 1, 1]} : vector<2x32x64xf32> to vector<2x1x64xf32>
    %413 = vector.shape_cast %412 : vector<2x1x64xf32> to vector<2x64xf32>
    %414 = arith.addf %413, %407 : vector<2x64xf32>
    %415 = arith.negf %414 : vector<2x64xf32>
    %416 = math.exp %415 : vector<2x64xf32>
    %cst_105 = arith.constant 1.000000e+00 : f32
    %417 = vector.broadcast %cst_105 : f32 to vector<2x64xf32>
    %418 = arith.addf %417, %416 : vector<2x64xf32>
    %419 = arith.divf %417, %418 : vector<2x64xf32>
    %420 = vector.extract_strided_slice %23 {offsets = [0, 12, 0], sizes = [2, 1, 64], strides = [1, 1, 1]} : vector<2x32x64xf32> to vector<2x1x64xf32>
    %421 = vector.shape_cast %420 : vector<2x1x64xf32> to vector<2x64xf32>
    %422 = arith.addf %421, %408 : vector<2x64xf32>
    %423 = arith.negf %422 : vector<2x64xf32>
    %424 = math.exp %423 : vector<2x64xf32>
    %cst_106 = arith.constant 1.000000e+00 : f32
    %425 = vector.broadcast %cst_106 : f32 to vector<2x64xf32>
    %426 = arith.addf %425, %424 : vector<2x64xf32>
    %427 = arith.divf %425, %426 : vector<2x64xf32>
    %428 = vector.extract_strided_slice %29 {offsets = [0, 12, 0], sizes = [2, 1, 64], strides = [1, 1, 1]} : vector<2x32x64xf32> to vector<2x1x64xf32>
    %429 = vector.shape_cast %428 : vector<2x1x64xf32> to vector<2x64xf32>
    %430 = arith.mulf %419, %411 : vector<2x64xf32>
    %431 = arith.addf %429, %430 : vector<2x64xf32>
    %432 = math.tanh %431 : vector<2x64xf32>
    %cst_107 = arith.constant 1.000000e+00 : f32
    %433 = vector.broadcast %cst_107 : f32 to vector<2x64xf32>
    %434 = arith.subf %433, %427 : vector<2x64xf32>
    %435 = arith.mulf %434, %432 : vector<2x64xf32>
    %436 = arith.mulf %427, %406 : vector<2x64xf32>
    %437 = arith.addf %435, %436 : vector<2x64xf32>
    %cst_108 = arith.constant dense<0.000000e+00> : vector<2x64xf32>
    %438 = tpu.matmul %437, %30, %cst_108 {dimension_numbers = #tpu.dot_dimension_numbers<[1], [0], [0], [1], [0, 0, 1, 1], [], []>} : vector<2x64xf32>, vector<64x64xf32>, vector<2x64xf32> -> vector<2x64xf32>
    %cst_109 = arith.constant dense<0.000000e+00> : vector<2x64xf32>
    %439 = tpu.matmul %437, %31, %cst_109 {dimension_numbers = #tpu.dot_dimension_numbers<[1], [0], [0], [1], [0, 0, 1, 1], [], []>} : vector<2x64xf32>, vector<64x64xf32>, vector<2x64xf32> -> vector<2x64xf32>
    %cst_110 = arith.constant dense<0.000000e+00> : vector<2x64xf32>
    %440 = tpu.matmul %437, %32, %cst_110 {dimension_numbers = #tpu.dot_dimension_numbers<[1], [0], [0], [1], [0, 0, 1, 1], [], []>} : vector<2x64xf32>, vector<64x64xf32>, vector<2x64xf32> -> vector<2x64xf32>
    %441 = vector.broadcast %33 : vector<1x64xf32> to vector<2x64xf32>
    %442 = arith.addf %440, %441 : vector<2x64xf32>
    %443 = vector.extract_strided_slice %17 {offsets = [0, 13, 0], sizes = [2, 1, 64], strides = [1, 1, 1]} : vector<2x32x64xf32> to vector<2x1x64xf32>
    %444 = vector.shape_cast %443 : vector<2x1x64xf32> to vector<2x64xf32>
    %445 = arith.addf %444, %438 : vector<2x64xf32>
    %446 = arith.negf %445 : vector<2x64xf32>
    %447 = math.exp %446 : vector<2x64xf32>
    %cst_111 = arith.constant 1.000000e+00 : f32
    %448 = vector.broadcast %cst_111 : f32 to vector<2x64xf32>
    %449 = arith.addf %448, %447 : vector<2x64xf32>
    %450 = arith.divf %448, %449 : vector<2x64xf32>
    %451 = vector.extract_strided_slice %23 {offsets = [0, 13, 0], sizes = [2, 1, 64], strides = [1, 1, 1]} : vector<2x32x64xf32> to vector<2x1x64xf32>
    %452 = vector.shape_cast %451 : vector<2x1x64xf32> to vector<2x64xf32>
    %453 = arith.addf %452, %439 : vector<2x64xf32>
    %454 = arith.negf %453 : vector<2x64xf32>
    %455 = math.exp %454 : vector<2x64xf32>
    %cst_112 = arith.constant 1.000000e+00 : f32
    %456 = vector.broadcast %cst_112 : f32 to vector<2x64xf32>
    %457 = arith.addf %456, %455 : vector<2x64xf32>
    %458 = arith.divf %456, %457 : vector<2x64xf32>
    %459 = vector.extract_strided_slice %29 {offsets = [0, 13, 0], sizes = [2, 1, 64], strides = [1, 1, 1]} : vector<2x32x64xf32> to vector<2x1x64xf32>
    %460 = vector.shape_cast %459 : vector<2x1x64xf32> to vector<2x64xf32>
    %461 = arith.mulf %450, %442 : vector<2x64xf32>
    %462 = arith.addf %460, %461 : vector<2x64xf32>
    %463 = math.tanh %462 : vector<2x64xf32>
    %cst_113 = arith.constant 1.000000e+00 : f32
    %464 = vector.broadcast %cst_113 : f32 to vector<2x64xf32>
    %465 = arith.subf %464, %458 : vector<2x64xf32>
    %466 = arith.mulf %465, %463 : vector<2x64xf32>
    %467 = arith.mulf %458, %437 : vector<2x64xf32>
    %468 = arith.addf %466, %467 : vector<2x64xf32>
    %cst_114 = arith.constant dense<0.000000e+00> : vector<2x64xf32>
    %469 = tpu.matmul %468, %30, %cst_114 {dimension_numbers = #tpu.dot_dimension_numbers<[1], [0], [0], [1], [0, 0, 1, 1], [], []>} : vector<2x64xf32>, vector<64x64xf32>, vector<2x64xf32> -> vector<2x64xf32>
    %cst_115 = arith.constant dense<0.000000e+00> : vector<2x64xf32>
    %470 = tpu.matmul %468, %31, %cst_115 {dimension_numbers = #tpu.dot_dimension_numbers<[1], [0], [0], [1], [0, 0, 1, 1], [], []>} : vector<2x64xf32>, vector<64x64xf32>, vector<2x64xf32> -> vector<2x64xf32>
    %cst_116 = arith.constant dense<0.000000e+00> : vector<2x64xf32>
    %471 = tpu.matmul %468, %32, %cst_116 {dimension_numbers = #tpu.dot_dimension_numbers<[1], [0], [0], [1], [0, 0, 1, 1], [], []>} : vector<2x64xf32>, vector<64x64xf32>, vector<2x64xf32> -> vector<2x64xf32>
    %472 = vector.broadcast %33 : vector<1x64xf32> to vector<2x64xf32>
    %473 = arith.addf %471, %472 : vector<2x64xf32>
    %474 = vector.extract_strided_slice %17 {offsets = [0, 14, 0], sizes = [2, 1, 64], strides = [1, 1, 1]} : vector<2x32x64xf32> to vector<2x1x64xf32>
    %475 = vector.shape_cast %474 : vector<2x1x64xf32> to vector<2x64xf32>
    %476 = arith.addf %475, %469 : vector<2x64xf32>
    %477 = arith.negf %476 : vector<2x64xf32>
    %478 = math.exp %477 : vector<2x64xf32>
    %cst_117 = arith.constant 1.000000e+00 : f32
    %479 = vector.broadcast %cst_117 : f32 to vector<2x64xf32>
    %480 = arith.addf %479, %478 : vector<2x64xf32>
    %481 = arith.divf %479, %480 : vector<2x64xf32>
    %482 = vector.extract_strided_slice %23 {offsets = [0, 14, 0], sizes = [2, 1, 64], strides = [1, 1, 1]} : vector<2x32x64xf32> to vector<2x1x64xf32>
    %483 = vector.shape_cast %482 : vector<2x1x64xf32> to vector<2x64xf32>
    %484 = arith.addf %483, %470 : vector<2x64xf32>
    %485 = arith.negf %484 : vector<2x64xf32>
    %486 = math.exp %485 : vector<2x64xf32>
    %cst_118 = arith.constant 1.000000e+00 : f32
    %487 = vector.broadcast %cst_118 : f32 to vector<2x64xf32>
    %488 = arith.addf %487, %486 : vector<2x64xf32>
    %489 = arith.divf %487, %488 : vector<2x64xf32>
    %490 = vector.extract_strided_slice %29 {offsets = [0, 14, 0], sizes = [2, 1, 64], strides = [1, 1, 1]} : vector<2x32x64xf32> to vector<2x1x64xf32>
    %491 = vector.shape_cast %490 : vector<2x1x64xf32> to vector<2x64xf32>
    %492 = arith.mulf %481, %473 : vector<2x64xf32>
    %493 = arith.addf %491, %492 : vector<2x64xf32>
    %494 = math.tanh %493 : vector<2x64xf32>
    %cst_119 = arith.constant 1.000000e+00 : f32
    %495 = vector.broadcast %cst_119 : f32 to vector<2x64xf32>
    %496 = arith.subf %495, %489 : vector<2x64xf32>
    %497 = arith.mulf %496, %494 : vector<2x64xf32>
    %498 = arith.mulf %489, %468 : vector<2x64xf32>
    %499 = arith.addf %497, %498 : vector<2x64xf32>
    %cst_120 = arith.constant dense<0.000000e+00> : vector<2x64xf32>
    %500 = tpu.matmul %499, %30, %cst_120 {dimension_numbers = #tpu.dot_dimension_numbers<[1], [0], [0], [1], [0, 0, 1, 1], [], []>} : vector<2x64xf32>, vector<64x64xf32>, vector<2x64xf32> -> vector<2x64xf32>
    %cst_121 = arith.constant dense<0.000000e+00> : vector<2x64xf32>
    %501 = tpu.matmul %499, %31, %cst_121 {dimension_numbers = #tpu.dot_dimension_numbers<[1], [0], [0], [1], [0, 0, 1, 1], [], []>} : vector<2x64xf32>, vector<64x64xf32>, vector<2x64xf32> -> vector<2x64xf32>
    %cst_122 = arith.constant dense<0.000000e+00> : vector<2x64xf32>
    %502 = tpu.matmul %499, %32, %cst_122 {dimension_numbers = #tpu.dot_dimension_numbers<[1], [0], [0], [1], [0, 0, 1, 1], [], []>} : vector<2x64xf32>, vector<64x64xf32>, vector<2x64xf32> -> vector<2x64xf32>
    %503 = vector.broadcast %33 : vector<1x64xf32> to vector<2x64xf32>
    %504 = arith.addf %502, %503 : vector<2x64xf32>
    %505 = vector.extract_strided_slice %17 {offsets = [0, 15, 0], sizes = [2, 1, 64], strides = [1, 1, 1]} : vector<2x32x64xf32> to vector<2x1x64xf32>
    %506 = vector.shape_cast %505 : vector<2x1x64xf32> to vector<2x64xf32>
    %507 = arith.addf %506, %500 : vector<2x64xf32>
    %508 = arith.negf %507 : vector<2x64xf32>
    %509 = math.exp %508 : vector<2x64xf32>
    %cst_123 = arith.constant 1.000000e+00 : f32
    %510 = vector.broadcast %cst_123 : f32 to vector<2x64xf32>
    %511 = arith.addf %510, %509 : vector<2x64xf32>
    %512 = arith.divf %510, %511 : vector<2x64xf32>
    %513 = vector.extract_strided_slice %23 {offsets = [0, 15, 0], sizes = [2, 1, 64], strides = [1, 1, 1]} : vector<2x32x64xf32> to vector<2x1x64xf32>
    %514 = vector.shape_cast %513 : vector<2x1x64xf32> to vector<2x64xf32>
    %515 = arith.addf %514, %501 : vector<2x64xf32>
    %516 = arith.negf %515 : vector<2x64xf32>
    %517 = math.exp %516 : vector<2x64xf32>
    %cst_124 = arith.constant 1.000000e+00 : f32
    %518 = vector.broadcast %cst_124 : f32 to vector<2x64xf32>
    %519 = arith.addf %518, %517 : vector<2x64xf32>
    %520 = arith.divf %518, %519 : vector<2x64xf32>
    %521 = vector.extract_strided_slice %29 {offsets = [0, 15, 0], sizes = [2, 1, 64], strides = [1, 1, 1]} : vector<2x32x64xf32> to vector<2x1x64xf32>
    %522 = vector.shape_cast %521 : vector<2x1x64xf32> to vector<2x64xf32>
    %523 = arith.mulf %512, %504 : vector<2x64xf32>
    %524 = arith.addf %522, %523 : vector<2x64xf32>
    %525 = math.tanh %524 : vector<2x64xf32>
    %cst_125 = arith.constant 1.000000e+00 : f32
    %526 = vector.broadcast %cst_125 : f32 to vector<2x64xf32>
    %527 = arith.subf %526, %520 : vector<2x64xf32>
    %528 = arith.mulf %527, %525 : vector<2x64xf32>
    %529 = arith.mulf %520, %499 : vector<2x64xf32>
    %530 = arith.addf %528, %529 : vector<2x64xf32>
    %cst_126 = arith.constant dense<0.000000e+00> : vector<2x64xf32>
    %531 = tpu.matmul %530, %30, %cst_126 {dimension_numbers = #tpu.dot_dimension_numbers<[1], [0], [0], [1], [0, 0, 1, 1], [], []>} : vector<2x64xf32>, vector<64x64xf32>, vector<2x64xf32> -> vector<2x64xf32>
    %cst_127 = arith.constant dense<0.000000e+00> : vector<2x64xf32>
    %532 = tpu.matmul %530, %31, %cst_127 {dimension_numbers = #tpu.dot_dimension_numbers<[1], [0], [0], [1], [0, 0, 1, 1], [], []>} : vector<2x64xf32>, vector<64x64xf32>, vector<2x64xf32> -> vector<2x64xf32>
    %cst_128 = arith.constant dense<0.000000e+00> : vector<2x64xf32>
    %533 = tpu.matmul %530, %32, %cst_128 {dimension_numbers = #tpu.dot_dimension_numbers<[1], [0], [0], [1], [0, 0, 1, 1], [], []>} : vector<2x64xf32>, vector<64x64xf32>, vector<2x64xf32> -> vector<2x64xf32>
    %534 = vector.broadcast %33 : vector<1x64xf32> to vector<2x64xf32>
    %535 = arith.addf %533, %534 : vector<2x64xf32>
    %536 = vector.extract_strided_slice %17 {offsets = [0, 16, 0], sizes = [2, 1, 64], strides = [1, 1, 1]} : vector<2x32x64xf32> to vector<2x1x64xf32>
    %537 = vector.shape_cast %536 : vector<2x1x64xf32> to vector<2x64xf32>
    %538 = arith.addf %537, %531 : vector<2x64xf32>
    %539 = arith.negf %538 : vector<2x64xf32>
    %540 = math.exp %539 : vector<2x64xf32>
    %cst_129 = arith.constant 1.000000e+00 : f32
    %541 = vector.broadcast %cst_129 : f32 to vector<2x64xf32>
    %542 = arith.addf %541, %540 : vector<2x64xf32>
    %543 = arith.divf %541, %542 : vector<2x64xf32>
    %544 = vector.extract_strided_slice %23 {offsets = [0, 16, 0], sizes = [2, 1, 64], strides = [1, 1, 1]} : vector<2x32x64xf32> to vector<2x1x64xf32>
    %545 = vector.shape_cast %544 : vector<2x1x64xf32> to vector<2x64xf32>
    %546 = arith.addf %545, %532 : vector<2x64xf32>
    %547 = arith.negf %546 : vector<2x64xf32>
    %548 = math.exp %547 : vector<2x64xf32>
    %cst_130 = arith.constant 1.000000e+00 : f32
    %549 = vector.broadcast %cst_130 : f32 to vector<2x64xf32>
    %550 = arith.addf %549, %548 : vector<2x64xf32>
    %551 = arith.divf %549, %550 : vector<2x64xf32>
    %552 = vector.extract_strided_slice %29 {offsets = [0, 16, 0], sizes = [2, 1, 64], strides = [1, 1, 1]} : vector<2x32x64xf32> to vector<2x1x64xf32>
    %553 = vector.shape_cast %552 : vector<2x1x64xf32> to vector<2x64xf32>
    %554 = arith.mulf %543, %535 : vector<2x64xf32>
    %555 = arith.addf %553, %554 : vector<2x64xf32>
    %556 = math.tanh %555 : vector<2x64xf32>
    %cst_131 = arith.constant 1.000000e+00 : f32
    %557 = vector.broadcast %cst_131 : f32 to vector<2x64xf32>
    %558 = arith.subf %557, %551 : vector<2x64xf32>
    %559 = arith.mulf %558, %556 : vector<2x64xf32>
    %560 = arith.mulf %551, %530 : vector<2x64xf32>
    %561 = arith.addf %559, %560 : vector<2x64xf32>
    %cst_132 = arith.constant dense<0.000000e+00> : vector<2x64xf32>
    %562 = tpu.matmul %561, %30, %cst_132 {dimension_numbers = #tpu.dot_dimension_numbers<[1], [0], [0], [1], [0, 0, 1, 1], [], []>} : vector<2x64xf32>, vector<64x64xf32>, vector<2x64xf32> -> vector<2x64xf32>
    %cst_133 = arith.constant dense<0.000000e+00> : vector<2x64xf32>
    %563 = tpu.matmul %561, %31, %cst_133 {dimension_numbers = #tpu.dot_dimension_numbers<[1], [0], [0], [1], [0, 0, 1, 1], [], []>} : vector<2x64xf32>, vector<64x64xf32>, vector<2x64xf32> -> vector<2x64xf32>
    %cst_134 = arith.constant dense<0.000000e+00> : vector<2x64xf32>
    %564 = tpu.matmul %561, %32, %cst_134 {dimension_numbers = #tpu.dot_dimension_numbers<[1], [0], [0], [1], [0, 0, 1, 1], [], []>} : vector<2x64xf32>, vector<64x64xf32>, vector<2x64xf32> -> vector<2x64xf32>
    %565 = vector.broadcast %33 : vector<1x64xf32> to vector<2x64xf32>
    %566 = arith.addf %564, %565 : vector<2x64xf32>
    %567 = vector.extract_strided_slice %17 {offsets = [0, 17, 0], sizes = [2, 1, 64], strides = [1, 1, 1]} : vector<2x32x64xf32> to vector<2x1x64xf32>
    %568 = vector.shape_cast %567 : vector<2x1x64xf32> to vector<2x64xf32>
    %569 = arith.addf %568, %562 : vector<2x64xf32>
    %570 = arith.negf %569 : vector<2x64xf32>
    %571 = math.exp %570 : vector<2x64xf32>
    %cst_135 = arith.constant 1.000000e+00 : f32
    %572 = vector.broadcast %cst_135 : f32 to vector<2x64xf32>
    %573 = arith.addf %572, %571 : vector<2x64xf32>
    %574 = arith.divf %572, %573 : vector<2x64xf32>
    %575 = vector.extract_strided_slice %23 {offsets = [0, 17, 0], sizes = [2, 1, 64], strides = [1, 1, 1]} : vector<2x32x64xf32> to vector<2x1x64xf32>
    %576 = vector.shape_cast %575 : vector<2x1x64xf32> to vector<2x64xf32>
    %577 = arith.addf %576, %563 : vector<2x64xf32>
    %578 = arith.negf %577 : vector<2x64xf32>
    %579 = math.exp %578 : vector<2x64xf32>
    %cst_136 = arith.constant 1.000000e+00 : f32
    %580 = vector.broadcast %cst_136 : f32 to vector<2x64xf32>
    %581 = arith.addf %580, %579 : vector<2x64xf32>
    %582 = arith.divf %580, %581 : vector<2x64xf32>
    %583 = vector.extract_strided_slice %29 {offsets = [0, 17, 0], sizes = [2, 1, 64], strides = [1, 1, 1]} : vector<2x32x64xf32> to vector<2x1x64xf32>
    %584 = vector.shape_cast %583 : vector<2x1x64xf32> to vector<2x64xf32>
    %585 = arith.mulf %574, %566 : vector<2x64xf32>
    %586 = arith.addf %584, %585 : vector<2x64xf32>
    %587 = math.tanh %586 : vector<2x64xf32>
    %cst_137 = arith.constant 1.000000e+00 : f32
    %588 = vector.broadcast %cst_137 : f32 to vector<2x64xf32>
    %589 = arith.subf %588, %582 : vector<2x64xf32>
    %590 = arith.mulf %589, %587 : vector<2x64xf32>
    %591 = arith.mulf %582, %561 : vector<2x64xf32>
    %592 = arith.addf %590, %591 : vector<2x64xf32>
    %cst_138 = arith.constant dense<0.000000e+00> : vector<2x64xf32>
    %593 = tpu.matmul %592, %30, %cst_138 {dimension_numbers = #tpu.dot_dimension_numbers<[1], [0], [0], [1], [0, 0, 1, 1], [], []>} : vector<2x64xf32>, vector<64x64xf32>, vector<2x64xf32> -> vector<2x64xf32>
    %cst_139 = arith.constant dense<0.000000e+00> : vector<2x64xf32>
    %594 = tpu.matmul %592, %31, %cst_139 {dimension_numbers = #tpu.dot_dimension_numbers<[1], [0], [0], [1], [0, 0, 1, 1], [], []>} : vector<2x64xf32>, vector<64x64xf32>, vector<2x64xf32> -> vector<2x64xf32>
    %cst_140 = arith.constant dense<0.000000e+00> : vector<2x64xf32>
    %595 = tpu.matmul %592, %32, %cst_140 {dimension_numbers = #tpu.dot_dimension_numbers<[1], [0], [0], [1], [0, 0, 1, 1], [], []>} : vector<2x64xf32>, vector<64x64xf32>, vector<2x64xf32> -> vector<2x64xf32>
    %596 = vector.broadcast %33 : vector<1x64xf32> to vector<2x64xf32>
    %597 = arith.addf %595, %596 : vector<2x64xf32>
    %598 = vector.extract_strided_slice %17 {offsets = [0, 18, 0], sizes = [2, 1, 64], strides = [1, 1, 1]} : vector<2x32x64xf32> to vector<2x1x64xf32>
    %599 = vector.shape_cast %598 : vector<2x1x64xf32> to vector<2x64xf32>
    %600 = arith.addf %599, %593 : vector<2x64xf32>
    %601 = arith.negf %600 : vector<2x64xf32>
    %602 = math.exp %601 : vector<2x64xf32>
    %cst_141 = arith.constant 1.000000e+00 : f32
    %603 = vector.broadcast %cst_141 : f32 to vector<2x64xf32>
    %604 = arith.addf %603, %602 : vector<2x64xf32>
    %605 = arith.divf %603, %604 : vector<2x64xf32>
    %606 = vector.extract_strided_slice %23 {offsets = [0, 18, 0], sizes = [2, 1, 64], strides = [1, 1, 1]} : vector<2x32x64xf32> to vector<2x1x64xf32>
    %607 = vector.shape_cast %606 : vector<2x1x64xf32> to vector<2x64xf32>
    %608 = arith.addf %607, %594 : vector<2x64xf32>
    %609 = arith.negf %608 : vector<2x64xf32>
    %610 = math.exp %609 : vector<2x64xf32>
    %cst_142 = arith.constant 1.000000e+00 : f32
    %611 = vector.broadcast %cst_142 : f32 to vector<2x64xf32>
    %612 = arith.addf %611, %610 : vector<2x64xf32>
    %613 = arith.divf %611, %612 : vector<2x64xf32>
    %614 = vector.extract_strided_slice %29 {offsets = [0, 18, 0], sizes = [2, 1, 64], strides = [1, 1, 1]} : vector<2x32x64xf32> to vector<2x1x64xf32>
    %615 = vector.shape_cast %614 : vector<2x1x64xf32> to vector<2x64xf32>
    %616 = arith.mulf %605, %597 : vector<2x64xf32>
    %617 = arith.addf %615, %616 : vector<2x64xf32>
    %618 = math.tanh %617 : vector<2x64xf32>
    %cst_143 = arith.constant 1.000000e+00 : f32
    %619 = vector.broadcast %cst_143 : f32 to vector<2x64xf32>
    %620 = arith.subf %619, %613 : vector<2x64xf32>
    %621 = arith.mulf %620, %618 : vector<2x64xf32>
    %622 = arith.mulf %613, %592 : vector<2x64xf32>
    %623 = arith.addf %621, %622 : vector<2x64xf32>
    %cst_144 = arith.constant dense<0.000000e+00> : vector<2x64xf32>
    %624 = tpu.matmul %623, %30, %cst_144 {dimension_numbers = #tpu.dot_dimension_numbers<[1], [0], [0], [1], [0, 0, 1, 1], [], []>} : vector<2x64xf32>, vector<64x64xf32>, vector<2x64xf32> -> vector<2x64xf32>
    %cst_145 = arith.constant dense<0.000000e+00> : vector<2x64xf32>
    %625 = tpu.matmul %623, %31, %cst_145 {dimension_numbers = #tpu.dot_dimension_numbers<[1], [0], [0], [1], [0, 0, 1, 1], [], []>} : vector<2x64xf32>, vector<64x64xf32>, vector<2x64xf32> -> vector<2x64xf32>
    %cst_146 = arith.constant dense<0.000000e+00> : vector<2x64xf32>
    %626 = tpu.matmul %623, %32, %cst_146 {dimension_numbers = #tpu.dot_dimension_numbers<[1], [0], [0], [1], [0, 0, 1, 1], [], []>} : vector<2x64xf32>, vector<64x64xf32>, vector<2x64xf32> -> vector<2x64xf32>
    %627 = vector.broadcast %33 : vector<1x64xf32> to vector<2x64xf32>
    %628 = arith.addf %626, %627 : vector<2x64xf32>
    %629 = vector.extract_strided_slice %17 {offsets = [0, 19, 0], sizes = [2, 1, 64], strides = [1, 1, 1]} : vector<2x32x64xf32> to vector<2x1x64xf32>
    %630 = vector.shape_cast %629 : vector<2x1x64xf32> to vector<2x64xf32>
    %631 = arith.addf %630, %624 : vector<2x64xf32>
    %632 = arith.negf %631 : vector<2x64xf32>
    %633 = math.exp %632 : vector<2x64xf32>
    %cst_147 = arith.constant 1.000000e+00 : f32
    %634 = vector.broadcast %cst_147 : f32 to vector<2x64xf32>
    %635 = arith.addf %634, %633 : vector<2x64xf32>
    %636 = arith.divf %634, %635 : vector<2x64xf32>
    %637 = vector.extract_strided_slice %23 {offsets = [0, 19, 0], sizes = [2, 1, 64], strides = [1, 1, 1]} : vector<2x32x64xf32> to vector<2x1x64xf32>
    %638 = vector.shape_cast %637 : vector<2x1x64xf32> to vector<2x64xf32>
    %639 = arith.addf %638, %625 : vector<2x64xf32>
    %640 = arith.negf %639 : vector<2x64xf32>
    %641 = math.exp %640 : vector<2x64xf32>
    %cst_148 = arith.constant 1.000000e+00 : f32
    %642 = vector.broadcast %cst_148 : f32 to vector<2x64xf32>
    %643 = arith.addf %642, %641 : vector<2x64xf32>
    %644 = arith.divf %642, %643 : vector<2x64xf32>
    %645 = vector.extract_strided_slice %29 {offsets = [0, 19, 0], sizes = [2, 1, 64], strides = [1, 1, 1]} : vector<2x32x64xf32> to vector<2x1x64xf32>
    %646 = vector.shape_cast %645 : vector<2x1x64xf32> to vector<2x64xf32>
    %647 = arith.mulf %636, %628 : vector<2x64xf32>
    %648 = arith.addf %646, %647 : vector<2x64xf32>
    %649 = math.tanh %648 : vector<2x64xf32>
    %cst_149 = arith.constant 1.000000e+00 : f32
    %650 = vector.broadcast %cst_149 : f32 to vector<2x64xf32>
    %651 = arith.subf %650, %644 : vector<2x64xf32>
    %652 = arith.mulf %651, %649 : vector<2x64xf32>
    %653 = arith.mulf %644, %623 : vector<2x64xf32>
    %654 = arith.addf %652, %653 : vector<2x64xf32>
    %cst_150 = arith.constant dense<0.000000e+00> : vector<2x64xf32>
    %655 = tpu.matmul %654, %30, %cst_150 {dimension_numbers = #tpu.dot_dimension_numbers<[1], [0], [0], [1], [0, 0, 1, 1], [], []>} : vector<2x64xf32>, vector<64x64xf32>, vector<2x64xf32> -> vector<2x64xf32>
    %cst_151 = arith.constant dense<0.000000e+00> : vector<2x64xf32>
    %656 = tpu.matmul %654, %31, %cst_151 {dimension_numbers = #tpu.dot_dimension_numbers<[1], [0], [0], [1], [0, 0, 1, 1], [], []>} : vector<2x64xf32>, vector<64x64xf32>, vector<2x64xf32> -> vector<2x64xf32>
    %cst_152 = arith.constant dense<0.000000e+00> : vector<2x64xf32>
    %657 = tpu.matmul %654, %32, %cst_152 {dimension_numbers = #tpu.dot_dimension_numbers<[1], [0], [0], [1], [0, 0, 1, 1], [], []>} : vector<2x64xf32>, vector<64x64xf32>, vector<2x64xf32> -> vector<2x64xf32>
    %658 = vector.broadcast %33 : vector<1x64xf32> to vector<2x64xf32>
    %659 = arith.addf %657, %658 : vector<2x64xf32>
    %660 = vector.extract_strided_slice %17 {offsets = [0, 20, 0], sizes = [2, 1, 64], strides = [1, 1, 1]} : vector<2x32x64xf32> to vector<2x1x64xf32>
    %661 = vector.shape_cast %660 : vector<2x1x64xf32> to vector<2x64xf32>
    %662 = arith.addf %661, %655 : vector<2x64xf32>
    %663 = arith.negf %662 : vector<2x64xf32>
    %664 = math.exp %663 : vector<2x64xf32>
    %cst_153 = arith.constant 1.000000e+00 : f32
    %665 = vector.broadcast %cst_153 : f32 to vector<2x64xf32>
    %666 = arith.addf %665, %664 : vector<2x64xf32>
    %667 = arith.divf %665, %666 : vector<2x64xf32>
    %668 = vector.extract_strided_slice %23 {offsets = [0, 20, 0], sizes = [2, 1, 64], strides = [1, 1, 1]} : vector<2x32x64xf32> to vector<2x1x64xf32>
    %669 = vector.shape_cast %668 : vector<2x1x64xf32> to vector<2x64xf32>
    %670 = arith.addf %669, %656 : vector<2x64xf32>
    %671 = arith.negf %670 : vector<2x64xf32>
    %672 = math.exp %671 : vector<2x64xf32>
    %cst_154 = arith.constant 1.000000e+00 : f32
    %673 = vector.broadcast %cst_154 : f32 to vector<2x64xf32>
    %674 = arith.addf %673, %672 : vector<2x64xf32>
    %675 = arith.divf %673, %674 : vector<2x64xf32>
    %676 = vector.extract_strided_slice %29 {offsets = [0, 20, 0], sizes = [2, 1, 64], strides = [1, 1, 1]} : vector<2x32x64xf32> to vector<2x1x64xf32>
    %677 = vector.shape_cast %676 : vector<2x1x64xf32> to vector<2x64xf32>
    %678 = arith.mulf %667, %659 : vector<2x64xf32>
    %679 = arith.addf %677, %678 : vector<2x64xf32>
    %680 = math.tanh %679 : vector<2x64xf32>
    %cst_155 = arith.constant 1.000000e+00 : f32
    %681 = vector.broadcast %cst_155 : f32 to vector<2x64xf32>
    %682 = arith.subf %681, %675 : vector<2x64xf32>
    %683 = arith.mulf %682, %680 : vector<2x64xf32>
    %684 = arith.mulf %675, %654 : vector<2x64xf32>
    %685 = arith.addf %683, %684 : vector<2x64xf32>
    %cst_156 = arith.constant dense<0.000000e+00> : vector<2x64xf32>
    %686 = tpu.matmul %685, %30, %cst_156 {dimension_numbers = #tpu.dot_dimension_numbers<[1], [0], [0], [1], [0, 0, 1, 1], [], []>} : vector<2x64xf32>, vector<64x64xf32>, vector<2x64xf32> -> vector<2x64xf32>
    %cst_157 = arith.constant dense<0.000000e+00> : vector<2x64xf32>
    %687 = tpu.matmul %685, %31, %cst_157 {dimension_numbers = #tpu.dot_dimension_numbers<[1], [0], [0], [1], [0, 0, 1, 1], [], []>} : vector<2x64xf32>, vector<64x64xf32>, vector<2x64xf32> -> vector<2x64xf32>
    %cst_158 = arith.constant dense<0.000000e+00> : vector<2x64xf32>
    %688 = tpu.matmul %685, %32, %cst_158 {dimension_numbers = #tpu.dot_dimension_numbers<[1], [0], [0], [1], [0, 0, 1, 1], [], []>} : vector<2x64xf32>, vector<64x64xf32>, vector<2x64xf32> -> vector<2x64xf32>
    %689 = vector.broadcast %33 : vector<1x64xf32> to vector<2x64xf32>
    %690 = arith.addf %688, %689 : vector<2x64xf32>
    %691 = vector.extract_strided_slice %17 {offsets = [0, 21, 0], sizes = [2, 1, 64], strides = [1, 1, 1]} : vector<2x32x64xf32> to vector<2x1x64xf32>
    %692 = vector.shape_cast %691 : vector<2x1x64xf32> to vector<2x64xf32>
    %693 = arith.addf %692, %686 : vector<2x64xf32>
    %694 = arith.negf %693 : vector<2x64xf32>
    %695 = math.exp %694 : vector<2x64xf32>
    %cst_159 = arith.constant 1.000000e+00 : f32
    %696 = vector.broadcast %cst_159 : f32 to vector<2x64xf32>
    %697 = arith.addf %696, %695 : vector<2x64xf32>
    %698 = arith.divf %696, %697 : vector<2x64xf32>
    %699 = vector.extract_strided_slice %23 {offsets = [0, 21, 0], sizes = [2, 1, 64], strides = [1, 1, 1]} : vector<2x32x64xf32> to vector<2x1x64xf32>
    %700 = vector.shape_cast %699 : vector<2x1x64xf32> to vector<2x64xf32>
    %701 = arith.addf %700, %687 : vector<2x64xf32>
    %702 = arith.negf %701 : vector<2x64xf32>
    %703 = math.exp %702 : vector<2x64xf32>
    %cst_160 = arith.constant 1.000000e+00 : f32
    %704 = vector.broadcast %cst_160 : f32 to vector<2x64xf32>
    %705 = arith.addf %704, %703 : vector<2x64xf32>
    %706 = arith.divf %704, %705 : vector<2x64xf32>
    %707 = vector.extract_strided_slice %29 {offsets = [0, 21, 0], sizes = [2, 1, 64], strides = [1, 1, 1]} : vector<2x32x64xf32> to vector<2x1x64xf32>
    %708 = vector.shape_cast %707 : vector<2x1x64xf32> to vector<2x64xf32>
    %709 = arith.mulf %698, %690 : vector<2x64xf32>
    %710 = arith.addf %708, %709 : vector<2x64xf32>
    %711 = math.tanh %710 : vector<2x64xf32>
    %cst_161 = arith.constant 1.000000e+00 : f32
    %712 = vector.broadcast %cst_161 : f32 to vector<2x64xf32>
    %713 = arith.subf %712, %706 : vector<2x64xf32>
    %714 = arith.mulf %713, %711 : vector<2x64xf32>
    %715 = arith.mulf %706, %685 : vector<2x64xf32>
    %716 = arith.addf %714, %715 : vector<2x64xf32>
    %cst_162 = arith.constant dense<0.000000e+00> : vector<2x64xf32>
    %717 = tpu.matmul %716, %30, %cst_162 {dimension_numbers = #tpu.dot_dimension_numbers<[1], [0], [0], [1], [0, 0, 1, 1], [], []>} : vector<2x64xf32>, vector<64x64xf32>, vector<2x64xf32> -> vector<2x64xf32>
    %cst_163 = arith.constant dense<0.000000e+00> : vector<2x64xf32>
    %718 = tpu.matmul %716, %31, %cst_163 {dimension_numbers = #tpu.dot_dimension_numbers<[1], [0], [0], [1], [0, 0, 1, 1], [], []>} : vector<2x64xf32>, vector<64x64xf32>, vector<2x64xf32> -> vector<2x64xf32>
    %cst_164 = arith.constant dense<0.000000e+00> : vector<2x64xf32>
    %719 = tpu.matmul %716, %32, %cst_164 {dimension_numbers = #tpu.dot_dimension_numbers<[1], [0], [0], [1], [0, 0, 1, 1], [], []>} : vector<2x64xf32>, vector<64x64xf32>, vector<2x64xf32> -> vector<2x64xf32>
    %720 = vector.broadcast %33 : vector<1x64xf32> to vector<2x64xf32>
    %721 = arith.addf %719, %720 : vector<2x64xf32>
    %722 = vector.extract_strided_slice %17 {offsets = [0, 22, 0], sizes = [2, 1, 64], strides = [1, 1, 1]} : vector<2x32x64xf32> to vector<2x1x64xf32>
    %723 = vector.shape_cast %722 : vector<2x1x64xf32> to vector<2x64xf32>
    %724 = arith.addf %723, %717 : vector<2x64xf32>
    %725 = arith.negf %724 : vector<2x64xf32>
    %726 = math.exp %725 : vector<2x64xf32>
    %cst_165 = arith.constant 1.000000e+00 : f32
    %727 = vector.broadcast %cst_165 : f32 to vector<2x64xf32>
    %728 = arith.addf %727, %726 : vector<2x64xf32>
    %729 = arith.divf %727, %728 : vector<2x64xf32>
    %730 = vector.extract_strided_slice %23 {offsets = [0, 22, 0], sizes = [2, 1, 64], strides = [1, 1, 1]} : vector<2x32x64xf32> to vector<2x1x64xf32>
    %731 = vector.shape_cast %730 : vector<2x1x64xf32> to vector<2x64xf32>
    %732 = arith.addf %731, %718 : vector<2x64xf32>
    %733 = arith.negf %732 : vector<2x64xf32>
    %734 = math.exp %733 : vector<2x64xf32>
    %cst_166 = arith.constant 1.000000e+00 : f32
    %735 = vector.broadcast %cst_166 : f32 to vector<2x64xf32>
    %736 = arith.addf %735, %734 : vector<2x64xf32>
    %737 = arith.divf %735, %736 : vector<2x64xf32>
    %738 = vector.extract_strided_slice %29 {offsets = [0, 22, 0], sizes = [2, 1, 64], strides = [1, 1, 1]} : vector<2x32x64xf32> to vector<2x1x64xf32>
    %739 = vector.shape_cast %738 : vector<2x1x64xf32> to vector<2x64xf32>
    %740 = arith.mulf %729, %721 : vector<2x64xf32>
    %741 = arith.addf %739, %740 : vector<2x64xf32>
    %742 = math.tanh %741 : vector<2x64xf32>
    %cst_167 = arith.constant 1.000000e+00 : f32
    %743 = vector.broadcast %cst_167 : f32 to vector<2x64xf32>
    %744 = arith.subf %743, %737 : vector<2x64xf32>
    %745 = arith.mulf %744, %742 : vector<2x64xf32>
    %746 = arith.mulf %737, %716 : vector<2x64xf32>
    %747 = arith.addf %745, %746 : vector<2x64xf32>
    %cst_168 = arith.constant dense<0.000000e+00> : vector<2x64xf32>
    %748 = tpu.matmul %747, %30, %cst_168 {dimension_numbers = #tpu.dot_dimension_numbers<[1], [0], [0], [1], [0, 0, 1, 1], [], []>} : vector<2x64xf32>, vector<64x64xf32>, vector<2x64xf32> -> vector<2x64xf32>
    %cst_169 = arith.constant dense<0.000000e+00> : vector<2x64xf32>
    %749 = tpu.matmul %747, %31, %cst_169 {dimension_numbers = #tpu.dot_dimension_numbers<[1], [0], [0], [1], [0, 0, 1, 1], [], []>} : vector<2x64xf32>, vector<64x64xf32>, vector<2x64xf32> -> vector<2x64xf32>
    %cst_170 = arith.constant dense<0.000000e+00> : vector<2x64xf32>
    %750 = tpu.matmul %747, %32, %cst_170 {dimension_numbers = #tpu.dot_dimension_numbers<[1], [0], [0], [1], [0, 0, 1, 1], [], []>} : vector<2x64xf32>, vector<64x64xf32>, vector<2x64xf32> -> vector<2x64xf32>
    %751 = vector.broadcast %33 : vector<1x64xf32> to vector<2x64xf32>
    %752 = arith.addf %750, %751 : vector<2x64xf32>
    %753 = vector.extract_strided_slice %17 {offsets = [0, 23, 0], sizes = [2, 1, 64], strides = [1, 1, 1]} : vector<2x32x64xf32> to vector<2x1x64xf32>
    %754 = vector.shape_cast %753 : vector<2x1x64xf32> to vector<2x64xf32>
    %755 = arith.addf %754, %748 : vector<2x64xf32>
    %756 = arith.negf %755 : vector<2x64xf32>
    %757 = math.exp %756 : vector<2x64xf32>
    %cst_171 = arith.constant 1.000000e+00 : f32
    %758 = vector.broadcast %cst_171 : f32 to vector<2x64xf32>
    %759 = arith.addf %758, %757 : vector<2x64xf32>
    %760 = arith.divf %758, %759 : vector<2x64xf32>
    %761 = vector.extract_strided_slice %23 {offsets = [0, 23, 0], sizes = [2, 1, 64], strides = [1, 1, 1]} : vector<2x32x64xf32> to vector<2x1x64xf32>
    %762 = vector.shape_cast %761 : vector<2x1x64xf32> to vector<2x64xf32>
    %763 = arith.addf %762, %749 : vector<2x64xf32>
    %764 = arith.negf %763 : vector<2x64xf32>
    %765 = math.exp %764 : vector<2x64xf32>
    %cst_172 = arith.constant 1.000000e+00 : f32
    %766 = vector.broadcast %cst_172 : f32 to vector<2x64xf32>
    %767 = arith.addf %766, %765 : vector<2x64xf32>
    %768 = arith.divf %766, %767 : vector<2x64xf32>
    %769 = vector.extract_strided_slice %29 {offsets = [0, 23, 0], sizes = [2, 1, 64], strides = [1, 1, 1]} : vector<2x32x64xf32> to vector<2x1x64xf32>
    %770 = vector.shape_cast %769 : vector<2x1x64xf32> to vector<2x64xf32>
    %771 = arith.mulf %760, %752 : vector<2x64xf32>
    %772 = arith.addf %770, %771 : vector<2x64xf32>
    %773 = math.tanh %772 : vector<2x64xf32>
    %cst_173 = arith.constant 1.000000e+00 : f32
    %774 = vector.broadcast %cst_173 : f32 to vector<2x64xf32>
    %775 = arith.subf %774, %768 : vector<2x64xf32>
    %776 = arith.mulf %775, %773 : vector<2x64xf32>
    %777 = arith.mulf %768, %747 : vector<2x64xf32>
    %778 = arith.addf %776, %777 : vector<2x64xf32>
    %cst_174 = arith.constant dense<0.000000e+00> : vector<2x64xf32>
    %779 = tpu.matmul %778, %30, %cst_174 {dimension_numbers = #tpu.dot_dimension_numbers<[1], [0], [0], [1], [0, 0, 1, 1], [], []>} : vector<2x64xf32>, vector<64x64xf32>, vector<2x64xf32> -> vector<2x64xf32>
    %cst_175 = arith.constant dense<0.000000e+00> : vector<2x64xf32>
    %780 = tpu.matmul %778, %31, %cst_175 {dimension_numbers = #tpu.dot_dimension_numbers<[1], [0], [0], [1], [0, 0, 1, 1], [], []>} : vector<2x64xf32>, vector<64x64xf32>, vector<2x64xf32> -> vector<2x64xf32>
    %cst_176 = arith.constant dense<0.000000e+00> : vector<2x64xf32>
    %781 = tpu.matmul %778, %32, %cst_176 {dimension_numbers = #tpu.dot_dimension_numbers<[1], [0], [0], [1], [0, 0, 1, 1], [], []>} : vector<2x64xf32>, vector<64x64xf32>, vector<2x64xf32> -> vector<2x64xf32>
    %782 = vector.broadcast %33 : vector<1x64xf32> to vector<2x64xf32>
    %783 = arith.addf %781, %782 : vector<2x64xf32>
    %784 = vector.extract_strided_slice %17 {offsets = [0, 24, 0], sizes = [2, 1, 64], strides = [1, 1, 1]} : vector<2x32x64xf32> to vector<2x1x64xf32>
    %785 = vector.shape_cast %784 : vector<2x1x64xf32> to vector<2x64xf32>
    %786 = arith.addf %785, %779 : vector<2x64xf32>
    %787 = arith.negf %786 : vector<2x64xf32>
    %788 = math.exp %787 : vector<2x64xf32>
    %cst_177 = arith.constant 1.000000e+00 : f32
    %789 = vector.broadcast %cst_177 : f32 to vector<2x64xf32>
    %790 = arith.addf %789, %788 : vector<2x64xf32>
    %791 = arith.divf %789, %790 : vector<2x64xf32>
    %792 = vector.extract_strided_slice %23 {offsets = [0, 24, 0], sizes = [2, 1, 64], strides = [1, 1, 1]} : vector<2x32x64xf32> to vector<2x1x64xf32>
    %793 = vector.shape_cast %792 : vector<2x1x64xf32> to vector<2x64xf32>
    %794 = arith.addf %793, %780 : vector<2x64xf32>
    %795 = arith.negf %794 : vector<2x64xf32>
    %796 = math.exp %795 : vector<2x64xf32>
    %cst_178 = arith.constant 1.000000e+00 : f32
    %797 = vector.broadcast %cst_178 : f32 to vector<2x64xf32>
    %798 = arith.addf %797, %796 : vector<2x64xf32>
    %799 = arith.divf %797, %798 : vector<2x64xf32>
    %800 = vector.extract_strided_slice %29 {offsets = [0, 24, 0], sizes = [2, 1, 64], strides = [1, 1, 1]} : vector<2x32x64xf32> to vector<2x1x64xf32>
    %801 = vector.shape_cast %800 : vector<2x1x64xf32> to vector<2x64xf32>
    %802 = arith.mulf %791, %783 : vector<2x64xf32>
    %803 = arith.addf %801, %802 : vector<2x64xf32>
    %804 = math.tanh %803 : vector<2x64xf32>
    %cst_179 = arith.constant 1.000000e+00 : f32
    %805 = vector.broadcast %cst_179 : f32 to vector<2x64xf32>
    %806 = arith.subf %805, %799 : vector<2x64xf32>
    %807 = arith.mulf %806, %804 : vector<2x64xf32>
    %808 = arith.mulf %799, %778 : vector<2x64xf32>
    %809 = arith.addf %807, %808 : vector<2x64xf32>
    %cst_180 = arith.constant dense<0.000000e+00> : vector<2x64xf32>
    %810 = tpu.matmul %809, %30, %cst_180 {dimension_numbers = #tpu.dot_dimension_numbers<[1], [0], [0], [1], [0, 0, 1, 1], [], []>} : vector<2x64xf32>, vector<64x64xf32>, vector<2x64xf32> -> vector<2x64xf32>
    %cst_181 = arith.constant dense<0.000000e+00> : vector<2x64xf32>
    %811 = tpu.matmul %809, %31, %cst_181 {dimension_numbers = #tpu.dot_dimension_numbers<[1], [0], [0], [1], [0, 0, 1, 1], [], []>} : vector<2x64xf32>, vector<64x64xf32>, vector<2x64xf32> -> vector<2x64xf32>
    %cst_182 = arith.constant dense<0.000000e+00> : vector<2x64xf32>
    %812 = tpu.matmul %809, %32, %cst_182 {dimension_numbers = #tpu.dot_dimension_numbers<[1], [0], [0], [1], [0, 0, 1, 1], [], []>} : vector<2x64xf32>, vector<64x64xf32>, vector<2x64xf32> -> vector<2x64xf32>
    %813 = vector.broadcast %33 : vector<1x64xf32> to vector<2x64xf32>
    %814 = arith.addf %812, %813 : vector<2x64xf32>
    %815 = vector.extract_strided_slice %17 {offsets = [0, 25, 0], sizes = [2, 1, 64], strides = [1, 1, 1]} : vector<2x32x64xf32> to vector<2x1x64xf32>
    %816 = vector.shape_cast %815 : vector<2x1x64xf32> to vector<2x64xf32>
    %817 = arith.addf %816, %810 : vector<2x64xf32>
    %818 = arith.negf %817 : vector<2x64xf32>
    %819 = math.exp %818 : vector<2x64xf32>
    %cst_183 = arith.constant 1.000000e+00 : f32
    %820 = vector.broadcast %cst_183 : f32 to vector<2x64xf32>
    %821 = arith.addf %820, %819 : vector<2x64xf32>
    %822 = arith.divf %820, %821 : vector<2x64xf32>
    %823 = vector.extract_strided_slice %23 {offsets = [0, 25, 0], sizes = [2, 1, 64], strides = [1, 1, 1]} : vector<2x32x64xf32> to vector<2x1x64xf32>
    %824 = vector.shape_cast %823 : vector<2x1x64xf32> to vector<2x64xf32>
    %825 = arith.addf %824, %811 : vector<2x64xf32>
    %826 = arith.negf %825 : vector<2x64xf32>
    %827 = math.exp %826 : vector<2x64xf32>
    %cst_184 = arith.constant 1.000000e+00 : f32
    %828 = vector.broadcast %cst_184 : f32 to vector<2x64xf32>
    %829 = arith.addf %828, %827 : vector<2x64xf32>
    %830 = arith.divf %828, %829 : vector<2x64xf32>
    %831 = vector.extract_strided_slice %29 {offsets = [0, 25, 0], sizes = [2, 1, 64], strides = [1, 1, 1]} : vector<2x32x64xf32> to vector<2x1x64xf32>
    %832 = vector.shape_cast %831 : vector<2x1x64xf32> to vector<2x64xf32>
    %833 = arith.mulf %822, %814 : vector<2x64xf32>
    %834 = arith.addf %832, %833 : vector<2x64xf32>
    %835 = math.tanh %834 : vector<2x64xf32>
    %cst_185 = arith.constant 1.000000e+00 : f32
    %836 = vector.broadcast %cst_185 : f32 to vector<2x64xf32>
    %837 = arith.subf %836, %830 : vector<2x64xf32>
    %838 = arith.mulf %837, %835 : vector<2x64xf32>
    %839 = arith.mulf %830, %809 : vector<2x64xf32>
    %840 = arith.addf %838, %839 : vector<2x64xf32>
    %cst_186 = arith.constant dense<0.000000e+00> : vector<2x64xf32>
    %841 = tpu.matmul %840, %30, %cst_186 {dimension_numbers = #tpu.dot_dimension_numbers<[1], [0], [0], [1], [0, 0, 1, 1], [], []>} : vector<2x64xf32>, vector<64x64xf32>, vector<2x64xf32> -> vector<2x64xf32>
    %cst_187 = arith.constant dense<0.000000e+00> : vector<2x64xf32>
    %842 = tpu.matmul %840, %31, %cst_187 {dimension_numbers = #tpu.dot_dimension_numbers<[1], [0], [0], [1], [0, 0, 1, 1], [], []>} : vector<2x64xf32>, vector<64x64xf32>, vector<2x64xf32> -> vector<2x64xf32>
    %cst_188 = arith.constant dense<0.000000e+00> : vector<2x64xf32>
    %843 = tpu.matmul %840, %32, %cst_188 {dimension_numbers = #tpu.dot_dimension_numbers<[1], [0], [0], [1], [0, 0, 1, 1], [], []>} : vector<2x64xf32>, vector<64x64xf32>, vector<2x64xf32> -> vector<2x64xf32>
    %844 = vector.broadcast %33 : vector<1x64xf32> to vector<2x64xf32>
    %845 = arith.addf %843, %844 : vector<2x64xf32>
    %846 = vector.extract_strided_slice %17 {offsets = [0, 26, 0], sizes = [2, 1, 64], strides = [1, 1, 1]} : vector<2x32x64xf32> to vector<2x1x64xf32>
    %847 = vector.shape_cast %846 : vector<2x1x64xf32> to vector<2x64xf32>
    %848 = arith.addf %847, %841 : vector<2x64xf32>
    %849 = arith.negf %848 : vector<2x64xf32>
    %850 = math.exp %849 : vector<2x64xf32>
    %cst_189 = arith.constant 1.000000e+00 : f32
    %851 = vector.broadcast %cst_189 : f32 to vector<2x64xf32>
    %852 = arith.addf %851, %850 : vector<2x64xf32>
    %853 = arith.divf %851, %852 : vector<2x64xf32>
    %854 = vector.extract_strided_slice %23 {offsets = [0, 26, 0], sizes = [2, 1, 64], strides = [1, 1, 1]} : vector<2x32x64xf32> to vector<2x1x64xf32>
    %855 = vector.shape_cast %854 : vector<2x1x64xf32> to vector<2x64xf32>
    %856 = arith.addf %855, %842 : vector<2x64xf32>
    %857 = arith.negf %856 : vector<2x64xf32>
    %858 = math.exp %857 : vector<2x64xf32>
    %cst_190 = arith.constant 1.000000e+00 : f32
    %859 = vector.broadcast %cst_190 : f32 to vector<2x64xf32>
    %860 = arith.addf %859, %858 : vector<2x64xf32>
    %861 = arith.divf %859, %860 : vector<2x64xf32>
    %862 = vector.extract_strided_slice %29 {offsets = [0, 26, 0], sizes = [2, 1, 64], strides = [1, 1, 1]} : vector<2x32x64xf32> to vector<2x1x64xf32>
    %863 = vector.shape_cast %862 : vector<2x1x64xf32> to vector<2x64xf32>
    %864 = arith.mulf %853, %845 : vector<2x64xf32>
    %865 = arith.addf %863, %864 : vector<2x64xf32>
    %866 = math.tanh %865 : vector<2x64xf32>
    %cst_191 = arith.constant 1.000000e+00 : f32
    %867 = vector.broadcast %cst_191 : f32 to vector<2x64xf32>
    %868 = arith.subf %867, %861 : vector<2x64xf32>
    %869 = arith.mulf %868, %866 : vector<2x64xf32>
    %870 = arith.mulf %861, %840 : vector<2x64xf32>
    %871 = arith.addf %869, %870 : vector<2x64xf32>
    %cst_192 = arith.constant dense<0.000000e+00> : vector<2x64xf32>
    %872 = tpu.matmul %871, %30, %cst_192 {dimension_numbers = #tpu.dot_dimension_numbers<[1], [0], [0], [1], [0, 0, 1, 1], [], []>} : vector<2x64xf32>, vector<64x64xf32>, vector<2x64xf32> -> vector<2x64xf32>
    %cst_193 = arith.constant dense<0.000000e+00> : vector<2x64xf32>
    %873 = tpu.matmul %871, %31, %cst_193 {dimension_numbers = #tpu.dot_dimension_numbers<[1], [0], [0], [1], [0, 0, 1, 1], [], []>} : vector<2x64xf32>, vector<64x64xf32>, vector<2x64xf32> -> vector<2x64xf32>
    %cst_194 = arith.constant dense<0.000000e+00> : vector<2x64xf32>
    %874 = tpu.matmul %871, %32, %cst_194 {dimension_numbers = #tpu.dot_dimension_numbers<[1], [0], [0], [1], [0, 0, 1, 1], [], []>} : vector<2x64xf32>, vector<64x64xf32>, vector<2x64xf32> -> vector<2x64xf32>
    %875 = vector.broadcast %33 : vector<1x64xf32> to vector<2x64xf32>
    %876 = arith.addf %874, %875 : vector<2x64xf32>
    %877 = vector.extract_strided_slice %17 {offsets = [0, 27, 0], sizes = [2, 1, 64], strides = [1, 1, 1]} : vector<2x32x64xf32> to vector<2x1x64xf32>
    %878 = vector.shape_cast %877 : vector<2x1x64xf32> to vector<2x64xf32>
    %879 = arith.addf %878, %872 : vector<2x64xf32>
    %880 = arith.negf %879 : vector<2x64xf32>
    %881 = math.exp %880 : vector<2x64xf32>
    %cst_195 = arith.constant 1.000000e+00 : f32
    %882 = vector.broadcast %cst_195 : f32 to vector<2x64xf32>
    %883 = arith.addf %882, %881 : vector<2x64xf32>
    %884 = arith.divf %882, %883 : vector<2x64xf32>
    %885 = vector.extract_strided_slice %23 {offsets = [0, 27, 0], sizes = [2, 1, 64], strides = [1, 1, 1]} : vector<2x32x64xf32> to vector<2x1x64xf32>
    %886 = vector.shape_cast %885 : vector<2x1x64xf32> to vector<2x64xf32>
    %887 = arith.addf %886, %873 : vector<2x64xf32>
    %888 = arith.negf %887 : vector<2x64xf32>
    %889 = math.exp %888 : vector<2x64xf32>
    %cst_196 = arith.constant 1.000000e+00 : f32
    %890 = vector.broadcast %cst_196 : f32 to vector<2x64xf32>
    %891 = arith.addf %890, %889 : vector<2x64xf32>
    %892 = arith.divf %890, %891 : vector<2x64xf32>
    %893 = vector.extract_strided_slice %29 {offsets = [0, 27, 0], sizes = [2, 1, 64], strides = [1, 1, 1]} : vector<2x32x64xf32> to vector<2x1x64xf32>
    %894 = vector.shape_cast %893 : vector<2x1x64xf32> to vector<2x64xf32>
    %895 = arith.mulf %884, %876 : vector<2x64xf32>
    %896 = arith.addf %894, %895 : vector<2x64xf32>
    %897 = math.tanh %896 : vector<2x64xf32>
    %cst_197 = arith.constant 1.000000e+00 : f32
    %898 = vector.broadcast %cst_197 : f32 to vector<2x64xf32>
    %899 = arith.subf %898, %892 : vector<2x64xf32>
    %900 = arith.mulf %899, %897 : vector<2x64xf32>
    %901 = arith.mulf %892, %871 : vector<2x64xf32>
    %902 = arith.addf %900, %901 : vector<2x64xf32>
    %cst_198 = arith.constant dense<0.000000e+00> : vector<2x64xf32>
    %903 = tpu.matmul %902, %30, %cst_198 {dimension_numbers = #tpu.dot_dimension_numbers<[1], [0], [0], [1], [0, 0, 1, 1], [], []>} : vector<2x64xf32>, vector<64x64xf32>, vector<2x64xf32> -> vector<2x64xf32>
    %cst_199 = arith.constant dense<0.000000e+00> : vector<2x64xf32>
    %904 = tpu.matmul %902, %31, %cst_199 {dimension_numbers = #tpu.dot_dimension_numbers<[1], [0], [0], [1], [0, 0, 1, 1], [], []>} : vector<2x64xf32>, vector<64x64xf32>, vector<2x64xf32> -> vector<2x64xf32>
    %cst_200 = arith.constant dense<0.000000e+00> : vector<2x64xf32>
    %905 = tpu.matmul %902, %32, %cst_200 {dimension_numbers = #tpu.dot_dimension_numbers<[1], [0], [0], [1], [0, 0, 1, 1], [], []>} : vector<2x64xf32>, vector<64x64xf32>, vector<2x64xf32> -> vector<2x64xf32>
    %906 = vector.broadcast %33 : vector<1x64xf32> to vector<2x64xf32>
    %907 = arith.addf %905, %906 : vector<2x64xf32>
    %908 = vector.extract_strided_slice %17 {offsets = [0, 28, 0], sizes = [2, 1, 64], strides = [1, 1, 1]} : vector<2x32x64xf32> to vector<2x1x64xf32>
    %909 = vector.shape_cast %908 : vector<2x1x64xf32> to vector<2x64xf32>
    %910 = arith.addf %909, %903 : vector<2x64xf32>
    %911 = arith.negf %910 : vector<2x64xf32>
    %912 = math.exp %911 : vector<2x64xf32>
    %cst_201 = arith.constant 1.000000e+00 : f32
    %913 = vector.broadcast %cst_201 : f32 to vector<2x64xf32>
    %914 = arith.addf %913, %912 : vector<2x64xf32>
    %915 = arith.divf %913, %914 : vector<2x64xf32>
    %916 = vector.extract_strided_slice %23 {offsets = [0, 28, 0], sizes = [2, 1, 64], strides = [1, 1, 1]} : vector<2x32x64xf32> to vector<2x1x64xf32>
    %917 = vector.shape_cast %916 : vector<2x1x64xf32> to vector<2x64xf32>
    %918 = arith.addf %917, %904 : vector<2x64xf32>
    %919 = arith.negf %918 : vector<2x64xf32>
    %920 = math.exp %919 : vector<2x64xf32>
    %cst_202 = arith.constant 1.000000e+00 : f32
    %921 = vector.broadcast %cst_202 : f32 to vector<2x64xf32>
    %922 = arith.addf %921, %920 : vector<2x64xf32>
    %923 = arith.divf %921, %922 : vector<2x64xf32>
    %924 = vector.extract_strided_slice %29 {offsets = [0, 28, 0], sizes = [2, 1, 64], strides = [1, 1, 1]} : vector<2x32x64xf32> to vector<2x1x64xf32>
    %925 = vector.shape_cast %924 : vector<2x1x64xf32> to vector<2x64xf32>
    %926 = arith.mulf %915, %907 : vector<2x64xf32>
    %927 = arith.addf %925, %926 : vector<2x64xf32>
    %928 = math.tanh %927 : vector<2x64xf32>
    %cst_203 = arith.constant 1.000000e+00 : f32
    %929 = vector.broadcast %cst_203 : f32 to vector<2x64xf32>
    %930 = arith.subf %929, %923 : vector<2x64xf32>
    %931 = arith.mulf %930, %928 : vector<2x64xf32>
    %932 = arith.mulf %923, %902 : vector<2x64xf32>
    %933 = arith.addf %931, %932 : vector<2x64xf32>
    %cst_204 = arith.constant dense<0.000000e+00> : vector<2x64xf32>
    %934 = tpu.matmul %933, %30, %cst_204 {dimension_numbers = #tpu.dot_dimension_numbers<[1], [0], [0], [1], [0, 0, 1, 1], [], []>} : vector<2x64xf32>, vector<64x64xf32>, vector<2x64xf32> -> vector<2x64xf32>
    %cst_205 = arith.constant dense<0.000000e+00> : vector<2x64xf32>
    %935 = tpu.matmul %933, %31, %cst_205 {dimension_numbers = #tpu.dot_dimension_numbers<[1], [0], [0], [1], [0, 0, 1, 1], [], []>} : vector<2x64xf32>, vector<64x64xf32>, vector<2x64xf32> -> vector<2x64xf32>
    %cst_206 = arith.constant dense<0.000000e+00> : vector<2x64xf32>
    %936 = tpu.matmul %933, %32, %cst_206 {dimension_numbers = #tpu.dot_dimension_numbers<[1], [0], [0], [1], [0, 0, 1, 1], [], []>} : vector<2x64xf32>, vector<64x64xf32>, vector<2x64xf32> -> vector<2x64xf32>
    %937 = vector.broadcast %33 : vector<1x64xf32> to vector<2x64xf32>
    %938 = arith.addf %936, %937 : vector<2x64xf32>
    %939 = vector.extract_strided_slice %17 {offsets = [0, 29, 0], sizes = [2, 1, 64], strides = [1, 1, 1]} : vector<2x32x64xf32> to vector<2x1x64xf32>
    %940 = vector.shape_cast %939 : vector<2x1x64xf32> to vector<2x64xf32>
    %941 = arith.addf %940, %934 : vector<2x64xf32>
    %942 = arith.negf %941 : vector<2x64xf32>
    %943 = math.exp %942 : vector<2x64xf32>
    %cst_207 = arith.constant 1.000000e+00 : f32
    %944 = vector.broadcast %cst_207 : f32 to vector<2x64xf32>
    %945 = arith.addf %944, %943 : vector<2x64xf32>
    %946 = arith.divf %944, %945 : vector<2x64xf32>
    %947 = vector.extract_strided_slice %23 {offsets = [0, 29, 0], sizes = [2, 1, 64], strides = [1, 1, 1]} : vector<2x32x64xf32> to vector<2x1x64xf32>
    %948 = vector.shape_cast %947 : vector<2x1x64xf32> to vector<2x64xf32>
    %949 = arith.addf %948, %935 : vector<2x64xf32>
    %950 = arith.negf %949 : vector<2x64xf32>
    %951 = math.exp %950 : vector<2x64xf32>
    %cst_208 = arith.constant 1.000000e+00 : f32
    %952 = vector.broadcast %cst_208 : f32 to vector<2x64xf32>
    %953 = arith.addf %952, %951 : vector<2x64xf32>
    %954 = arith.divf %952, %953 : vector<2x64xf32>
    %955 = vector.extract_strided_slice %29 {offsets = [0, 29, 0], sizes = [2, 1, 64], strides = [1, 1, 1]} : vector<2x32x64xf32> to vector<2x1x64xf32>
    %956 = vector.shape_cast %955 : vector<2x1x64xf32> to vector<2x64xf32>
    %957 = arith.mulf %946, %938 : vector<2x64xf32>
    %958 = arith.addf %956, %957 : vector<2x64xf32>
    %959 = math.tanh %958 : vector<2x64xf32>
    %cst_209 = arith.constant 1.000000e+00 : f32
    %960 = vector.broadcast %cst_209 : f32 to vector<2x64xf32>
    %961 = arith.subf %960, %954 : vector<2x64xf32>
    %962 = arith.mulf %961, %959 : vector<2x64xf32>
    %963 = arith.mulf %954, %933 : vector<2x64xf32>
    %964 = arith.addf %962, %963 : vector<2x64xf32>
    %cst_210 = arith.constant dense<0.000000e+00> : vector<2x64xf32>
    %965 = tpu.matmul %964, %30, %cst_210 {dimension_numbers = #tpu.dot_dimension_numbers<[1], [0], [0], [1], [0, 0, 1, 1], [], []>} : vector<2x64xf32>, vector<64x64xf32>, vector<2x64xf32> -> vector<2x64xf32>
    %cst_211 = arith.constant dense<0.000000e+00> : vector<2x64xf32>
    %966 = tpu.matmul %964, %31, %cst_211 {dimension_numbers = #tpu.dot_dimension_numbers<[1], [0], [0], [1], [0, 0, 1, 1], [], []>} : vector<2x64xf32>, vector<64x64xf32>, vector<2x64xf32> -> vector<2x64xf32>
    %cst_212 = arith.constant dense<0.000000e+00> : vector<2x64xf32>
    %967 = tpu.matmul %964, %32, %cst_212 {dimension_numbers = #tpu.dot_dimension_numbers<[1], [0], [0], [1], [0, 0, 1, 1], [], []>} : vector<2x64xf32>, vector<64x64xf32>, vector<2x64xf32> -> vector<2x64xf32>
    %968 = vector.broadcast %33 : vector<1x64xf32> to vector<2x64xf32>
    %969 = arith.addf %967, %968 : vector<2x64xf32>
    %970 = vector.extract_strided_slice %17 {offsets = [0, 30, 0], sizes = [2, 1, 64], strides = [1, 1, 1]} : vector<2x32x64xf32> to vector<2x1x64xf32>
    %971 = vector.shape_cast %970 : vector<2x1x64xf32> to vector<2x64xf32>
    %972 = arith.addf %971, %965 : vector<2x64xf32>
    %973 = arith.negf %972 : vector<2x64xf32>
    %974 = math.exp %973 : vector<2x64xf32>
    %cst_213 = arith.constant 1.000000e+00 : f32
    %975 = vector.broadcast %cst_213 : f32 to vector<2x64xf32>
    %976 = arith.addf %975, %974 : vector<2x64xf32>
    %977 = arith.divf %975, %976 : vector<2x64xf32>
    %978 = vector.extract_strided_slice %23 {offsets = [0, 30, 0], sizes = [2, 1, 64], strides = [1, 1, 1]} : vector<2x32x64xf32> to vector<2x1x64xf32>
    %979 = vector.shape_cast %978 : vector<2x1x64xf32> to vector<2x64xf32>
    %980 = arith.addf %979, %966 : vector<2x64xf32>
    %981 = arith.negf %980 : vector<2x64xf32>
    %982 = math.exp %981 : vector<2x64xf32>
    %cst_214 = arith.constant 1.000000e+00 : f32
    %983 = vector.broadcast %cst_214 : f32 to vector<2x64xf32>
    %984 = arith.addf %983, %982 : vector<2x64xf32>
    %985 = arith.divf %983, %984 : vector<2x64xf32>
    %986 = vector.extract_strided_slice %29 {offsets = [0, 30, 0], sizes = [2, 1, 64], strides = [1, 1, 1]} : vector<2x32x64xf32> to vector<2x1x64xf32>
    %987 = vector.shape_cast %986 : vector<2x1x64xf32> to vector<2x64xf32>
    %988 = arith.mulf %977, %969 : vector<2x64xf32>
    %989 = arith.addf %987, %988 : vector<2x64xf32>
    %990 = math.tanh %989 : vector<2x64xf32>
    %cst_215 = arith.constant 1.000000e+00 : f32
    %991 = vector.broadcast %cst_215 : f32 to vector<2x64xf32>
    %992 = arith.subf %991, %985 : vector<2x64xf32>
    %993 = arith.mulf %992, %990 : vector<2x64xf32>
    %994 = arith.mulf %985, %964 : vector<2x64xf32>
    %995 = arith.addf %993, %994 : vector<2x64xf32>
    %cst_216 = arith.constant dense<0.000000e+00> : vector<2x64xf32>
    %996 = tpu.matmul %995, %30, %cst_216 {dimension_numbers = #tpu.dot_dimension_numbers<[1], [0], [0], [1], [0, 0, 1, 1], [], []>} : vector<2x64xf32>, vector<64x64xf32>, vector<2x64xf32> -> vector<2x64xf32>
    %cst_217 = arith.constant dense<0.000000e+00> : vector<2x64xf32>
    %997 = tpu.matmul %995, %31, %cst_217 {dimension_numbers = #tpu.dot_dimension_numbers<[1], [0], [0], [1], [0, 0, 1, 1], [], []>} : vector<2x64xf32>, vector<64x64xf32>, vector<2x64xf32> -> vector<2x64xf32>
    %cst_218 = arith.constant dense<0.000000e+00> : vector<2x64xf32>
    %998 = tpu.matmul %995, %32, %cst_218 {dimension_numbers = #tpu.dot_dimension_numbers<[1], [0], [0], [1], [0, 0, 1, 1], [], []>} : vector<2x64xf32>, vector<64x64xf32>, vector<2x64xf32> -> vector<2x64xf32>
    %999 = vector.broadcast %33 : vector<1x64xf32> to vector<2x64xf32>
    %1000 = arith.addf %998, %999 : vector<2x64xf32>
    %1001 = vector.extract_strided_slice %17 {offsets = [0, 31, 0], sizes = [2, 1, 64], strides = [1, 1, 1]} : vector<2x32x64xf32> to vector<2x1x64xf32>
    %1002 = vector.shape_cast %1001 : vector<2x1x64xf32> to vector<2x64xf32>
    %1003 = arith.addf %1002, %996 : vector<2x64xf32>
    %1004 = arith.negf %1003 : vector<2x64xf32>
    %1005 = math.exp %1004 : vector<2x64xf32>
    %cst_219 = arith.constant 1.000000e+00 : f32
    %1006 = vector.broadcast %cst_219 : f32 to vector<2x64xf32>
    %1007 = arith.addf %1006, %1005 : vector<2x64xf32>
    %1008 = arith.divf %1006, %1007 : vector<2x64xf32>
    %1009 = vector.extract_strided_slice %23 {offsets = [0, 31, 0], sizes = [2, 1, 64], strides = [1, 1, 1]} : vector<2x32x64xf32> to vector<2x1x64xf32>
    %1010 = vector.shape_cast %1009 : vector<2x1x64xf32> to vector<2x64xf32>
    %1011 = arith.addf %1010, %997 : vector<2x64xf32>
    %1012 = arith.negf %1011 : vector<2x64xf32>
    %1013 = math.exp %1012 : vector<2x64xf32>
    %cst_220 = arith.constant 1.000000e+00 : f32
    %1014 = vector.broadcast %cst_220 : f32 to vector<2x64xf32>
    %1015 = arith.addf %1014, %1013 : vector<2x64xf32>
    %1016 = arith.divf %1014, %1015 : vector<2x64xf32>
    %1017 = vector.extract_strided_slice %29 {offsets = [0, 31, 0], sizes = [2, 1, 64], strides = [1, 1, 1]} : vector<2x32x64xf32> to vector<2x1x64xf32>
    %1018 = vector.shape_cast %1017 : vector<2x1x64xf32> to vector<2x64xf32>
    %1019 = arith.mulf %1008, %1000 : vector<2x64xf32>
    %1020 = arith.addf %1018, %1019 : vector<2x64xf32>
    %1021 = math.tanh %1020 : vector<2x64xf32>
    %cst_221 = arith.constant 1.000000e+00 : f32
    %1022 = vector.broadcast %cst_221 : f32 to vector<2x64xf32>
    %1023 = arith.subf %1022, %1016 : vector<2x64xf32>
    %1024 = arith.mulf %1023, %1021 : vector<2x64xf32>
    %1025 = arith.mulf %1016, %995 : vector<2x64xf32>
    %1026 = arith.addf %1024, %1025 : vector<2x64xf32>
    %c0_222 = arith.constant 0 : index
    %c0_223 = arith.constant 0 : index
    %1027 = vector.load %arg13[%c0_222, %c0_223] : memref<64x64xf32, #tpu.memory_space<vmem>>, vector<64x64xf32>
    %cst_224 = arith.constant dense<0.000000e+00> : vector<2x64xf32>
    %1028 = tpu.matmul %1026, %1027, %cst_224 {dimension_numbers = #tpu.dot_dimension_numbers<[1], [0], [0], [1], [0, 0, 1, 1], [], []>} : vector<2x64xf32>, vector<64x64xf32>, vector<2x64xf32> -> vector<2x64xf32>
    %c0_225 = arith.constant 0 : index
    %c0_226 = arith.constant 0 : index
    %1029 = vector.load %arg14[%c0_225, %c0_226] : memref<1x64xf32, #tpu.memory_space<vmem>>, vector<1x64xf32>
    %1030 = vector.broadcast %1029 : vector<1x64xf32> to vector<2x64xf32>
    %1031 = arith.addf %1028, %1030 : vector<2x64xf32>
    %cst_227 = arith.constant 0.000000e+00 : f32
    %1032 = vector.broadcast %cst_227 : f32 to vector<2x64xf32>
    %1033 = arith.cmpf oge, %1031, %1032 : vector<2x64xf32>
    %cst_228 = arith.constant 1.000000e-01 : f32
    %1034 = vector.broadcast %cst_228 : f32 to vector<2x64xf32>
    %1035 = arith.mulf %1034, %1031 : vector<2x64xf32>
    %1036 = arith.select %1033, %1031, %1035 : vector<2x64xi1>, vector<2x64xf32>
    %c0_229 = arith.constant 0 : index
    %c0_230 = arith.constant 0 : index
    %1037 = vector.load %arg15[%c0_229, %c0_230] : memref<64x32xf32, #tpu.memory_space<vmem>>, vector<64x32xf32>
    %cst_231 = arith.constant dense<0.000000e+00> : vector<2x32xf32>
    %1038 = tpu.matmul %1036, %1037, %cst_231 {dimension_numbers = #tpu.dot_dimension_numbers<[1], [0], [0], [1], [0, 0, 1, 1], [], []>} : vector<2x64xf32>, vector<64x32xf32>, vector<2x32xf32> -> vector<2x32xf32>
    %c0_232 = arith.constant 0 : index
    %c0_233 = arith.constant 0 : index
    %1039 = vector.load %arg16[%c0_232, %c0_233] : memref<1x32xf32, #tpu.memory_space<vmem>>, vector<1x32xf32>
    %1040 = vector.broadcast %1039 : vector<1x32xf32> to vector<2x32xf32>
    %1041 = arith.addf %1038, %1040 : vector<2x32xf32>
    %cst_234 = arith.constant 0.000000e+00 : f32
    %1042 = vector.broadcast %cst_234 : f32 to vector<2x32xf32>
    %1043 = arith.cmpf oge, %1041, %1042 : vector<2x32xf32>
    %cst_235 = arith.constant 1.000000e-01 : f32
    %1044 = vector.broadcast %cst_235 : f32 to vector<2x32xf32>
    %1045 = arith.mulf %1044, %1041 : vector<2x32xf32>
    %1046 = arith.select %1043, %1041, %1045 : vector<2x32xi1>, vector<2x32xf32>
    %c0_236 = arith.constant 0 : index
    %c0_237 = arith.constant 0 : index
    %1047 = vector.load %arg17[%c0_236, %c0_237] : memref<32x128xf32, #tpu.memory_space<vmem>>, vector<32x128xf32>
    %cst_238 = arith.constant dense<0.000000e+00> : vector<2x128xf32>
    %1048 = tpu.matmul %1046, %1047, %cst_238 {dimension_numbers = #tpu.dot_dimension_numbers<[1], [0], [0], [1], [0, 0, 1, 1], [], []>} : vector<2x32xf32>, vector<32x128xf32>, vector<2x128xf32> -> vector<2x128xf32>
    %c0_239 = arith.constant 0 : index
    %c0_240 = arith.constant 0 : index
    %1049 = vector.load %arg18[%c0_239, %c0_240] : memref<1x128xf32, #tpu.memory_space<vmem>>, vector<1x128xf32>
    %1050 = vector.broadcast %1049 : vector<1x128xf32> to vector<2x128xf32>
    %1051 = arith.addf %1048, %1050 : vector<2x128xf32>
    %c0_241 = arith.constant 0 : index
    %c0_242 = arith.constant 0 : index
    %1052 = vector.load %arg19[%c0_241, %c0_242] : memref<2x128xf32, #tpu.memory_space<vmem>>, vector<2x128xf32>
    tpu.vector_store %arg19[%c0_241, %c0_242], %1051 {strides = array<i32>} : memref<2x128xf32, #tpu.memory_space<vmem>>, vector<2x128xf32>,
    return
  }
  func.func @transform_0(%arg0: i32) -> (i32, i32, i32) {
    %c0_i32 = arith.constant 0 : i32
    %c0_i32_0 = arith.constant 0 : i32
    %c0_i32_1 = arith.constant 0 : i32
    return %arg0, %c0_i32, %c0_i32_0 : i32, i32, i32
  }
  func.func @transform_1(%arg0: i32) -> (i32, i32) {
    %c0_i32 = arith.constant 0 : i32
    %c0_i32_0 = arith.constant 0 : i32
    %c0_i32_1 = arith.constant 0 : i32
    return %c0_i32, %c0_i32_0 : i32, i32
  }
  func.func @transform_2(%arg0: i32) -> (i32, i32) {
    %c0_i32 = arith.constant 0 : i32
    %c0_i32_0 = arith.constant 0 : i32
    %c0_i32_1 = arith.constant 0 : i32
    return %c0_i32, %c0_i32_0 : i32, i32
  }
  func.func @transform_3(%arg0: i32) -> (i32, i32) {
    %c0_i32 = arith.constant 0 : i32
    %c0_i32_0 = arith.constant 0 : i32
    %c0_i32_1 = arith.constant 0 : i32
    return %c0_i32, %c0_i32_0 : i32, i32
  }
  func.func @transform_4(%arg0: i32) -> (i32, i32) {
    %c0_i32 = arith.constant 0 : i32
    %c0_i32_0 = arith.constant 0 : i32
    %c0_i32_1 = arith.constant 0 : i32
    return %c0_i32, %c0_i32_0 : i32, i32
  }
  func.func @transform_5(%arg0: i32) -> (i32, i32) {
    %c0_i32 = arith.constant 0 : i32
    %c0_i32_0 = arith.constant 0 : i32
    %c0_i32_1 = arith.constant 0 : i32
    return %c0_i32, %c0_i32_0 : i32, i32
  }
  func.func @transform_6(%arg0: i32) -> (i32, i32) {
    %c0_i32 = arith.constant 0 : i32
    %c0_i32_0 = arith.constant 0 : i32
    %c0_i32_1 = arith.constant 0 : i32
    return %c0_i32, %c0_i32_0 : i32, i32
  }
  func.func @transform_7(%arg0: i32) -> (i32, i32) {
    %c0_i32 = arith.constant 0 : i32
    %c0_i32_0 = arith.constant 0 : i32
    %c0_i32_1 = arith.constant 0 : i32
    return %c0_i32, %c0_i32_0 : i32, i32
  }
  func.func @transform_8(%arg0: i32) -> (i32, i32) {
    %c0_i32 = arith.constant 0 : i32
    %c0_i32_0 = arith.constant 0 : i32
    %c0_i32_1 = arith.constant 0 : i32
    return %c0_i32, %c0_i32_0 : i32, i32
  }
  func.func @transform_9(%arg0: i32) -> (i32, i32) {
    %c0_i32 = arith.constant 0 : i32
    %c0_i32_0 = arith.constant 0 : i32
    %c0_i32_1 = arith.constant 0 : i32
    return %c0_i32, %c0_i32_0 : i32, i32
  }
  func.func @transform_10(%arg0: i32) -> (i32, i32) {
    %c0_i32 = arith.constant 0 : i32
    %c0_i32_0 = arith.constant 0 : i32
    %c0_i32_1 = arith.constant 0 : i32
    return %c0_i32, %c0_i32_0 : i32, i32
  }
  func.func @transform_11(%arg0: i32) -> (i32, i32) {
    %c0_i32 = arith.constant 0 : i32
    %c0_i32_0 = arith.constant 0 : i32
    %c0_i32_1 = arith.constant 0 : i32
    return %c0_i32, %c0_i32_0 : i32, i32
  }
  func.func @transform_12(%arg0: i32) -> (i32, i32) {
    %c0_i32 = arith.constant 0 : i32
    %c0_i32_0 = arith.constant 0 : i32
    %c0_i32_1 = arith.constant 0 : i32
    return %c0_i32, %c0_i32_0 : i32, i32
  }
  func.func @transform_13(%arg0: i32) -> (i32, i32) {
    %c0_i32 = arith.constant 0 : i32
    %c0_i32_0 = arith.constant 0 : i32
    %c0_i32_1 = arith.constant 0 : i32
    return %c0_i32, %c0_i32_0 : i32, i32
  }
  func.func @transform_14(%arg0: i32) -> (i32, i32) {
    %c0_i32 = arith.constant 0 : i32
    %c0_i32_0 = arith.constant 0 : i32
    %c0_i32_1 = arith.constant 0 : i32
    return %c0_i32, %c0_i32_0 : i32, i32
  }
  func.func @transform_15(%arg0: i32) -> (i32, i32) {
    %c0_i32 = arith.constant 0 : i32
    %c0_i32_0 = arith.constant 0 : i32
    %c0_i32_1 = arith.constant 0 : i32
    return %c0_i32, %c0_i32_0 : i32, i32
  }
  func.func @transform_16(%arg0: i32) -> (i32, i32) {
    %c0_i32 = arith.constant 0 : i32
    %c0_i32_0 = arith.constant 0 : i32
    %c0_i32_1 = arith.constant 0 : i32
    return %c0_i32, %c0_i32_0 : i32, i32
  }
  func.func @transform_17(%arg0: i32) -> (i32, i32) {
    %c0_i32 = arith.constant 0 : i32
    %c0_i32_0 = arith.constant 0 : i32
    %c0_i32_1 = arith.constant 0 : i32
    return %c0_i32, %c0_i32_0 : i32, i32
  }
  func.func @transform_18(%arg0: i32) -> (i32, i32) {
    %c0_i32 = arith.constant 0 : i32
    %c0_i32_0 = arith.constant 0 : i32
    return %arg0, %c0_i32 : i32, i32
  }
}

</mosaic_0001>

<bundles_post_ra>
// kernel: generator_forward.1
= control target key start
LH: loop header
LB: loop body
LE: loop exit
PB: predicated region body
PF: predicated region fallthrough
CT: control target
= control target key end

     0   :  { %s17025_s0 = inlined_call_operand.vmem [shape: f32[2,8,64], index: 0, kind: input, shape index: {}]   ;;  %s17026_s1 = inlined_call_operand.vmem [shape: f32[32,8], index: 1, kind: input, shape index: {}]   ;;  %s17027_s2 = inlined_call_operand.vmem [shape: f32[64,64], index: 2, kind: input, shape index: {}]   ;;  %s17028_s3 = inlined_call_operand.vmem [shape: f32[64,64], index: 3, kind: input, shape index: {}]   ;;  %s17029_s4 = inlined_call_operand.vmem [shape: f32[64,64], index: 4, kind: input, shape index: {}]   ;;  %s17030_s5 = inlined_call_operand.vmem [shape: f32[64,64], index: 5, kind: input, shape index: {}]   ;;  %s17031_s6 = inlined_call_operand.vmem [shape: f32[64,64], index: 6, kind: input, shape index: {}]   ;;  %s17032_s7 = inlined_call_operand.vmem [shape: f32[64,64], index: 7, kind: input, shape index: {}]   ;;  %s17033_s8 = inlined_call_operand.vmem [shape: f32[1,64], index: 8, kind: input, shape index: {}]   ;;  %s17034_s9 = inlined_call_operand.vmem [shape: f32[1,64], index: 9, kind: input, shape index: {}]   ;;  %s17035_s10 = inlined_call_operand.vmem [shape: f32[1,64], index: 10, kind: input, shape index: {}]   ;;  %s17036_s11 = inlined_call_operand.vmem [shape: f32[1,64], index: 11, kind: input, shape index: {}]   ;;  %s17037_s12 = inlined_call_operand.vmem [shape: f32[64,64], index: 12, kind: input, shape index: {}]   ;;  %s17038_s13 = inlined_call_operand.vmem [shape: f32[1,64], index: 13, kind: input, shape index: {}]   ;;  %s17039_s14 = inlined_call_operand.vmem [shape: f32[64,32], index: 14, kind: input, shape index: {}]   ;;  %s17040_s15 = inlined_call_operand.vmem [shape: f32[1,32], index: 15, kind: input, shape index: {}]   ;;  %s17041_s16 = inlined_call_operand.vmem [shape: f32[32,128], index: 16, kind: input, shape index: {}]   ;;  %s17042_s17 = inlined_call_operand.vmem [shape: f32[1,128], index: 17, kind: input, shape index: {}]   ;;  %s17043_s18 = inlined_call_operand.hbm [shape: f32[2,128], index: 18, kind: output, shape index: {}]  }
   0x1   :  { %17047 = sst [smem:[#allocation5_spill]] %s17025_s0 }
   0x2   :  { %17048 = sst [smem:[#allocation6_spill]] %s17026_s1 }
   0x3   :  { %17049 = sst [smem:[#allocation7_spill]] %s17027_s2 }
   0x4   :  { %17050 = sst [smem:[#allocation8_spill]] %s17038_s13 }
   0x5   :  { %s17051_s29 = sld [smem:[#allocation5_spill]]  ;;  %s17052_s13 = sld [smem:[#allocation6_spill]]  ;;  %vm66_vm0 = vcmask 64512   ;;  %v418_v8 = vld [vmem:[%s17028_s3] sm:$0xff]  ;;  %v419_v10 = vld [vmem:[%s17028_s3 + $0x8] sm:$0xff]  ;;  %v420_v15 = vld [vmem:[%s17028_s3 + $0x10] sm:$0xff] }
   0x6   :  { %s17053_s27 = sld [smem:[#allocation7_spill]]  ;;  %v13022_v13 = vpack.c.bf16 %v419_v10, %v418_v8  ;;  %v421_v16 = vld [vmem:[%s17028_s3 + $0x18] sm:$0xff]  ;;  %v422_v20 = vld [vmem:[%s17028_s3 + $0x20] sm:$0xff]  ;;  %v423_v21 = vld [vmem:[%s17028_s3 + $0x28] sm:$0xff] }
   0x7   :  { %v13026_v18 = vpack.c.bf16 %v421_v16, %v420_v15 }
   0xb   :  { %v64_v0 = vld [vmem:[%s17051_s29] sm:$0xff]  ;;  %v61_v2 = vld [vmem:[%s17052_s13 + $0x8] sm:$0xff]  ;;  %v62_v3 = vld [vmem:[%s17052_s13 + $0x10] sm:$0xff] }
   0xc   :  { %v60_v1 = vld [vmem:[%s17052_s13] sm:$0xff]  ;;  %11033 = vmatprep.subr.mxu0 %v64_v0  ;;  %v65_v4 = vld [vmem:[%s17051_s29 + $0x8] sm:$0xff]  ;;  %v63_v5 = vld [vmem:[%s17052_s13 + $0x18] sm:$0xff] }
   0xd   :  { %11035 = vmatprep.mubr.msk.f32.mxu0 %vm66_vm0, %v60_v1  ;;  %11034 = vmatpush3.msra.mxu0 %v64_v0  ;;  %v273_v6 = vld [vmem:[%s17053_s27] sm:$0xff]  ;;  %v274_v7 = vld [vmem:[%s17053_s27 + $0x8] sm:$0xff]  ;;  %v275_v11 = vld [vmem:[%s17053_s27 + $0x10] sm:$0xff] }
   0xe   :  { %11041 = vmatprep.subr.mxu1 %v65_v4  ;;  %11036 = vmatmul.mubr.msk.f32.vlgmr.msra.gmra.mrb[0].mxu0 %vm66_vm0, %v61_v2  ;;  %v13006_v9 = vpack.c.bf16 %v274_v7, %v273_v6  ;;  %v276_v12 = vld [vmem:[%s17053_s27 + $0x18] sm:$0xff]  ;;  %v277_v17 = vld [vmem:[%s17053_s27 + $0x20] sm:$0xff]  ;;  %v278_v19 = vld [vmem:[%s17053_s27 + $0x28] sm:$0xff] }
   0xf   :  { %11042 = vmatpush3.msra.mxu1 %v65_v4  ;;  %11038 = vmatprep.mubr.msk.f32.mxu0 %vm66_vm0, %v62_v3  ;;  %v13010_v14 = vpack.c.bf16 %v276_v12, %v275_v11 }
  0x10   :  { %11043 = vmatprep.mubr.msk.f32.mxu1 %vm66_vm0, %v60_v1  ;;  %13007 = vmatprep.subr.bf16.mxu0 %v13006_v9 }
  0x11   :  { %11044 = vmatmul.mubr.msk.f32.vlgmr.msra.gmra.mrb[0].mxu1 %vm66_vm0, %v61_v2  ;;  %13009 = vmatpush3.bf16.msra.mxu0 %v13006_v9 }
  0x12   :  { %11046 = vmatprep.mubr.msk.f32.mxu1 %vm66_vm0, %v62_v3 }
  0x13   :  { %23 = vsyncpa [#allocation3], 0  ;;  %11039 = vmatmul.mubr.msk.f32.gmra.mrb[2].mxu0 %vm66_vm0, %v63_v5  ;;  %13023 = vmatprep.subr.bf16.mxu1 %v13022_v13  ;;  %v13014_v22 = vpack.c.bf16 %v278_v19, %v277_v17  ;;  %v13030_v23 = vpack.c.bf16 %v423_v21, %v422_v20  ;;  %v279_v24 = vld [vmem:[%s17053_s27 + $0x30] sm:$0xff]  ;;  %v280_v25 = vld [vmem:[%s17053_s27 + $0x38] sm:$0xff]  ;;  %v14909_v33 = vmov 0.0|0.0   ;;  %vm288_vm3 = vcmask 523264  }
  0x14   :  { %13025 = vmatpush3.bf16.msra.mxu1 %v13022_v13  ;;  %13011 = vmatprep.subr.bf16.mxu0 %v13010_v14  ;;  %v424_v26 = vld [vmem:[%s17028_s3 + $0x30] sm:$0xff]  ;;  %v13018_v27 = vpack.c.bf16 %v280_v25, %v279_v24  ;;  %v425_v28 = vld [vmem:[%s17028_s3 + $0x38] sm:$0xff]  ;;  %v538_v30 = vld [vmem:[%s17029_s4] sm:$0xff]  ;;  %vm14910_vm10 = vmmov 0   ;;  %v14911_v20 = vmov 0.0   ;;  %vm959_vm11 = vcmask 1041409  }
  0x15   :  { %11047 = vmatmul.mubr.msk.f32.gmra.mrb[2].mxu1 %vm66_vm0, %v63_v5  ;;  %13027 = vmatprep.subr.bf16.mxu1 %v13026_v18  ;;  %v13034_v29 = vpack.c.bf16 %v425_v28, %v424_v26  ;;  %v539_v31 = vld [vmem:[%s17029_s4 + $0x8] sm:$0xff]  ;;  %v658_v35 = vld [vmem:[%s17030_s5] sm:$0xff]  ;;  %v540_v39 = vld [vmem:[%s17029_s4 + $0x10] sm:$0xff]  ;;  %vm9736_vm14 = vcmask 261120  }
  0x16   :  { %13013 = vmatpush3.bf16.msra.mxu0 %v13010_v14  ;;  %v13038_v32 = vpack.c.bf16 %v539_v31, %v538_v30  ;;  %v659_v36 = vld [vmem:[%s17030_s5 + $0x8] sm:$0xff]  ;;  %v541_v40 = vld [vmem:[%s17029_s4 + $0x18] sm:$0xff]  ;;  %v660_v49 = vld [vmem:[%s17030_s5 + $0x10] sm:$0xff] }
  0x17   :  { %13015 = vmatprep.subr.bf16.mxu0 %v13014_v22  ;;  %v15101_v44 = vpack.c.bf16 %v659_v36, %v658_v35  ;;  %v13042_v48 = vpack.c.bf16 %v541_v40, %v540_v39  ;;  %v661_v53 = vld [vmem:[%s17030_s5 + $0x18] sm:$0xff]  ;;  %v542_v54 = vld [vmem:[%s17029_s4 + $0x20] sm:$0xff]  ;;  %v543_v57 = vld [vmem:[%s17029_s4 + $0x28] sm:$0xff] }
  0x18   :  { %13029 = vmatpush3.bf16.msra.mxu1 %v13026_v18  ;;  %v15134_v62 = vpack.c.bf16 %v661_v53, %v660_v49  ;;  %v13046_v1 = vpack.c.bf16 %v543_v57, %v542_v54  ;;  %v662_v2 = vld [vmem:[%s17030_s5 + $0x20] sm:$0xff]  ;;  %v663_v3 = vld [vmem:[%s17030_s5 + $0x28] sm:$0xff]  ;;  %v544_v4 = vld [vmem:[%s17029_s4 + $0x30] sm:$0xff] }
  0x19   :  { %13031 = vmatprep.subr.bf16.mxu1 %v13030_v23  ;;  %v545_v5 = vld [vmem:[%s17029_s4 + $0x38] sm:$0xff]  ;;  %v15166_v7 = vpack.c.bf16 %v663_v3, %v662_v2  ;;  %v664_v11 = vld [vmem:[%s17030_s5 + $0x30] sm:$0xff]  ;;  %v666_v14 = vld [vmem:[%s17031_s6] sm:$0xff] }
  0x1a   :  { %13017 = vmatpush3.bf16.msra.mxu0 %v13014_v22  ;;  %v13050_v10 = vpack.c.bf16 %v545_v5, %v544_v4  ;;  %v665_v12 = vld [vmem:[%s17030_s5 + $0x38] sm:$0xff]  ;;  %v667_v15 = vld [vmem:[%s17031_s6 + $0x8] sm:$0xff]  ;;  %v674_v17 = vld [vmem:[%s17032_s7] sm:$0xff]  ;;  %s14912_s5 = smov [#allocation2]  }
  0x1b   :  { %13019 = vmatprep.subr.bf16.mxu0 %v13018_v27  ;;  %v15182_v13 = vpack.c.bf16 %v665_v12, %v664_v11  ;;  %v675_v18 = vld [vmem:[%s17032_s7 + $0x8] sm:$0xff]  ;;  %v15201_v19 = vpack.c.bf16 %v667_v15, %v666_v14  ;;  %v668_v21 = vld [vmem:[%s17031_s6 + $0x10] sm:$0xff]  ;;  %v669_v22 = vld [vmem:[%s17031_s6 + $0x18] sm:$0xff] }
  0x1c   :  { %13033 = vmatpush3.bf16.msra.mxu1 %v13030_v23  ;;  %v15214_v23 = vpack.c.bf16 %v675_v18, %v674_v17  ;;  %v676_v24 = vld [vmem:[%s17032_s7 + $0x10] sm:$0xff]  ;;  %v677_v25 = vld [vmem:[%s17032_s7 + $0x18] sm:$0xff]  ;;  %v15226_v26 = vpack.c.bf16 %v669_v22, %v668_v21  ;;  %v671_v28 = vld [vmem:[%s17031_s6 + $0x28] sm:$0xff] }
  0x1d   :  { %13035 = vmatprep.subr.bf16.mxu1 %v13034_v29  ;;  %v678_v30 = vld [vmem:[%s17032_s7 + $0x20] sm:$0xff]  ;;  %v679_v31 = vld [vmem:[%s17032_s7 + $0x28] sm:$0xff]  ;;  %v673_v35 = vld [vmem:[%s17031_s6 + $0x38] sm:$0xff] }
  0x1e   :  { %13021 = vmatpush3.bf16.msra.mxu0 %v13018_v27  ;;  %v670_v27 = vld [vmem:[%s17031_s6 + $0x20] sm:$0xff]  ;;  %v15264_v36 = vpack.c.bf16 %v679_v31, %v678_v30 }
  0x1f   :  { %13039 = vmatprep.subr.bf16.mxu0 %v13038_v32 }
  0x20   :  { %13037 = vmatpush3.bf16.msra.mxu1 %v13034_v29  ;;  %v15238_v29 = vpack.c.bf16 %v677_v25, %v676_v24 }
  0x21   :  { %13054 = vmatprep.subr.bf16.mxu1 %v14909_v33 }
  0xe1   :  { %v11037_v34 = vpop.f32.mrb[0].mxu0 }
  0xe2   :  { %v258_v37 = vmul.f32 0.1, %v11037_v34  ;;  %v145_v38 = vpop.f32.mrb[1].mxu0  ;;  %vm250_vm1 = vcmp.ge.f32.partialorder %v11037_v34, 0.0 }
  0xe3   :  { %vm249_vm2 = vcmp.ge.f32.partialorder %v145_v38, 0.0  ;;  %v257_v41 = vmul.f32 0.1, %v145_v38 }
  0xe4   :  { %v11045_v42 = vpop.f32.mrb[0].mxu1  ;;  %v15108_v50 = vsel %vm250_vm1, %v11037_v34, %v258_v37  ;;  %v672_v34 = vld [vmem:[%s17031_s6 + $0x30] sm:$0xff] }
  0xe5   :  { %v230_v43 = vpop.f32.mrb[1].mxu1  ;;  %v15103_v46 = vsel %vm249_vm2, %v145_v38, %v257_v41  ;;  %v262_v63 = vmul.f32 0.1, %v11045_v42  ;;  %vm254_vm8 = vcmp.ge.f32.partialorder %v11045_v42, 0.0  ;;  %v680_v37 = vld [vmem:[%s17032_s7 + $0x30] sm:$0xff]  ;;  %v681_v38 = vld [vmem:[%s17032_s7 + $0x38] sm:$0xff]  ;;  %v15277_v39 = vpack.c.bf16 %v673_v35, %v672_v34 }
  0xe6   :  { %v11040_v45 = vpop.f32.mrb[2].mxu0  ;;  %v261_v47 = vmul.f32 0.1, %v230_v43  ;;  %11065 = vmatprep.mubr.msk.f32.mxu0 %vm288_vm3, %v15103_v46  ;;  %11093 = vmatprep.mubr.msk.f32.mxu1 %vm288_vm3, %v15103_v46  ;;  %vm253_vm4 = vcmp.ge.f32.partialorder %v230_v43, 0.0  ;;  %v15281_v40 = vpack.c.bf16 %v681_v38, %v680_v37  ;;  %v9833_v41 = vld [vmem:[%s17033_s8] ss:$0 sm:$0xff] }
  0xe7   :  { %v260_v51 = vmul.f32 0.1, %v11040_v45  ;;  %v155_v52 = vpop.f32.mrb[3].mxu0  ;;  %vm252_vm5 = vcmp.ge.f32.partialorder %v11040_v45, 0.0  ;;  %11066 = vmatmul.mubr.msk.f32.vlgmr.msra.gmra.mrb[4].mxu0 %vm288_vm3, %v15108_v50  ;;  %11094 = vmatmul.mubr.msk.f32.vlgmr.msra.gmra.mrb[4].mxu1 %vm288_vm3, %v15108_v50  ;;  %v270_v9 = vsel %vm254_vm8, %v11045_v42, %v262_v63  ;;  %v9842_v42 = vld [vmem:[%s17034_s9] ss:$0 sm:$0xff] }
  0xe8   :  { %vm251_vm6 = vcmp.ge.f32.partialorder %v155_v52, 0.0  ;;  %v259_v55 = vmul.f32 0.1, %v155_v52  ;;  %v11048_v56 = vpop.f32.mrb[2].mxu1  ;;  %13041 = vmatpush3.bf16.msra.mxu0 %v13038_v32  ;;  %13056 = vmatpush3.bf16.msra.mxu1 %v15101_v44  ;;  %v15132_v61 = vsel %vm253_vm4, %v230_v43, %v261_v47  ;;  %v15254_v32 = vpack.c.bf16 %v671_v28, %v670_v27  ;;  %s17054_s9 = sld [smem:[#allocation8_spill]] }
  0xe9   :  { %v240_v58 = vpop.f32.mrb[3].mxu1  ;;  %13043 = vmatprep.subr.bf16.mxu0 %v13042_v48  ;;  %13057 = vmatprep.subr.bf16.mxu1 %v14909_v33  ;;  %v15141_v0 = vsel %vm252_vm5, %v11040_v45, %v260_v51  ;;  %v264_v8 = vmul.f32 0.1, %v11048_v56  ;;  %vm256_vm9 = vcmp.ge.f32.partialorder %v11048_v56, 0.0 }
  0xea   :  { %v15128_v59 = vsel %vm251_vm6, %v155_v52, %v259_v55  ;;  %v263_v60 = vmul.f32 0.1, %v240_v58  ;;  %vm255_vm7 = vcmp.ge.f32.partialorder %v240_v58, 0.0 }
  0xeb   :  { %11068 = vmatprep.mubr.msk.f32.mxu0 %vm288_vm3, %v15128_v59  ;;  %11096 = vmatprep.mubr.msk.f32.mxu1 %vm288_vm3, %v15128_v59  ;;  %v272_v16 = vsel %vm256_vm9, %v11048_v56, %v264_v8 }
  0xec   :  { %11069 = vmatmul.mubr.msk.f32.gmra.mrb[6].mxu0 %vm288_vm3, %v15141_v0  ;;  %11097 = vmatmul.mubr.msk.f32.gmra.mrb[6].mxu1 %vm288_vm3, %v15141_v0  ;;  %v15164_v6 = vsel %vm255_vm7, %v240_v58, %v263_v60 }
  0xed   :  { %13045 = vmatpush3.bf16.msra.mxu0 %v13042_v48  ;;  %11071 = vmatprep.mubr.msk.f32.mxu0 %vm288_vm3, %v15132_v61 }
  0xee   :  { %11099 = vmatprep.mubr.msk.f32.mxu1 %vm288_vm3, %v15132_v61  ;;  %13059 = vmatpush3.bf16.msra.mxu1 %v15134_v62 }
  0xef   :  { %13047 = vmatprep.subr.bf16.mxu0 %v13046_v1  ;;  %13060 = vmatprep.subr.bf16.mxu1 %v14909_v33 }
  0xf0   :  { %11072 = vmatmul.mubr.msk.f32.gmra.mrb[8].mxu0 %vm288_vm3, %v270_v9  ;;  %11100 = vmatmul.mubr.msk.f32.gmra.mrb[8].mxu1 %vm288_vm3, %v270_v9 }
  0xf1   :  { %13049 = vmatpush3.bf16.msra.mxu0 %v13046_v1  ;;  %11074 = vmatprep.mubr.msk.f32.mxu0 %vm288_vm3, %v15164_v6 }
  0xf2   :  { %11102 = vmatprep.mubr.msk.f32.mxu1 %vm288_vm3, %v15164_v6  ;;  %13062 = vmatpush3.bf16.msra.mxu1 %v15166_v7 }
  0xf3   :  { %13051 = vmatprep.subr.bf16.mxu0 %v13050_v10  ;;  %13063 = vmatprep.subr.bf16.mxu1 %v14909_v33 }
  0xf4   :  { %11075 = vmatmul.mubr.msk.f32.gmra.mrb[10].mxu0 %vm288_vm3, %v272_v16  ;;  %11103 = vmatmul.mubr.msk.f32.gmra.mrb[10].mxu1 %vm288_vm3, %v272_v16 }
  0xf5   :  { %13053 = vmatpush3.bf16.msra.mxu0 %v13050_v10  ;;  %11121 = vmatprep.mubr.msk.f32.mxu0 %vm288_vm3, %v15103_v46  ;;  %v9851_v10 = vld [vmem:[%s17035_s10] ss:$0 sm:$0xff] }
  0xf6   :  { %13065 = vmatpush3.bf16.msra.mxu1 %v15182_v13  ;;  %11149 = vmatprep.mubr.msk.f32.mxu1 %vm14910_vm10, %v14911_v20 }
  0xf7   :  { %13066 = vmatprep.subr.bf16.mxu0 %v14909_v33  ;;  %13078 = vmatprep.subr.bf16.mxu1 %v14909_v33 }
  0xf8   :  { %11122 = vmatmul.mubr.msk.f32.vlgmr.msra.gmra.mrb[12].mxu0 %vm288_vm3, %v15108_v50 }
  0xf9   :  { %11150 = vmatmul.mubr.f32.vlgmr.msra.gmra.mrb[12].mxu1 %v14911_v20  ;;  %13068 = vmatpush3.bf16.msra.mxu0 %v15201_v19 }
  0xfa   :  { %11124 = vmatprep.mubr.msk.f32.mxu0 %vm288_vm3, %v15128_v59  ;;  %13069 = vmatprep.subr.bf16.mxu0 %v14909_v33 }
  0xfb   :  { %13080 = vmatpush3.bf16.msra.mxu1 %v15214_v23  ;;  %11187 = vmatprep.mubr.msk.f32.mxu1 %vm14910_vm10, %v14911_v20 }
  0xfc   :  { %11125 = vmatmul.mubr.msk.f32.gmra.mrb[14].mxu0 %vm288_vm3, %v15141_v0  ;;  %13081 = vmatprep.subr.bf16.mxu1 %v14909_v33 }
  0xfd   :  { %13071 = vmatpush3.bf16.msra.mxu0 %v15226_v26  ;;  %11127 = vmatprep.mubr.msk.f32.mxu0 %vm288_vm3, %v15132_v61 }
  0xfe   :  { %13072 = vmatprep.subr.bf16.mxu0 %v14909_v33 }
  0xff   :  { %13083 = vmatpush3.bf16.msra.mxu1 %v15238_v29 }
 0x100   :  { %11128 = vmatmul.mubr.msk.f32.gmra.mrb[16].mxu0 %vm288_vm3, %v270_v9  ;;  %13084 = vmatprep.subr.bf16.mxu1 %v14909_v33 }
 0x101   :  { %13074 = vmatpush3.bf16.msra.mxu0 %v15254_v32  ;;  %11130 = vmatprep.mubr.msk.f32.mxu0 %vm288_vm3, %v15164_v6 }
 0x102   :  { %13075 = vmatprep.subr.bf16.mxu0 %v14909_v33 }
 0x103   :  { %13086 = vmatpush3.bf16.msra.mxu1 %v15264_v36 }
 0x104   :  { %11131 = vmatmul.mubr.msk.f32.gmra.mrb[18].mxu0 %vm288_vm3, %v272_v16  ;;  %13087 = vmatprep.subr.bf16.mxu1 %v14909_v33 }
 0x105   :  { %13077 = vmatpush3.bf16.msra.mxu0 %v15277_v39  ;;  %11168 = vmatprep.mubr.msk.f32.mxu0 %vm14910_vm10, %v14911_v20 }
 0x106   :  { %13090 = vmatprep.subr.bf16.mxu0 %v14909_v33 }
 0x107   :  { %13089 = vmatpush3.bf16.msra.mxu1 %v15281_v40 }
 0x108   :  { %11169 = vmatmul.mubr.f32.vlgmr.msra.gmra.mrb[20].mxu0 %v14911_v20  ;;  %13102 = vmatprep.subr.bf16.mxu1 %v14909_v33 }
 0x109   :  { %13092 = vmatpush3.bf16.msra.mxu0 %v15101_v44  ;;  %11206 = vmatprep.mubr.msk.f32.mxu0 %vm14910_vm10, %v14911_v20 }
 0x10a   :  { %11188 = vmatmul.mubr.f32.vlgmr.msra.gmra.mrb[14].mxu1 %v14911_v20  ;;  %13093 = vmatprep.subr.bf16.mxu0 %v14909_v33 }
 0x10b   :  { %13104 = vmatpush3.bf16.msra.mxu1 %v15201_v19  ;;  %11225 = vmatprep.mubr.msk.f32.mxu1 %vm14910_vm10, %v14911_v20 }
 0x10c   :  { %13105 = vmatprep.subr.bf16.mxu1 %v14909_v33 }
 0x10d   :  { %13095 = vmatpush3.bf16.msra.mxu0 %v15134_v62 }
 0x10e   :  { %13096 = vmatprep.subr.bf16.mxu0 %v14909_v33 }
 0x10f   :  { %13107 = vmatpush3.bf16.msra.mxu1 %v15226_v26 }
 0x110   :  { %13108 = vmatprep.subr.bf16.mxu1 %v14909_v33 }
 0x111   :  { %13098 = vmatpush3.bf16.msra.mxu0 %v15166_v7 }
 0x112   :  { %13099 = vmatprep.subr.bf16.mxu0 %v14909_v33 }
 0x113   :  { %13110 = vmatpush3.bf16.msra.mxu1 %v15254_v32 }
 0x114   :  { %13111 = vmatprep.subr.bf16.mxu1 %v14909_v33 }
 0x115   :  { %13101 = vmatpush3.bf16.msra.mxu0 %v15182_v13 }
 0x116   :  { %13114 = vmatprep.subr.bf16.mxu0 %v14909_v33 }
 0x117   :  { %13113 = vmatpush3.bf16.msra.mxu1 %v15277_v39 }
 0x118   :  { %13126 = vmatprep.subr.bf16.mxu1 %v14909_v33 }
 0x1ba   :  { %v11067_v43 = vpop.f32.mrb[4].mxu0  ;;  %v11095_v45 = vpop.f32.mrb[4].mxu1 }
 0x1bb   :  { %v15319_v46 = vadd.f32 %v11067_v43, %v9833_v41  ;;  %v15321_v47 = vadd.f32 %v11095_v45, %v9842_v42  ;;  %v379_v48 = vpop.f32.mrb[5].mxu0  ;;  %v499_v49 = vpop.f32.mrb[5].mxu1 }
 0x1bc   :  { %v15346_v11 = vadd.f32 %v9833_v41, %v379_v48 }
 0x1bf   :  { %v11070_v50 = vpop.f32.mrb[6].mxu0  ;;  %v11098_v51 = vpop.f32.mrb[6].mxu1 }
 0x1c0   :  { %v15323_v52 = vadd.f32 %v11070_v50, %v9833_v41  ;;  %v15325_v53 = vadd.f32 %v11098_v51, %v9842_v42  ;;  %v389_v54 = vpop.f32.mrb[7].mxu0  ;;  %v509_v55 = vpop.f32.mrb[7].mxu1  ;;  %v15364_v50 = vadd.f32 %v9842_v42, %v499_v49 }
 0x1c1   :  { %v15327_v56 = vadd.f32 %v9833_v41, %v389_v54  ;;  %v15329_v57 = vadd.f32 %v9842_v42, %v509_v55 }
 0x1c3   :  { %v11073_v58 = vpop.f32.mrb[8].mxu0  ;;  %v11101_v59 = vpop.f32.mrb[8].mxu1 }
 0x1c4   :  { %v15331_v60 = vadd.f32 %v11073_v58, %v9833_v41  ;;  %v15333_v61 = vadd.f32 %v11101_v59, %v9842_v42  ;;  %v399_v63 = vpop.f32.mrb[9].mxu0  ;;  %v519_v0 = vpop.f32.mrb[9].mxu1 }
 0x1c5   :  { %v15350_v17 = vadd.f32 %v9833_v41, %v399_v63  ;;  %v15366_v55 = vadd.f32 %v9842_v42, %v519_v0 }
 0x1c7   :  { %v11076_v1 = vpop.f32.mrb[10].mxu0  ;;  %v11104_v2 = vpop.f32.mrb[10].mxu1 }
 0x1c8   :  { %v15335_v3 = vadd.f32 %v11076_v1, %v9833_v41  ;;  %v15337_v4 = vadd.f32 %v11104_v2, %v9842_v42  ;;  %v409_v5 = vpop.f32.mrb[11].mxu0  ;;  %v529_v6 = vpop.f32.mrb[11].mxu1 }
 0x1c9   :  { %v15339_v8 = vadd.f32 %v9833_v41, %v409_v5  ;;  %v15341_v9 = vadd.f32 %v9842_v42, %v529_v6  ;;  %v15373_v42 = vld [vmem:[%s17036_s11] ss:$0 sm:$0xff] }
 0x1cb   :  { %v11123_v12 = vpop.f32.mrb[12].mxu0 }
 0x1cc   :  { %v15348_v14 = vadd.f32 %v11123_v12, %v9851_v10  ;;  %v752_v15 = vpop.f32.mrb[12].mxu1  ;;  %v619_v16 = vpop.f32.mrb[13].mxu0 }
 0x1cd   :  { %v903_v18 = vrot.slane %v752_v15, 1  ;;  %v906_v21 = vadd.f32 %v752_v15, %v15346_v11  ;;  %v11151_v22 = vpop.f32.mrb[13].mxu1 }
 0x1cf   :  { %v907_v24 = vadd.f32 %v903_v18, %v15350_v17  ;;  %v9861_v25 = vmul.f32 -1.442695, %v906_v21  ;;  %v11126_v27 = vpop.f32.mrb[14].mxu0 }
 0x1d0   :  { %v15354_v28 = vadd.f32 %v11126_v27, %v9851_v10  ;;  %v629_v30 = vpop.f32.mrb[15].mxu0  ;;  %v15376_v27 = vadd.f32 %v9851_v10, %v619_v16 }
 0x1d1   :  { %14240 = vpow2.f32 %v9861_v25  ;;  %v9862_v31 = vmul.f32 -1.442695, %v907_v24  ;;  %v15356_v34 = vadd.f32 %v9851_v10, %v629_v30 }
 0x1d3   :  { %14242 = vpow2.f32 %v9862_v31  ;;  %v11129_v35 = vpop.f32.mrb[16].mxu0 }
 0x1d4   :  { %v15358_v37 = vadd.f32 %v11129_v35, %v9851_v10  ;;  %v639_v38 = vpop.f32.mrb[17].mxu0 }
 0x1d5   :  { %v15378_v31 = vadd.f32 %v9851_v10, %v639_v38 }
 0x1d7   :  { %v11132_v41 = vpop.f32.mrb[18].mxu0 }
 0x1d8   :  { %v15360_v43 = vadd.f32 %v11132_v41, %v9851_v10  ;;  %v649_v45 = vpop.f32.mrb[19].mxu0 }
 0x1d9   :  { %v15362_v48 = vadd.f32 %v9851_v10, %v649_v45 }
 0x1db   :  { %v14241_v51 = vpop.eup %14240  ;;  %v822_v54 = vpop.f32.mrb[20].mxu0 }
 0x1dc   :  { %v914_v58 = vadd.f32 1.0, %v14241_v51  ;;  %v921_v59 = vrot.slane %v822_v54, 1  ;;  %v924_v63 = vadd.f32 %v822_v54, %v15364_v50  ;;  %v11170_v1 = vpop.f32.mrb[21].mxu0 }
 0x1dd   :  { %v14243_v2 = vpop.eup %14242  ;;  %v898_v5 = vpop.f32.mrb[14].mxu1 }
 0x1de   :  { %v915_v6 = vadd.f32 1.0, %v14243_v2  ;;  %14244 = vrcp.f32 %v914_v58  ;;  %v925_v12 = vadd.f32 %v921_v59, %v15366_v55  ;;  %v9863_v15 = vmul.f32 -1.442695, %v924_v63  ;;  %v11189_v18 = vpop.f32.mrb[15].mxu1 }
 0x1df   :  { %v899_v0 = vadd.f32 %v15373_v42, %v898_v5 }
 0x1e0   :  { %14246 = vrcp.f32 %v915_v6  ;;  %v9864_v49 = vmul.f32 -1.442695, %v925_v12 }
 0x1e1   :  { %14248 = vpow2.f32 %v9863_v15  ;;  %v939_v21 = vrot.slane %v899_v0, 1 }
 0x1e2   :  { %14250 = vpow2.f32 %v9864_v49 }
 0x1e8   :  { %v14245_v22 = vpop.eup %14244 }
 0x1e9   :  { %v942_v24 = vmul.f32 %v14245_v22, %v899_v0 }
 0x1ea   :  { %v14247_v25 = vpop.eup %14246 }
 0x1eb   :  { %v14249_v30 = vpop.eup %14248  ;;  %v943_v35 = vmul.f32 %v14247_v25, %v939_v21  ;;  %v944_v51 = vadd.f32 %v942_v24, %v15376_v27 }
 0x1ec   :  { %v14251_v41 = vpop.eup %14250  ;;  %v932_v45 = vadd.f32 1.0, %v14249_v30 }
 0x1ed   :  { %v933_v54 = vadd.f32 1.0, %v14251_v41  ;;  %v945_v58 = vadd.f32 %v943_v35, %v15378_v31 }
 0x1ee   :  { %14252 = vrcp.f32 %v932_v45 }
 0x1ef   :  { %14254 = vrcp.f32 %v933_v54 }
 0x1f0   :  { %14256 = vtanh.f32 %v944_v51 }
 0x1f1   :  { %14258 = vtanh.f32 %v945_v58 }
 0x1f8   :  { %v14253_v59 = vpop.eup %14252 }
 0x1f9   :  { %v14255_v63 = vpop.eup %14254  ;;  %v948_v1 = vsub.f32 1.0, %v14253_v59  ;;  %v952_v38 = vmul.f32 0.0, %v14253_v59 }
 0x1fa   :  { %v14257_v16 = vpop.eup %14256  ;;  %v949_v2 = vsub.f32 1.0, %v14255_v63  ;;  %v953_v12 = vmul.f32 0.0, %v14255_v63 }
 0x1fb   :  { %v14259_v5 = vpop.eup %14258  ;;  %v950_v10 = vmul.f32 %v14257_v16, %v948_v1 }
 0x1fc   :  { %v951_v6 = vmul.f32 %v14259_v5, %v949_v2 }
 0x1fd   :  { %v15382_v15 = vadd.f32 %v952_v38, %v950_v10 }
 0x1fe   :  { %v15384_v18 = vadd.f32 %v953_v12, %v951_v6 }
 0x200   :  { %v958_v49 = vrot.slane %v15384_v18, 7 }
 0x202   :  { %v960_v0 = vsel %vm959_vm11, %v958_v49, %v15382_v15 }
 0x203   :  { %11207 = vmatmul.mubr.msk.f32.vlgmr.msra.gmra.mrb[22].mxu0 %vm288_vm3, %v960_v0  ;;  %11226 = vmatmul.mubr.msk.f32.vlgmr.msra.gmra.mrb[16].mxu1 %vm288_vm3, %v960_v0 }
 0x204   :  { %13116 = vmatpush3.bf16.msra.mxu0 %v15214_v23  ;;  %11244 = vmatprep.mubr.msk.f32.mxu0 %vm14910_vm10, %v14911_v20 }
 0x205   :  { %13117 = vmatprep.subr.bf16.mxu0 %v14909_v33  ;;  %13128 = vmatpush3.bf16.msra.mxu1 %v15101_v44 }
 0x206   :  { %13129 = vmatprep.subr.bf16.mxu1 %v14909_v33  ;;  %11263 = vmatprep.mubr.msk.f32.mxu1 %vm14910_vm10, %v14911_v20 }
 0x208   :  { %13119 = vmatpush3.bf16.msra.mxu0 %v15238_v29 }
 0x209   :  { %13120 = vmatprep.subr.bf16.mxu0 %v14909_v33  ;;  %13131 = vmatpush3.bf16.msra.mxu1 %v15134_v62 }
 0x20a   :  { %13132 = vmatprep.subr.bf16.mxu1 %v14909_v33 }
 0x20c   :  { %13122 = vmatpush3.bf16.msra.mxu0 %v15264_v36 }
 0x20d   :  { %13123 = vmatprep.subr.bf16.mxu0 %v14909_v33  ;;  %13134 = vmatpush3.bf16.msra.mxu1 %v15166_v7 }
 0x20e   :  { %13135 = vmatprep.subr.bf16.mxu1 %v14909_v33 }
 0x210   :  { %13125 = vmatpush3.bf16.msra.mxu0 %v15281_v40 }
 0x211   :  { %13138 = vmatprep.subr.bf16.mxu0 %v14909_v33  ;;  %13137 = vmatpush3.bf16.msra.mxu1 %v15182_v13 }
 0x212   :  { %13150 = vmatprep.subr.bf16.mxu1 %v14909_v33 }
 0x213   :  { %11245 = vmatmul.mubr.msk.f32.vlgmr.msra.gmra.mrb[24].mxu0 %vm288_vm3, %v960_v0 }
 0x214   :  { %13140 = vmatpush3.bf16.msra.mxu0 %v15201_v19  ;;  %11282 = vmatprep.mubr.msk.f32.mxu0 %vm14910_vm10, %v14911_v20 }
 0x215   :  { %13141 = vmatprep.subr.bf16.mxu0 %v14909_v33 }
 0x218   :  { %13143 = vmatpush3.bf16.msra.mxu0 %v15226_v26 }
 0x219   :  { %13144 = vmatprep.subr.bf16.mxu0 %v14909_v33 }
 0x21c   :  { %13146 = vmatpush3.bf16.msra.mxu0 %v15254_v32 }
 0x21d   :  { %13147 = vmatprep.subr.bf16.mxu0 %v14909_v33 }
 0x220   :  { %13149 = vmatpush3.bf16.msra.mxu0 %v15277_v39 }
 0x221   :  { %13162 = vmatprep.subr.bf16.mxu0 %v14909_v33 }
 0x2d6   :  { %v1029_v21 = vpop.f32.mrb[22].mxu0  ;;  %v1099_v22 = vpop.f32.mrb[16].mxu1 }
 0x2d7   :  { %v1174_v24 = vrot.slane %v1029_v21, 7  ;;  %v1178_v25 = vadd.f32 %v1029_v21, %v15350_v17  ;;  %v1192_v30 = vrot.slane %v1099_v22, 7  ;;  %v11208_v35 = vpop.f32.mrb[23].mxu0  ;;  %v11227_v41 = vpop.f32.mrb[17].mxu1  ;;  %v1196_v58 = vadd.f32 %v1099_v22, %v15366_v55 }
 0x2d9   :  { %v1177_v45 = vadd.f32 %v1174_v24, %v15346_v11  ;;  %v9869_v51 = vmul.f32 -1.442695, %v1178_v25  ;;  %v1195_v54 = vadd.f32 %v1192_v30, %v15364_v50  ;;  %v9871_v1 = vmul.f32 -1.442695, %v1196_v58 }
 0x2db   :  { %v9868_v59 = vmul.f32 -1.442695, %v1177_v45  ;;  %14260 = vpow2.f32 %v9869_v51  ;;  %v9870_v63 = vmul.f32 -1.442695, %v1195_v54  ;;  %v1223_v45 = vrot.slane %v15382_v15, 7 }
 0x2dd   :  { %14262 = vpow2.f32 %v9868_v59 }
 0x2de   :  { %14264 = vpow2.f32 %v9870_v63 }
 0x2df   :  { %14266 = vpow2.f32 %v9871_v1 }
 0x2e5   :  { %v14261_v16 = vpop.eup %14260 }
 0x2e6   :  { %v1186_v2 = vadd.f32 1.0, %v14261_v16  ;;  %v1169_v5 = vpop.f32.mrb[24].mxu0 }
 0x2e7   :  { %v14263_v10 = vpop.eup %14262  ;;  %v11246_v38 = vpop.f32.mrb[25].mxu0  ;;  %v1170_v24 = vadd.f32 %v15373_v42, %v1169_v5 }
 0x2e8   :  { %v14265_v6 = vpop.eup %14264  ;;  %v1185_v12 = vadd.f32 1.0, %v14263_v10  ;;  %14268 = vrcp.f32 %v1186_v2 }
 0x2e9   :  { %v1203_v0 = vadd.f32 1.0, %v14265_v6  ;;  %v14267_v21 = vpop.eup %14266  ;;  %v1210_v30 = vrot.slane %v1170_v24, 7 }
 0x2ea   :  { %14270 = vrcp.f32 %v1185_v12  ;;  %v1204_v22 = vadd.f32 1.0, %v14267_v21 }
 0x2eb   :  { %14272 = vrcp.f32 %v1203_v0 }
 0x2ec   :  { %14274 = vrcp.f32 %v1204_v22 }
 0x2f2   :  { %v14269_v25 = vpop.eup %14268 }
 0x2f3   :  { %v1214_v35 = vmul.f32 %v14269_v25, %v1170_v24 }
 0x2f4   :  { %v14271_v41 = vpop.eup %14270 }
 0x2f5   :  { %v14273_v51 = vpop.eup %14272  ;;  %v1213_v54 = vmul.f32 %v14271_v41, %v1210_v30  ;;  %v1216_v58 = vadd.f32 %v1214_v35, %v15378_v31 }
 0x2f6   :  { %v1226_v59 = vmul.f32 %v14273_v51, %v1223_v45  ;;  %v14275_v1 = vpop.eup %14274  ;;  %v1219_v5 = vsub.f32 1.0, %v14273_v51 }
 0x2f7   :  { %v1215_v63 = vadd.f32 %v1213_v54, %v15376_v27  ;;  %14276 = vtanh.f32 %v1216_v58  ;;  %v1220_v16 = vsub.f32 1.0, %v14275_v1  ;;  %v1227_v38 = vmul.f32 %v14275_v1, %v958_v49 }
 0x2f9   :  { %14278 = vtanh.f32 %v1215_v63 }
 0x301   :  { %v14277_v2 = vpop.eup %14276 }
 0x302   :  { %v1222_v10 = vmul.f32 %v14277_v2, %v1220_v16 }
 0x303   :  { %v14279_v6 = vpop.eup %14278 }
 0x304   :  { %v1221_v12 = vmul.f32 %v14279_v6, %v1219_v5  ;;  %v15434_v15 = vadd.f32 %v1227_v38, %v1222_v10 }
 0x306   :  { %v15436_v0 = vadd.f32 %v1226_v59, %v1221_v12 }
 0x308   :  { %v1232_v21 = vrot.slane %v15436_v0, 1 }
 0x30a   :  { %v1233_v22 = vsel %vm959_vm11, %v15434_v15, %v1232_v21 }
 0x30b   :  { %11264 = vmatmul.mubr.msk.f32.vlgmr.msra.gmra.mrb[18].mxu1 %vm288_vm3, %v1233_v22  ;;  %11283 = vmatmul.mubr.msk.f32.vlgmr.msra.gmra.mrb[26].mxu0 %vm288_vm3, %v1233_v22 }
 0x30c   :  { %13152 = vmatpush3.bf16.msra.mxu1 %v15214_v23  ;;  %11301 = vmatprep.mubr.msk.f32.mxu1 %vm14910_vm10, %v14911_v20 }
 0x30d   :  { %13153 = vmatprep.subr.bf16.mxu1 %v14909_v33  ;;  %13164 = vmatpush3.bf16.msra.mxu0 %v15101_v44 }
 0x30e   :  { %13165 = vmatprep.subr.bf16.mxu0 %v14909_v33  ;;  %11320 = vmatprep.mubr.msk.f32.mxu0 %vm14910_vm10, %v14911_v20 }
 0x310   :  { %13155 = vmatpush3.bf16.msra.mxu1 %v15238_v29 }
 0x311   :  { %13156 = vmatprep.subr.bf16.mxu1 %v14909_v33  ;;  %13167 = vmatpush3.bf16.msra.mxu0 %v15134_v62 }
 0x312   :  { %13168 = vmatprep.subr.bf16.mxu0 %v14909_v33 }
 0x314   :  { %13158 = vmatpush3.bf16.msra.mxu1 %v15264_v36 }
 0x315   :  { %13159 = vmatprep.subr.bf16.mxu1 %v14909_v33  ;;  %13170 = vmatpush3.bf16.msra.mxu0 %v15166_v7 }
 0x316   :  { %13171 = vmatprep.subr.bf16.mxu0 %v14909_v33 }
 0x318   :  { %13161 = vmatpush3.bf16.msra.mxu1 %v15281_v40 }
 0x319   :  { %13174 = vmatprep.subr.bf16.mxu1 %v14909_v33  ;;  %13173 = vmatpush3.bf16.msra.mxu0 %v15182_v13 }
 0x31a   :  { %13186 = vmatprep.subr.bf16.mxu0 %v14909_v33 }
 0x31b   :  { %11302 = vmatmul.mubr.msk.f32.vlgmr.msra.gmra.mrb[20].mxu1 %vm288_vm3, %v1233_v22 }
 0x31c   :  { %13176 = vmatpush3.bf16.msra.mxu1 %v15201_v19  ;;  %11339 = vmatprep.mubr.msk.f32.mxu1 %vm14910_vm10, %v14911_v20 }
 0x31d   :  { %13177 = vmatprep.subr.bf16.mxu1 %v14909_v33 }
 0x320   :  { %13179 = vmatpush3.bf16.msra.mxu1 %v15226_v26 }
 0x321   :  { %13180 = vmatprep.subr.bf16.mxu1 %v14909_v33 }
 0x324   :  { %13182 = vmatpush3.bf16.msra.mxu1 %v15254_v32 }
 0x325   :  { %13183 = vmatprep.subr.bf16.mxu1 %v14909_v33 }
 0x328   :  { %13185 = vmatpush3.bf16.msra.mxu1 %v15277_v39 }
 0x329   :  { %13198 = vmatprep.subr.bf16.mxu1 %v14909_v33 }
 0x3de   :  { %v1302_v18 = vpop.f32.mrb[18].mxu1  ;;  %v1372_v49 = vpop.f32.mrb[26].mxu0 }
 0x3df   :  { %v1447_v24 = vrot.slane %v1302_v18, 6  ;;  %v1448_v25 = vrot.slane %v1302_v18, 7  ;;  %v1466_v30 = vrot.slane %v1372_v49, 6  ;;  %v1467_v35 = vrot.slane %v1372_v49, 7  ;;  %v11265_v41 = vpop.f32.mrb[19].mxu1  ;;  %v11284_v45 = vpop.f32.mrb[27].mxu0 }
 0x3e1   :  { %v1451_v51 = vadd.f32 %v1447_v24, %v15346_v11  ;;  %v1452_v54 = vadd.f32 %v1448_v25, %v15350_v17  ;;  %v1470_v58 = vadd.f32 %v1466_v30, %v15364_v50  ;;  %v1471_v59 = vadd.f32 %v1467_v35, %v15366_v55 }
 0x3e3   :  { %v9875_v63 = vmul.f32 -1.442695, %v1451_v51  ;;  %v9876_v1 = vmul.f32 -1.442695, %v1452_v54  ;;  %v9877_v16 = vmul.f32 -1.442695, %v1470_v58 }
 0x3e4   :  { %v9878_v2 = vmul.f32 -1.442695, %v1471_v59  ;;  %v1499_v51 = vrot.slane %v15436_v0, 7  ;;  %v1500_v59 = vrot.slane %v15434_v15, 7 }
 0x3e5   :  { %14280 = vpow2.f32 %v9875_v63 }
 0x3e6   :  { %14282 = vpow2.f32 %v9876_v1 }
 0x3e7   :  { %14284 = vpow2.f32 %v9877_v16 }
 0x3e8   :  { %14286 = vpow2.f32 %v9878_v2 }
 0x3ee   :  { %v1442_v5 = vpop.f32.mrb[20].mxu1 }
 0x3ef   :  { %v14281_v10 = vpop.eup %14280  ;;  %v11303_v38 = vpop.f32.mrb[21].mxu1  ;;  %v1443_v25 = vadd.f32 %v15373_v42, %v1442_v5 }
 0x3f0   :  { %v14283_v6 = vpop.eup %14282  ;;  %v1459_v12 = vadd.f32 1.0, %v14281_v10 }
 0x3f1   :  { %v14285_v21 = vpop.eup %14284  ;;  %v1460_v22 = vadd.f32 1.0, %v14283_v6  ;;  %v1485_v30 = vrot.slane %v1443_v25, 6  ;;  %v1486_v41 = vrot.slane %v1443_v25, 7 }
 0x3f2   :  { %v14287_v18 = vpop.eup %14286  ;;  %14288 = vrcp.f32 %v1459_v12  ;;  %v1478_v49 = vadd.f32 1.0, %v14285_v21 }
 0x3f3   :  { %14290 = vrcp.f32 %v1460_v22  ;;  %v1479_v24 = vadd.f32 1.0, %v14287_v18 }
 0x3f4   :  { %14292 = vrcp.f32 %v1478_v49 }
 0x3f5   :  { %14294 = vrcp.f32 %v1479_v24 }
 0x3fc   :  { %v14289_v35 = vpop.eup %14288 }
 0x3fd   :  { %v14291_v45 = vpop.eup %14290  ;;  %v1489_v54 = vmul.f32 %v14289_v35, %v1485_v30 }
 0x3fe   :  { %v14293_v58 = vpop.eup %14292  ;;  %v1490_v63 = vmul.f32 %v14291_v45, %v1486_v41 }
 0x3ff   :  { %v14295_v1 = vpop.eup %14294  ;;  %v1491_v16 = vadd.f32 %v1489_v54, %v15376_v27  ;;  %v1503_v2 = vmul.f32 %v14293_v58, %v1499_v51  ;;  %v1495_v5 = vsub.f32 1.0, %v14293_v58 }
 0x400   :  { %v1492_v10 = vadd.f32 %v1490_v63, %v15378_v31  ;;  %v1504_v38 = vmul.f32 %v14295_v1, %v1500_v59  ;;  %v1496_v12 = vsub.f32 1.0, %v14295_v1 }
 0x401   :  { %14296 = vtanh.f32 %v1491_v16 }
 0x402   :  { %14298 = vtanh.f32 %v1492_v10 }
 0x40b   :  { %v14297_v6 = vpop.eup %14296 }
 0x40c   :  { %v14299_v21 = vpop.eup %14298  ;;  %v1497_v22 = vmul.f32 %v14297_v6, %v1495_v5 }
 0x40d   :  { %v1498_v0 = vmul.f32 %v14299_v21, %v1496_v12 }
 0x40e   :  { %v15483_v18 = vadd.f32 %v1503_v2, %v1497_v22 }
 0x40f   :  { %v15485_v49 = vadd.f32 %v1504_v38, %v1498_v0 }
 0x410   :  { %v1509_v15 = vrot.slane %v15483_v18, 2 }
 0x411   :  { %v1510_v24 = vrot.slane %v15485_v49, 1 }
 0x413   :  { %v1511_v25 = vsel %vm959_vm11, %v1510_v24, %v1509_v15 }
 0x414   :  { %11321 = vmatmul.mubr.msk.f32.vlgmr.msra.gmra.mrb[28].mxu0 %vm288_vm3, %v1511_v25  ;;  %11340 = vmatmul.mubr.msk.f32.vlgmr.msra.gmra.mrb[22].mxu1 %vm288_vm3, %v1511_v25 }
 0x415   :  { %13188 = vmatpush3.bf16.msra.mxu0 %v15214_v23  ;;  %11358 = vmatprep.mubr.msk.f32.mxu0 %vm14910_vm10, %v14911_v20 }
 0x416   :  { %13189 = vmatprep.subr.bf16.mxu0 %v14909_v33  ;;  %13200 = vmatpush3.bf16.msra.mxu1 %v15101_v44 }
 0x417   :  { %13201 = vmatprep.subr.bf16.mxu1 %v14909_v33  ;;  %11377 = vmatprep.mubr.msk.f32.mxu1 %vm14910_vm10, %v14911_v20 }
 0x419   :  { %13191 = vmatpush3.bf16.msra.mxu0 %v15238_v29 }
 0x41a   :  { %13192 = vmatprep.subr.bf16.mxu0 %v14909_v33  ;;  %13203 = vmatpush3.bf16.msra.mxu1 %v15134_v62 }
 0x41b   :  { %13204 = vmatprep.subr.bf16.mxu1 %v14909_v33 }
 0x41d   :  { %13194 = vmatpush3.bf16.msra.mxu0 %v15264_v36 }
 0x41e   :  { %13195 = vmatprep.subr.bf16.mxu0 %v14909_v33  ;;  %13206 = vmatpush3.bf16.msra.mxu1 %v15166_v7 }
 0x41f   :  { %13207 = vmatprep.subr.bf16.mxu1 %v14909_v33 }
 0x421   :  { %13197 = vmatpush3.bf16.msra.mxu0 %v15281_v40 }
 0x422   :  { %13210 = vmatprep.subr.bf16.mxu0 %v14909_v33  ;;  %13209 = vmatpush3.bf16.msra.mxu1 %v15182_v13 }
 0x423   :  { %13222 = vmatprep.subr.bf16.mxu1 %v14909_v33 }
 0x424   :  { %11359 = vmatmul.mubr.msk.f32.vlgmr.msra.gmra.mrb[30].mxu0 %vm288_vm3, %v1511_v25 }
 0x425   :  { %13212 = vmatpush3.bf16.msra.mxu0 %v15201_v19  ;;  %11396 = vmatprep.mubr.msk.f32.mxu0 %vm14910_vm10, %v14911_v20 }
 0x426   :  { %13213 = vmatprep.subr.bf16.mxu0 %v14909_v33 }
 0x429   :  { %13215 = vmatpush3.bf16.msra.mxu0 %v15226_v26 }
 0x42a   :  { %13216 = vmatprep.subr.bf16.mxu0 %v14909_v33 }
 0x42d   :  { %13218 = vmatpush3.bf16.msra.mxu0 %v15254_v32 }
 0x42e   :  { %13219 = vmatprep.subr.bf16.mxu0 %v14909_v33 }
 0x431   :  { %13221 = vmatpush3.bf16.msra.mxu0 %v15277_v39 }
 0x432   :  { %13234 = vmatprep.subr.bf16.mxu0 %v14909_v33 }
 0x4e7   :  { %v1580_v30 = vpop.f32.mrb[28].mxu0  ;;  %v1650_v35 = vpop.f32.mrb[22].mxu1 }
 0x4e8   :  { %v1725_v41 = vrot.slane %v1580_v30, 5  ;;  %v1726_v45 = vrot.slane %v1580_v30, 6  ;;  %v1744_v51 = vrot.slane %v1650_v35, 5  ;;  %v1745_v54 = vrot.slane %v1650_v35, 6  ;;  %v11322_v58 = vpop.f32.mrb[29].mxu0  ;;  %v11341_v59 = vpop.f32.mrb[23].mxu1 }
 0x4ea   :  { %v1729_v63 = vadd.f32 %v1725_v41, %v15346_v11  ;;  %v1730_v1 = vadd.f32 %v1726_v45, %v15350_v17  ;;  %v1748_v16 = vadd.f32 %v1744_v51, %v15364_v50  ;;  %v1749_v2 = vadd.f32 %v1745_v54, %v15366_v55 }
 0x4ec   :  { %v9882_v10 = vmul.f32 -1.442695, %v1729_v63  ;;  %v9883_v38 = vmul.f32 -1.442695, %v1730_v1  ;;  %v9884_v5 = vmul.f32 -1.442695, %v1748_v16 }
 0x4ed   :  { %v9885_v6 = vmul.f32 -1.442695, %v1749_v2  ;;  %v1777_v63 = vrot.slane %v15483_v18, 7  ;;  %v1778_v2 = vrot.slane %v15485_v49, 7 }
 0x4ee   :  { %14300 = vpow2.f32 %v9882_v10 }
 0x4ef   :  { %14302 = vpow2.f32 %v9883_v38 }
 0x4f0   :  { %14304 = vpow2.f32 %v9884_v5 }
 0x4f1   :  { %14306 = vpow2.f32 %v9885_v6 }
 0x4f7   :  { %v1720_v12 = vpop.f32.mrb[30].mxu0 }
 0x4f8   :  { %v14301_v21 = vpop.eup %14300  ;;  %v11360_v22 = vpop.f32.mrb[31].mxu0  ;;  %v1721_v45 = vadd.f32 %v15373_v42, %v1720_v12 }
 0x4f9   :  { %v14303_v0 = vpop.eup %14302  ;;  %v1737_v15 = vadd.f32 1.0, %v14301_v21 }
 0x4fa   :  { %v14305_v24 = vpop.eup %14304  ;;  %v1738_v25 = vadd.f32 1.0, %v14303_v0  ;;  %v1763_v51 = vrot.slane %v1721_v45, 5  ;;  %v1764_v58 = vrot.slane %v1721_v45, 6 }
 0x4fb   :  { %v14307_v30 = vpop.eup %14306  ;;  %14308 = vrcp.f32 %v1737_v15  ;;  %v1756_v35 = vadd.f32 1.0, %v14305_v24 }
 0x4fc   :  { %14310 = vrcp.f32 %v1738_v25  ;;  %v1757_v41 = vadd.f32 1.0, %v14307_v30 }
 0x4fd   :  { %14312 = vrcp.f32 %v1756_v35 }
 0x4fe   :  { %14314 = vrcp.f32 %v1757_v41 }
 0x505   :  { %v14309_v54 = vpop.eup %14308 }
 0x506   :  { %v14311_v59 = vpop.eup %14310  ;;  %v1767_v1 = vmul.f32 %v14309_v54, %v1763_v51 }
 0x507   :  { %v14313_v16 = vpop.eup %14312  ;;  %v1768_v10 = vmul.f32 %v14311_v59, %v1764_v58 }
 0x508   :  { %v14315_v38 = vpop.eup %14314  ;;  %v1769_v5 = vadd.f32 %v1767_v1, %v15376_v27  ;;  %v1781_v6 = vmul.f32 %v14313_v16, %v1777_v63  ;;  %v1773_v12 = vsub.f32 1.0, %v14313_v16 }
 0x509   :  { %v1770_v21 = vadd.f32 %v1768_v10, %v15378_v31  ;;  %v1782_v22 = vmul.f32 %v14315_v38, %v1778_v2  ;;  %v1774_v15 = vsub.f32 1.0, %v14315_v38 }
 0x50a   :  { %14316 = vtanh.f32 %v1769_v5 }
 0x50b   :  { %14318 = vtanh.f32 %v1770_v21 }
 0x514   :  { %v14317_v0 = vpop.eup %14316 }
 0x515   :  { %v14319_v24 = vpop.eup %14318  ;;  %v1775_v25 = vmul.f32 %v14317_v0, %v1773_v12 }
 0x516   :  { %v1776_v18 = vmul.f32 %v14319_v24, %v1774_v15 }
 0x517   :  { %v15532_v30 = vadd.f32 %v1781_v6, %v1775_v25 }
 0x518   :  { %v15534_v35 = vadd.f32 %v1782_v22, %v1776_v18 }
 0x519   :  { %v1787_v49 = vrot.slane %v15532_v30, 3 }
 0x51a   :  { %v1788_v41 = vrot.slane %v15534_v35, 2 }
 0x51c   :  { %v1789_v45 = vsel %vm959_vm11, %v1788_v41, %v1787_v49 }
 0x51d   :  { %11378 = vmatmul.mubr.msk.f32.vlgmr.msra.gmra.mrb[24].mxu1 %vm288_vm3, %v1789_v45  ;;  %11397 = vmatmul.mubr.msk.f32.vlgmr.msra.gmra.mrb[32].mxu0 %vm288_vm3, %v1789_v45 }
 0x51e   :  { %13224 = vmatpush3.bf16.msra.mxu1 %v15214_v23  ;;  %11415 = vmatprep.mubr.msk.f32.mxu1 %vm14910_vm10, %v14911_v20 }
 0x51f   :  { %13225 = vmatprep.subr.bf16.mxu1 %v14909_v33  ;;  %13236 = vmatpush3.bf16.msra.mxu0 %v15101_v44 }
 0x520   :  { %13237 = vmatprep.subr.bf16.mxu0 %v14909_v33  ;;  %11434 = vmatprep.mubr.msk.f32.mxu0 %vm14910_vm10, %v14911_v20 }
 0x522   :  { %13227 = vmatpush3.bf16.msra.mxu1 %v15238_v29 }
 0x523   :  { %13228 = vmatprep.subr.bf16.mxu1 %v14909_v33  ;;  %13239 = vmatpush3.bf16.msra.mxu0 %v15134_v62 }
 0x524   :  { %13240 = vmatprep.subr.bf16.mxu0 %v14909_v33 }
 0x526   :  { %13230 = vmatpush3.bf16.msra.mxu1 %v15264_v36 }
 0x527   :  { %13231 = vmatprep.subr.bf16.mxu1 %v14909_v33  ;;  %13242 = vmatpush3.bf16.msra.mxu0 %v15166_v7 }
 0x528   :  { %13243 = vmatprep.subr.bf16.mxu0 %v14909_v33 }
 0x52a   :  { %13233 = vmatpush3.bf16.msra.mxu1 %v15281_v40 }
 0x52b   :  { %13246 = vmatprep.subr.bf16.mxu1 %v14909_v33  ;;  %13245 = vmatpush3.bf16.msra.mxu0 %v15182_v13 }
 0x52c   :  { %13258 = vmatprep.subr.bf16.mxu0 %v14909_v33 }
 0x52d   :  { %11416 = vmatmul.mubr.msk.f32.vlgmr.msra.gmra.mrb[26].mxu1 %vm288_vm3, %v1789_v45 }
 0x52e   :  { %13248 = vmatpush3.bf16.msra.mxu1 %v15201_v19  ;;  %11453 = vmatprep.mubr.msk.f32.mxu1 %vm14910_vm10, %v14911_v20 }
 0x52f   :  { %13249 = vmatprep.subr.bf16.mxu1 %v14909_v33 }
 0x532   :  { %13251 = vmatpush3.bf16.msra.mxu1 %v15226_v26 }
 0x533   :  { %13252 = vmatprep.subr.bf16.mxu1 %v14909_v33 }
 0x536   :  { %13254 = vmatpush3.bf16.msra.mxu1 %v15254_v32 }
 0x537   :  { %13255 = vmatprep.subr.bf16.mxu1 %v14909_v33 }
 0x53a   :  { %13257 = vmatpush3.bf16.msra.mxu1 %v15277_v39 }
 0x53b   :  { %13270 = vmatprep.subr.bf16.mxu1 %v14909_v33 }
 0x5f0   :  { %v1858_v51 = vpop.f32.mrb[24].mxu1  ;;  %v1928_v54 = vpop.f32.mrb[32].mxu0 }
 0x5f1   :  { %v2003_v58 = vrot.slane %v1858_v51, 4  ;;  %v2004_v59 = vrot.slane %v1858_v51, 5  ;;  %v2022_v63 = vrot.slane %v1928_v54, 4  ;;  %v2023_v1 = vrot.slane %v1928_v54, 5  ;;  %v11379_v16 = vpop.f32.mrb[25].mxu1  ;;  %v11398_v2 = vpop.f32.mrb[33].mxu0 }
 0x5f3   :  { %v2007_v10 = vadd.f32 %v2003_v58, %v15346_v11  ;;  %v2008_v38 = vadd.f32 %v2004_v59, %v15350_v17  ;;  %v2026_v5 = vadd.f32 %v2022_v63, %v15364_v50  ;;  %v2027_v6 = vadd.f32 %v2023_v1, %v15366_v55 }
 0x5f5   :  { %v9889_v21 = vmul.f32 -1.442695, %v2007_v10  ;;  %v9890_v22 = vmul.f32 -1.442695, %v2008_v38  ;;  %v9891_v12 = vmul.f32 -1.442695, %v2026_v5 }
 0x5f6   :  { %v9892_v0 = vmul.f32 -1.442695, %v2027_v6  ;;  %v2055_v10 = vrot.slane %v15532_v30, 7  ;;  %v2056_v6 = vrot.slane %v15534_v35, 7 }
 0x5f7   :  { %14320 = vpow2.f32 %v9889_v21 }
 0x5f8   :  { %14322 = vpow2.f32 %v9890_v22 }
 0x5f9   :  { %14324 = vpow2.f32 %v9891_v12 }
 0x5fa   :  { %14326 = vpow2.f32 %v9892_v0 }
 0x600   :  { %v1998_v15 = vpop.f32.mrb[26].mxu1 }
 0x601   :  { %v14321_v24 = vpop.eup %14320  ;;  %v11417_v25 = vpop.f32.mrb[27].mxu1  ;;  %v1999_v59 = vadd.f32 %v15373_v42, %v1998_v15 }
 0x602   :  { %v14323_v18 = vpop.eup %14322  ;;  %v2015_v49 = vadd.f32 1.0, %v14321_v24 }
 0x603   :  { %v14325_v41 = vpop.eup %14324  ;;  %v2016_v45 = vadd.f32 1.0, %v14323_v18  ;;  %v2041_v63 = vrot.slane %v1999_v59, 4  ;;  %v2042_v16 = vrot.slane %v1999_v59, 5 }
 0x604   :  { %v14327_v51 = vpop.eup %14326  ;;  %14328 = vrcp.f32 %v2015_v49  ;;  %v2034_v54 = vadd.f32 1.0, %v14325_v41 }
 0x605   :  { %14330 = vrcp.f32 %v2016_v45  ;;  %v2035_v58 = vadd.f32 1.0, %v14327_v51 }
 0x606   :  { %14332 = vrcp.f32 %v2034_v54 }
 0x607   :  { %14334 = vrcp.f32 %v2035_v58 }
 0x60e   :  { %v14329_v1 = vpop.eup %14328 }
 0x60f   :  { %v14331_v2 = vpop.eup %14330  ;;  %v2045_v38 = vmul.f32 %v14329_v1, %v2041_v63 }
 0x610   :  { %v14333_v5 = vpop.eup %14332  ;;  %v2046_v21 = vmul.f32 %v14331_v2, %v2042_v16 }
 0x611   :  { %v14335_v22 = vpop.eup %14334  ;;  %v2047_v12 = vadd.f32 %v2045_v38, %v15376_v27  ;;  %v2059_v0 = vmul.f32 %v14333_v5, %v2055_v10  ;;  %v2051_v15 = vsub.f32 1.0, %v14333_v5 }
 0x612   :  { %v2048_v24 = vadd.f32 %v2046_v21, %v15378_v31  ;;  %v2060_v25 = vmul.f32 %v14335_v22, %v2056_v6  ;;  %v2052_v49 = vsub.f32 1.0, %v14335_v22 }
 0x613   :  { %14336 = vtanh.f32 %v2047_v12 }
 0x614   :  { %14338 = vtanh.f32 %v2048_v24 }
 0x61d   :  { %v14337_v18 = vpop.eup %14336 }
 0x61e   :  { %v14339_v41 = vpop.eup %14338  ;;  %v2053_v45 = vmul.f32 %v14337_v18, %v2051_v15 }
 0x61f   :  { %v2054_v30 = vmul.f32 %v14339_v41, %v2052_v49 }
 0x620   :  { %v15581_v51 = vadd.f32 %v2059_v0, %v2053_v45 }
 0x621   :  { %v15583_v54 = vadd.f32 %v2060_v25, %v2054_v30 }
 0x622   :  { %v2065_v35 = vrot.slane %v15581_v51, 4 }
 0x623   :  { %v2066_v58 = vrot.slane %v15583_v54, 3 }
 0x625   :  { %v2067_v59 = vsel %vm959_vm11, %v2066_v58, %v2065_v35 }
 0x626   :  { %11435 = vmatmul.mubr.msk.f32.vlgmr.msra.gmra.mrb[34].mxu0 %vm288_vm3, %v2067_v59  ;;  %11454 = vmatmul.mubr.msk.f32.vlgmr.msra.gmra.mrb[28].mxu1 %vm288_vm3, %v2067_v59 }
 0x627   :  { %13260 = vmatpush3.bf16.msra.mxu0 %v15214_v23  ;;  %11472 = vmatprep.mubr.msk.f32.mxu0 %vm14910_vm10, %v14911_v20 }
 0x628   :  { %13261 = vmatprep.subr.bf16.mxu0 %v14909_v33  ;;  %13272 = vmatpush3.bf16.msra.mxu1 %v15101_v44 }
 0x629   :  { %13273 = vmatprep.subr.bf16.mxu1 %v14909_v33  ;;  %11491 = vmatprep.mubr.msk.f32.mxu1 %vm14910_vm10, %v14911_v20 }
 0x62b   :  { %13263 = vmatpush3.bf16.msra.mxu0 %v15238_v29 }
 0x62c   :  { %13264 = vmatprep.subr.bf16.mxu0 %v14909_v33  ;;  %13275 = vmatpush3.bf16.msra.mxu1 %v15134_v62 }
 0x62d   :  { %13276 = vmatprep.subr.bf16.mxu1 %v14909_v33 }
 0x62f   :  { %13266 = vmatpush3.bf16.msra.mxu0 %v15264_v36 }
 0x630   :  { %13267 = vmatprep.subr.bf16.mxu0 %v14909_v33  ;;  %13278 = vmatpush3.bf16.msra.mxu1 %v15166_v7 }
 0x631   :  { %13279 = vmatprep.subr.bf16.mxu1 %v14909_v33 }
 0x633   :  { %13269 = vmatpush3.bf16.msra.mxu0 %v15281_v40 }
 0x634   :  { %13282 = vmatprep.subr.bf16.mxu0 %v14909_v33  ;;  %13281 = vmatpush3.bf16.msra.mxu1 %v15182_v13 }
 0x635   :  { %13294 = vmatprep.subr.bf16.mxu1 %v14909_v33 }
 0x636   :  { %11473 = vmatmul.mubr.msk.f32.vlgmr.msra.gmra.mrb[36].mxu0 %vm288_vm3, %v2067_v59 }
 0x637   :  { %13284 = vmatpush3.bf16.msra.mxu0 %v15201_v19  ;;  %11510 = vmatprep.mubr.msk.f32.mxu0 %vm14910_vm10, %v14911_v20 }
 0x638   :  { %13285 = vmatprep.subr.bf16.mxu0 %v14909_v33 }
 0x63b   :  { %13287 = vmatpush3.bf16.msra.mxu0 %v15226_v26 }
 0x63c   :  { %13288 = vmatprep.subr.bf16.mxu0 %v14909_v33 }
 0x63f   :  { %13290 = vmatpush3.bf16.msra.mxu0 %v15254_v32 }
 0x640   :  { %13291 = vmatprep.subr.bf16.mxu0 %v14909_v33 }
 0x643   :  { %13293 = vmatpush3.bf16.msra.mxu0 %v15277_v39 }
 0x644   :  { %13306 = vmatprep.subr.bf16.mxu0 %v14909_v33 }
 0x6f9   :  { %v2136_v63 = vpop.f32.mrb[34].mxu0  ;;  %v2206_v1 = vpop.f32.mrb[28].mxu1 }
 0x6fa   :  { %v2281_v16 = vrot.slane %v2136_v63, 3  ;;  %v2282_v2 = vrot.slane %v2136_v63, 4  ;;  %v2300_v10 = vrot.slane %v2206_v1, 3  ;;  %v2301_v38 = vrot.slane %v2206_v1, 4  ;;  %v11436_v5 = vpop.f32.mrb[35].mxu0  ;;  %v11455_v6 = vpop.f32.mrb[29].mxu1 }
 0x6fc   :  { %v2285_v21 = vadd.f32 %v2281_v16, %v15346_v11  ;;  %v2286_v22 = vadd.f32 %v2282_v2, %v15350_v17  ;;  %v2304_v12 = vadd.f32 %v2300_v10, %v15364_v50  ;;  %v2305_v0 = vadd.f32 %v2301_v38, %v15366_v55 }
 0x6fe   :  { %v9896_v24 = vmul.f32 -1.442695, %v2285_v21  ;;  %v9897_v25 = vmul.f32 -1.442695, %v2286_v22  ;;  %v9898_v15 = vmul.f32 -1.442695, %v2304_v12 }
 0x6ff   :  { %v9899_v18 = vmul.f32 -1.442695, %v2305_v0  ;;  %v2333_v21 = vrot.slane %v15581_v51, 7  ;;  %v2334_v0 = vrot.slane %v15583_v54, 7 }
 0x700   :  { %14340 = vpow2.f32 %v9896_v24 }
 0x701   :  { %14342 = vpow2.f32 %v9897_v25 }
 0x702   :  { %14344 = vpow2.f32 %v9898_v15 }
 0x703   :  { %14346 = vpow2.f32 %v9899_v18 }
 0x709   :  { %v2276_v49 = vpop.f32.mrb[36].mxu0 }
 0x70a   :  { %v14341_v41 = vpop.eup %14340  ;;  %v11474_v45 = vpop.f32.mrb[37].mxu0  ;;  %v2277_v2 = vadd.f32 %v15373_v42, %v2276_v49 }
 0x70b   :  { %v14343_v30 = vpop.eup %14342  ;;  %v2293_v35 = vadd.f32 1.0, %v14341_v41 }
 0x70c   :  { %v14345_v58 = vpop.eup %14344  ;;  %v2294_v59 = vadd.f32 1.0, %v14343_v30  ;;  %v2319_v10 = vrot.slane %v2277_v2, 3  ;;  %v2320_v5 = vrot.slane %v2277_v2, 4 }
 0x70d   :  { %v14347_v63 = vpop.eup %14346  ;;  %14348 = vrcp.f32 %v2293_v35  ;;  %v2312_v1 = vadd.f32 1.0, %v14345_v58 }
 0x70e   :  { %14350 = vrcp.f32 %v2294_v59  ;;  %v2313_v16 = vadd.f32 1.0, %v14347_v63 }
 0x70f   :  { %14352 = vrcp.f32 %v2312_v1 }
 0x710   :  { %14354 = vrcp.f32 %v2313_v16 }
 0x717   :  { %v14349_v38 = vpop.eup %14348 }
 0x718   :  { %v14351_v6 = vpop.eup %14350  ;;  %v2323_v22 = vmul.f32 %v14349_v38, %v2319_v10 }
 0x719   :  { %v14353_v12 = vpop.eup %14352  ;;  %v2324_v24 = vmul.f32 %v14351_v6, %v2320_v5 }
 0x71a   :  { %v14355_v25 = vpop.eup %14354  ;;  %v2325_v15 = vadd.f32 %v2323_v22, %v15376_v27  ;;  %v2337_v18 = vmul.f32 %v14353_v12, %v2333_v21  ;;  %v2329_v42 = vsub.f32 1.0, %v14353_v12 }
 0x71b   :  { %v2326_v41 = vadd.f32 %v2324_v24, %v15378_v31  ;;  %v2338_v45 = vmul.f32 %v14355_v25, %v2334_v0  ;;  %v2330_v30 = vsub.f32 1.0, %v14355_v25 }
 0x71c   :  { %14356 = vtanh.f32 %v2325_v15 }
 0x71d   :  { %14358 = vtanh.f32 %v2326_v41 }
 0x726   :  { %v14357_v49 = vpop.eup %14356 }
 0x727   :  { %v14359_v35 = vpop.eup %14358  ;;  %v2331_v58 = vmul.f32 %v14357_v49, %v2329_v42 }
 0x728   :  { %v2332_v51 = vmul.f32 %v14359_v35, %v2330_v30 }
 0x729   :  { %v15630_v59 = vadd.f32 %v2337_v18, %v2331_v58 }
 0x72a   :  { %v15632_v63 = vadd.f32 %v2338_v45, %v2332_v51 }
 0x72b   :  { %v2343_v54 = vrot.slane %v15630_v59, 5 }
 0x72c   :  { %v2344_v1 = vrot.slane %v15632_v63, 4 }
 0x72e   :  { %v2345_v16 = vsel %vm959_vm11, %v2344_v1, %v2343_v54 }
 0x72f   :  { %11492 = vmatmul.mubr.msk.f32.vlgmr.msra.gmra.mrb[30].mxu1 %vm288_vm3, %v2345_v16  ;;  %11511 = vmatmul.mubr.msk.f32.vlgmr.msra.gmra.mrb[38].mxu0 %vm288_vm3, %v2345_v16 }
 0x730   :  { %13296 = vmatpush3.bf16.msra.mxu1 %v15214_v23  ;;  %11529 = vmatprep.mubr.msk.f32.mxu1 %vm14910_vm10, %v14911_v20 }
 0x731   :  { %13297 = vmatprep.subr.bf16.mxu1 %v14909_v33  ;;  %13308 = vmatpush3.bf16.msra.mxu0 %v15101_v44 }
 0x732   :  { %13309 = vmatprep.subr.bf16.mxu0 %v14909_v33  ;;  %11548 = vmatprep.mubr.msk.f32.mxu0 %vm14910_vm10, %v14911_v20 }
 0x734   :  { %13299 = vmatpush3.bf16.msra.mxu1 %v15238_v29 }
 0x735   :  { %13300 = vmatprep.subr.bf16.mxu1 %v14909_v33  ;;  %13311 = vmatpush3.bf16.msra.mxu0 %v15134_v62 }
 0x736   :  { %13312 = vmatprep.subr.bf16.mxu0 %v14909_v33 }
 0x738   :  { %13302 = vmatpush3.bf16.msra.mxu1 %v15264_v36 }
 0x739   :  { %13303 = vmatprep.subr.bf16.mxu1 %v14909_v33  ;;  %13314 = vmatpush3.bf16.msra.mxu0 %v15166_v7 }
 0x73a   :  { %13315 = vmatprep.subr.bf16.mxu0 %v14909_v33 }
 0x73c   :  { %13305 = vmatpush3.bf16.msra.mxu1 %v15281_v40 }
 0x73d   :  { %13318 = vmatprep.subr.bf16.mxu1 %v14909_v33  ;;  %13317 = vmatpush3.bf16.msra.mxu0 %v15182_v13 }
 0x73e   :  { %13330 = vmatprep.subr.bf16.mxu0 %v14909_v33 }
 0x73f   :  { %11530 = vmatmul.mubr.msk.f32.vlgmr.msra.gmra.mrb[32].mxu1 %vm288_vm3, %v2345_v16 }
 0x740   :  { %13320 = vmatpush3.bf16.msra.mxu1 %v15201_v19  ;;  %11567 = vmatprep.mubr.msk.f32.mxu1 %vm14910_vm10, %v14911_v20 }
 0x741   :  { %13321 = vmatprep.subr.bf16.mxu1 %v14909_v33 }
 0x744   :  { %13323 = vmatpush3.bf16.msra.mxu1 %v15226_v26 }
 0x745   :  { %13324 = vmatprep.subr.bf16.mxu1 %v14909_v33 }
 0x748   :  { %13326 = vmatpush3.bf16.msra.mxu1 %v15254_v32 }
 0x749   :  { %13327 = vmatprep.subr.bf16.mxu1 %v14909_v33 }
 0x74c   :  { %13329 = vmatpush3.bf16.msra.mxu1 %v15277_v39 }
 0x74d   :  { %13342 = vmatprep.subr.bf16.mxu1 %v14909_v33 }
 0x802   :  { %v2414_v2 = vpop.f32.mrb[30].mxu1  ;;  %v2484_v10 = vpop.f32.mrb[38].mxu0 }
 0x803   :  { %v2559_v38 = vrot.slane %v2414_v2, 2  ;;  %v2560_v5 = vrot.slane %v2414_v2, 3  ;;  %v2578_v6 = vrot.slane %v2484_v10, 2  ;;  %v2579_v21 = vrot.slane %v2484_v10, 3  ;;  %v11493_v22 = vpop.f32.mrb[31].mxu1  ;;  %v11512_v12 = vpop.f32.mrb[39].mxu0 }
 0x805   :  { %v2563_v0 = vadd.f32 %v2559_v38, %v15346_v11  ;;  %v2564_v24 = vadd.f32 %v2560_v5, %v15350_v17  ;;  %v2582_v25 = vadd.f32 %v2578_v6, %v15364_v50  ;;  %v2583_v15 = vadd.f32 %v2579_v21, %v15366_v55  ;;  %v15677_v38 = vld [vmem:[%s17036_s11] ss:$0 sm:$0xff] }
 0x807   :  { %v9903_v18 = vmul.f32 -1.442695, %v2563_v0  ;;  %v9904_v41 = vmul.f32 -1.442695, %v2564_v24  ;;  %v9905_v45 = vmul.f32 -1.442695, %v2582_v25 }
 0x808   :  { %v9906_v42 = vmul.f32 -1.442695, %v2583_v15  ;;  %v2611_v0 = vrot.slane %v15630_v59, 7  ;;  %v2612_v15 = vrot.slane %v15632_v63, 7 }
 0x809   :  { %14360 = vpow2.f32 %v9903_v18 }
 0x80a   :  { %14362 = vpow2.f32 %v9904_v41 }
 0x80b   :  { %14364 = vpow2.f32 %v9905_v45 }
 0x80c   :  { %14366 = vpow2.f32 %v9906_v42 }
 0x812   :  { %v2554_v49 = vpop.f32.mrb[32].mxu1 }
 0x813   :  { %v14361_v30 = vpop.eup %14360  ;;  %v11531_v35 = vpop.f32.mrb[33].mxu1  ;;  %v2555_v5 = vadd.f32 %v15677_v38, %v2554_v49 }
 0x814   :  { %v14363_v58 = vpop.eup %14362  ;;  %v2571_v51 = vadd.f32 1.0, %v14361_v30 }
 0x815   :  { %v14365_v54 = vpop.eup %14364  ;;  %v2572_v1 = vadd.f32 1.0, %v14363_v58  ;;  %v2597_v6 = vrot.slane %v2555_v5, 2  ;;  %v2598_v22 = vrot.slane %v2555_v5, 3 }
 0x816   :  { %v14367_v16 = vpop.eup %14366  ;;  %14368 = vrcp.f32 %v2571_v51  ;;  %v2590_v2 = vadd.f32 1.0, %v14365_v54 }
 0x817   :  { %14370 = vrcp.f32 %v2572_v1  ;;  %v2591_v10 = vadd.f32 1.0, %v14367_v16 }
 0x818   :  { %14372 = vrcp.f32 %v2590_v2 }
 0x819   :  { %14374 = vrcp.f32 %v2591_v10 }
 0x820   :  { %v14369_v21 = vpop.eup %14368 }
 0x821   :  { %v14371_v12 = vpop.eup %14370  ;;  %v2601_v24 = vmul.f32 %v14369_v21, %v2597_v6 }
 0x822   :  { %v14373_v25 = vpop.eup %14372  ;;  %v2602_v18 = vmul.f32 %v14371_v12, %v2598_v22 }
 0x823   :  { %v14375_v41 = vpop.eup %14374  ;;  %v2603_v45 = vadd.f32 %v2601_v24, %v15376_v27  ;;  %v2615_v42 = vmul.f32 %v14373_v25, %v2611_v0  ;;  %v2607_v49 = vsub.f32 1.0, %v14373_v25 }
 0x824   :  { %v2604_v30 = vadd.f32 %v2602_v18, %v15378_v31  ;;  %v2616_v35 = vmul.f32 %v14375_v41, %v2612_v15  ;;  %v2608_v51 = vsub.f32 1.0, %v14375_v41 }
 0x825   :  { %14376 = vtanh.f32 %v2603_v45 }
 0x826   :  { %14378 = vtanh.f32 %v2604_v30 }
 0x82f   :  { %v14377_v58 = vpop.eup %14376 }
 0x830   :  { %v14379_v54 = vpop.eup %14378  ;;  %v2609_v1 = vmul.f32 %v14377_v58, %v2607_v49 }
 0x831   :  { %v2610_v59 = vmul.f32 %v14379_v54, %v2608_v51 }
 0x832   :  { %v15684_v16 = vadd.f32 %v2615_v42, %v2609_v1 }
 0x833   :  { %v15686_v2 = vadd.f32 %v2616_v35, %v2610_v59 }
 0x834   :  { %v2621_v63 = vrot.slane %v15684_v16, 6 }
 0x835   :  { %v2622_v10 = vrot.slane %v15686_v2, 5 }
 0x837   :  { %v2623_v5 = vsel %vm959_vm11, %v2622_v10, %v2621_v63 }
 0x838   :  { %11549 = vmatmul.mubr.msk.f32.vlgmr.msra.gmra.mrb[40].mxu0 %vm288_vm3, %v2623_v5  ;;  %11568 = vmatmul.mubr.msk.f32.vlgmr.msra.gmra.mrb[34].mxu1 %vm288_vm3, %v2623_v5 }
 0x839   :  { %13332 = vmatpush3.bf16.msra.mxu0 %v15214_v23  ;;  %11586 = vmatprep.mubr.msk.f32.mxu0 %vm14910_vm10, %v14911_v20 }
 0x83a   :  { %13333 = vmatprep.subr.bf16.mxu0 %v14909_v33  ;;  %13344 = vmatpush3.bf16.msra.mxu1 %v15101_v44 }
 0x83b   :  { %13345 = vmatprep.subr.bf16.mxu1 %v14909_v33  ;;  %11605 = vmatprep.mubr.msk.f32.mxu1 %vm14910_vm10, %v14911_v20 }
 0x83d   :  { %13335 = vmatpush3.bf16.msra.mxu0 %v15238_v29 }
 0x83e   :  { %13336 = vmatprep.subr.bf16.mxu0 %v14909_v33  ;;  %13347 = vmatpush3.bf16.msra.mxu1 %v15134_v62 }
 0x83f   :  { %13348 = vmatprep.subr.bf16.mxu1 %v14909_v33 }
 0x841   :  { %13338 = vmatpush3.bf16.msra.mxu0 %v15264_v36 }
 0x842   :  { %13339 = vmatprep.subr.bf16.mxu0 %v14909_v33  ;;  %13350 = vmatpush3.bf16.msra.mxu1 %v15166_v7 }
 0x843   :  { %13351 = vmatprep.subr.bf16.mxu1 %v14909_v33 }
 0x845   :  { %13341 = vmatpush3.bf16.msra.mxu0 %v15281_v40 }
 0x846   :  { %13354 = vmatprep.subr.bf16.mxu0 %v14909_v33  ;;  %13353 = vmatpush3.bf16.msra.mxu1 %v15182_v13 }
 0x847   :  { %13366 = vmatprep.subr.bf16.mxu1 %v14909_v33 }
 0x848   :  { %11587 = vmatmul.mubr.msk.f32.vlgmr.msra.gmra.mrb[42].mxu0 %vm288_vm3, %v2623_v5 }
 0x849   :  { %13356 = vmatpush3.bf16.msra.mxu0 %v15201_v19  ;;  %11624 = vmatprep.mubr.msk.f32.mxu0 %vm14910_vm10, %v14911_v20 }
 0x84a   :  { %13357 = vmatprep.subr.bf16.mxu0 %v14909_v33 }
 0x84d   :  { %13359 = vmatpush3.bf16.msra.mxu0 %v15226_v26 }
 0x84e   :  { %13360 = vmatprep.subr.bf16.mxu0 %v14909_v33 }
 0x851   :  { %13362 = vmatpush3.bf16.msra.mxu0 %v15254_v32 }
 0x852   :  { %13363 = vmatprep.subr.bf16.mxu0 %v14909_v33 }
 0x855   :  { %13365 = vmatpush3.bf16.msra.mxu0 %v15277_v39 }
 0x856   :  { %13378 = vmatprep.subr.bf16.mxu0 %v14909_v33 }
 0x90b   :  { %v2692_v6 = vpop.f32.mrb[40].mxu0  ;;  %v2762_v21 = vpop.f32.mrb[34].mxu1 }
 0x90c   :  { %v2837_v22 = vrot.slane %v2692_v6, 1  ;;  %v2838_v12 = vrot.slane %v2692_v6, 2  ;;  %v2856_v0 = vrot.slane %v2762_v21, 1  ;;  %v2857_v24 = vrot.slane %v2762_v21, 2  ;;  %v11550_v25 = vpop.f32.mrb[41].mxu0  ;;  %v11569_v15 = vpop.f32.mrb[35].mxu1 }
 0x90d   :  { %v2890_v15 = vrot.slane %v15686_v2, 7 }
 0x90e   :  { %v2841_v18 = vadd.f32 %v2837_v22, %v15346_v11  ;;  %v2842_v41 = vadd.f32 %v2838_v12, %v15350_v17  ;;  %v2860_v45 = vadd.f32 %v2856_v0, %v15364_v50  ;;  %v2861_v42 = vadd.f32 %v2857_v24, %v15366_v55 }
 0x90f   :  { %v2889_v0 = vrot.slane %v15684_v16, 7 }
 0x910   :  { %v9910_v30 = vmul.f32 -1.442695, %v2841_v18  ;;  %v9911_v35 = vmul.f32 -1.442695, %v2842_v41  ;;  %v9912_v49 = vmul.f32 -1.442695, %v2860_v45 }
 0x911   :  { %v9913_v58 = vmul.f32 -1.442695, %v2861_v42 }
 0x912   :  { %14380 = vpow2.f32 %v9910_v30 }
 0x913   :  { %14382 = vpow2.f32 %v9911_v35 }
 0x914   :  { %14384 = vpow2.f32 %v9912_v49 }
 0x915   :  { %14386 = vpow2.f32 %v9913_v58 }
 0x91b   :  { %v2832_v51 = vpop.f32.mrb[42].mxu0 }
 0x91c   :  { %v14381_v54 = vpop.eup %14380  ;;  %v11588_v1 = vpop.f32.mrb[43].mxu0  ;;  %v2833_v5 = vadd.f32 %v15677_v38, %v2832_v51 }
 0x91d   :  { %v14383_v59 = vpop.eup %14382  ;;  %v2849_v63 = vadd.f32 1.0, %v14381_v54 }
 0x91e   :  { %v14385_v11 = vpop.eup %14384  ;;  %v2850_v10 = vadd.f32 1.0, %v14383_v59  ;;  %v2875_v6 = vrot.slane %v2833_v5, 1  ;;  %v2876_v22 = vrot.slane %v2833_v5, 2 }
 0x91f   :  { %v14387_v17 = vpop.eup %14386  ;;  %14388 = vrcp.f32 %v2849_v63  ;;  %v2868_v50 = vadd.f32 1.0, %v14385_v11 }
 0x920   :  { %14390 = vrcp.f32 %v2850_v10  ;;  %v2869_v55 = vadd.f32 1.0, %v14387_v17 }
 0x921   :  { %14392 = vrcp.f32 %v2868_v50 }
 0x922   :  { %14394 = vrcp.f32 %v2869_v55 }
 0x929   :  { %v14389_v21 = vpop.eup %14388 }
 0x92a   :  { %v14391_v12 = vpop.eup %14390  ;;  %v2879_v24 = vmul.f32 %v14389_v21, %v2875_v6 }
 0x92b   :  { %v14393_v25 = vpop.eup %14392  ;;  %v2880_v18 = vmul.f32 %v14391_v12, %v2876_v22 }
 0x92c   :  { %v14395_v41 = vpop.eup %14394  ;;  %v2881_v45 = vadd.f32 %v2879_v24, %v15376_v27  ;;  %v2893_v42 = vmul.f32 %v14393_v25, %v2889_v0  ;;  %v2885_v49 = vsub.f32 1.0, %v14393_v25 }
 0x92d   :  { %v2882_v30 = vadd.f32 %v2880_v18, %v15378_v31  ;;  %v2894_v35 = vmul.f32 %v14395_v41, %v2890_v15  ;;  %v2886_v51 = vsub.f32 1.0, %v14395_v41 }
 0x92e   :  { %14396 = vtanh.f32 %v2881_v45 }
 0x92f   :  { %14398 = vtanh.f32 %v2882_v30 }
 0x938   :  { %v14397_v58 = vpop.eup %14396 }
 0x939   :  { %v14399_v54 = vpop.eup %14398  ;;  %v2887_v1 = vmul.f32 %v14397_v58, %v2885_v49 }
 0x93a   :  { %v2888_v16 = vmul.f32 %v14399_v54, %v2886_v51 }
 0x93b   :  { %v15733_v59 = vadd.f32 %v2893_v42, %v2887_v1 }
 0x93c   :  { %v15735_v63 = vadd.f32 %v2894_v35, %v2888_v16 }
 0x93d   :  { %v2899_v2 = vrot.slane %v15733_v59, 7 }
 0x93e   :  { %v2900_v27 = vrot.slane %v15735_v63, 6 }
 0x940   :  { %v2901_v31 = vsel %vm959_vm11, %v2900_v27, %v2899_v2 }
 0x941   :  { %11606 = vmatmul.mubr.msk.f32.vlgmr.msra.gmra.mrb[36].mxu1 %vm288_vm3, %v2901_v31  ;;  %11625 = vmatmul.mubr.msk.f32.vlgmr.msra.gmra.mrb[44].mxu0 %vm288_vm3, %v2901_v31 }
 0x942   :  { %13368 = vmatpush3.bf16.msra.mxu1 %v15214_v23  ;;  %11643 = vmatprep.mubr.msk.f32.mxu1 %vm14910_vm10, %v14911_v20 }
 0x943   :  { %13369 = vmatprep.subr.bf16.mxu1 %v14909_v33  ;;  %13380 = vmatpush3.bf16.msra.mxu0 %v15101_v44 }
 0x944   :  { %13381 = vmatprep.subr.bf16.mxu0 %v14909_v33  ;;  %11662 = vmatprep.mubr.msk.f32.mxu0 %vm14910_vm10, %v14911_v20 }
 0x946   :  { %13371 = vmatpush3.bf16.msra.mxu1 %v15238_v29 }
 0x947   :  { %13372 = vmatprep.subr.bf16.mxu1 %v14909_v33  ;;  %13383 = vmatpush3.bf16.msra.mxu0 %v15134_v62 }
 0x948   :  { %13384 = vmatprep.subr.bf16.mxu0 %v14909_v33 }
 0x94a   :  { %13374 = vmatpush3.bf16.msra.mxu1 %v15264_v36 }
 0x94b   :  { %13375 = vmatprep.subr.bf16.mxu1 %v14909_v33  ;;  %13386 = vmatpush3.bf16.msra.mxu0 %v15166_v7 }
 0x94c   :  { %13387 = vmatprep.subr.bf16.mxu0 %v14909_v33 }
 0x94e   :  { %13377 = vmatpush3.bf16.msra.mxu1 %v15281_v40 }
 0x94f   :  { %13390 = vmatprep.subr.bf16.mxu1 %v14909_v33  ;;  %13389 = vmatpush3.bf16.msra.mxu0 %v15182_v13 }
 0x950   :  { %13402 = vmatprep.subr.bf16.mxu0 %v14909_v33 }
 0x951   :  { %11644 = vmatmul.mubr.msk.f32.vlgmr.msra.gmra.mrb[38].mxu1 %vm288_vm3, %v2901_v31 }
 0x952   :  { %13392 = vmatpush3.bf16.msra.mxu1 %v15201_v19  ;;  %11681 = vmatprep.mubr.msk.f32.mxu1 %vm14910_vm10, %v14911_v20 }
 0x953   :  { %13393 = vmatprep.subr.bf16.mxu1 %v14909_v33 }
 0x956   :  { %13395 = vmatpush3.bf16.msra.mxu1 %v15226_v26 }
 0x957   :  { %13396 = vmatprep.subr.bf16.mxu1 %v14909_v33 }
 0x95a   :  { %13398 = vmatpush3.bf16.msra.mxu1 %v15254_v32 }
 0x95b   :  { %13399 = vmatprep.subr.bf16.mxu1 %v14909_v33 }
 0x95e   :  { %13401 = vmatpush3.bf16.msra.mxu1 %v15277_v39 }
 0x95f   :  { %13414 = vmatprep.subr.bf16.mxu1 %v14909_v33 }
 0xa14   :  { %v2970_v11 = vpop.f32.mrb[36].mxu1  ;;  %v3040_v10 = vpop.f32.mrb[44].mxu0 }
 0xa15   :  { %v3115_v17 = vrot.slane %v2970_v11, 1  ;;  %v3118_v50 = vadd.f32 %v2970_v11, %v15319_v46  ;;  %v3133_v55 = vrot.slane %v3040_v10, 1  ;;  %v11607_v5 = vpop.f32.mrb[37].mxu1  ;;  %v11626_v6 = vpop.f32.mrb[45].mxu0  ;;  %v3136_v0 = vadd.f32 %v3040_v10, %v15321_v47 }
 0xa16   :  { %v3164_v10 = vrot.slane %v15735_v63, 7 }
 0xa17   :  { %v3119_v21 = vadd.f32 %v3115_v17, %v15331_v60  ;;  %v9917_v22 = vmul.f32 -1.442695, %v3118_v50  ;;  %v3137_v12 = vadd.f32 %v3133_v55, %v15333_v61  ;;  %v9919_v15 = vmul.f32 -1.442695, %v3136_v0 }
 0xa19   :  { %14400 = vpow2.f32 %v9917_v22  ;;  %v9918_v24 = vmul.f32 -1.442695, %v3119_v21  ;;  %v9920_v25 = vmul.f32 -1.442695, %v3137_v12 }
 0xa1b   :  { %14402 = vpow2.f32 %v9918_v24 }
 0xa1c   :  { %14404 = vpow2.f32 %v9920_v25 }
 0xa1d   :  { %14406 = vpow2.f32 %v9919_v15 }
 0xa23   :  { %v14401_v18 = vpop.eup %14400 }
 0xa24   :  { %v3126_v41 = vadd.f32 1.0, %v14401_v18  ;;  %v3110_v45 = vpop.f32.mrb[38].mxu1 }
 0xa25   :  { %v14403_v42 = vpop.eup %14402  ;;  %v11645_v30 = vpop.f32.mrb[39].mxu1  ;;  %v3111_v1 = vadd.f32 %v15677_v38, %v3110_v45 }
 0xa26   :  { %v14405_v35 = vpop.eup %14404  ;;  %v3127_v49 = vadd.f32 1.0, %v14403_v42  ;;  %14408 = vrcp.f32 %v3126_v41 }
 0xa27   :  { %v3145_v58 = vadd.f32 1.0, %v14405_v35  ;;  %v14407_v51 = vpop.eup %14406  ;;  %v3151_v27 = vrot.slane %v3111_v1, 1 }
 0xa28   :  { %14410 = vrcp.f32 %v3127_v49  ;;  %v3144_v54 = vadd.f32 1.0, %v14407_v51 }
 0xa29   :  { %14412 = vrcp.f32 %v3145_v58 }
 0xa2a   :  { %14414 = vrcp.f32 %v3144_v54 }
 0xa30   :  { %v14409_v16 = vpop.eup %14408 }
 0xa31   :  { %v3154_v31 = vmul.f32 %v14409_v16, %v3111_v1 }
 0xa32   :  { %v14411_v11 = vpop.eup %14410 }
 0xa33   :  { %v14413_v17 = vpop.eup %14412  ;;  %v3155_v50 = vmul.f32 %v14411_v11, %v3151_v27  ;;  %v3156_v55 = vadd.f32 %v3154_v31, %v15348_v14 }
 0xa34   :  { %v3168_v5 = vmul.f32 %v14413_v17, %v3164_v10  ;;  %v14415_v21 = vpop.eup %14414  ;;  %v3161_v0 = vsub.f32 1.0, %v14413_v17 }
 0xa35   :  { %v3157_v6 = vadd.f32 %v3155_v50, %v15358_v37  ;;  %14416 = vtanh.f32 %v3156_v55  ;;  %v3160_v22 = vsub.f32 1.0, %v14415_v21  ;;  %v3167_v25 = vmul.f32 %v14415_v21, %v2899_v2 }
 0xa37   :  { %14418 = vtanh.f32 %v3157_v6 }
 0xa3f   :  { %v14417_v12 = vpop.eup %14416 }
 0xa40   :  { %v3162_v24 = vmul.f32 %v14417_v12, %v3160_v22 }
 0xa41   :  { %v14419_v15 = vpop.eup %14418 }
 0xa42   :  { %v3163_v18 = vmul.f32 %v14419_v15, %v3161_v0  ;;  %v15785_v63 = vadd.f32 %v3167_v25, %v3162_v24 }
 0xa44   :  { %v15787_v41 = vadd.f32 %v3168_v5, %v3163_v18 }
 0xa46   :  { %v3173_v45 = vrot.slane %v15787_v41, 7 }
 0xa48   :  { %v3174_v42 = vsel %vm959_vm11, %v3173_v45, %v15785_v63 }
 0xa49   :  { %11663 = vmatmul.mubr.msk.f32.vlgmr.msra.gmra.mrb[46].mxu0 %vm288_vm3, %v3174_v42  ;;  %11682 = vmatmul.mubr.msk.f32.vlgmr.msra.gmra.mrb[40].mxu1 %vm288_vm3, %v3174_v42 }
 0xa4a   :  { %13404 = vmatpush3.bf16.msra.mxu0 %v15214_v23  ;;  %11700 = vmatprep.mubr.msk.f32.mxu0 %vm14910_vm10, %v14911_v20 }
 0xa4b   :  { %13405 = vmatprep.subr.bf16.mxu0 %v14909_v33  ;;  %13416 = vmatpush3.bf16.msra.mxu1 %v15101_v44 }
 0xa4c   :  { %13417 = vmatprep.subr.bf16.mxu1 %v14909_v33  ;;  %11719 = vmatprep.mubr.msk.f32.mxu1 %vm14910_vm10, %v14911_v20 }
 0xa4e   :  { %13407 = vmatpush3.bf16.msra.mxu0 %v15238_v29 }
 0xa4f   :  { %13408 = vmatprep.subr.bf16.mxu0 %v14909_v33  ;;  %13419 = vmatpush3.bf16.msra.mxu1 %v15134_v62 }
 0xa50   :  { %13420 = vmatprep.subr.bf16.mxu1 %v14909_v33 }
 0xa52   :  { %13410 = vmatpush3.bf16.msra.mxu0 %v15264_v36 }
 0xa53   :  { %13411 = vmatprep.subr.bf16.mxu0 %v14909_v33  ;;  %13422 = vmatpush3.bf16.msra.mxu1 %v15166_v7 }
 0xa54   :  { %13423 = vmatprep.subr.bf16.mxu1 %v14909_v33 }
 0xa56   :  { %13413 = vmatpush3.bf16.msra.mxu0 %v15281_v40 }
 0xa57   :  { %13426 = vmatprep.subr.bf16.mxu0 %v14909_v33  ;;  %13425 = vmatpush3.bf16.msra.mxu1 %v15182_v13 }
 0xa58   :  { %13438 = vmatprep.subr.bf16.mxu1 %v14909_v33 }
 0xa59   :  { %11701 = vmatmul.mubr.msk.f32.vlgmr.msra.gmra.mrb[48].mxu0 %vm288_vm3, %v3174_v42 }
 0xa5a   :  { %13428 = vmatpush3.bf16.msra.mxu0 %v15201_v19  ;;  %11738 = vmatprep.mubr.msk.f32.mxu0 %vm14910_vm10, %v14911_v20 }
 0xa5b   :  { %13429 = vmatprep.subr.bf16.mxu0 %v14909_v33 }
 0xa5e   :  { %13431 = vmatpush3.bf16.msra.mxu0 %v15226_v26 }
 0xa5f   :  { %13432 = vmatprep.subr.bf16.mxu0 %v14909_v33 }
 0xa62   :  { %13434 = vmatpush3.bf16.msra.mxu0 %v15254_v32 }
 0xa63   :  { %13435 = vmatprep.subr.bf16.mxu0 %v14909_v33 }
 0xa66   :  { %13437 = vmatpush3.bf16.msra.mxu0 %v15277_v39 }
 0xa67   :  { %13450 = vmatprep.subr.bf16.mxu0 %v14909_v33 }
 0xb1c   :  { %v3243_v59 = vpop.f32.mrb[46].mxu0  ;;  %v3313_v2 = vpop.f32.mrb[40].mxu1 }
 0xb1d   :  { %v3388_v30 = vrot.slane %v3243_v59, 7  ;;  %v3392_v35 = vadd.f32 %v3243_v59, %v15331_v60  ;;  %v3406_v49 = vrot.slane %v3313_v2, 7  ;;  %v11664_v58 = vpop.f32.mrb[47].mxu0  ;;  %v11683_v51 = vpop.f32.mrb[41].mxu1  ;;  %v3410_v27 = vadd.f32 %v3313_v2, %v15333_v61 }
 0xb1e   :  { %v3437_v2 = vrot.slane %v15785_v63, 7 }
 0xb1f   :  { %v3391_v54 = vadd.f32 %v3388_v30, %v15319_v46  ;;  %v9925_v1 = vmul.f32 -1.442695, %v3392_v35  ;;  %v3409_v16 = vadd.f32 %v3406_v49, %v15321_v47  ;;  %v9927_v10 = vmul.f32 -1.442695, %v3410_v27 }
 0xb21   :  { %v9924_v31 = vmul.f32 -1.442695, %v3391_v54  ;;  %14420 = vpow2.f32 %v9925_v1  ;;  %v9926_v11 = vmul.f32 -1.442695, %v3409_v16 }
 0xb23   :  { %14422 = vpow2.f32 %v9924_v31 }
 0xb24   :  { %14424 = vpow2.f32 %v9926_v11 }
 0xb25   :  { %14426 = vpow2.f32 %v9927_v10 }
 0xb2b   :  { %v14421_v17 = vpop.eup %14420 }
 0xb2c   :  { %v3400_v50 = vadd.f32 1.0, %v14421_v17  ;;  %v3383_v55 = vpop.f32.mrb[48].mxu0 }
 0xb2d   :  { %v14423_v5 = vpop.eup %14422  ;;  %v11702_v6 = vpop.f32.mrb[49].mxu0  ;;  %v3384_v25 = vadd.f32 %v15677_v38, %v3383_v55 }
 0xb2e   :  { %v14425_v21 = vpop.eup %14424  ;;  %v3399_v22 = vadd.f32 1.0, %v14423_v5  ;;  %14428 = vrcp.f32 %v3400_v50 }
 0xb2f   :  { %v3417_v12 = vadd.f32 1.0, %v14425_v21  ;;  %v14427_v0 = vpop.eup %14426  ;;  %v3424_v18 = vrot.slane %v3384_v25, 7 }
 0xb30   :  { %14430 = vrcp.f32 %v3399_v22  ;;  %v3418_v24 = vadd.f32 1.0, %v14427_v0 }
 0xb31   :  { %14432 = vrcp.f32 %v3417_v12 }
 0xb32   :  { %14434 = vrcp.f32 %v3418_v24 }
 0xb38   :  { %v14429_v15 = vpop.eup %14428 }
 0xb39   :  { %v3428_v42 = vmul.f32 %v14429_v15, %v3384_v25 }
 0xb3a   :  { %v14431_v59 = vpop.eup %14430 }
 0xb3b   :  { %v14433_v30 = vpop.eup %14432  ;;  %v3427_v35 = vmul.f32 %v14431_v59, %v3424_v18  ;;  %v3430_v49 = vadd.f32 %v3428_v42, %v15358_v37 }
 0xb3c   :  { %v3440_v58 = vmul.f32 %v14433_v30, %v3437_v2  ;;  %v14435_v54 = vpop.eup %14434  ;;  %v3433_v27 = vsub.f32 1.0, %v14433_v30 }
 0xb3d   :  { %v3429_v51 = vadd.f32 %v3427_v35, %v15348_v14  ;;  %14436 = vtanh.f32 %v3430_v49  ;;  %v3434_v1 = vsub.f32 1.0, %v14435_v54  ;;  %v3441_v11 = vmul.f32 %v14435_v54, %v3173_v45 }
 0xb3f   :  { %14438 = vtanh.f32 %v3429_v51 }
 0xb47   :  { %v14437_v16 = vpop.eup %14436 }
 0xb48   :  { %v3436_v31 = vmul.f32 %v14437_v16, %v3434_v1 }
 0xb49   :  { %v14439_v10 = vpop.eup %14438 }
 0xb4a   :  { %v3435_v17 = vmul.f32 %v14439_v10, %v3433_v27  ;;  %v15837_v63 = vadd.f32 %v3441_v11, %v3436_v31 }
 0xb4c   :  { %v15839_v50 = vadd.f32 %v3440_v58, %v3435_v17 }
 0xb4e   :  { %v3446_v55 = vrot.slane %v15839_v50, 1 }
 0xb50   :  { %v3447_v5 = vsel %vm959_vm11, %v15837_v63, %v3446_v55 }
 0xb51   :  { %11720 = vmatmul.mubr.msk.f32.vlgmr.msra.gmra.mrb[42].mxu1 %vm288_vm3, %v3447_v5  ;;  %11739 = vmatmul.mubr.msk.f32.vlgmr.msra.gmra.mrb[50].mxu0 %vm288_vm3, %v3447_v5 }
 0xb52   :  { %13440 = vmatpush3.bf16.msra.mxu1 %v15214_v23  ;;  %11757 = vmatprep.mubr.msk.f32.mxu1 %vm14910_vm10, %v14911_v20 }
 0xb53   :  { %13441 = vmatprep.subr.bf16.mxu1 %v14909_v33  ;;  %13452 = vmatpush3.bf16.msra.mxu0 %v15101_v44 }
 0xb54   :  { %13453 = vmatprep.subr.bf16.mxu0 %v14909_v33  ;;  %11776 = vmatprep.mubr.msk.f32.mxu0 %vm14910_vm10, %v14911_v20 }
 0xb56   :  { %13443 = vmatpush3.bf16.msra.mxu1 %v15238_v29 }
 0xb57   :  { %13444 = vmatprep.subr.bf16.mxu1 %v14909_v33  ;;  %13455 = vmatpush3.bf16.msra.mxu0 %v15134_v62 }
 0xb58   :  { %13456 = vmatprep.subr.bf16.mxu0 %v14909_v33 }
 0xb5a   :  { %13446 = vmatpush3.bf16.msra.mxu1 %v15264_v36 }
 0xb5b   :  { %13447 = vmatprep.subr.bf16.mxu1 %v14909_v33  ;;  %13458 = vmatpush3.bf16.msra.mxu0 %v15166_v7 }
 0xb5c   :  { %13459 = vmatprep.subr.bf16.mxu0 %v14909_v33 }
 0xb5e   :  { %13449 = vmatpush3.bf16.msra.mxu1 %v15281_v40 }
 0xb5f   :  { %13462 = vmatprep.subr.bf16.mxu1 %v14909_v33  ;;  %13461 = vmatpush3.bf16.msra.mxu0 %v15182_v13 }
 0xb60   :  { %13474 = vmatprep.subr.bf16.mxu0 %v14909_v33 }
 0xb61   :  { %11758 = vmatmul.mubr.msk.f32.vlgmr.msra.gmra.mrb[44].mxu1 %vm288_vm3, %v3447_v5 }
 0xb62   :  { %13464 = vmatpush3.bf16.msra.mxu1 %v15201_v19  ;;  %11795 = vmatprep.mubr.msk.f32.mxu1 %vm14910_vm10, %v14911_v20 }
 0xb63   :  { %13465 = vmatprep.subr.bf16.mxu1 %v14909_v33 }
 0xb66   :  { %13467 = vmatpush3.bf16.msra.mxu1 %v15226_v26 }
 0xb67   :  { %13468 = vmatprep.subr.bf16.mxu1 %v14909_v33 }
 0xb6a   :  { %13470 = vmatpush3.bf16.msra.mxu1 %v15254_v32 }
 0xb6b   :  { %13471 = vmatprep.subr.bf16.mxu1 %v14909_v33 }
 0xb6e   :  { %13473 = vmatpush3.bf16.msra.mxu1 %v15277_v39 }
 0xb6f   :  { %13486 = vmatprep.subr.bf16.mxu1 %v14909_v33 }
 0xc24   :  { %v3516_v41 = vpop.f32.mrb[42].mxu1  ;;  %v3586_v45 = vpop.f32.mrb[50].mxu0 }
 0xc25   :  { %v3661_v6 = vrot.slane %v3516_v41, 6  ;;  %v3662_v21 = vrot.slane %v3516_v41, 7  ;;  %v3680_v22 = vrot.slane %v3586_v45, 6  ;;  %v3681_v12 = vrot.slane %v3586_v45, 7  ;;  %v11721_v0 = vpop.f32.mrb[43].mxu1  ;;  %v11740_v24 = vpop.f32.mrb[51].mxu0 }
 0xc27   :  { %v3665_v25 = vadd.f32 %v3661_v6, %v15319_v46  ;;  %v3666_v15 = vadd.f32 %v3662_v21, %v15331_v60  ;;  %v3684_v18 = vadd.f32 %v3680_v22, %v15321_v47  ;;  %v3685_v42 = vadd.f32 %v3681_v12, %v15333_v61 }
 0xc28   :  { %v3713_v6 = vrot.slane %v15839_v50, 7  ;;  %v3714_v12 = vrot.slane %v15837_v63, 7 }
 0xc29   :  { %v9931_v59 = vmul.f32 -1.442695, %v3665_v25  ;;  %v9932_v2 = vmul.f32 -1.442695, %v3666_v15  ;;  %v9933_v30 = vmul.f32 -1.442695, %v3684_v18 }
 0xc2a   :  { %v9934_v35 = vmul.f32 -1.442695, %v3685_v42 }
 0xc2b   :  { %14440 = vpow2.f32 %v9931_v59 }
 0xc2c   :  { %14442 = vpow2.f32 %v9932_v2 }
 0xc2d   :  { %14444 = vpow2.f32 %v9933_v30 }
 0xc2e   :  { %14446 = vpow2.f32 %v9934_v35 }
 0xc34   :  { %v3656_v49 = vpop.f32.mrb[44].mxu1 }
 0xc35   :  { %v14441_v58 = vpop.eup %14440  ;;  %v11759_v51 = vpop.f32.mrb[45].mxu1  ;;  %v3657_v17 = vadd.f32 %v15677_v38, %v3656_v49 }
 0xc36   :  { %v14443_v54 = vpop.eup %14442  ;;  %v3673_v1 = vadd.f32 1.0, %v14441_v58 }
 0xc37   :  { %v14445_v16 = vpop.eup %14444  ;;  %v3674_v27 = vadd.f32 1.0, %v14443_v54  ;;  %v3699_v55 = vrot.slane %v3657_v17, 6  ;;  %v3700_v41 = vrot.slane %v3657_v17, 7 }
 0xc38   :  { %v14447_v31 = vpop.eup %14446  ;;  %14448 = vrcp.f32 %v3673_v1  ;;  %v3692_v11 = vadd.f32 1.0, %v14445_v16 }
 0xc39   :  { %14450 = vrcp.f32 %v3674_v27  ;;  %v3693_v10 = vadd.f32 1.0, %v14447_v31 }
 0xc3a   :  { %14452 = vrcp.f32 %v3692_v11 }
 0xc3b   :  { %14454 = vrcp.f32 %v3693_v10 }
 0xc42   :  { %v14449_v5 = vpop.eup %14448 }
 0xc43   :  { %v14451_v45 = vpop.eup %14450  ;;  %v3703_v21 = vmul.f32 %v14449_v5, %v3699_v55 }
 0xc44   :  { %v14453_v22 = vpop.eup %14452  ;;  %v3704_v0 = vmul.f32 %v14451_v45, %v3700_v41 }
 0xc45   :  { %v14455_v24 = vpop.eup %14454  ;;  %v3705_v25 = vadd.f32 %v3703_v21, %v15348_v14  ;;  %v3717_v15 = vmul.f32 %v14453_v22, %v3713_v6  ;;  %v3709_v59 = vsub.f32 1.0, %v14453_v22 }
 0xc46   :  { %v3706_v18 = vadd.f32 %v3704_v0, %v15358_v37  ;;  %v3718_v42 = vmul.f32 %v14455_v24, %v3714_v12  ;;  %v3710_v30 = vsub.f32 1.0, %v14455_v24 }
 0xc47   :  { %14456 = vtanh.f32 %v3705_v25 }
 0xc48   :  { %14458 = vtanh.f32 %v3706_v18 }
 0xc51   :  { %v14457_v2 = vpop.eup %14456 }
 0xc52   :  { %v14459_v35 = vpop.eup %14458  ;;  %v3711_v49 = vmul.f32 %v14457_v2, %v3709_v59 }
 0xc53   :  { %v3712_v50 = vmul.f32 %v14459_v35, %v3710_v30 }
 0xc54   :  { %v15886_v58 = vadd.f32 %v3717_v15, %v3711_v49 }
 0xc55   :  { %v15888_v51 = vadd.f32 %v3718_v42, %v3712_v50 }
 0xc56   :  { %v3723_v63 = vrot.slane %v15886_v58, 2 }
 0xc57   :  { %v3724_v54 = vrot.slane %v15888_v51, 1 }
 0xc59   :  { %v3725_v1 = vsel %vm959_vm11, %v3724_v54, %v3723_v63 }
 0xc5a   :  { %11777 = vmatmul.mubr.msk.f32.vlgmr.msra.gmra.mrb[52].mxu0 %vm288_vm3, %v3725_v1  ;;  %11796 = vmatmul.mubr.msk.f32.vlgmr.msra.gmra.mrb[46].mxu1 %vm288_vm3, %v3725_v1 }
 0xc5b   :  { %13476 = vmatpush3.bf16.msra.mxu0 %v15214_v23  ;;  %11814 = vmatprep.mubr.msk.f32.mxu0 %vm14910_vm10, %v14911_v20 }
 0xc5c   :  { %13477 = vmatprep.subr.bf16.mxu0 %v14909_v33  ;;  %13488 = vmatpush3.bf16.msra.mxu1 %v15101_v44 }
 0xc5d   :  { %13489 = vmatprep.subr.bf16.mxu1 %v14909_v33  ;;  %11833 = vmatprep.mubr.msk.f32.mxu1 %vm14910_vm10, %v14911_v20 }
 0xc5f   :  { %13479 = vmatpush3.bf16.msra.mxu0 %v15238_v29 }
 0xc60   :  { %13480 = vmatprep.subr.bf16.mxu0 %v14909_v33  ;;  %13491 = vmatpush3.bf16.msra.mxu1 %v15134_v62 }
 0xc61   :  { %13492 = vmatprep.subr.bf16.mxu1 %v14909_v33 }
 0xc63   :  { %13482 = vmatpush3.bf16.msra.mxu0 %v15264_v36 }
 0xc64   :  { %13483 = vmatprep.subr.bf16.mxu0 %v14909_v33  ;;  %13494 = vmatpush3.bf16.msra.mxu1 %v15166_v7 }
 0xc65   :  { %13495 = vmatprep.subr.bf16.mxu1 %v14909_v33 }
 0xc67   :  { %13485 = vmatpush3.bf16.msra.mxu0 %v15281_v40 }
 0xc68   :  { %13498 = vmatprep.subr.bf16.mxu0 %v14909_v33  ;;  %13497 = vmatpush3.bf16.msra.mxu1 %v15182_v13 }
 0xc69   :  { %13510 = vmatprep.subr.bf16.mxu1 %v14909_v33 }
 0xc6a   :  { %11815 = vmatmul.mubr.msk.f32.vlgmr.msra.gmra.mrb[54].mxu0 %vm288_vm3, %v3725_v1 }
 0xc6b   :  { %13500 = vmatpush3.bf16.msra.mxu0 %v15201_v19  ;;  %11852 = vmatprep.mubr.msk.f32.mxu0 %vm14910_vm10, %v14911_v20 }
 0xc6c   :  { %13501 = vmatprep.subr.bf16.mxu0 %v14909_v33 }
 0xc6f   :  { %13503 = vmatpush3.bf16.msra.mxu0 %v15226_v26 }
 0xc70   :  { %13504 = vmatprep.subr.bf16.mxu0 %v14909_v33 }
 0xc73   :  { %13506 = vmatpush3.bf16.msra.mxu0 %v15254_v32 }
 0xc74   :  { %13507 = vmatprep.subr.bf16.mxu0 %v14909_v33 }
 0xc77   :  { %13509 = vmatpush3.bf16.msra.mxu0 %v15277_v39 }
 0xc78   :  { %13522 = vmatprep.subr.bf16.mxu0 %v14909_v33 }
 0xd2d   :  { %v3794_v16 = vpop.f32.mrb[52].mxu0  ;;  %v3864_v27 = vpop.f32.mrb[46].mxu1 }
 0xd2e   :  { %v3939_v31 = vrot.slane %v3794_v16, 5  ;;  %v3940_v11 = vrot.slane %v3794_v16, 6  ;;  %v3958_v10 = vrot.slane %v3864_v27, 5  ;;  %v3959_v17 = vrot.slane %v3864_v27, 6  ;;  %v11778_v55 = vpop.f32.mrb[53].mxu0  ;;  %v11797_v5 = vpop.f32.mrb[47].mxu1 }
 0xd30   :  { %v3943_v41 = vadd.f32 %v3939_v31, %v15319_v46  ;;  %v3944_v45 = vadd.f32 %v3940_v11, %v15331_v60  ;;  %v3962_v6 = vadd.f32 %v3958_v10, %v15321_v47  ;;  %v3963_v21 = vadd.f32 %v3959_v17, %v15333_v61 }
 0xd31   :  { %v3991_v31 = vrot.slane %v15886_v58, 7  ;;  %v3992_v17 = vrot.slane %v15888_v51, 7 }
 0xd32   :  { %v9938_v22 = vmul.f32 -1.442695, %v3943_v41  ;;  %v9939_v12 = vmul.f32 -1.442695, %v3944_v45  ;;  %v9940_v0 = vmul.f32 -1.442695, %v3962_v6 }
 0xd33   :  { %v9941_v24 = vmul.f32 -1.442695, %v3963_v21 }
 0xd34   :  { %14460 = vpow2.f32 %v9938_v22 }
 0xd35   :  { %14462 = vpow2.f32 %v9939_v12 }
 0xd36   :  { %14464 = vpow2.f32 %v9940_v0 }
 0xd37   :  { %14466 = vpow2.f32 %v9941_v24 }
 0xd3d   :  { %v3934_v25 = vpop.f32.mrb[54].mxu0 }
 0xd3e   :  { %v14461_v15 = vpop.eup %14460  ;;  %v11816_v18 = vpop.f32.mrb[55].mxu0  ;;  %v3935_v63 = vadd.f32 %v15677_v38, %v3934_v25 }
 0xd3f   :  { %v14463_v42 = vpop.eup %14462  ;;  %v3951_v59 = vadd.f32 1.0, %v14461_v15 }
 0xd40   :  { %v14465_v2 = vpop.eup %14464  ;;  %v3952_v30 = vadd.f32 1.0, %v14463_v42  ;;  %v3977_v54 = vrot.slane %v3935_v63, 5  ;;  %v3978_v16 = vrot.slane %v3935_v63, 6 }
 0xd41   :  { %v14467_v35 = vpop.eup %14466  ;;  %14468 = vrcp.f32 %v3951_v59  ;;  %v3970_v49 = vadd.f32 1.0, %v14465_v2 }
 0xd42   :  { %14470 = vrcp.f32 %v3952_v30  ;;  %v3971_v50 = vadd.f32 1.0, %v14467_v35 }
 0xd43   :  { %14472 = vrcp.f32 %v3970_v49 }
 0xd44   :  { %14474 = vrcp.f32 %v3971_v50 }
 0xd4b   :  { %v14469_v1 = vpop.eup %14468 }
 0xd4c   :  { %v14471_v27 = vpop.eup %14470  ;;  %v3981_v11 = vmul.f32 %v14469_v1, %v3977_v54 }
 0xd4d   :  { %v14473_v10 = vpop.eup %14472  ;;  %v3982_v55 = vmul.f32 %v14471_v27, %v3978_v16 }
 0xd4e   :  { %v14475_v5 = vpop.eup %14474  ;;  %v3983_v41 = vadd.f32 %v3981_v11, %v15348_v14  ;;  %v3995_v45 = vmul.f32 %v14473_v10, %v3991_v31  ;;  %v3987_v38 = vsub.f32 1.0, %v14473_v10 }
 0xd4f   :  { %v3984_v6 = vadd.f32 %v3982_v55, %v15358_v37  ;;  %v3996_v21 = vmul.f32 %v14475_v5, %v3992_v17  ;;  %v3988_v12 = vsub.f32 1.0, %v14475_v5 }
 0xd50   :  { %14476 = vtanh.f32 %v3983_v41 }
 0xd51   :  { %14478 = vtanh.f32 %v3984_v6 }
 0xd5a   :  { %v14477_v22 = vpop.eup %14476 }
 0xd5b   :  { %v14479_v0 = vpop.eup %14478  ;;  %v3989_v24 = vmul.f32 %v14477_v22, %v3987_v38 }
 0xd5c   :  { %v3990_v58 = vmul.f32 %v14479_v0, %v3988_v12 }
 0xd5d   :  { %v15935_v25 = vadd.f32 %v3995_v45, %v3989_v24 }
 0xd5e   :  { %v15937_v15 = vadd.f32 %v3996_v21, %v3990_v58  ;;  %v15982_v58 = vld [vmem:[%s17036_s11] ss:$0 sm:$0xff] }
 0xd5f   :  { %v4001_v51 = vrot.slane %v15935_v25, 3 }
 0xd60   :  { %v4002_v18 = vrot.slane %v15937_v15, 2 }
 0xd62   :  { %v4003_v42 = vsel %vm959_vm11, %v4002_v18, %v4001_v51 }
 0xd63   :  { %11834 = vmatmul.mubr.msk.f32.vlgmr.msra.gmra.mrb[48].mxu1 %vm288_vm3, %v4003_v42  ;;  %11853 = vmatmul.mubr.msk.f32.vlgmr.msra.gmra.mrb[56].mxu0 %vm288_vm3, %v4003_v42 }
 0xd64   :  { %13512 = vmatpush3.bf16.msra.mxu1 %v15214_v23  ;;  %11871 = vmatprep.mubr.msk.f32.mxu1 %vm14910_vm10, %v14911_v20 }
 0xd65   :  { %13513 = vmatprep.subr.bf16.mxu1 %v14909_v33  ;;  %13524 = vmatpush3.bf16.msra.mxu0 %v15101_v44 }
 0xd66   :  { %13525 = vmatprep.subr.bf16.mxu0 %v14909_v33  ;;  %11890 = vmatprep.mubr.msk.f32.mxu0 %vm14910_vm10, %v14911_v20 }
 0xd68   :  { %13515 = vmatpush3.bf16.msra.mxu1 %v15238_v29 }
 0xd69   :  { %13516 = vmatprep.subr.bf16.mxu1 %v14909_v33  ;;  %13527 = vmatpush3.bf16.msra.mxu0 %v15134_v62 }
 0xd6a   :  { %13528 = vmatprep.subr.bf16.mxu0 %v14909_v33 }
 0xd6c   :  { %13518 = vmatpush3.bf16.msra.mxu1 %v15264_v36 }
 0xd6d   :  { %13519 = vmatprep.subr.bf16.mxu1 %v14909_v33  ;;  %13530 = vmatpush3.bf16.msra.mxu0 %v15166_v7 }
 0xd6e   :  { %13531 = vmatprep.subr.bf16.mxu0 %v14909_v33 }
 0xd70   :  { %13521 = vmatpush3.bf16.msra.mxu1 %v15281_v40 }
 0xd71   :  { %13534 = vmatprep.subr.bf16.mxu1 %v14909_v33  ;;  %13533 = vmatpush3.bf16.msra.mxu0 %v15182_v13 }
 0xd72   :  { %13546 = vmatprep.subr.bf16.mxu0 %v14909_v33 }
 0xd73   :  { %11872 = vmatmul.mubr.msk.f32.vlgmr.msra.gmra.mrb[50].mxu1 %vm288_vm3, %v4003_v42 }
 0xd74   :  { %13536 = vmatpush3.bf16.msra.mxu1 %v15201_v19  ;;  %11909 = vmatprep.mubr.msk.f32.mxu1 %vm14910_vm10, %v14911_v20 }
 0xd75   :  { %13537 = vmatprep.subr.bf16.mxu1 %v14909_v33 }
 0xd78   :  { %13539 = vmatpush3.bf16.msra.mxu1 %v15226_v26 }
 0xd79   :  { %13540 = vmatprep.subr.bf16.mxu1 %v14909_v33 }
 0xd7c   :  { %13542 = vmatpush3.bf16.msra.mxu1 %v15254_v32 }
 0xd7d   :  { %13543 = vmatprep.subr.bf16.mxu1 %v14909_v33 }
 0xd80   :  { %13545 = vmatpush3.bf16.msra.mxu1 %v15277_v39 }
 0xd81   :  { %13558 = vmatprep.subr.bf16.mxu1 %v14909_v33 }
 0xe36   :  { %v4072_v59 = vpop.f32.mrb[48].mxu1  ;;  %v4142_v2 = vpop.f32.mrb[56].mxu0 }
 0xe37   :  { %v4217_v30 = vrot.slane %v4072_v59, 4  ;;  %v4218_v35 = vrot.slane %v4072_v59, 5  ;;  %v4236_v49 = vrot.slane %v4142_v2, 4  ;;  %v4237_v50 = vrot.slane %v4142_v2, 5  ;;  %v11835_v63 = vpop.f32.mrb[49].mxu1  ;;  %v11854_v54 = vpop.f32.mrb[57].mxu0 }
 0xe39   :  { %v4221_v1 = vadd.f32 %v4217_v30, %v15319_v46  ;;  %v4222_v16 = vadd.f32 %v4218_v35, %v15331_v60  ;;  %v4240_v27 = vadd.f32 %v4236_v49, %v15321_v47  ;;  %v4241_v31 = vadd.f32 %v4237_v50, %v15333_v61 }
 0xe3a   :  { %v4269_v30 = vrot.slane %v15935_v25, 7  ;;  %v4270_v50 = vrot.slane %v15937_v15, 7 }
 0xe3b   :  { %v9945_v11 = vmul.f32 -1.442695, %v4221_v1  ;;  %v9946_v10 = vmul.f32 -1.442695, %v4222_v16  ;;  %v9947_v17 = vmul.f32 -1.442695, %v4240_v27 }
 0xe3c   :  { %v9948_v55 = vmul.f32 -1.442695, %v4241_v31 }
 0xe3d   :  { %14480 = vpow2.f32 %v9945_v11 }
 0xe3e   :  { %14482 = vpow2.f32 %v9946_v10 }
 0xe3f   :  { %14484 = vpow2.f32 %v9947_v17 }
 0xe40   :  { %14486 = vpow2.f32 %v9948_v55 }
 0xe46   :  { %v4212_v5 = vpop.f32.mrb[50].mxu1 }
 0xe47   :  { %v14481_v41 = vpop.eup %14480  ;;  %v11873_v45 = vpop.f32.mrb[51].mxu1  ;;  %v4213_v51 = vadd.f32 %v15982_v58, %v4212_v5 }
 0xe48   :  { %v14483_v6 = vpop.eup %14482  ;;  %v4229_v21 = vadd.f32 1.0, %v14481_v41 }
 0xe49   :  { %v14485_v38 = vpop.eup %14484  ;;  %v4230_v22 = vadd.f32 1.0, %v14483_v6  ;;  %v4255_v18 = vrot.slane %v4213_v51, 4  ;;  %v4256_v59 = vrot.slane %v4213_v51, 5 }
 0xe4a   :  { %v14487_v12 = vpop.eup %14486  ;;  %14488 = vrcp.f32 %v4229_v21  ;;  %v4248_v0 = vadd.f32 1.0, %v14485_v38 }
 0xe4b   :  { %14490 = vrcp.f32 %v4230_v22  ;;  %v4249_v24 = vadd.f32 1.0, %v14487_v12 }
 0xe4c   :  { %14492 = vrcp.f32 %v4248_v0 }
 0xe4d   :  { %14494 = vrcp.f32 %v4249_v24 }
 0xe54   :  { %v14489_v42 = vpop.eup %14488 }
 0xe55   :  { %v14491_v2 = vpop.eup %14490  ;;  %v4259_v35 = vmul.f32 %v14489_v42, %v4255_v18 }
 0xe56   :  { %v14493_v49 = vpop.eup %14492  ;;  %v4260_v63 = vmul.f32 %v14491_v2, %v4256_v59 }
 0xe57   :  { %v14495_v54 = vpop.eup %14494  ;;  %v4261_v1 = vadd.f32 %v4259_v35, %v15348_v14  ;;  %v4273_v16 = vmul.f32 %v14493_v49, %v4269_v30  ;;  %v4265_v11 = vsub.f32 1.0, %v14493_v49 }
 0xe58   :  { %v4262_v27 = vadd.f32 %v4260_v63, %v15358_v37  ;;  %v4274_v31 = vmul.f32 %v14495_v54, %v4270_v50  ;;  %v4266_v17 = vsub.f32 1.0, %v14495_v54 }
 0xe59   :  { %14496 = vtanh.f32 %v4261_v1 }
 0xe5a   :  { %14498 = vtanh.f32 %v4262_v27 }
 0xe63   :  { %v14497_v10 = vpop.eup %14496 }
 0xe64   :  { %v14499_v55 = vpop.eup %14498  ;;  %v4267_v5 = vmul.f32 %v14497_v10, %v4265_v11 }
 0xe65   :  { %v4268_v25 = vmul.f32 %v14499_v55, %v4266_v17 }
 0xe66   :  { %v15989_v41 = vadd.f32 %v4273_v16, %v4267_v5 }
 0xe67   :  { %v15991_v45 = vadd.f32 %v4274_v31, %v4268_v25 }
 0xe68   :  { %v4279_v15 = vrot.slane %v15989_v41, 4 }
 0xe69   :  { %v4280_v6 = vrot.slane %v15991_v45, 3 }
 0xe6b   :  { %v4281_v21 = vsel %vm959_vm11, %v4280_v6, %v4279_v15 }
 0xe6c   :  { %11891 = vmatmul.mubr.msk.f32.vlgmr.msra.gmra.mrb[58].mxu0 %vm288_vm3, %v4281_v21  ;;  %11910 = vmatmul.mubr.msk.f32.vlgmr.msra.gmra.mrb[52].mxu1 %vm288_vm3, %v4281_v21 }
 0xe6d   :  { %13548 = vmatpush3.bf16.msra.mxu0 %v15214_v23  ;;  %11928 = vmatprep.mubr.msk.f32.mxu0 %vm14910_vm10, %v14911_v20 }
 0xe6e   :  { %13549 = vmatprep.subr.bf16.mxu0 %v14909_v33  ;;  %13560 = vmatpush3.bf16.msra.mxu1 %v15101_v44 }
 0xe6f   :  { %13561 = vmatprep.subr.bf16.mxu1 %v14909_v33  ;;  %11947 = vmatprep.mubr.msk.f32.mxu1 %vm14910_vm10, %v14911_v20 }
 0xe71   :  { %13551 = vmatpush3.bf16.msra.mxu0 %v15238_v29 }
 0xe72   :  { %13552 = vmatprep.subr.bf16.mxu0 %v14909_v33  ;;  %13563 = vmatpush3.bf16.msra.mxu1 %v15134_v62 }
 0xe73   :  { %13564 = vmatprep.subr.bf16.mxu1 %v14909_v33 }
 0xe75   :  { %13554 = vmatpush3.bf16.msra.mxu0 %v15264_v36 }
 0xe76   :  { %13555 = vmatprep.subr.bf16.mxu0 %v14909_v33  ;;  %13566 = vmatpush3.bf16.msra.mxu1 %v15166_v7 }
 0xe77   :  { %13567 = vmatprep.subr.bf16.mxu1 %v14909_v33 }
 0xe79   :  { %13557 = vmatpush3.bf16.msra.mxu0 %v15281_v40 }
 0xe7a   :  { %13570 = vmatprep.subr.bf16.mxu0 %v14909_v33  ;;  %13569 = vmatpush3.bf16.msra.mxu1 %v15182_v13 }
 0xe7b   :  { %13582 = vmatprep.subr.bf16.mxu1 %v14909_v33 }
 0xe7c   :  { %11929 = vmatmul.mubr.msk.f32.vlgmr.msra.gmra.mrb[60].mxu0 %vm288_vm3, %v4281_v21 }
 0xe7d   :  { %13572 = vmatpush3.bf16.msra.mxu0 %v15201_v19  ;;  %11966 = vmatprep.mubr.msk.f32.mxu0 %vm14910_vm10, %v14911_v20 }
 0xe7e   :  { %13573 = vmatprep.subr.bf16.mxu0 %v14909_v33 }
 0xe81   :  { %13575 = vmatpush3.bf16.msra.mxu0 %v15226_v26 }
 0xe82   :  { %13576 = vmatprep.subr.bf16.mxu0 %v14909_v33 }
 0xe85   :  { %13578 = vmatpush3.bf16.msra.mxu0 %v15254_v32 }
 0xe86   :  { %13579 = vmatprep.subr.bf16.mxu0 %v14909_v33 }
 0xe89   :  { %13581 = vmatpush3.bf16.msra.mxu0 %v15277_v39 }
 0xe8a   :  { %13594 = vmatprep.subr.bf16.mxu0 %v14909_v33 }
 0xf3f   :  { %v4350_v38 = vpop.f32.mrb[58].mxu0  ;;  %v4420_v22 = vpop.f32.mrb[52].mxu1 }
 0xf40   :  { %v4495_v12 = vrot.slane %v4350_v38, 3  ;;  %v4496_v0 = vrot.slane %v4350_v38, 4  ;;  %v4514_v24 = vrot.slane %v4420_v22, 3  ;;  %v4515_v51 = vrot.slane %v4420_v22, 4  ;;  %v11892_v18 = vpop.f32.mrb[59].mxu0  ;;  %v11911_v42 = vpop.f32.mrb[53].mxu1 }
 0xf42   :  { %v4499_v59 = vadd.f32 %v4495_v12, %v15319_v46  ;;  %v4500_v2 = vadd.f32 %v4496_v0, %v15331_v60  ;;  %v4518_v30 = vadd.f32 %v4514_v24, %v15321_v47  ;;  %v4519_v35 = vadd.f32 %v4515_v51, %v15333_v61 }
 0xf43   :  { %v4547_v12 = vrot.slane %v15989_v41, 7  ;;  %v4548_v51 = vrot.slane %v15991_v45, 7 }
 0xf44   :  { %v9952_v49 = vmul.f32 -1.442695, %v4499_v59  ;;  %v9953_v50 = vmul.f32 -1.442695, %v4500_v2  ;;  %v9954_v63 = vmul.f32 -1.442695, %v4518_v30 }
 0xf45   :  { %v9955_v54 = vmul.f32 -1.442695, %v4519_v35 }
 0xf46   :  { %14500 = vpow2.f32 %v9952_v49 }
 0xf47   :  { %14502 = vpow2.f32 %v9953_v50 }
 0xf48   :  { %14504 = vpow2.f32 %v9954_v63 }
 0xf49   :  { %14506 = vpow2.f32 %v9955_v54 }
 0xf4f   :  { %v4490_v1 = vpop.f32.mrb[60].mxu0 }
 0xf50   :  { %v14501_v16 = vpop.eup %14500  ;;  %v11930_v27 = vpop.f32.mrb[61].mxu0  ;;  %v4491_v15 = vadd.f32 %v15982_v58, %v4490_v1 }
 0xf51   :  { %v14503_v31 = vpop.eup %14502  ;;  %v4507_v11 = vadd.f32 1.0, %v14501_v16 }
 0xf52   :  { %v14505_v10 = vpop.eup %14504  ;;  %v4508_v17 = vadd.f32 1.0, %v14503_v31  ;;  %v4533_v6 = vrot.slane %v4491_v15, 3  ;;  %v4534_v38 = vrot.slane %v4491_v15, 4 }
 0xf53   :  { %v14507_v55 = vpop.eup %14506  ;;  %14508 = vrcp.f32 %v4507_v11  ;;  %v4526_v5 = vadd.f32 1.0, %v14505_v10 }
 0xf54   :  { %14510 = vrcp.f32 %v4508_v17  ;;  %v4527_v25 = vadd.f32 1.0, %v14507_v55 }
 0xf55   :  { %14512 = vrcp.f32 %v4526_v5 }
 0xf56   :  { %14514 = vrcp.f32 %v4527_v25 }
 0xf5d   :  { %v14509_v21 = vpop.eup %14508 }
 0xf5e   :  { %v14511_v22 = vpop.eup %14510  ;;  %v4537_v0 = vmul.f32 %v14509_v21, %v4533_v6 }
 0xf5f   :  { %v14513_v24 = vpop.eup %14512  ;;  %v4538_v18 = vmul.f32 %v14511_v22, %v4534_v38 }
 0xf60   :  { %v14515_v42 = vpop.eup %14514  ;;  %v4539_v59 = vadd.f32 %v4537_v0, %v15348_v14  ;;  %v4551_v2 = vmul.f32 %v14513_v24, %v4547_v12  ;;  %v4543_v49 = vsub.f32 1.0, %v14513_v24 }
 0xf61   :  { %v4540_v30 = vadd.f32 %v4538_v18, %v15358_v37  ;;  %v4552_v35 = vmul.f32 %v14515_v42, %v4548_v51  ;;  %v4544_v63 = vsub.f32 1.0, %v14515_v42 }
 0xf62   :  { %14516 = vtanh.f32 %v4539_v59 }
 0xf63   :  { %14518 = vtanh.f32 %v4540_v30 }
 0xf6c   :  { %v14517_v50 = vpop.eup %14516 }
 0xf6d   :  { %v14519_v54 = vpop.eup %14518  ;;  %v4545_v1 = vmul.f32 %v14517_v50, %v4543_v49 }
 0xf6e   :  { %v4546_v41 = vmul.f32 %v14519_v54, %v4544_v63 }
 0xf6f   :  { %v16038_v16 = vadd.f32 %v4551_v2, %v4545_v1 }
 0xf70   :  { %v16040_v27 = vadd.f32 %v4552_v35, %v4546_v41 }
 0xf71   :  { %v4557_v45 = vrot.slane %v16038_v16, 5 }
 0xf72   :  { %v4558_v31 = vrot.slane %v16040_v27, 4 }
 0xf74   :  { %v4559_v11 = vsel %vm959_vm11, %v4558_v31, %v4557_v45 }
 0xf75   :  { %11948 = vmatmul.mubr.msk.f32.vlgmr.msra.gmra.mrb[54].mxu1 %vm288_vm3, %v4559_v11  ;;  %11967 = vmatmul.mubr.msk.f32.vlgmr.msra.gmra.mrb[62].mxu0 %vm288_vm3, %v4559_v11 }
 0xf76   :  { %13584 = vmatpush3.bf16.msra.mxu1 %v15214_v23  ;;  %11985 = vmatprep.mubr.msk.f32.mxu1 %vm14910_vm10, %v14911_v20 }
 0xf77   :  { %13585 = vmatprep.subr.bf16.mxu1 %v14909_v33  ;;  %13596 = vmatpush3.bf16.msra.mxu0 %v15101_v44 }
 0xf78   :  { %13597 = vmatprep.subr.bf16.mxu0 %v14909_v33  ;;  %12004 = vmatprep.mubr.msk.f32.mxu0 %vm14910_vm10, %v14911_v20 }
 0xf7a   :  { %13587 = vmatpush3.bf16.msra.mxu1 %v15238_v29 }
 0xf7b   :  { %13588 = vmatprep.subr.bf16.mxu1 %v14909_v33  ;;  %13599 = vmatpush3.bf16.msra.mxu0 %v15134_v62 }
 0xf7c   :  { %13600 = vmatprep.subr.bf16.mxu0 %v14909_v33 }
 0xf7e   :  { %13590 = vmatpush3.bf16.msra.mxu1 %v15264_v36 }
 0xf7f   :  { %13591 = vmatprep.subr.bf16.mxu1 %v14909_v33  ;;  %13602 = vmatpush3.bf16.msra.mxu0 %v15166_v7 }
 0xf80   :  { %13603 = vmatprep.subr.bf16.mxu0 %v14909_v33 }
 0xf82   :  { %13593 = vmatpush3.bf16.msra.mxu1 %v15281_v40 }
 0xf83   :  { %13606 = vmatprep.subr.bf16.mxu1 %v14909_v33  ;;  %13605 = vmatpush3.bf16.msra.mxu0 %v15182_v13 }
 0xf84   :  { %13618 = vmatprep.subr.bf16.mxu0 %v14909_v33 }
 0xf85   :  { %11986 = vmatmul.mubr.msk.f32.vlgmr.msra.gmra.mrb[56].mxu1 %vm288_vm3, %v4559_v11 }
 0xf86   :  { %13608 = vmatpush3.bf16.msra.mxu1 %v15201_v19  ;;  %12023 = vmatprep.mubr.msk.f32.mxu1 %vm14910_vm10, %v14911_v20 }
 0xf87   :  { %13609 = vmatprep.subr.bf16.mxu1 %v14909_v33 }
 0xf8a   :  { %13611 = vmatpush3.bf16.msra.mxu1 %v15226_v26 }
 0xf8b   :  { %13612 = vmatprep.subr.bf16.mxu1 %v14909_v33 }
 0xf8e   :  { %13614 = vmatpush3.bf16.msra.mxu1 %v15254_v32 }
 0xf8f   :  { %13615 = vmatprep.subr.bf16.mxu1 %v14909_v33 }
 0xf92   :  { %13617 = vmatpush3.bf16.msra.mxu1 %v15277_v39 }
 0xf93   :  { %13630 = vmatprep.subr.bf16.mxu1 %v14909_v33 }
0x1048   :  { %v4628_v10 = vpop.f32.mrb[54].mxu1  ;;  %v4698_v17 = vpop.f32.mrb[62].mxu0 }
0x1049   :  { %v4773_v55 = vrot.slane %v4628_v10, 2  ;;  %v4774_v5 = vrot.slane %v4628_v10, 3  ;;  %v4792_v25 = vrot.slane %v4698_v17, 2  ;;  %v4793_v15 = vrot.slane %v4698_v17, 3  ;;  %v11949_v6 = vpop.f32.mrb[55].mxu1  ;;  %v11968_v21 = vpop.f32.mrb[63].mxu0 }
0x104b   :  { %v4777_v38 = vadd.f32 %v4773_v55, %v15319_v46  ;;  %v4778_v22 = vadd.f32 %v4774_v5, %v15331_v60  ;;  %v4796_v12 = vadd.f32 %v4792_v25, %v15321_v47  ;;  %v4797_v0 = vadd.f32 %v4793_v15, %v15333_v61 }
0x104c   :  { %v4825_v55 = vrot.slane %v16038_v16, 7  ;;  %v4826_v15 = vrot.slane %v16040_v27, 7 }
0x104d   :  { %v9959_v24 = vmul.f32 -1.442695, %v4777_v38  ;;  %v9960_v51 = vmul.f32 -1.442695, %v4778_v22  ;;  %v9961_v18 = vmul.f32 -1.442695, %v4796_v12 }
0x104e   :  { %v9962_v42 = vmul.f32 -1.442695, %v4797_v0 }
0x104f   :  { %14520 = vpow2.f32 %v9959_v24 }
0x1050   :  { %14522 = vpow2.f32 %v9960_v51 }
0x1051   :  { %14524 = vpow2.f32 %v9961_v18 }
0x1052   :  { %14526 = vpow2.f32 %v9962_v42 }
0x1058   :  { %v4768_v59 = vpop.f32.mrb[56].mxu1 }
0x1059   :  { %v14521_v2 = vpop.eup %14520  ;;  %v11987_v30 = vpop.f32.mrb[57].mxu1  ;;  %v4769_v45 = vadd.f32 %v15982_v58, %v4768_v59 }
0x105a   :  { %v14523_v35 = vpop.eup %14522  ;;  %v4785_v49 = vadd.f32 1.0, %v14521_v2 }
0x105b   :  { %v14525_v50 = vpop.eup %14524  ;;  %v4786_v63 = vadd.f32 1.0, %v14523_v35  ;;  %v4811_v31 = vrot.slane %v4769_v45, 2  ;;  %v4812_v10 = vrot.slane %v4769_v45, 3 }
0x105c   :  { %v14527_v54 = vpop.eup %14526  ;;  %14528 = vrcp.f32 %v4785_v49  ;;  %v4804_v1 = vadd.f32 1.0, %v14525_v50 }
0x105d   :  { %14530 = vrcp.f32 %v4786_v63  ;;  %v4805_v41 = vadd.f32 1.0, %v14527_v54 }
0x105e   :  { %14532 = vrcp.f32 %v4804_v1 }
0x105f   :  { %14534 = vrcp.f32 %v4805_v41 }
0x1066   :  { %v14529_v11 = vpop.eup %14528 }
0x1067   :  { %v14531_v17 = vpop.eup %14530  ;;  %v4815_v5 = vmul.f32 %v14529_v11, %v4811_v31 }
0x1068   :  { %v14533_v25 = vpop.eup %14532  ;;  %v4816_v6 = vmul.f32 %v14531_v17, %v4812_v10 }
0x1069   :  { %v14535_v21 = vpop.eup %14534  ;;  %v4817_v38 = vadd.f32 %v4815_v5, %v15348_v14  ;;  %v4829_v22 = vmul.f32 %v14533_v25, %v4825_v55  ;;  %v4821_v24 = vsub.f32 1.0, %v14533_v25 }
0x106a   :  { %v4818_v12 = vadd.f32 %v4816_v6, %v15358_v37  ;;  %v4830_v0 = vmul.f32 %v14535_v21, %v4826_v15  ;;  %v4822_v18 = vsub.f32 1.0, %v14535_v21 }
0x106b   :  { %14536 = vtanh.f32 %v4817_v38 }
0x106c   :  { %14538 = vtanh.f32 %v4818_v12 }
0x1075   :  { %v14537_v51 = vpop.eup %14536 }
0x1076   :  { %v14539_v42 = vpop.eup %14538  ;;  %v4823_v59 = vmul.f32 %v14537_v51, %v4821_v24 }
0x1077   :  { %v4824_v16 = vmul.f32 %v14539_v42, %v4822_v18 }
0x1078   :  { %v16087_v2 = vadd.f32 %v4829_v22, %v4823_v59 }
0x1079   :  { %v16089_v30 = vadd.f32 %v4830_v0, %v4824_v16 }
0x107a   :  { %v4835_v27 = vrot.slane %v16087_v2, 6 }
0x107b   :  { %v4836_v35 = vrot.slane %v16089_v30, 5 }
0x107d   :  { %v4837_v49 = vsel %vm959_vm11, %v4836_v35, %v4835_v27  ;;  %v5103_v35 = vrot.slane %v16087_v2, 7 }
0x107e   :  { %12005 = vmatmul.mubr.msk.f32.vlgmr.msra.gmra.mrb[64].mxu0 %vm288_vm3, %v4837_v49  ;;  %12024 = vmatmul.mubr.msk.f32.vlgmr.msra.gmra.mrb[58].mxu1 %vm288_vm3, %v4837_v49 }
0x107f   :  { %13620 = vmatpush3.bf16.msra.mxu0 %v15214_v23  ;;  %12042 = vmatprep.mubr.msk.f32.mxu0 %vm14910_vm10, %v14911_v20 }
0x1080   :  { %13621 = vmatprep.subr.bf16.mxu0 %v14909_v33  ;;  %13632 = vmatpush3.bf16.msra.mxu1 %v15101_v44 }
0x1081   :  { %13633 = vmatprep.subr.bf16.mxu1 %v14909_v33  ;;  %12061 = vmatprep.mubr.msk.f32.mxu1 %vm14910_vm10, %v14911_v20 }
0x1083   :  { %13623 = vmatpush3.bf16.msra.mxu0 %v15238_v29 }
0x1084   :  { %13624 = vmatprep.subr.bf16.mxu0 %v14909_v33  ;;  %13635 = vmatpush3.bf16.msra.mxu1 %v15134_v62 }
0x1085   :  { %13636 = vmatprep.subr.bf16.mxu1 %v14909_v33 }
0x1087   :  { %13626 = vmatpush3.bf16.msra.mxu0 %v15264_v36 }
0x1088   :  { %13627 = vmatprep.subr.bf16.mxu0 %v14909_v33  ;;  %13638 = vmatpush3.bf16.msra.mxu1 %v15166_v7 }
0x1089   :  { %13639 = vmatprep.subr.bf16.mxu1 %v14909_v33 }
0x108b   :  { %13629 = vmatpush3.bf16.msra.mxu0 %v15281_v40 }
0x108c   :  { %13642 = vmatprep.subr.bf16.mxu0 %v14909_v33  ;;  %13641 = vmatpush3.bf16.msra.mxu1 %v15182_v13 }
0x108d   :  { %13654 = vmatprep.subr.bf16.mxu1 %v14909_v33 }
0x108e   :  { %12043 = vmatmul.mubr.msk.f32.vlgmr.msra.gmra.mrb[66].mxu0 %vm288_vm3, %v4837_v49 }
0x108f   :  { %13644 = vmatpush3.bf16.msra.mxu0 %v15201_v19  ;;  %12080 = vmatprep.mubr.msk.f32.mxu0 %vm14910_vm10, %v14911_v20 }
0x1090   :  { %13645 = vmatprep.subr.bf16.mxu0 %v14909_v33 }
0x1093   :  { %13647 = vmatpush3.bf16.msra.mxu0 %v15226_v26 }
0x1094   :  { %13648 = vmatprep.subr.bf16.mxu0 %v14909_v33 }
0x1097   :  { %13650 = vmatpush3.bf16.msra.mxu0 %v15254_v32 }
0x1098   :  { %13651 = vmatprep.subr.bf16.mxu0 %v14909_v33 }
0x109b   :  { %13653 = vmatpush3.bf16.msra.mxu0 %v15277_v39 }
0x109c   :  { %13666 = vmatprep.subr.bf16.mxu0 %v14909_v33 }
0x1151   :  { %v4906_v50 = vpop.f32.mrb[64].mxu0  ;;  %v4976_v63 = vpop.f32.mrb[58].mxu1 }
0x1152   :  { %v5051_v54 = vrot.slane %v4906_v50, 1  ;;  %v5052_v1 = vrot.slane %v4906_v50, 2  ;;  %v5070_v41 = vrot.slane %v4976_v63, 1  ;;  %v5071_v45 = vrot.slane %v4976_v63, 2  ;;  %v12006_v31 = vpop.f32.mrb[65].mxu0  ;;  %v12025_v11 = vpop.f32.mrb[59].mxu1 }
0x1153   :  { %v5104_v63 = vrot.slane %v16089_v30, 7 }
0x1154   :  { %v5055_v10 = vadd.f32 %v5051_v54, %v15319_v46  ;;  %v5056_v17 = vadd.f32 %v5052_v1, %v15331_v60  ;;  %v5074_v55 = vadd.f32 %v5070_v41, %v15321_v47  ;;  %v5075_v5 = vadd.f32 %v5071_v45, %v15333_v61 }
0x1156   :  { %v9966_v25 = vmul.f32 -1.442695, %v5055_v10  ;;  %v9967_v15 = vmul.f32 -1.442695, %v5056_v17  ;;  %v9968_v6 = vmul.f32 -1.442695, %v5074_v55 }
0x1157   :  { %v9969_v21 = vmul.f32 -1.442695, %v5075_v5 }
0x1158   :  { %14540 = vpow2.f32 %v9966_v25 }
0x1159   :  { %14542 = vpow2.f32 %v9967_v15 }
0x115a   :  { %14544 = vpow2.f32 %v9968_v6 }
0x115b   :  { %14546 = vpow2.f32 %v9969_v21 }
0x1161   :  { %v5046_v38 = vpop.f32.mrb[66].mxu0 }
0x1162   :  { %v14541_v22 = vpop.eup %14540  ;;  %v12044_v12 = vpop.f32.mrb[67].mxu0  ;;  %v5047_v18 = vadd.f32 %v15982_v58, %v5046_v38 }
0x1163   :  { %v14543_v0 = vpop.eup %14542  ;;  %v5063_v24 = vadd.f32 1.0, %v14541_v22 }
0x1164   :  { %v14545_v46 = vpop.eup %14544  ;;  %v5064_v51 = vadd.f32 1.0, %v14543_v0  ;;  %v5089_v42 = vrot.slane %v5047_v18, 1  ;;  %v5090_v16 = vrot.slane %v5047_v18, 2 }
0x1165   :  { %v14547_v60 = vpop.eup %14546  ;;  %14548 = vrcp.f32 %v5063_v24  ;;  %v5082_v47 = vadd.f32 1.0, %v14545_v46 }
0x1166   :  { %14550 = vrcp.f32 %v5064_v51  ;;  %v5083_v61 = vadd.f32 1.0, %v14547_v60 }
0x1167   :  { %14552 = vrcp.f32 %v5082_v47 }
0x1168   :  { %14554 = vrcp.f32 %v5083_v61 }
0x116f   :  { %v14549_v59 = vpop.eup %14548 }
0x1170   :  { %v14551_v27 = vpop.eup %14550  ;;  %v5093_v49 = vmul.f32 %v14549_v59, %v5089_v42 }
0x1171   :  { %v14553_v50 = vpop.eup %14552  ;;  %v5094_v54 = vmul.f32 %v14551_v27, %v5090_v16 }
0x1172   :  { %v14555_v1 = vpop.eup %14554  ;;  %v5095_v41 = vadd.f32 %v5093_v49, %v15348_v14  ;;  %v5107_v45 = vmul.f32 %v14553_v50, %v5103_v35  ;;  %v5099_v10 = vsub.f32 1.0, %v14553_v50 }
0x1173   :  { %v5096_v31 = vadd.f32 %v5094_v54, %v15358_v37  ;;  %v5108_v11 = vmul.f32 %v14555_v1, %v5104_v63  ;;  %v5100_v55 = vsub.f32 1.0, %v14555_v1 }
0x1174   :  { %14556 = vtanh.f32 %v5095_v41 }
0x1175   :  { %14558 = vtanh.f32 %v5096_v31 }
0x117e   :  { %v14557_v17 = vpop.eup %14556 }
0x117f   :  { %v14559_v5 = vpop.eup %14558  ;;  %v5101_v25 = vmul.f32 %v14557_v17, %v5099_v10 }
0x1180   :  { %v5102_v2 = vmul.f32 %v14559_v5, %v5100_v55 }
0x1181   :  { %v16136_v15 = vadd.f32 %v5107_v45, %v5101_v25 }
0x1182   :  { %v16138_v6 = vadd.f32 %v5108_v11, %v5102_v2 }
0x1183   :  { %v5113_v30 = vrot.slane %v16136_v15, 7 }
0x1184   :  { %v5114_v14 = vrot.slane %v16138_v6, 6  ;;  %v5378_v5 = vrot.slane %v16138_v6, 7 }
0x1186   :  { %v5115_v37 = vsel %vm959_vm11, %v5114_v14, %v5113_v30 }
0x1187   :  { %12062 = vmatmul.mubr.msk.f32.vlgmr.msra.gmra.mrb[60].mxu1 %vm288_vm3, %v5115_v37  ;;  %12081 = vmatmul.mubr.msk.f32.vlgmr.msra.gmra.mrb[68].mxu0 %vm288_vm3, %v5115_v37 }
0x1188   :  { %13656 = vmatpush3.bf16.msra.mxu1 %v15214_v23  ;;  %12099 = vmatprep.mubr.msk.f32.mxu1 %vm14910_vm10, %v14911_v20 }
0x1189   :  { %13657 = vmatprep.subr.bf16.mxu1 %v14909_v33  ;;  %13668 = vmatpush3.bf16.msra.mxu0 %v15101_v44 }
0x118a   :  { %13669 = vmatprep.subr.bf16.mxu0 %v14909_v33  ;;  %12118 = vmatprep.mubr.msk.f32.mxu0 %vm14910_vm10, %v14911_v20 }
0x118c   :  { %13659 = vmatpush3.bf16.msra.mxu1 %v15238_v29 }
0x118d   :  { %13660 = vmatprep.subr.bf16.mxu1 %v14909_v33  ;;  %13671 = vmatpush3.bf16.msra.mxu0 %v15134_v62 }
0x118e   :  { %13672 = vmatprep.subr.bf16.mxu0 %v14909_v33 }
0x1190   :  { %13662 = vmatpush3.bf16.msra.mxu1 %v15264_v36 }
0x1191   :  { %13663 = vmatprep.subr.bf16.mxu1 %v14909_v33  ;;  %13674 = vmatpush3.bf16.msra.mxu0 %v15166_v7 }
0x1192   :  { %13675 = vmatprep.subr.bf16.mxu0 %v14909_v33 }
0x1194   :  { %13665 = vmatpush3.bf16.msra.mxu1 %v15281_v40 }
0x1195   :  { %13678 = vmatprep.subr.bf16.mxu1 %v14909_v33  ;;  %13677 = vmatpush3.bf16.msra.mxu0 %v15182_v13 }
0x1196   :  { %13690 = vmatprep.subr.bf16.mxu0 %v14909_v33 }
0x1197   :  { %12100 = vmatmul.mubr.msk.f32.vlgmr.msra.gmra.mrb[62].mxu1 %vm288_vm3, %v5115_v37 }
0x1198   :  { %13680 = vmatpush3.bf16.msra.mxu1 %v15201_v19  ;;  %12137 = vmatprep.mubr.msk.f32.mxu1 %vm14910_vm10, %v14911_v20 }
0x1199   :  { %13681 = vmatprep.subr.bf16.mxu1 %v14909_v33 }
0x119c   :  { %13683 = vmatpush3.bf16.msra.mxu1 %v15226_v26 }
0x119d   :  { %13684 = vmatprep.subr.bf16.mxu1 %v14909_v33 }
0x11a0   :  { %13686 = vmatpush3.bf16.msra.mxu1 %v15254_v32 }
0x11a1   :  { %13687 = vmatprep.subr.bf16.mxu1 %v14909_v33 }
0x11a4   :  { %13689 = vmatpush3.bf16.msra.mxu1 %v15277_v39 }
0x11a5   :  { %13702 = vmatprep.subr.bf16.mxu1 %v14909_v33 }
0x125a   :  { %v5184_v21 = vpop.f32.mrb[60].mxu1  ;;  %v5254_v38 = vpop.f32.mrb[68].mxu0 }
0x125b   :  { %v5329_v22 = vrot.slane %v5184_v21, 1  ;;  %v5332_v12 = vadd.f32 %v5184_v21, %v15327_v56  ;;  %v5347_v0 = vrot.slane %v5254_v38, 1  ;;  %v12063_v24 = vpop.f32.mrb[61].mxu1  ;;  %v12082_v46 = vpop.f32.mrb[69].mxu0  ;;  %v5350_v61 = vadd.f32 %v5254_v38, %v15329_v57 }
0x125d   :  { %v5333_v51 = vadd.f32 %v5329_v22, %v15339_v8  ;;  %v9973_v60 = vmul.f32 -1.442695, %v5332_v12  ;;  %v5351_v47 = vadd.f32 %v5347_v0, %v15341_v9  ;;  %v9975_v59 = vmul.f32 -1.442695, %v5350_v61 }
0x125f   :  { %14560 = vpow2.f32 %v9973_v60  ;;  %v9974_v18 = vmul.f32 -1.442695, %v5333_v51  ;;  %v9976_v42 = vmul.f32 -1.442695, %v5351_v47 }
0x1261   :  { %14562 = vpow2.f32 %v9974_v18 }
0x1262   :  { %14564 = vpow2.f32 %v9976_v42 }
0x1263   :  { %14566 = vpow2.f32 %v9975_v59 }
0x1269   :  { %v14561_v16 = vpop.eup %14560 }
0x126a   :  { %v5340_v27 = vadd.f32 1.0, %v14561_v16  ;;  %v5324_v35 = vpop.f32.mrb[62].mxu1 }
0x126b   :  { %v14563_v49 = vpop.eup %14562  ;;  %v12101_v50 = vpop.f32.mrb[63].mxu1  ;;  %v5325_v31 = vadd.f32 %v15982_v58, %v5324_v35 }
0x126c   :  { %v14565_v63 = vpop.eup %14564  ;;  %v5341_v54 = vadd.f32 1.0, %v14563_v49  ;;  %14568 = vrcp.f32 %v5340_v27 }
0x126d   :  { %v5359_v1 = vadd.f32 1.0, %v14565_v63  ;;  %v14567_v41 = vpop.eup %14566  ;;  %v5365_v10 = vrot.slane %v5325_v31, 1 }
0x126e   :  { %14570 = vrcp.f32 %v5341_v54  ;;  %v5358_v45 = vadd.f32 1.0, %v14567_v41 }
0x126f   :  { %14572 = vrcp.f32 %v5359_v1 }
0x1270   :  { %14574 = vrcp.f32 %v5358_v45 }
0x1276   :  { %v14569_v11 = vpop.eup %14568 }
0x1277   :  { %v5368_v17 = vmul.f32 %v14569_v11, %v5325_v31 }
0x1278   :  { %v14571_v55 = vpop.eup %14570 }
0x1279   :  { %v14573_v25 = vpop.eup %14572  ;;  %v5369_v2 = vmul.f32 %v14571_v55, %v5365_v10  ;;  %v5370_v14 = vadd.f32 %v5368_v17, %v15356_v34 }
0x127a   :  { %v5382_v37 = vmul.f32 %v14573_v25, %v5378_v5  ;;  %v14575_v38 = vpop.eup %14574  ;;  %v5375_v0 = vsub.f32 1.0, %v14573_v25 }
0x127b   :  { %v5371_v21 = vadd.f32 %v5369_v2, %v15362_v48  ;;  %14576 = vtanh.f32 %v5370_v14  ;;  %v5374_v22 = vsub.f32 1.0, %v14575_v38  ;;  %v5381_v46 = vmul.f32 %v14575_v38, %v5113_v30 }
0x127d   :  { %14578 = vtanh.f32 %v5371_v21 }
0x1285   :  { %v14577_v12 = vpop.eup %14576 }
0x1286   :  { %v5376_v24 = vmul.f32 %v14577_v12, %v5374_v22 }
0x1287   :  { %v14579_v51 = vpop.eup %14578 }
0x1288   :  { %v5377_v60 = vmul.f32 %v14579_v51, %v5375_v0  ;;  %v16188_v6 = vadd.f32 %v5381_v46, %v5376_v24 }
0x128a   :  { %v16190_v47 = vadd.f32 %v5382_v37, %v5377_v60  ;;  %v5651_v24 = vrot.slane %v16188_v6, 7 }
0x128c   :  { %v5387_v61 = vrot.slane %v16190_v47, 7 }
0x128e   :  { %v5388_v18 = vsel %vm959_vm11, %v5387_v61, %v16188_v6 }
0x128f   :  { %12119 = vmatmul.mubr.msk.f32.vlgmr.msra.gmra.mrb[70].mxu0 %vm288_vm3, %v5388_v18  ;;  %12138 = vmatmul.mubr.msk.f32.vlgmr.msra.gmra.mrb[64].mxu1 %vm288_vm3, %v5388_v18 }
0x1290   :  { %13692 = vmatpush3.bf16.msra.mxu0 %v15214_v23  ;;  %12156 = vmatprep.mubr.msk.f32.mxu0 %vm14910_vm10, %v14911_v20 }
0x1291   :  { %13693 = vmatprep.subr.bf16.mxu0 %v14909_v33  ;;  %13704 = vmatpush3.bf16.msra.mxu1 %v15101_v44 }
0x1292   :  { %13705 = vmatprep.subr.bf16.mxu1 %v14909_v33  ;;  %12175 = vmatprep.mubr.msk.f32.mxu1 %vm14910_vm10, %v14911_v20 }
0x1294   :  { %13695 = vmatpush3.bf16.msra.mxu0 %v15238_v29 }
0x1295   :  { %13696 = vmatprep.subr.bf16.mxu0 %v14909_v33  ;;  %13707 = vmatpush3.bf16.msra.mxu1 %v15134_v62 }
0x1296   :  { %13708 = vmatprep.subr.bf16.mxu1 %v14909_v33 }
0x1298   :  { %13698 = vmatpush3.bf16.msra.mxu0 %v15264_v36 }
0x1299   :  { %13699 = vmatprep.subr.bf16.mxu0 %v14909_v33  ;;  %13710 = vmatpush3.bf16.msra.mxu1 %v15166_v7 }
0x129a   :  { %13711 = vmatprep.subr.bf16.mxu1 %v14909_v33 }
0x129c   :  { %13701 = vmatpush3.bf16.msra.mxu0 %v15281_v40 }
0x129d   :  { %13714 = vmatprep.subr.bf16.mxu0 %v14909_v33  ;;  %13713 = vmatpush3.bf16.msra.mxu1 %v15182_v13 }
0x129e   :  { %13726 = vmatprep.subr.bf16.mxu1 %v14909_v33 }
0x129f   :  { %12157 = vmatmul.mubr.msk.f32.vlgmr.msra.gmra.mrb[72].mxu0 %vm288_vm3, %v5388_v18 }
0x12a0   :  { %13716 = vmatpush3.bf16.msra.mxu0 %v15201_v19  ;;  %12194 = vmatprep.mubr.msk.f32.mxu0 %vm14910_vm10, %v14911_v20 }
0x12a1   :  { %13717 = vmatprep.subr.bf16.mxu0 %v14909_v33 }
0x12a4   :  { %13719 = vmatpush3.bf16.msra.mxu0 %v15226_v26 }
0x12a5   :  { %13720 = vmatprep.subr.bf16.mxu0 %v14909_v33 }
0x12a8   :  { %13722 = vmatpush3.bf16.msra.mxu0 %v15254_v32 }
0x12a9   :  { %13723 = vmatprep.subr.bf16.mxu0 %v14909_v33 }
0x12ac   :  { %13725 = vmatpush3.bf16.msra.mxu0 %v15277_v39 }
0x12ad   :  { %13738 = vmatprep.subr.bf16.mxu0 %v14909_v33 }
0x1362   :  { %v5457_v15 = vpop.f32.mrb[70].mxu0  ;;  %v5527_v30 = vpop.f32.mrb[64].mxu1 }
0x1363   :  { %v5602_v42 = vrot.slane %v5457_v15, 7  ;;  %v5606_v59 = vadd.f32 %v5457_v15, %v15339_v8  ;;  %v5620_v16 = vrot.slane %v5527_v30, 7  ;;  %v12120_v27 = vpop.f32.mrb[71].mxu0  ;;  %v12139_v35 = vpop.f32.mrb[65].mxu1  ;;  %v5624_v54 = vadd.f32 %v5527_v30, %v15341_v9 }
0x1365   :  { %v5605_v49 = vadd.f32 %v5602_v42, %v15327_v56  ;;  %v9981_v50 = vmul.f32 -1.442695, %v5606_v59  ;;  %v5623_v63 = vadd.f32 %v5620_v16, %v15329_v57  ;;  %v9983_v45 = vmul.f32 -1.442695, %v5624_v54 }
0x1367   :  { %v9980_v1 = vmul.f32 -1.442695, %v5605_v49  ;;  %14580 = vpow2.f32 %v9981_v50  ;;  %v9982_v41 = vmul.f32 -1.442695, %v5623_v63 }
0x1369   :  { %14582 = vpow2.f32 %v9980_v1 }
0x136a   :  { %14584 = vpow2.f32 %v9982_v41 }
0x136b   :  { %14586 = vpow2.f32 %v9983_v45 }
0x1371   :  { %v14581_v31 = vpop.eup %14580 }
0x1372   :  { %v5614_v11 = vadd.f32 1.0, %v14581_v31  ;;  %v5597_v10 = vpop.f32.mrb[72].mxu0 }
0x1373   :  { %v14583_v17 = vpop.eup %14582  ;;  %v12158_v55 = vpop.f32.mrb[73].mxu0  ;;  %v5598_v21 = vadd.f32 %v15982_v58, %v5597_v10 }
0x1374   :  { %v14585_v5 = vpop.eup %14584  ;;  %v5613_v25 = vadd.f32 1.0, %v14583_v17  ;;  %14588 = vrcp.f32 %v5614_v11 }
0x1375   :  { %v5631_v2 = vadd.f32 1.0, %v14585_v5  ;;  %v14587_v14 = vpop.eup %14586  ;;  %v5638_v22 = vrot.slane %v5598_v21, 7 }
0x1376   :  { %14590 = vrcp.f32 %v5613_v25  ;;  %v5632_v37 = vadd.f32 1.0, %v14587_v14 }
0x1377   :  { %14592 = vrcp.f32 %v5631_v2 }
0x1378   :  { %14594 = vrcp.f32 %v5632_v37 }
0x137e   :  { %v14589_v38 = vpop.eup %14588 }
0x137f   :  { %v5642_v12 = vmul.f32 %v14589_v38, %v5598_v21 }
0x1380   :  { %v14591_v0 = vpop.eup %14590 }
0x1381   :  { %v14593_v46 = vpop.eup %14592  ;;  %v5641_v51 = vmul.f32 %v14591_v0, %v5638_v22  ;;  %v5644_v60 = vadd.f32 %v5642_v12, %v15362_v48 }
0x1382   :  { %v5654_v18 = vmul.f32 %v14593_v46, %v5651_v24  ;;  %v14595_v30 = vpop.eup %14594  ;;  %v5647_v58 = vsub.f32 1.0, %v14593_v46 }
0x1383   :  { %v5643_v15 = vadd.f32 %v5641_v51, %v15356_v34  ;;  %14596 = vtanh.f32 %v5644_v60  ;;  %v5648_v42 = vsub.f32 1.0, %v14595_v30  ;;  %v5655_v27 = vmul.f32 %v14595_v30, %v5387_v61  ;;  %v16287_v30 = vld [vmem:[%s17036_s11] ss:$0 sm:$0xff] }
0x1385   :  { %14598 = vtanh.f32 %v5643_v15 }
0x138d   :  { %v14597_v59 = vpop.eup %14596 }
0x138e   :  { %v5650_v16 = vmul.f32 %v14597_v59, %v5648_v42 }
0x138f   :  { %v14599_v35 = vpop.eup %14598 }
0x1390   :  { %v5649_v49 = vmul.f32 %v14599_v35, %v5647_v58  ;;  %v16240_v6 = vadd.f32 %v5655_v27, %v5650_v16 }
0x1392   :  { %v16242_v50 = vadd.f32 %v5654_v18, %v5649_v49 }
0x1394   :  { %v5660_v63 = vrot.slane %v16242_v50, 1  ;;  %v5927_v35 = vrot.slane %v16242_v50, 7 }
0x1396   :  { %v5661_v54 = vsel %vm959_vm11, %v16240_v6, %v5660_v63 }
0x1397   :  { %12176 = vmatmul.mubr.msk.f32.vlgmr.msra.gmra.mrb[66].mxu1 %vm288_vm3, %v5661_v54  ;;  %12195 = vmatmul.mubr.msk.f32.vlgmr.msra.gmra.mrb[74].mxu0 %vm288_vm3, %v5661_v54 }
0x1398   :  { %13728 = vmatpush3.bf16.msra.mxu1 %v15214_v23  ;;  %12213 = vmatprep.mubr.msk.f32.mxu1 %vm14910_vm10, %v14911_v20 }
0x1399   :  { %13729 = vmatprep.subr.bf16.mxu1 %v14909_v33  ;;  %13740 = vmatpush3.bf16.msra.mxu0 %v15101_v44 }
0x139a   :  { %13741 = vmatprep.subr.bf16.mxu0 %v14909_v33  ;;  %12232 = vmatprep.mubr.msk.f32.mxu0 %vm14910_vm10, %v14911_v20 }
0x139c   :  { %13731 = vmatpush3.bf16.msra.mxu1 %v15238_v29 }
0x139d   :  { %13732 = vmatprep.subr.bf16.mxu1 %v14909_v33  ;;  %13743 = vmatpush3.bf16.msra.mxu0 %v15134_v62 }
0x139e   :  { %13744 = vmatprep.subr.bf16.mxu0 %v14909_v33 }
0x13a0   :  { %13734 = vmatpush3.bf16.msra.mxu1 %v15264_v36 }
0x13a1   :  { %13735 = vmatprep.subr.bf16.mxu1 %v14909_v33  ;;  %13746 = vmatpush3.bf16.msra.mxu0 %v15166_v7 }
0x13a2   :  { %13747 = vmatprep.subr.bf16.mxu0 %v14909_v33 }
0x13a4   :  { %13737 = vmatpush3.bf16.msra.mxu1 %v15281_v40 }
0x13a5   :  { %13750 = vmatprep.subr.bf16.mxu1 %v14909_v33  ;;  %13749 = vmatpush3.bf16.msra.mxu0 %v15182_v13 }
0x13a6   :  { %13762 = vmatprep.subr.bf16.mxu0 %v14909_v33 }
0x13a7   :  { %12214 = vmatmul.mubr.msk.f32.vlgmr.msra.gmra.mrb[68].mxu1 %vm288_vm3, %v5661_v54  ;;  %v5928_v54 = vrot.slane %v16240_v6, 7 }
0x13a8   :  { %13752 = vmatpush3.bf16.msra.mxu1 %v15201_v19  ;;  %12251 = vmatprep.mubr.msk.f32.mxu1 %vm14910_vm10, %v14911_v20 }
0x13a9   :  { %13753 = vmatprep.subr.bf16.mxu1 %v14909_v33 }
0x13ac   :  { %13755 = vmatpush3.bf16.msra.mxu1 %v15226_v26 }
0x13ad   :  { %13756 = vmatprep.subr.bf16.mxu1 %v14909_v33 }
0x13b0   :  { %13758 = vmatpush3.bf16.msra.mxu1 %v15254_v32 }
0x13b1   :  { %13759 = vmatprep.subr.bf16.mxu1 %v14909_v33 }
0x13b4   :  { %13761 = vmatpush3.bf16.msra.mxu1 %v15277_v39 }
0x13b5   :  { %13774 = vmatprep.subr.bf16.mxu1 %v14909_v33 }
0x146a   :  { %v5730_v47 = vpop.f32.mrb[66].mxu1  ;;  %v5800_v61 = vpop.f32.mrb[74].mxu0 }
0x146b   :  { %v5875_v1 = vrot.slane %v5730_v47, 6  ;;  %v5876_v41 = vrot.slane %v5730_v47, 7  ;;  %v5894_v45 = vrot.slane %v5800_v61, 6  ;;  %v5895_v31 = vrot.slane %v5800_v61, 7  ;;  %v12177_v11 = vpop.f32.mrb[67].mxu1  ;;  %v12196_v10 = vpop.f32.mrb[75].mxu0 }
0x146d   :  { %v5879_v17 = vadd.f32 %v5875_v1, %v15327_v56  ;;  %v5880_v55 = vadd.f32 %v5876_v41, %v15339_v8  ;;  %v5898_v5 = vadd.f32 %v5894_v45, %v15329_v57  ;;  %v5899_v25 = vadd.f32 %v5895_v31, %v15341_v9 }
0x146f   :  { %v9987_v2 = vmul.f32 -1.442695, %v5879_v17  ;;  %v9988_v14 = vmul.f32 -1.442695, %v5880_v55  ;;  %v9989_v37 = vmul.f32 -1.442695, %v5898_v5 }
0x1470   :  { %v9990_v21 = vmul.f32 -1.442695, %v5899_v25 }
0x1471   :  { %14600 = vpow2.f32 %v9987_v2 }
0x1472   :  { %14602 = vpow2.f32 %v9988_v14 }
0x1473   :  { %14604 = vpow2.f32 %v9989_v37 }
0x1474   :  { %14606 = vpow2.f32 %v9990_v21 }
0x147a   :  { %v5870_v38 = vpop.f32.mrb[68].mxu1 }
0x147b   :  { %v14601_v22 = vpop.eup %14600  ;;  %v12215_v12 = vpop.f32.mrb[69].mxu1  ;;  %v5871_v42 = vadd.f32 %v16287_v30, %v5870_v38 }
0x147c   :  { %v14603_v0 = vpop.eup %14602  ;;  %v5887_v24 = vadd.f32 1.0, %v14601_v22 }
0x147d   :  { %v14605_v46 = vpop.eup %14604  ;;  %v5888_v51 = vadd.f32 1.0, %v14603_v0  ;;  %v5913_v59 = vrot.slane %v5871_v42, 6  ;;  %v5914_v16 = vrot.slane %v5871_v42, 7 }
0x147e   :  { %v14607_v60 = vpop.eup %14606  ;;  %14608 = vrcp.f32 %v5887_v24  ;;  %v5906_v18 = vadd.f32 1.0, %v14605_v46 }
0x147f   :  { %14610 = vrcp.f32 %v5888_v51  ;;  %v5907_v15 = vadd.f32 1.0, %v14607_v60 }
0x1480   :  { %14612 = vrcp.f32 %v5906_v18 }
0x1481   :  { %14614 = vrcp.f32 %v5907_v15 }
0x1488   :  { %v14609_v58 = vpop.eup %14608 }
0x1489   :  { %v14611_v27 = vpop.eup %14610  ;;  %v5917_v49 = vmul.f32 %v14609_v58, %v5913_v59 }
0x148a   :  { %v14613_v63 = vpop.eup %14612  ;;  %v5918_v47 = vmul.f32 %v14611_v27, %v5914_v16 }
0x148b   :  { %v14615_v61 = vpop.eup %14614  ;;  %v5919_v1 = vadd.f32 %v5917_v49, %v15356_v34  ;;  %v5931_v41 = vmul.f32 %v14613_v63, %v5927_v35  ;;  %v5923_v11 = vsub.f32 1.0, %v14613_v63 }
0x148c   :  { %v5920_v45 = vadd.f32 %v5918_v47, %v15362_v48  ;;  %v5932_v31 = vmul.f32 %v14615_v61, %v5928_v54  ;;  %v5924_v17 = vsub.f32 1.0, %v14615_v61 }
0x148d   :  { %14616 = vtanh.f32 %v5919_v1 }
0x148e   :  { %14618 = vtanh.f32 %v5920_v45 }
0x1497   :  { %v14617_v10 = vpop.eup %14616 }
0x1498   :  { %v14619_v55 = vpop.eup %14618  ;;  %v5925_v5 = vmul.f32 %v14617_v10, %v5923_v11 }
0x1499   :  { %v5926_v50 = vmul.f32 %v14619_v55, %v5924_v17 }
0x149a   :  { %v16294_v25 = vadd.f32 %v5931_v41, %v5925_v5 }
0x149b   :  { %v16296_v2 = vadd.f32 %v5932_v31, %v5926_v50 }
0x149c   :  { %v5937_v6 = vrot.slane %v16294_v25, 2  ;;  %v6205_v50 = vrot.slane %v16294_v25, 7 }
0x149d   :  { %v5938_v14 = vrot.slane %v16296_v2, 1 }
0x149f   :  { %v5939_v37 = vsel %vm959_vm11, %v5938_v14, %v5937_v6 }
0x14a0   :  { %12233 = vmatmul.mubr.msk.f32.vlgmr.msra.gmra.mrb[76].mxu0 %vm288_vm3, %v5939_v37  ;;  %12252 = vmatmul.mubr.msk.f32.vlgmr.msra.gmra.mrb[70].mxu1 %vm288_vm3, %v5939_v37 }
0x14a1   :  { %13764 = vmatpush3.bf16.msra.mxu0 %v15214_v23  ;;  %12270 = vmatprep.mubr.msk.f32.mxu0 %vm14910_vm10, %v14911_v20 }
0x14a2   :  { %13765 = vmatprep.subr.bf16.mxu0 %v14909_v33  ;;  %13776 = vmatpush3.bf16.msra.mxu1 %v15101_v44 }
0x14a3   :  { %13777 = vmatprep.subr.bf16.mxu1 %v14909_v33  ;;  %12289 = vmatprep.mubr.msk.f32.mxu1 %vm14910_vm10, %v14911_v20 }
0x14a5   :  { %13767 = vmatpush3.bf16.msra.mxu0 %v15238_v29 }
0x14a6   :  { %13768 = vmatprep.subr.bf16.mxu0 %v14909_v33  ;;  %13779 = vmatpush3.bf16.msra.mxu1 %v15134_v62 }
0x14a7   :  { %13780 = vmatprep.subr.bf16.mxu1 %v14909_v33 }
0x14a9   :  { %13770 = vmatpush3.bf16.msra.mxu0 %v15264_v36 }
0x14aa   :  { %13771 = vmatprep.subr.bf16.mxu0 %v14909_v33  ;;  %13782 = vmatpush3.bf16.msra.mxu1 %v15166_v7 }
0x14ab   :  { %13783 = vmatprep.subr.bf16.mxu1 %v14909_v33 }
0x14ad   :  { %13773 = vmatpush3.bf16.msra.mxu0 %v15281_v40 }
0x14ae   :  { %13786 = vmatprep.subr.bf16.mxu0 %v14909_v33  ;;  %13785 = vmatpush3.bf16.msra.mxu1 %v15182_v13 }
0x14af   :  { %13798 = vmatprep.subr.bf16.mxu1 %v14909_v33 }
0x14b0   :  { %12271 = vmatmul.mubr.msk.f32.vlgmr.msra.gmra.mrb[78].mxu0 %vm288_vm3, %v5939_v37  ;;  %v6206_v37 = vrot.slane %v16296_v2, 7 }
0x14b1   :  { %13788 = vmatpush3.bf16.msra.mxu0 %v15201_v19  ;;  %12308 = vmatprep.mubr.msk.f32.mxu0 %vm14910_vm10, %v14911_v20 }
0x14b2   :  { %13789 = vmatprep.subr.bf16.mxu0 %v14909_v33 }
0x14b5   :  { %13791 = vmatpush3.bf16.msra.mxu0 %v15226_v26 }
0x14b6   :  { %13792 = vmatprep.subr.bf16.mxu0 %v14909_v33 }
0x14b9   :  { %13794 = vmatpush3.bf16.msra.mxu0 %v15254_v32 }
0x14ba   :  { %13795 = vmatprep.subr.bf16.mxu0 %v14909_v33 }
0x14bd   :  { %13797 = vmatpush3.bf16.msra.mxu0 %v15277_v39 }
0x14be   :  { %13810 = vmatprep.subr.bf16.mxu0 %v14909_v33 }
0x1573   :  { %v6008_v21 = vpop.f32.mrb[76].mxu0  ;;  %v6078_v38 = vpop.f32.mrb[70].mxu1 }
0x1574   :  { %v6153_v22 = vrot.slane %v6008_v21, 5  ;;  %v6154_v12 = vrot.slane %v6008_v21, 6  ;;  %v6172_v0 = vrot.slane %v6078_v38, 5  ;;  %v6173_v24 = vrot.slane %v6078_v38, 6  ;;  %v12234_v46 = vpop.f32.mrb[77].mxu0  ;;  %v12253_v51 = vpop.f32.mrb[71].mxu1 }
0x1576   :  { %v6157_v60 = vadd.f32 %v6153_v22, %v15327_v56  ;;  %v6158_v18 = vadd.f32 %v6154_v12, %v15339_v8  ;;  %v6176_v15 = vadd.f32 %v6172_v0, %v15329_v57  ;;  %v6177_v42 = vadd.f32 %v6173_v24, %v15341_v9 }
0x1578   :  { %v9994_v59 = vmul.f32 -1.442695, %v6157_v60  ;;  %v9995_v58 = vmul.f32 -1.442695, %v6158_v18  ;;  %v9996_v16 = vmul.f32 -1.442695, %v6176_v15 }
0x1579   :  { %v9997_v27 = vmul.f32 -1.442695, %v6177_v42 }
0x157a   :  { %14620 = vpow2.f32 %v9994_v59 }
0x157b   :  { %14622 = vpow2.f32 %v9995_v58 }
0x157c   :  { %14624 = vpow2.f32 %v9996_v16 }
0x157d   :  { %14626 = vpow2.f32 %v9997_v27 }
0x1583   :  { %v6148_v35 = vpop.f32.mrb[78].mxu0 }
0x1584   :  { %v14621_v49 = vpop.eup %14620  ;;  %v12272_v63 = vpop.f32.mrb[79].mxu0  ;;  %v6149_v11 = vadd.f32 %v16287_v30, %v6148_v35 }
0x1585   :  { %v14623_v54 = vpop.eup %14622  ;;  %v6165_v47 = vadd.f32 1.0, %v14621_v49 }
0x1586   :  { %v14625_v61 = vpop.eup %14624  ;;  %v6166_v1 = vadd.f32 1.0, %v14623_v54  ;;  %v6191_v10 = vrot.slane %v6149_v11, 5  ;;  %v6192_v55 = vrot.slane %v6149_v11, 6 }
0x1587   :  { %v14627_v41 = vpop.eup %14626  ;;  %14628 = vrcp.f32 %v6165_v47  ;;  %v6184_v45 = vadd.f32 1.0, %v14625_v61 }
0x1588   :  { %14630 = vrcp.f32 %v6166_v1  ;;  %v6185_v31 = vadd.f32 1.0, %v14627_v41 }
0x1589   :  { %14632 = vrcp.f32 %v6184_v45 }
0x158a   :  { %14634 = vrcp.f32 %v6185_v31 }
0x1591   :  { %v14629_v17 = vpop.eup %14628 }
0x1592   :  { %v14631_v5 = vpop.eup %14630  ;;  %v6195_v6 = vmul.f32 %v14629_v17, %v6191_v10 }
0x1593   :  { %v14633_v14 = vpop.eup %14632  ;;  %v6196_v21 = vmul.f32 %v14631_v5, %v6192_v55 }
0x1594   :  { %v14635_v38 = vpop.eup %14634  ;;  %v6197_v22 = vadd.f32 %v6195_v6, %v15356_v34  ;;  %v6209_v12 = vmul.f32 %v14633_v14, %v6205_v50  ;;  %v6201_v46 = vsub.f32 1.0, %v14633_v14 }
0x1595   :  { %v6198_v0 = vadd.f32 %v6196_v21, %v15362_v48  ;;  %v6210_v24 = vmul.f32 %v14635_v38, %v6206_v37  ;;  %v6202_v60 = vsub.f32 1.0, %v14635_v38 }
0x1596   :  { %14636 = vtanh.f32 %v6197_v22 }
0x1597   :  { %14638 = vtanh.f32 %v6198_v0 }
0x15a0   :  { %v14637_v51 = vpop.eup %14636 }
0x15a1   :  { %v14639_v18 = vpop.eup %14638  ;;  %v6203_v15 = vmul.f32 %v14637_v51, %v6201_v46 }
0x15a2   :  { %v6204_v25 = vmul.f32 %v14639_v18, %v6202_v60 }
0x15a3   :  { %v16343_v42 = vadd.f32 %v6209_v12, %v6203_v15 }
0x15a4   :  { %v16345_v59 = vadd.f32 %v6210_v24, %v6204_v25 }
0x15a5   :  { %v6215_v2 = vrot.slane %v16343_v42, 3  ;;  %v6483_v25 = vrot.slane %v16343_v42, 7 }
0x15a6   :  { %v6216_v58 = vrot.slane %v16345_v59, 2 }
0x15a8   :  { %v6217_v16 = vsel %vm959_vm11, %v6216_v58, %v6215_v2 }
0x15a9   :  { %12290 = vmatmul.mubr.msk.f32.vlgmr.msra.gmra.mrb[72].mxu1 %vm288_vm3, %v6217_v16  ;;  %12309 = vmatmul.mubr.msk.f32.vlgmr.msra.gmra.mrb[80].mxu0 %vm288_vm3, %v6217_v16 }
0x15aa   :  { %13800 = vmatpush3.bf16.msra.mxu1 %v15214_v23  ;;  %12327 = vmatprep.mubr.msk.f32.mxu1 %vm14910_vm10, %v14911_v20 }
0x15ab   :  { %13801 = vmatprep.subr.bf16.mxu1 %v14909_v33  ;;  %13812 = vmatpush3.bf16.msra.mxu0 %v15101_v44 }
0x15ac   :  { %13813 = vmatprep.subr.bf16.mxu0 %v14909_v33  ;;  %12346 = vmatprep.mubr.msk.f32.mxu0 %vm14910_vm10, %v14911_v20 }
0x15ae   :  { %13803 = vmatpush3.bf16.msra.mxu1 %v15238_v29 }
0x15af   :  { %13804 = vmatprep.subr.bf16.mxu1 %v14909_v33  ;;  %13815 = vmatpush3.bf16.msra.mxu0 %v15134_v62 }
0x15b0   :  { %13816 = vmatprep.subr.bf16.mxu0 %v14909_v33 }
0x15b2   :  { %13806 = vmatpush3.bf16.msra.mxu1 %v15264_v36 }
0x15b3   :  { %13807 = vmatprep.subr.bf16.mxu1 %v14909_v33  ;;  %13818 = vmatpush3.bf16.msra.mxu0 %v15166_v7 }
0x15b4   :  { %13819 = vmatprep.subr.bf16.mxu0 %v14909_v33 }
0x15b6   :  { %13809 = vmatpush3.bf16.msra.mxu1 %v15281_v40 }
0x15b7   :  { %13822 = vmatprep.subr.bf16.mxu1 %v14909_v33  ;;  %13821 = vmatpush3.bf16.msra.mxu0 %v15182_v13 }
0x15b8   :  { %13834 = vmatprep.subr.bf16.mxu0 %v14909_v33 }
0x15b9   :  { %12328 = vmatmul.mubr.msk.f32.vlgmr.msra.gmra.mrb[74].mxu1 %vm288_vm3, %v6217_v16  ;;  %v6484_v16 = vrot.slane %v16345_v59, 7 }
0x15ba   :  { %13824 = vmatpush3.bf16.msra.mxu1 %v15201_v19  ;;  %12365 = vmatprep.mubr.msk.f32.mxu1 %vm14910_vm10, %v14911_v20 }
0x15bb   :  { %13825 = vmatprep.subr.bf16.mxu1 %v14909_v33 }
0x15be   :  { %13827 = vmatpush3.bf16.msra.mxu1 %v15226_v26 }
0x15bf   :  { %13828 = vmatprep.subr.bf16.mxu1 %v14909_v33 }
0x15c2   :  { %13830 = vmatpush3.bf16.msra.mxu1 %v15254_v32 }
0x15c3   :  { %13831 = vmatprep.subr.bf16.mxu1 %v14909_v33 }
0x15c6   :  { %13833 = vmatpush3.bf16.msra.mxu1 %v15277_v39 }
0x15c7   :  { %13846 = vmatprep.subr.bf16.mxu1 %v14909_v33 }
0x167c   :  { %v6286_v27 = vpop.f32.mrb[72].mxu1  ;;  %v6356_v35 = vpop.f32.mrb[80].mxu0 }
0x167d   :  { %v6431_v49 = vrot.slane %v6286_v27, 4  ;;  %v6432_v63 = vrot.slane %v6286_v27, 5  ;;  %v6450_v54 = vrot.slane %v6356_v35, 4  ;;  %v6451_v47 = vrot.slane %v6356_v35, 5  ;;  %v12291_v61 = vpop.f32.mrb[73].mxu1  ;;  %v12310_v1 = vpop.f32.mrb[81].mxu0 }
0x167f   :  { %v6435_v41 = vadd.f32 %v6431_v49, %v15327_v56  ;;  %v6436_v45 = vadd.f32 %v6432_v63, %v15339_v8  ;;  %v6454_v31 = vadd.f32 %v6450_v54, %v15329_v57  ;;  %v6455_v11 = vadd.f32 %v6451_v47, %v15341_v9 }
0x1681   :  { %v10001_v10 = vmul.f32 -1.442695, %v6435_v41  ;;  %v10002_v17 = vmul.f32 -1.442695, %v6436_v45  ;;  %v10003_v55 = vmul.f32 -1.442695, %v6454_v31 }
0x1682   :  { %v10004_v5 = vmul.f32 -1.442695, %v6455_v11 }
0x1683   :  { %14640 = vpow2.f32 %v10001_v10 }
0x1684   :  { %14642 = vpow2.f32 %v10002_v17 }
0x1685   :  { %14644 = vpow2.f32 %v10003_v55 }
0x1686   :  { %14646 = vpow2.f32 %v10004_v5 }
0x168c   :  { %v6426_v50 = vpop.f32.mrb[74].mxu1 }
0x168d   :  { %v14641_v6 = vpop.eup %14640  ;;  %v12329_v14 = vpop.f32.mrb[75].mxu1  ;;  %v6427_v46 = vadd.f32 %v16287_v30, %v6426_v50 }
0x168e   :  { %v14643_v37 = vpop.eup %14642  ;;  %v6443_v21 = vadd.f32 1.0, %v14641_v6 }
0x168f   :  { %v14645_v38 = vpop.eup %14644  ;;  %v6444_v22 = vadd.f32 1.0, %v14643_v37  ;;  %v6469_v51 = vrot.slane %v6427_v46, 4  ;;  %v6470_v18 = vrot.slane %v6427_v46, 5 }
0x1690   :  { %v14647_v12 = vpop.eup %14646  ;;  %14648 = vrcp.f32 %v6443_v21  ;;  %v6462_v0 = vadd.f32 1.0, %v14645_v38 }
0x1691   :  { %14650 = vrcp.f32 %v6444_v22  ;;  %v6463_v24 = vadd.f32 1.0, %v14647_v12 }
0x1692   :  { %14652 = vrcp.f32 %v6462_v0 }
0x1693   :  { %14654 = vrcp.f32 %v6463_v24 }
0x169a   :  { %v14649_v60 = vpop.eup %14648 }
0x169b   :  { %v14651_v15 = vpop.eup %14650  ;;  %v6473_v2 = vmul.f32 %v14649_v60, %v6469_v51 }
0x169c   :  { %v14653_v58 = vpop.eup %14652  ;;  %v6474_v27 = vmul.f32 %v14651_v15, %v6470_v18 }
0x169d   :  { %v14655_v35 = vpop.eup %14654  ;;  %v6475_v49 = vadd.f32 %v6473_v2, %v15356_v34  ;;  %v6487_v63 = vmul.f32 %v14653_v58, %v6483_v25  ;;  %v6479_v61 = vsub.f32 1.0, %v14653_v58 }
0x169e   :  { %v6476_v54 = vadd.f32 %v6474_v27, %v15362_v48  ;;  %v6488_v47 = vmul.f32 %v14655_v35, %v6484_v16  ;;  %v6480_v41 = vsub.f32 1.0, %v14655_v35 }
0x169f   :  { %14656 = vtanh.f32 %v6475_v49 }
0x16a0   :  { %14658 = vtanh.f32 %v6476_v54 }
0x16a9   :  { %v14657_v1 = vpop.eup %14656 }
0x16aa   :  { %v14659_v45 = vpop.eup %14658  ;;  %v6481_v31 = vmul.f32 %v14657_v1, %v6479_v61 }
0x16ab   :  { %v6482_v42 = vmul.f32 %v14659_v45, %v6480_v41 }
0x16ac   :  { %v16392_v11 = vadd.f32 %v6487_v63, %v6481_v31 }
0x16ad   :  { %v16394_v10 = vadd.f32 %v6488_v47, %v6482_v42 }
0x16ae   :  { %v6493_v59 = vrot.slane %v16392_v11, 4  ;;  %v6761_v42 = vrot.slane %v16392_v11, 7 }
0x16af   :  { %v6494_v17 = vrot.slane %v16394_v10, 3 }
0x16b1   :  { %v6495_v55 = vsel %vm959_vm11, %v6494_v17, %v6493_v59 }
0x16b2   :  { %12347 = vmatmul.mubr.msk.f32.vlgmr.msra.gmra.mrb[82].mxu0 %vm288_vm3, %v6495_v55  ;;  %12366 = vmatmul.mubr.msk.f32.vlgmr.msra.gmra.mrb[76].mxu1 %vm288_vm3, %v6495_v55 }
0x16b3   :  { %13836 = vmatpush3.bf16.msra.mxu0 %v15214_v23  ;;  %12384 = vmatprep.mubr.msk.f32.mxu0 %vm14910_vm10, %v14911_v20 }
0x16b4   :  { %13837 = vmatprep.subr.bf16.mxu0 %v14909_v33  ;;  %13848 = vmatpush3.bf16.msra.mxu1 %v15101_v44 }
0x16b5   :  { %13849 = vmatprep.subr.bf16.mxu1 %v14909_v33  ;;  %12403 = vmatprep.mubr.msk.f32.mxu1 %vm14910_vm10, %v14911_v20 }
0x16b7   :  { %13839 = vmatpush3.bf16.msra.mxu0 %v15238_v29 }
0x16b8   :  { %13840 = vmatprep.subr.bf16.mxu0 %v14909_v33  ;;  %13851 = vmatpush3.bf16.msra.mxu1 %v15134_v62 }
0x16b9   :  { %13852 = vmatprep.subr.bf16.mxu1 %v14909_v33 }
0x16bb   :  { %13842 = vmatpush3.bf16.msra.mxu0 %v15264_v36 }
0x16bc   :  { %13843 = vmatprep.subr.bf16.mxu0 %v14909_v33  ;;  %13854 = vmatpush3.bf16.msra.mxu1 %v15166_v7 }
0x16bd   :  { %13855 = vmatprep.subr.bf16.mxu1 %v14909_v33 }
0x16bf   :  { %13845 = vmatpush3.bf16.msra.mxu0 %v15281_v40 }
0x16c0   :  { %13858 = vmatprep.subr.bf16.mxu0 %v14909_v33  ;;  %13857 = vmatpush3.bf16.msra.mxu1 %v15182_v13 }
0x16c1   :  { %13870 = vmatprep.subr.bf16.mxu1 %v14909_v33 }
0x16c2   :  { %12385 = vmatmul.mubr.msk.f32.vlgmr.msra.gmra.mrb[84].mxu0 %vm288_vm3, %v6495_v55  ;;  %v6762_v55 = vrot.slane %v16394_v10, 7 }
0x16c3   :  { %13860 = vmatpush3.bf16.msra.mxu0 %v15201_v19  ;;  %12422 = vmatprep.mubr.msk.f32.mxu0 %vm14910_vm10, %v14911_v20 }
0x16c4   :  { %13861 = vmatprep.subr.bf16.mxu0 %v14909_v33 }
0x16c7   :  { %13863 = vmatpush3.bf16.msra.mxu0 %v15226_v26 }
0x16c8   :  { %13864 = vmatprep.subr.bf16.mxu0 %v14909_v33 }
0x16cb   :  { %13866 = vmatpush3.bf16.msra.mxu0 %v15254_v32 }
0x16cc   :  { %13867 = vmatprep.subr.bf16.mxu0 %v14909_v33 }
0x16cf   :  { %13869 = vmatpush3.bf16.msra.mxu0 %v15277_v39 }
0x16d0   :  { %13882 = vmatprep.subr.bf16.mxu0 %v14909_v33 }
0x1785   :  { %v6564_v5 = vpop.f32.mrb[82].mxu0  ;;  %v6634_v50 = vpop.f32.mrb[76].mxu1 }
0x1786   :  { %v6709_v6 = vrot.slane %v6564_v5, 3  ;;  %v6710_v14 = vrot.slane %v6564_v5, 4  ;;  %v6728_v37 = vrot.slane %v6634_v50, 3  ;;  %v6729_v21 = vrot.slane %v6634_v50, 4  ;;  %v12348_v38 = vpop.f32.mrb[83].mxu0  ;;  %v12367_v22 = vpop.f32.mrb[77].mxu1 }
0x1788   :  { %v6713_v12 = vadd.f32 %v6709_v6, %v15327_v56  ;;  %v6714_v0 = vadd.f32 %v6710_v14, %v15339_v8  ;;  %v6732_v24 = vadd.f32 %v6728_v37, %v15329_v57  ;;  %v6733_v46 = vadd.f32 %v6729_v21, %v15341_v9 }
0x178a   :  { %v10008_v51 = vmul.f32 -1.442695, %v6713_v12  ;;  %v10009_v60 = vmul.f32 -1.442695, %v6714_v0  ;;  %v10010_v18 = vmul.f32 -1.442695, %v6732_v24 }
0x178b   :  { %v10011_v15 = vmul.f32 -1.442695, %v6733_v46 }
0x178c   :  { %14660 = vpow2.f32 %v10008_v51 }
0x178d   :  { %14662 = vpow2.f32 %v10009_v60 }
0x178e   :  { %14664 = vpow2.f32 %v10010_v18 }
0x178f   :  { %14666 = vpow2.f32 %v10011_v15 }
0x1795   :  { %v6704_v25 = vpop.f32.mrb[84].mxu0 }
0x1796   :  { %v14661_v2 = vpop.eup %14660  ;;  %v12386_v58 = vpop.f32.mrb[85].mxu0  ;;  %v6705_v61 = vadd.f32 %v16287_v30, %v6704_v25 }
0x1797   :  { %v14663_v16 = vpop.eup %14662  ;;  %v6721_v27 = vadd.f32 1.0, %v14661_v2 }
0x1798   :  { %v14665_v35 = vpop.eup %14664  ;;  %v6722_v49 = vadd.f32 1.0, %v14663_v16  ;;  %v6747_v1 = vrot.slane %v6705_v61, 3  ;;  %v6748_v45 = vrot.slane %v6705_v61, 4 }
0x1799   :  { %v14667_v63 = vpop.eup %14666  ;;  %14668 = vrcp.f32 %v6721_v27  ;;  %v6740_v54 = vadd.f32 1.0, %v14665_v35 }
0x179a   :  { %14670 = vrcp.f32 %v6722_v49  ;;  %v6741_v47 = vadd.f32 1.0, %v14667_v63 }
0x179b   :  { %14672 = vrcp.f32 %v6740_v54 }
0x179c   :  { %14674 = vrcp.f32 %v6741_v47 }
0x17a3   :  { %v14669_v41 = vpop.eup %14668 }
0x17a4   :  { %v14671_v31 = vpop.eup %14670  ;;  %v6751_v59 = vmul.f32 %v14669_v41, %v6747_v1 }
0x17a5   :  { %v14673_v17 = vpop.eup %14672  ;;  %v6752_v5 = vmul.f32 %v14671_v31, %v6748_v45 }
0x17a6   :  { %v14675_v50 = vpop.eup %14674  ;;  %v6753_v6 = vadd.f32 %v6751_v59, %v15356_v34  ;;  %v6765_v14 = vmul.f32 %v14673_v17, %v6761_v42  ;;  %v6757_v38 = vsub.f32 1.0, %v14673_v17 }
0x17a7   :  { %v6754_v37 = vadd.f32 %v6752_v5, %v15362_v48  ;;  %v6766_v21 = vmul.f32 %v14675_v50, %v6762_v55  ;;  %v6758_v12 = vsub.f32 1.0, %v14675_v50 }
0x17a8   :  { %14676 = vtanh.f32 %v6753_v6 }
0x17a9   :  { %14678 = vtanh.f32 %v6754_v37 }
0x17b2   :  { %v14677_v22 = vpop.eup %14676 }
0x17b3   :  { %v14679_v0 = vpop.eup %14678  ;;  %v6759_v24 = vmul.f32 %v14677_v22, %v6757_v38 }
0x17b4   :  { %v6760_v11 = vmul.f32 %v14679_v0, %v6758_v12 }
0x17b5   :  { %v16441_v46 = vadd.f32 %v6765_v14, %v6759_v24 }
0x17b6   :  { %v16443_v51 = vadd.f32 %v6766_v21, %v6760_v11 }
0x17b7   :  { %v6771_v10 = vrot.slane %v16441_v46, 5  ;;  %v7039_v11 = vrot.slane %v16441_v46, 7 }
0x17b8   :  { %v6772_v60 = vrot.slane %v16443_v51, 4 }
0x17ba   :  { %v6773_v18 = vsel %vm959_vm11, %v6772_v60, %v6771_v10 }
0x17bb   :  { %12404 = vmatmul.mubr.msk.f32.vlgmr.msra.gmra.mrb[78].mxu1 %vm288_vm3, %v6773_v18  ;;  %12423 = vmatmul.mubr.msk.f32.vlgmr.msra.gmra.mrb[86].mxu0 %vm288_vm3, %v6773_v18 }
0x17bc   :  { %13872 = vmatpush3.bf16.msra.mxu1 %v15214_v23  ;;  %12441 = vmatprep.mubr.msk.f32.mxu1 %vm14910_vm10, %v14911_v20 }
0x17bd   :  { %13873 = vmatprep.subr.bf16.mxu1 %v14909_v33  ;;  %13884 = vmatpush3.bf16.msra.mxu0 %v15101_v44 }
0x17be   :  { %13885 = vmatprep.subr.bf16.mxu0 %v14909_v33  ;;  %12460 = vmatprep.mubr.msk.f32.mxu0 %vm14910_vm10, %v14911_v20 }
0x17c0   :  { %13875 = vmatpush3.bf16.msra.mxu1 %v15238_v29 }
0x17c1   :  { %13876 = vmatprep.subr.bf16.mxu1 %v14909_v33  ;;  %13887 = vmatpush3.bf16.msra.mxu0 %v15134_v62 }
0x17c2   :  { %13888 = vmatprep.subr.bf16.mxu0 %v14909_v33 }
0x17c4   :  { %13878 = vmatpush3.bf16.msra.mxu1 %v15264_v36 }
0x17c5   :  { %13879 = vmatprep.subr.bf16.mxu1 %v14909_v33  ;;  %13890 = vmatpush3.bf16.msra.mxu0 %v15166_v7 }
0x17c6   :  { %13891 = vmatprep.subr.bf16.mxu0 %v14909_v33 }
0x17c8   :  { %13881 = vmatpush3.bf16.msra.mxu1 %v15281_v40 }
0x17c9   :  { %13894 = vmatprep.subr.bf16.mxu1 %v14909_v33  ;;  %13893 = vmatpush3.bf16.msra.mxu0 %v15182_v13 }
0x17ca   :  { %13906 = vmatprep.subr.bf16.mxu0 %v14909_v33 }
0x17cb   :  { %12442 = vmatmul.mubr.msk.f32.vlgmr.msra.gmra.mrb[80].mxu1 %vm288_vm3, %v6773_v18  ;;  %v7040_v18 = vrot.slane %v16443_v51, 7 }
0x17cc   :  { %13896 = vmatpush3.bf16.msra.mxu1 %v15201_v19  ;;  %12479 = vmatprep.mubr.msk.f32.mxu1 %vm14910_vm10, %v14911_v20 }
0x17cd   :  { %13897 = vmatprep.subr.bf16.mxu1 %v14909_v33 }
0x17d0   :  { %13899 = vmatpush3.bf16.msra.mxu1 %v15226_v26 }
0x17d1   :  { %13900 = vmatprep.subr.bf16.mxu1 %v14909_v33 }
0x17d4   :  { %13902 = vmatpush3.bf16.msra.mxu1 %v15254_v32 }
0x17d5   :  { %13903 = vmatprep.subr.bf16.mxu1 %v14909_v33 }
0x17d8   :  { %13905 = vmatpush3.bf16.msra.mxu1 %v15277_v39 }
0x17d9   :  { %13918 = vmatprep.subr.bf16.mxu1 %v14909_v33 }
0x188e   :  { %v6842_v15 = vpop.f32.mrb[78].mxu1  ;;  %v6912_v25 = vpop.f32.mrb[86].mxu0 }
0x188f   :  { %v6987_v2 = vrot.slane %v6842_v15, 2  ;;  %v6988_v58 = vrot.slane %v6842_v15, 3  ;;  %v7006_v16 = vrot.slane %v6912_v25, 2  ;;  %v7007_v27 = vrot.slane %v6912_v25, 3  ;;  %v12405_v35 = vpop.f32.mrb[79].mxu1  ;;  %v12424_v49 = vpop.f32.mrb[87].mxu0 }
0x1891   :  { %v6991_v63 = vadd.f32 %v6987_v2, %v15327_v56  ;;  %v6992_v54 = vadd.f32 %v6988_v58, %v15339_v8  ;;  %v7010_v47 = vadd.f32 %v7006_v16, %v15329_v57  ;;  %v7011_v61 = vadd.f32 %v7007_v27, %v15341_v9 }
0x1893   :  { %v10015_v1 = vmul.f32 -1.442695, %v6991_v63  ;;  %v10016_v41 = vmul.f32 -1.442695, %v6992_v54  ;;  %v10017_v45 = vmul.f32 -1.442695, %v7010_v47 }
0x1894   :  { %v10018_v31 = vmul.f32 -1.442695, %v7011_v61 }
0x1895   :  { %14680 = vpow2.f32 %v10015_v1 }
0x1896   :  { %14682 = vpow2.f32 %v10016_v41 }
0x1897   :  { %14684 = vpow2.f32 %v10017_v45 }
0x1898   :  { %14686 = vpow2.f32 %v10018_v31 }
0x189e   :  { %v6982_v42 = vpop.f32.mrb[80].mxu1 }
0x189f   :  { %v14681_v59 = vpop.eup %14680  ;;  %v12443_v17 = vpop.f32.mrb[81].mxu1  ;;  %v6983_v38 = vadd.f32 %v16287_v30, %v6982_v42 }
0x18a0   :  { %v14683_v55 = vpop.eup %14682  ;;  %v6999_v5 = vadd.f32 1.0, %v14681_v59 }
0x18a1   :  { %v14685_v50 = vpop.eup %14684  ;;  %v7000_v6 = vadd.f32 1.0, %v14683_v55  ;;  %v7025_v22 = vrot.slane %v6983_v38, 2  ;;  %v7026_v0 = vrot.slane %v6983_v38, 3 }
0x18a2   :  { %v14687_v14 = vpop.eup %14686  ;;  %14688 = vrcp.f32 %v6999_v5  ;;  %v7018_v37 = vadd.f32 1.0, %v14685_v50 }
0x18a3   :  { %14690 = vrcp.f32 %v7000_v6  ;;  %v7019_v21 = vadd.f32 1.0, %v14687_v14 }
0x18a4   :  { %14692 = vrcp.f32 %v7018_v37 }
0x18a5   :  { %14694 = vrcp.f32 %v7019_v21 }
0x18ac   :  { %v14689_v12 = vpop.eup %14688 }
0x18ad   :  { %v14691_v24 = vpop.eup %14690  ;;  %v7029_v10 = vmul.f32 %v14689_v12, %v7025_v22 }
0x18ae   :  { %v14693_v60 = vpop.eup %14692  ;;  %v7030_v15 = vmul.f32 %v14691_v24, %v7026_v0 }
0x18af   :  { %v14695_v25 = vpop.eup %14694  ;;  %v7031_v2 = vadd.f32 %v7029_v10, %v15356_v34  ;;  %v7043_v58 = vmul.f32 %v14693_v60, %v7039_v11  ;;  %v7035_v35 = vsub.f32 1.0, %v14693_v60 }
0x18b0   :  { %v7032_v16 = vadd.f32 %v7030_v15, %v15362_v48  ;;  %v7044_v27 = vmul.f32 %v14695_v25, %v7040_v18  ;;  %v7036_v63 = vsub.f32 1.0, %v14695_v25 }
0x18b1   :  { %14696 = vtanh.f32 %v7031_v2 }
0x18b2   :  { %14698 = vtanh.f32 %v7032_v16 }
0x18bb   :  { %v14697_v49 = vpop.eup %14696 }
0x18bc   :  { %v14699_v54 = vpop.eup %14698  ;;  %v7037_v47 = vmul.f32 %v14697_v49, %v7035_v35 }
0x18bd   :  { %v7038_v46 = vmul.f32 %v14699_v54, %v7036_v63 }
0x18be   :  { %v16490_v61 = vadd.f32 %v7043_v58, %v7037_v47 }
0x18bf   :  { %v16492_v1 = vadd.f32 %v7044_v27, %v7038_v46 }
0x18c0   :  { %v7049_v51 = vrot.slane %v16490_v61, 6  ;;  %v7317_v49 = vrot.slane %v16490_v61, 7 }
0x18c1   :  { %v7050_v41 = vrot.slane %v16492_v1, 5  ;;  %v7318_v47 = vrot.slane %v16492_v1, 7 }
0x18c3   :  { %v7051_v45 = vsel %vm959_vm11, %v7050_v41, %v7049_v51 }
0x18c4   :  { %12461 = vmatmul.mubr.msk.f32.vlgmr.msra.gmra.mrb[88].mxu0 %vm288_vm3, %v7051_v45  ;;  %12480 = vmatmul.mubr.msk.f32.vlgmr.msra.gmra.mrb[82].mxu1 %vm288_vm3, %v7051_v45 }
0x18c5   :  { %13908 = vmatpush3.bf16.msra.mxu0 %v15214_v23  ;;  %12498 = vmatprep.mubr.msk.f32.mxu0 %vm14910_vm10, %v14911_v20 }
0x18c6   :  { %13909 = vmatprep.subr.bf16.mxu0 %v14909_v33  ;;  %13920 = vmatpush3.bf16.msra.mxu1 %v15101_v44 }
0x18c7   :  { %13921 = vmatprep.subr.bf16.mxu1 %v14909_v33  ;;  %12517 = vmatprep.mubr.msk.f32.mxu1 %vm14910_vm10, %v14911_v20 }
0x18c9   :  { %13911 = vmatpush3.bf16.msra.mxu0 %v15238_v29 }
0x18ca   :  { %13912 = vmatprep.subr.bf16.mxu0 %v14909_v33  ;;  %13923 = vmatpush3.bf16.msra.mxu1 %v15134_v62 }
0x18cb   :  { %13924 = vmatprep.subr.bf16.mxu1 %v14909_v33 }
0x18cd   :  { %13914 = vmatpush3.bf16.msra.mxu0 %v15264_v36 }
0x18ce   :  { %13915 = vmatprep.subr.bf16.mxu0 %v14909_v33  ;;  %13926 = vmatpush3.bf16.msra.mxu1 %v15166_v7 }
0x18cf   :  { %13927 = vmatprep.subr.bf16.mxu1 %v14909_v33 }
0x18d1   :  { %13917 = vmatpush3.bf16.msra.mxu0 %v15281_v40 }
0x18d2   :  { %13930 = vmatprep.subr.bf16.mxu0 %v14909_v33  ;;  %13929 = vmatpush3.bf16.msra.mxu1 %v15182_v13 }
0x18d3   :  { %13942 = vmatprep.subr.bf16.mxu1 %v14909_v33 }
0x18d4   :  { %12499 = vmatmul.mubr.msk.f32.vlgmr.msra.gmra.mrb[90].mxu0 %vm288_vm3, %v7051_v45 }
0x18d5   :  { %13932 = vmatpush3.bf16.msra.mxu0 %v15201_v19  ;;  %12536 = vmatprep.mubr.msk.f32.mxu0 %vm14910_vm10, %v14911_v20 }
0x18d6   :  { %13933 = vmatprep.subr.bf16.mxu0 %v14909_v33 }
0x18d9   :  { %13935 = vmatpush3.bf16.msra.mxu0 %v15226_v26 }
0x18da   :  { %13936 = vmatprep.subr.bf16.mxu0 %v14909_v33 }
0x18dd   :  { %13938 = vmatpush3.bf16.msra.mxu0 %v15254_v32 }
0x18de   :  { %13939 = vmatprep.subr.bf16.mxu0 %v14909_v33 }
0x18e1   :  { %13941 = vmatpush3.bf16.msra.mxu0 %v15277_v39 }
0x18e2   :  { %13954 = vmatprep.subr.bf16.mxu0 %v14909_v33 }
0x1997   :  { %v7120_v31 = vpop.f32.mrb[88].mxu0  ;;  %v7190_v42 = vpop.f32.mrb[82].mxu1 }
0x1998   :  { %v7265_v59 = vrot.slane %v7120_v31, 1  ;;  %v7266_v17 = vrot.slane %v7120_v31, 2  ;;  %v7284_v55 = vrot.slane %v7190_v42, 1  ;;  %v7285_v5 = vrot.slane %v7190_v42, 2  ;;  %v12462_v50 = vpop.f32.mrb[89].mxu0  ;;  %v12481_v6 = vpop.f32.mrb[83].mxu1 }
0x199a   :  { %v7269_v14 = vadd.f32 %v7265_v59, %v15327_v56  ;;  %v7270_v37 = vadd.f32 %v7266_v17, %v15339_v8  ;;  %v7288_v21 = vadd.f32 %v7284_v55, %v15329_v57  ;;  %v7289_v38 = vadd.f32 %v7285_v5, %v15341_v9 }
0x199c   :  { %v10022_v22 = vmul.f32 -1.442695, %v7269_v14  ;;  %v10023_v12 = vmul.f32 -1.442695, %v7270_v37  ;;  %v10024_v0 = vmul.f32 -1.442695, %v7288_v21 }
0x199d   :  { %v10025_v24 = vmul.f32 -1.442695, %v7289_v38 }
0x199e   :  { %14700 = vpow2.f32 %v10022_v22 }
0x199f   :  { %14702 = vpow2.f32 %v10023_v12 }
0x19a0   :  { %14704 = vpow2.f32 %v10024_v0 }
0x19a1   :  { %14706 = vpow2.f32 %v10025_v24 }
0x19a7   :  { %v7260_v11 = vpop.f32.mrb[90].mxu0 }
0x19a8   :  { %v14701_v10 = vpop.eup %14700  ;;  %v12500_v60 = vpop.f32.mrb[91].mxu0  ;;  %v7261_v2 = vadd.f32 %v16287_v30, %v7260_v11 }
0x19a9   :  { %v14703_v18 = vpop.eup %14702  ;;  %v7277_v15 = vadd.f32 1.0, %v14701_v10 }
0x19aa   :  { %v14705_v56 = vpop.eup %14704  ;;  %v7278_v25 = vadd.f32 1.0, %v14703_v18  ;;  %v7303_v58 = vrot.slane %v7261_v2, 1  ;;  %v7304_v27 = vrot.slane %v7261_v2, 2 }
0x19ab   :  { %v14707_v8 = vpop.eup %14706  ;;  %14708 = vrcp.f32 %v7277_v15  ;;  %v7296_v57 = vadd.f32 1.0, %v14705_v56 }
0x19ac   :  { %14710 = vrcp.f32 %v7278_v25  ;;  %v7297_v9 = vadd.f32 1.0, %v14707_v8 }
0x19ad   :  { %14712 = vrcp.f32 %v7296_v57 }
0x19ae   :  { %14714 = vrcp.f32 %v7297_v9 }
0x19b5   :  { %v14709_v16 = vpop.eup %14708 }
0x19b6   :  { %v14711_v35 = vpop.eup %14710  ;;  %v7307_v63 = vmul.f32 %v14709_v16, %v7303_v58 }
0x19b7   :  { %v14713_v54 = vpop.eup %14712  ;;  %v7308_v46 = vmul.f32 %v14711_v35, %v7304_v27 }
0x19b8   :  { %v14715_v51 = vpop.eup %14714  ;;  %v7309_v41 = vadd.f32 %v7307_v63, %v15356_v34  ;;  %v7321_v45 = vmul.f32 %v14713_v54, %v7317_v49  ;;  %v7313_v30 = vsub.f32 1.0, %v14713_v54  ;;  %v16588_v63 = vld [vmem:[%s17036_s11] ss:$0 sm:$0xff] }
0x19b9   :  { %v7310_v31 = vadd.f32 %v7308_v46, %v15362_v48  ;;  %v7322_v42 = vmul.f32 %v14715_v51, %v7318_v47  ;;  %v7314_v17 = vsub.f32 1.0, %v14715_v51 }
0x19ba   :  { %14716 = vtanh.f32 %v7309_v41 }
0x19bb   :  { %14718 = vtanh.f32 %v7310_v31 }
0x19c4   :  { %v14717_v59 = vpop.eup %14716 }
0x19c5   :  { %v14719_v55 = vpop.eup %14718  ;;  %v7315_v5 = vmul.f32 %v14717_v59, %v7313_v30 }
0x19c6   :  { %v7316_v61 = vmul.f32 %v14719_v55, %v7314_v17 }
0x19c7   :  { %v16539_v50 = vadd.f32 %v7321_v45, %v7315_v5 }
0x19c8   :  { %v16541_v6 = vadd.f32 %v7322_v42, %v7316_v61 }
0x19c9   :  { %v7327_v1 = vrot.slane %v16539_v50, 7 }
0x19ca   :  { %v7328_v34 = vrot.slane %v16541_v6, 6  ;;  %v7592_v45 = vrot.slane %v16541_v6, 7 }
0x19cc   :  { %v7329_v48 = vsel %vm959_vm11, %v7328_v34, %v7327_v1 }
0x19cd   :  { %12518 = vmatmul.mubr.msk.f32.vlgmr.msra.gmra.mrb[84].mxu1 %vm288_vm3, %v7329_v48  ;;  %12537 = vmatmul.mubr.msk.f32.vlgmr.msra.gmra.mrb[92].mxu0 %vm288_vm3, %v7329_v48 }
0x19ce   :  { %13944 = vmatpush3.bf16.msra.mxu1 %v15214_v23  ;;  %12555 = vmatprep.mubr.msk.f32.mxu1 %vm14910_vm10, %v14911_v20 }
0x19cf   :  { %13945 = vmatprep.subr.bf16.mxu1 %v14909_v33  ;;  %13956 = vmatpush3.bf16.msra.mxu0 %v15101_v44 }
0x19d0   :  { %13957 = vmatprep.subr.bf16.mxu0 %v14909_v33  ;;  %12574 = vmatprep.mubr.msk.f32.mxu0 %vm14910_vm10, %v14911_v20 }
0x19d2   :  { %13947 = vmatpush3.bf16.msra.mxu1 %v15238_v29 }
0x19d3   :  { %13948 = vmatprep.subr.bf16.mxu1 %v14909_v33  ;;  %13959 = vmatpush3.bf16.msra.mxu0 %v15134_v62 }
0x19d4   :  { %13960 = vmatprep.subr.bf16.mxu0 %v14909_v33 }
0x19d6   :  { %13950 = vmatpush3.bf16.msra.mxu1 %v15264_v36 }
0x19d7   :  { %13951 = vmatprep.subr.bf16.mxu1 %v14909_v33  ;;  %13962 = vmatpush3.bf16.msra.mxu0 %v15166_v7 }
0x19d8   :  { %13963 = vmatprep.subr.bf16.mxu0 %v14909_v33 }
0x19da   :  { %13953 = vmatpush3.bf16.msra.mxu1 %v15281_v40 }
0x19db   :  { %13966 = vmatprep.subr.bf16.mxu1 %v14909_v33  ;;  %13965 = vmatpush3.bf16.msra.mxu0 %v15182_v13 }
0x19dc   :  { %13978 = vmatprep.subr.bf16.mxu0 %v14909_v33 }
0x19dd   :  { %12556 = vmatmul.mubr.msk.f32.vlgmr.msra.gmra.mrb[86].mxu1 %vm288_vm3, %v7329_v48 }
0x19de   :  { %13968 = vmatpush3.bf16.msra.mxu1 %v15201_v19  ;;  %12593 = vmatprep.mubr.msk.f32.mxu1 %vm14910_vm10, %v14911_v20 }
0x19df   :  { %13969 = vmatprep.subr.bf16.mxu1 %v14909_v33 }
0x19e2   :  { %13971 = vmatpush3.bf16.msra.mxu1 %v15226_v26 }
0x19e3   :  { %13972 = vmatprep.subr.bf16.mxu1 %v14909_v33 }
0x19e6   :  { %13974 = vmatpush3.bf16.msra.mxu1 %v15254_v32 }
0x19e7   :  { %13975 = vmatprep.subr.bf16.mxu1 %v14909_v33 }
0x19ea   :  { %13977 = vmatpush3.bf16.msra.mxu1 %v15277_v39 }
0x19eb   :  { %13990 = vmatprep.subr.bf16.mxu1 %v14909_v33 }
0x1aa0   :  { %v7398_v14 = vpop.f32.mrb[84].mxu1  ;;  %v7468_v37 = vpop.f32.mrb[92].mxu0 }
0x1aa1   :  { %v7543_v21 = vrot.slane %v7398_v14, 1  ;;  %v7546_v38 = vadd.f32 %v7398_v14, %v15323_v52  ;;  %v7561_v22 = vrot.slane %v7468_v37, 1  ;;  %v12519_v12 = vpop.f32.mrb[85].mxu1  ;;  %v12538_v0 = vpop.f32.mrb[93].mxu0  ;;  %v7564_v60 = vadd.f32 %v7468_v37, %v15325_v53 }
0x1aa3   :  { %v7547_v24 = vadd.f32 %v7543_v21, %v15335_v3  ;;  %v10029_v11 = vmul.f32 -1.442695, %v7546_v38  ;;  %v7565_v10 = vadd.f32 %v7561_v22, %v15337_v4  ;;  %v10031_v56 = vmul.f32 -1.442695, %v7564_v60 }
0x1aa5   :  { %14720 = vpow2.f32 %v10029_v11  ;;  %v10030_v18 = vmul.f32 -1.442695, %v7547_v24  ;;  %v10032_v15 = vmul.f32 -1.442695, %v7565_v10 }
0x1aa7   :  { %14722 = vpow2.f32 %v10030_v18 }
0x1aa8   :  { %14724 = vpow2.f32 %v10032_v15 }
0x1aa9   :  { %14726 = vpow2.f32 %v10031_v56 }
0x1aaf   :  { %v14721_v25 = vpop.eup %14720 }
0x1ab0   :  { %v7554_v8 = vadd.f32 1.0, %v14721_v25  ;;  %v7538_v57 = vpop.f32.mrb[86].mxu1 }
0x1ab1   :  { %v14723_v9 = vpop.eup %14722  ;;  %v12557_v2 = vpop.f32.mrb[87].mxu1  ;;  %v7539_v54 = vadd.f32 %v16588_v63, %v7538_v57 }
0x1ab2   :  { %v14725_v58 = vpop.eup %14724  ;;  %v7555_v16 = vadd.f32 1.0, %v14723_v9  ;;  %14728 = vrcp.f32 %v7554_v8 }
0x1ab3   :  { %v7573_v27 = vadd.f32 1.0, %v14725_v58  ;;  %v14727_v35 = vpop.eup %14726  ;;  %v7579_v46 = vrot.slane %v7539_v54, 1 }
0x1ab4   :  { %14730 = vrcp.f32 %v7555_v16  ;;  %v7572_v49 = vadd.f32 1.0, %v14727_v35 }
0x1ab5   :  { %14732 = vrcp.f32 %v7573_v27 }
0x1ab6   :  { %14734 = vrcp.f32 %v7572_v49 }
0x1abc   :  { %v14729_v47 = vpop.eup %14728 }
0x1abd   :  { %v7582_v51 = vmul.f32 %v14729_v47, %v7539_v54 }
0x1abe   :  { %v14731_v41 = vpop.eup %14730 }
0x1abf   :  { %v14733_v31 = vpop.eup %14732  ;;  %v7583_v42 = vmul.f32 %v14731_v41, %v7579_v46  ;;  %v7584_v30 = vadd.f32 %v7582_v51, %v15354_v28 }
0x1ac0   :  { %v7596_v59 = vmul.f32 %v14733_v31, %v7592_v45  ;;  %v14735_v55 = vpop.eup %14734  ;;  %v7589_v34 = vsub.f32 1.0, %v14733_v31 }
0x1ac1   :  { %v7585_v17 = vadd.f32 %v7583_v42, %v15360_v43  ;;  %14736 = vtanh.f32 %v7584_v30  ;;  %v7588_v5 = vsub.f32 1.0, %v14735_v55  ;;  %v7595_v14 = vmul.f32 %v14735_v55, %v7327_v1 }
0x1ac3   :  { %14738 = vtanh.f32 %v7585_v17 }
0x1acb   :  { %v14737_v61 = vpop.eup %14736 }
0x1acc   :  { %v7590_v48 = vmul.f32 %v14737_v61, %v7588_v5 }
0x1acd   :  { %v14739_v37 = vpop.eup %14738 }
0x1ace   :  { %v7591_v21 = vmul.f32 %v14739_v37, %v7589_v34  ;;  %v16596_v6 = vadd.f32 %v7595_v14, %v7590_v48 }
0x1ad0   :  { %v16598_v38 = vadd.f32 %v7596_v59, %v7591_v21  ;;  %v7865_v59 = vrot.slane %v16596_v6, 7 }
0x1ad2   :  { %v7601_v22 = vrot.slane %v16598_v38, 7 }
0x1ad4   :  { %v7602_v12 = vsel %vm959_vm11, %v7601_v22, %v16596_v6 }
0x1ad5   :  { %12575 = vmatmul.mubr.msk.f32.vlgmr.msra.gmra.mrb[94].mxu0 %vm288_vm3, %v7602_v12  ;;  %12594 = vmatmul.mubr.msk.f32.vlgmr.msra.gmra.mrb[88].mxu1 %vm288_vm3, %v7602_v12 }
0x1ad6   :  { %13980 = vmatpush3.bf16.msra.mxu0 %v15214_v23  ;;  %12612 = vmatprep.mubr.msk.f32.mxu0 %vm14910_vm10, %v14911_v20 }
0x1ad7   :  { %13981 = vmatprep.subr.bf16.mxu0 %v14909_v33  ;;  %13992 = vmatpush3.bf16.msra.mxu1 %v15101_v44 }
0x1ad8   :  { %13993 = vmatprep.subr.bf16.mxu1 %v14909_v33  ;;  %12631 = vmatprep.mubr.msk.f32.mxu1 %vm14910_vm10, %v14911_v20 }
0x1ada   :  { %13983 = vmatpush3.bf16.msra.mxu0 %v15238_v29 }
0x1adb   :  { %13984 = vmatprep.subr.bf16.mxu0 %v14909_v33  ;;  %13995 = vmatpush3.bf16.msra.mxu1 %v15134_v62 }
0x1adc   :  { %13996 = vmatprep.subr.bf16.mxu1 %v14909_v33 }
0x1ade   :  { %13986 = vmatpush3.bf16.msra.mxu0 %v15264_v36 }
0x1adf   :  { %13987 = vmatprep.subr.bf16.mxu0 %v14909_v33  ;;  %13998 = vmatpush3.bf16.msra.mxu1 %v15166_v7 }
0x1ae0   :  { %13999 = vmatprep.subr.bf16.mxu1 %v14909_v33 }
0x1ae2   :  { %13989 = vmatpush3.bf16.msra.mxu0 %v15281_v40 }
0x1ae3   :  { %14002 = vmatprep.subr.bf16.mxu0 %v14909_v33  ;;  %14001 = vmatpush3.bf16.msra.mxu1 %v15182_v13 }
0x1ae4   :  { %14014 = vmatprep.subr.bf16.mxu1 %v14909_v33 }
0x1ae5   :  { %12613 = vmatmul.mubr.msk.f32.vlgmr.msra.gmra.mrb[96].mxu0 %vm288_vm3, %v7602_v12 }
0x1ae6   :  { %14004 = vmatpush3.bf16.msra.mxu0 %v15201_v19  ;;  %12650 = vmatprep.mubr.msk.f32.mxu0 %vm14910_vm10, %v14911_v20 }
0x1ae7   :  { %14005 = vmatprep.subr.bf16.mxu0 %v14909_v33 }
0x1aea   :  { %14007 = vmatpush3.bf16.msra.mxu0 %v15226_v26 }
0x1aeb   :  { %14008 = vmatprep.subr.bf16.mxu0 %v14909_v33 }
0x1aee   :  { %14010 = vmatpush3.bf16.msra.mxu0 %v15254_v32 }
0x1aef   :  { %14011 = vmatprep.subr.bf16.mxu0 %v14909_v33 }
0x1af2   :  { %14013 = vmatpush3.bf16.msra.mxu0 %v15277_v39 }
0x1af3   :  { %14026 = vmatprep.subr.bf16.mxu0 %v14909_v33 }
0x1ba8   :  { %v7671_v50 = vpop.f32.mrb[94].mxu0  ;;  %v7741_v1 = vpop.f32.mrb[88].mxu1 }
0x1ba9   :  { %v7816_v0 = vrot.slane %v7671_v50, 7  ;;  %v7820_v24 = vadd.f32 %v7671_v50, %v15335_v3  ;;  %v7834_v11 = vrot.slane %v7741_v1, 7  ;;  %v12576_v10 = vpop.f32.mrb[95].mxu0  ;;  %v12595_v60 = vpop.f32.mrb[89].mxu1  ;;  %v7838_v25 = vadd.f32 %v7741_v1, %v15337_v4 }
0x1bab   :  { %v7819_v18 = vadd.f32 %v7816_v0, %v15323_v52  ;;  %v10037_v15 = vmul.f32 -1.442695, %v7820_v24  ;;  %v7837_v56 = vadd.f32 %v7834_v11, %v15325_v53  ;;  %v10039_v9 = vmul.f32 -1.442695, %v7838_v25 }
0x1bad   :  { %v10036_v8 = vmul.f32 -1.442695, %v7819_v18  ;;  %14740 = vpow2.f32 %v10037_v15  ;;  %v10038_v57 = vmul.f32 -1.442695, %v7837_v56 }
0x1baf   :  { %14742 = vpow2.f32 %v10036_v8 }
0x1bb0   :  { %14744 = vpow2.f32 %v10038_v57 }
0x1bb1   :  { %14746 = vpow2.f32 %v10039_v9 }
0x1bb7   :  { %v14741_v2 = vpop.eup %14740 }
0x1bb8   :  { %v7828_v58 = vadd.f32 1.0, %v14741_v2  ;;  %v7811_v16 = vpop.f32.mrb[96].mxu0 }
0x1bb9   :  { %v14743_v27 = vpop.eup %14742  ;;  %v12614_v35 = vpop.f32.mrb[97].mxu0  ;;  %v7812_v41 = vadd.f32 %v16588_v63, %v7811_v16 }
0x1bba   :  { %v14745_v49 = vpop.eup %14744  ;;  %v7827_v54 = vadd.f32 1.0, %v14743_v27  ;;  %14748 = vrcp.f32 %v7828_v58 }
0x1bbb   :  { %v7845_v47 = vadd.f32 1.0, %v14745_v49  ;;  %v14747_v46 = vpop.eup %14746  ;;  %v7852_v31 = vrot.slane %v7812_v41, 7 }
0x1bbc   :  { %14750 = vrcp.f32 %v7827_v54  ;;  %v7846_v51 = vadd.f32 1.0, %v14747_v46 }
0x1bbd   :  { %14752 = vrcp.f32 %v7845_v47 }
0x1bbe   :  { %14754 = vrcp.f32 %v7846_v51 }
0x1bc4   :  { %v14749_v45 = vpop.eup %14748 }
0x1bc5   :  { %v7856_v42 = vmul.f32 %v14749_v45, %v7812_v41 }
0x1bc6   :  { %v14751_v30 = vpop.eup %14750 }
0x1bc7   :  { %v14753_v17 = vpop.eup %14752  ;;  %v7855_v55 = vmul.f32 %v14751_v30, %v7852_v31  ;;  %v7858_v5 = vadd.f32 %v7856_v42, %v15360_v43 }
0x1bc8   :  { %v7868_v61 = vmul.f32 %v14753_v17, %v7865_v59  ;;  %v14755_v48 = vpop.eup %14754  ;;  %v7861_v21 = vsub.f32 1.0, %v14753_v17 }
0x1bc9   :  { %v7857_v34 = vadd.f32 %v7855_v55, %v15354_v28  ;;  %14756 = vtanh.f32 %v7858_v5  ;;  %v7862_v14 = vsub.f32 1.0, %v14755_v48  ;;  %v7869_v50 = vmul.f32 %v14755_v48, %v7601_v22 }
0x1bcb   :  { %14758 = vtanh.f32 %v7857_v34 }
0x1bd3   :  { %v14757_v37 = vpop.eup %14756 }
0x1bd4   :  { %v7864_v12 = vmul.f32 %v14757_v37, %v7862_v14 }
0x1bd5   :  { %v14759_v1 = vpop.eup %14758 }
0x1bd6   :  { %v7863_v0 = vmul.f32 %v14759_v1, %v7861_v21  ;;  %v16648_v6 = vadd.f32 %v7869_v50, %v7864_v12 }
0x1bd8   :  { %v16650_v24 = vadd.f32 %v7868_v61, %v7863_v0  ;;  %v8142_v21 = vrot.slane %v16648_v6, 7 }
0x1bda   :  { %v7874_v11 = vrot.slane %v16650_v24, 1  ;;  %v8141_v48 = vrot.slane %v16650_v24, 7 }
0x1bdc   :  { %v7875_v10 = vsel %vm959_vm11, %v16648_v6, %v7874_v11 }
0x1bdd   :  { %12632 = vmatmul.mubr.msk.f32.vlgmr.msra.gmra.mrb[90].mxu1 %vm288_vm3, %v7875_v10  ;;  %12651 = vmatmul.mubr.msk.f32.vlgmr.msra.gmra.mrb[98].mxu0 %vm288_vm3, %v7875_v10 }
0x1bde   :  { %14016 = vmatpush3.bf16.msra.mxu1 %v15214_v23  ;;  %12669 = vmatprep.mubr.msk.f32.mxu1 %vm14910_vm10, %v14911_v20 }
0x1bdf   :  { %14017 = vmatprep.subr.bf16.mxu1 %v14909_v33  ;;  %14028 = vmatpush3.bf16.msra.mxu0 %v15101_v44 }
0x1be0   :  { %14029 = vmatprep.subr.bf16.mxu0 %v14909_v33  ;;  %12688 = vmatprep.mubr.msk.f32.mxu0 %vm14910_vm10, %v14911_v20 }
0x1be2   :  { %14019 = vmatpush3.bf16.msra.mxu1 %v15238_v29 }
0x1be3   :  { %14020 = vmatprep.subr.bf16.mxu1 %v14909_v33  ;;  %14031 = vmatpush3.bf16.msra.mxu0 %v15134_v62 }
0x1be4   :  { %14032 = vmatprep.subr.bf16.mxu0 %v14909_v33 }
0x1be6   :  { %14022 = vmatpush3.bf16.msra.mxu1 %v15264_v36 }
0x1be7   :  { %14023 = vmatprep.subr.bf16.mxu1 %v14909_v33  ;;  %14034 = vmatpush3.bf16.msra.mxu0 %v15166_v7 }
0x1be8   :  { %14035 = vmatprep.subr.bf16.mxu0 %v14909_v33 }
0x1bea   :  { %14025 = vmatpush3.bf16.msra.mxu1 %v15281_v40 }
0x1beb   :  { %14038 = vmatprep.subr.bf16.mxu1 %v14909_v33  ;;  %14037 = vmatpush3.bf16.msra.mxu0 %v15182_v13 }
0x1bec   :  { %14050 = vmatprep.subr.bf16.mxu0 %v14909_v33 }
0x1bed   :  { %12670 = vmatmul.mubr.msk.f32.vlgmr.msra.gmra.mrb[92].mxu1 %vm288_vm3, %v7875_v10 }
0x1bee   :  { %14040 = vmatpush3.bf16.msra.mxu1 %v15201_v19  ;;  %12707 = vmatprep.mubr.msk.f32.mxu1 %vm14910_vm10, %v14911_v20 }
0x1bef   :  { %14041 = vmatprep.subr.bf16.mxu1 %v14909_v33 }
0x1bf2   :  { %14043 = vmatpush3.bf16.msra.mxu1 %v15226_v26 }
0x1bf3   :  { %14044 = vmatprep.subr.bf16.mxu1 %v14909_v33 }
0x1bf6   :  { %14046 = vmatpush3.bf16.msra.mxu1 %v15254_v32 }
0x1bf7   :  { %14047 = vmatprep.subr.bf16.mxu1 %v14909_v33 }
0x1bfa   :  { %14049 = vmatpush3.bf16.msra.mxu1 %v15277_v39 }
0x1bfb   :  { %14062 = vmatprep.subr.bf16.mxu1 %v14909_v33 }
0x1cb0   :  { %v7944_v38 = vpop.f32.mrb[90].mxu1  ;;  %v8014_v22 = vpop.f32.mrb[98].mxu0 }
0x1cb1   :  { %v8089_v60 = vrot.slane %v7944_v38, 6  ;;  %v8090_v18 = vrot.slane %v7944_v38, 7  ;;  %v8108_v15 = vrot.slane %v8014_v22, 6  ;;  %v8109_v56 = vrot.slane %v8014_v22, 7  ;;  %v12633_v25 = vpop.f32.mrb[91].mxu1  ;;  %v12652_v8 = vpop.f32.mrb[99].mxu0 }
0x1cb3   :  { %v8093_v57 = vadd.f32 %v8089_v60, %v15323_v52  ;;  %v8094_v9 = vadd.f32 %v8090_v18, %v15335_v3  ;;  %v8112_v2 = vadd.f32 %v8108_v15, %v15325_v53  ;;  %v8113_v58 = vadd.f32 %v8109_v56, %v15337_v4 }
0x1cb5   :  { %v10043_v16 = vmul.f32 -1.442695, %v8093_v57  ;;  %v10044_v27 = vmul.f32 -1.442695, %v8094_v9  ;;  %v10045_v35 = vmul.f32 -1.442695, %v8112_v2 }
0x1cb6   :  { %v10046_v49 = vmul.f32 -1.442695, %v8113_v58 }
0x1cb7   :  { %14760 = vpow2.f32 %v10043_v16 }
0x1cb8   :  { %14762 = vpow2.f32 %v10044_v27 }
0x1cb9   :  { %14764 = vpow2.f32 %v10045_v35 }
0x1cba   :  { %14766 = vpow2.f32 %v10046_v49 }
0x1cc0   :  { %v8084_v54 = vpop.f32.mrb[92].mxu1 }
0x1cc1   :  { %v14761_v47 = vpop.eup %14760  ;;  %v12671_v46 = vpop.f32.mrb[93].mxu1  ;;  %v8085_v17 = vadd.f32 %v16588_v63, %v8084_v54 }
0x1cc2   :  { %v14763_v51 = vpop.eup %14762  ;;  %v8101_v41 = vadd.f32 1.0, %v14761_v47 }
0x1cc3   :  { %v14765_v45 = vpop.eup %14764  ;;  %v8102_v31 = vadd.f32 1.0, %v14763_v51  ;;  %v8127_v55 = vrot.slane %v8085_v17, 6  ;;  %v8128_v61 = vrot.slane %v8085_v17, 7 }
0x1cc4   :  { %v14767_v42 = vpop.eup %14766  ;;  %14768 = vrcp.f32 %v8101_v41  ;;  %v8120_v30 = vadd.f32 1.0, %v14765_v45 }
0x1cc5   :  { %14770 = vrcp.f32 %v8102_v31  ;;  %v8121_v59 = vadd.f32 1.0, %v14767_v42 }
0x1cc6   :  { %14772 = vrcp.f32 %v8120_v30 }
0x1cc7   :  { %14774 = vrcp.f32 %v8121_v59 }
0x1cce   :  { %v14769_v5 = vpop.eup %14768 }
0x1ccf   :  { %v14771_v34 = vpop.eup %14770  ;;  %v8131_v14 = vmul.f32 %v14769_v5, %v8127_v55 }
0x1cd0   :  { %v14773_v37 = vpop.eup %14772  ;;  %v8132_v12 = vmul.f32 %v14771_v34, %v8128_v61 }
0x1cd1   :  { %v14775_v50 = vpop.eup %14774  ;;  %v8133_v1 = vadd.f32 %v8131_v14, %v15354_v28  ;;  %v8145_v0 = vmul.f32 %v14773_v37, %v8141_v48  ;;  %v8137_v38 = vsub.f32 1.0, %v14773_v37 }
0x1cd2   :  { %v8134_v11 = vadd.f32 %v8132_v12, %v15360_v43  ;;  %v8146_v10 = vmul.f32 %v14775_v50, %v8142_v21  ;;  %v8138_v60 = vsub.f32 1.0, %v14775_v50 }
0x1cd3   :  { %14776 = vtanh.f32 %v8133_v1 }
0x1cd4   :  { %14778 = vtanh.f32 %v8134_v11 }
0x1cdd   :  { %v14777_v22 = vpop.eup %14776 }
0x1cde   :  { %v14779_v18 = vpop.eup %14778  ;;  %v8139_v15 = vmul.f32 %v14777_v22, %v8137_v38 }
0x1cdf   :  { %v8140_v24 = vmul.f32 %v14779_v18, %v8138_v60 }
0x1ce0   :  { %v16697_v56 = vadd.f32 %v8145_v0, %v8139_v15 }
0x1ce1   :  { %v16699_v25 = vadd.f32 %v8146_v10, %v8140_v24 }
0x1ce2   :  { %v8151_v6 = vrot.slane %v16697_v56, 2  ;;  %v8419_v10 = vrot.slane %v16697_v56, 7 }
0x1ce3   :  { %v8152_v8 = vrot.slane %v16699_v25, 1  ;;  %v8420_v60 = vrot.slane %v16699_v25, 7 }
0x1ce5   :  { %v8153_v57 = vsel %vm959_vm11, %v8152_v8, %v8151_v6 }
0x1ce6   :  { %12689 = vmatmul.mubr.msk.f32.vlgmr.msra.gmra.mrb[100].mxu0 %vm288_vm3, %v8153_v57  ;;  %12708 = vmatmul.mubr.msk.f32.vlgmr.msra.gmra.mrb[94].mxu1 %vm288_vm3, %v8153_v57 }
0x1ce7   :  { %14052 = vmatpush3.bf16.msra.mxu0 %v15214_v23  ;;  %12726 = vmatprep.mubr.msk.f32.mxu0 %vm14910_vm10, %v14911_v20 }
0x1ce8   :  { %14053 = vmatprep.subr.bf16.mxu0 %v14909_v33  ;;  %14064 = vmatpush3.bf16.msra.mxu1 %v15101_v44 }
0x1ce9   :  { %14065 = vmatprep.subr.bf16.mxu1 %v14909_v33  ;;  %12745 = vmatprep.mubr.msk.f32.mxu1 %vm14910_vm10, %v14911_v20 }
0x1ceb   :  { %14055 = vmatpush3.bf16.msra.mxu0 %v15238_v29 }
0x1cec   :  { %14056 = vmatprep.subr.bf16.mxu0 %v14909_v33  ;;  %14067 = vmatpush3.bf16.msra.mxu1 %v15134_v62 }
0x1ced   :  { %14068 = vmatprep.subr.bf16.mxu1 %v14909_v33 }
0x1cef   :  { %14058 = vmatpush3.bf16.msra.mxu0 %v15264_v36 }
0x1cf0   :  { %14059 = vmatprep.subr.bf16.mxu0 %v14909_v33  ;;  %14070 = vmatpush3.bf16.msra.mxu1 %v15166_v7 }
0x1cf1   :  { %14071 = vmatprep.subr.bf16.mxu1 %v14909_v33 }
0x1cf3   :  { %14061 = vmatpush3.bf16.msra.mxu0 %v15281_v40 }
0x1cf4   :  { %14074 = vmatprep.subr.bf16.mxu0 %v14909_v33  ;;  %14073 = vmatpush3.bf16.msra.mxu1 %v15182_v13 }
0x1cf5   :  { %14086 = vmatprep.subr.bf16.mxu1 %v14909_v33 }
0x1cf6   :  { %12727 = vmatmul.mubr.msk.f32.vlgmr.msra.gmra.mrb[102].mxu0 %vm288_vm3, %v8153_v57 }
0x1cf7   :  { %14076 = vmatpush3.bf16.msra.mxu0 %v15201_v19  ;;  %12764 = vmatprep.mubr.msk.f32.mxu0 %vm14910_vm10, %v14911_v20 }
0x1cf8   :  { %14077 = vmatprep.subr.bf16.mxu0 %v14909_v33 }
0x1cfb   :  { %14079 = vmatpush3.bf16.msra.mxu0 %v15226_v26 }
0x1cfc   :  { %14080 = vmatprep.subr.bf16.mxu0 %v14909_v33 }
0x1cff   :  { %14082 = vmatpush3.bf16.msra.mxu0 %v15254_v32 }
0x1d00   :  { %14083 = vmatprep.subr.bf16.mxu0 %v14909_v33 }
0x1d03   :  { %14085 = vmatpush3.bf16.msra.mxu0 %v15277_v39 }
0x1d04   :  { %14098 = vmatprep.subr.bf16.mxu0 %v14909_v33 }
0x1db9   :  { %v8222_v9 = vpop.f32.mrb[100].mxu0  ;;  %v8292_v2 = vpop.f32.mrb[94].mxu1 }
0x1dba   :  { %v8367_v58 = vrot.slane %v8222_v9, 5  ;;  %v8368_v16 = vrot.slane %v8222_v9, 6  ;;  %v8386_v27 = vrot.slane %v8292_v2, 5  ;;  %v8387_v35 = vrot.slane %v8292_v2, 6  ;;  %v12690_v49 = vpop.f32.mrb[101].mxu0  ;;  %v12709_v54 = vpop.f32.mrb[95].mxu1 }
0x1dbc   :  { %v8371_v47 = vadd.f32 %v8367_v58, %v15323_v52  ;;  %v8372_v46 = vadd.f32 %v8368_v16, %v15335_v3  ;;  %v8390_v51 = vadd.f32 %v8386_v27, %v15325_v53  ;;  %v8391_v41 = vadd.f32 %v8387_v35, %v15337_v4 }
0x1dbe   :  { %v10050_v45 = vmul.f32 -1.442695, %v8371_v47  ;;  %v10051_v31 = vmul.f32 -1.442695, %v8372_v46  ;;  %v10052_v42 = vmul.f32 -1.442695, %v8390_v51 }
0x1dbf   :  { %v10053_v30 = vmul.f32 -1.442695, %v8391_v41 }
0x1dc0   :  { %14780 = vpow2.f32 %v10050_v45 }
0x1dc1   :  { %14782 = vpow2.f32 %v10051_v31 }
0x1dc2   :  { %14784 = vpow2.f32 %v10052_v42 }
0x1dc3   :  { %14786 = vpow2.f32 %v10053_v30 }
0x1dc9   :  { %v8362_v59 = vpop.f32.mrb[102].mxu0 }
0x1dca   :  { %v14781_v17 = vpop.eup %14780  ;;  %v12728_v55 = vpop.f32.mrb[103].mxu0  ;;  %v8363_v12 = vadd.f32 %v16588_v63, %v8362_v59 }
0x1dcb   :  { %v14783_v5 = vpop.eup %14782  ;;  %v8379_v61 = vadd.f32 1.0, %v14781_v17 }
0x1dcc   :  { %v14785_v34 = vpop.eup %14784  ;;  %v8380_v48 = vadd.f32 1.0, %v14783_v5  ;;  %v8405_v50 = vrot.slane %v8363_v12, 5  ;;  %v8406_v0 = vrot.slane %v8363_v12, 6 }
0x1dcd   :  { %v14787_v14 = vpop.eup %14786  ;;  %14788 = vrcp.f32 %v8379_v61  ;;  %v8398_v37 = vadd.f32 1.0, %v14785_v34 }
0x1dce   :  { %14790 = vrcp.f32 %v8380_v48  ;;  %v8399_v21 = vadd.f32 1.0, %v14787_v14 }
0x1dcf   :  { %14792 = vrcp.f32 %v8398_v37 }
0x1dd0   :  { %14794 = vrcp.f32 %v8399_v21 }
0x1dd7   :  { %v14789_v1 = vpop.eup %14788 }
0x1dd8   :  { %v14791_v11 = vpop.eup %14790  ;;  %v8409_v38 = vmul.f32 %v14789_v1, %v8405_v50 }
0x1dd9   :  { %v14793_v22 = vpop.eup %14792  ;;  %v8410_v18 = vmul.f32 %v14791_v11, %v8406_v0 }
0x1dda   :  { %v14795_v15 = vpop.eup %14794  ;;  %v8411_v24 = vadd.f32 %v8409_v38, %v15354_v28  ;;  %v8423_v6 = vmul.f32 %v14793_v22, %v8419_v10  ;;  %v8415_v9 = vsub.f32 1.0, %v14793_v22 }
0x1ddb   :  { %v8412_v8 = vadd.f32 %v8410_v18, %v15360_v43  ;;  %v8424_v57 = vmul.f32 %v14795_v15, %v8420_v60  ;;  %v8416_v58 = vsub.f32 1.0, %v14795_v15 }
0x1ddc   :  { %14796 = vtanh.f32 %v8411_v24 }
0x1ddd   :  { %14798 = vtanh.f32 %v8412_v8 }
0x1de6   :  { %v14797_v2 = vpop.eup %14796 }
0x1de7   :  { %v14799_v16 = vpop.eup %14798  ;;  %v8417_v27 = vmul.f32 %v14797_v2, %v8415_v9 }
0x1de8   :  { %v8418_v56 = vmul.f32 %v14799_v16, %v8416_v58 }
0x1de9   :  { %v16746_v35 = vadd.f32 %v8423_v6, %v8417_v27 }
0x1dea   :  { %v16748_v49 = vadd.f32 %v8424_v57, %v8418_v56 }
0x1deb   :  { %v8429_v25 = vrot.slane %v16746_v35, 3  ;;  %v8697_v57 = vrot.slane %v16746_v35, 7 }
0x1dec   :  { %v8430_v54 = vrot.slane %v16748_v49, 2  ;;  %v8698_v58 = vrot.slane %v16748_v49, 7 }
0x1dee   :  { %v8431_v47 = vsel %vm959_vm11, %v8430_v54, %v8429_v25 }
0x1def   :  { %12746 = vmatmul.mubr.msk.f32.vlgmr.msra.gmra.mrb[96].mxu1 %vm288_vm3, %v8431_v47  ;;  %12765 = vmatmul.mubr.msk.f32.vlgmr.msra.gmra.mrb[104].mxu0 %vm288_vm3, %v8431_v47 }
0x1df0   :  { %14088 = vmatpush3.bf16.msra.mxu1 %v15214_v23  ;;  %12783 = vmatprep.mubr.msk.f32.mxu1 %vm14910_vm10, %v14911_v20 }
0x1df1   :  { %14089 = vmatprep.subr.bf16.mxu1 %v14909_v33  ;;  %14100 = vmatpush3.bf16.msra.mxu0 %v15101_v44 }
0x1df2   :  { %14101 = vmatprep.subr.bf16.mxu0 %v14909_v33  ;;  %12802 = vmatprep.mubr.msk.f32.mxu0 %vm14910_vm10, %v14911_v20 }
0x1df4   :  { %14091 = vmatpush3.bf16.msra.mxu1 %v15238_v29 }
0x1df5   :  { %14092 = vmatprep.subr.bf16.mxu1 %v14909_v33  ;;  %14103 = vmatpush3.bf16.msra.mxu0 %v15134_v62 }
0x1df6   :  { %14104 = vmatprep.subr.bf16.mxu0 %v14909_v33 }
0x1df8   :  { %14094 = vmatpush3.bf16.msra.mxu1 %v15264_v36 }
0x1df9   :  { %14095 = vmatprep.subr.bf16.mxu1 %v14909_v33  ;;  %14106 = vmatpush3.bf16.msra.mxu0 %v15166_v7 }
0x1dfa   :  { %14107 = vmatprep.subr.bf16.mxu0 %v14909_v33 }
0x1dfc   :  { %14097 = vmatpush3.bf16.msra.mxu1 %v15281_v40 }
0x1dfd   :  { %14110 = vmatprep.subr.bf16.mxu1 %v14909_v33  ;;  %14109 = vmatpush3.bf16.msra.mxu0 %v15182_v13 }
0x1dfe   :  { %14122 = vmatprep.subr.bf16.mxu0 %v14909_v33 }
0x1dff   :  { %12784 = vmatmul.mubr.msk.f32.vlgmr.msra.gmra.mrb[98].mxu1 %vm288_vm3, %v8431_v47 }
0x1e00   :  { %14112 = vmatpush3.bf16.msra.mxu1 %v15201_v19  ;;  %12821 = vmatprep.mubr.msk.f32.mxu1 %vm14910_vm10, %v14911_v20 }
0x1e01   :  { %14113 = vmatprep.subr.bf16.mxu1 %v14909_v33 }
0x1e04   :  { %14115 = vmatpush3.bf16.msra.mxu1 %v15226_v26 }
0x1e05   :  { %14116 = vmatprep.subr.bf16.mxu1 %v14909_v33 }
0x1e08   :  { %14118 = vmatpush3.bf16.msra.mxu1 %v15254_v32 }
0x1e09   :  { %14119 = vmatprep.subr.bf16.mxu1 %v14909_v33 }
0x1e0c   :  { %14121 = vmatpush3.bf16.msra.mxu1 %v15277_v39 }
0x1e0d   :  { %14134 = vmatprep.subr.bf16.mxu1 %v14909_v33 }
0x1ec2   :  { %v8500_v46 = vpop.f32.mrb[96].mxu1  ;;  %v8570_v51 = vpop.f32.mrb[104].mxu0 }
0x1ec3   :  { %v8645_v41 = vrot.slane %v8500_v46, 4  ;;  %v8646_v45 = vrot.slane %v8500_v46, 5  ;;  %v8664_v31 = vrot.slane %v8570_v51, 4  ;;  %v8665_v42 = vrot.slane %v8570_v51, 5  ;;  %v12747_v30 = vpop.f32.mrb[97].mxu1  ;;  %v12766_v59 = vpop.f32.mrb[105].mxu0 }
0x1ec5   :  { %v8649_v17 = vadd.f32 %v8645_v41, %v15323_v52  ;;  %v8650_v55 = vadd.f32 %v8646_v45, %v15335_v3  ;;  %v8668_v5 = vadd.f32 %v8664_v31, %v15325_v53  ;;  %v8669_v61 = vadd.f32 %v8665_v42, %v15337_v4 }
0x1ec7   :  { %v10057_v34 = vmul.f32 -1.442695, %v8649_v17  ;;  %v10058_v48 = vmul.f32 -1.442695, %v8650_v55  ;;  %v10059_v14 = vmul.f32 -1.442695, %v8668_v5 }
0x1ec8   :  { %v10060_v37 = vmul.f32 -1.442695, %v8669_v61 }
0x1ec9   :  { %14800 = vpow2.f32 %v10057_v34 }
0x1eca   :  { %14802 = vpow2.f32 %v10058_v48 }
0x1ecb   :  { %14804 = vpow2.f32 %v10059_v14 }
0x1ecc   :  { %14806 = vpow2.f32 %v10060_v37 }
0x1ed2   :  { %v8640_v21 = vpop.f32.mrb[98].mxu1 }
0x1ed3   :  { %v14801_v12 = vpop.eup %14800  ;;  %v12785_v50 = vpop.f32.mrb[99].mxu1  ;;  %v8641_v18 = vadd.f32 %v16588_v63, %v8640_v21 }
0x1ed4   :  { %v14803_v1 = vpop.eup %14802  ;;  %v8657_v0 = vadd.f32 1.0, %v14801_v12 }
0x1ed5   :  { %v14805_v11 = vpop.eup %14804  ;;  %v8658_v10 = vadd.f32 1.0, %v14803_v1  ;;  %v8683_v15 = vrot.slane %v8641_v18, 4  ;;  %v8684_v6 = vrot.slane %v8641_v18, 5 }
0x1ed6   :  { %v14807_v38 = vpop.eup %14806  ;;  %14808 = vrcp.f32 %v8657_v0  ;;  %v8676_v22 = vadd.f32 1.0, %v14805_v11 }
0x1ed7   :  { %14810 = vrcp.f32 %v8658_v10  ;;  %v8677_v60 = vadd.f32 1.0, %v14807_v38 }
0x1ed8   :  { %14812 = vrcp.f32 %v8676_v22 }
0x1ed9   :  { %14814 = vrcp.f32 %v8677_v60 }
0x1ee0   :  { %v14809_v24 = vpop.eup %14808 }
0x1ee1   :  { %v14811_v8 = vpop.eup %14810  ;;  %v8687_v9 = vmul.f32 %v14809_v24, %v8683_v15 }
0x1ee2   :  { %v14813_v2 = vpop.eup %14812  ;;  %v8688_v16 = vmul.f32 %v14811_v8, %v8684_v6 }
0x1ee3   :  { %v14815_v27 = vpop.eup %14814  ;;  %v8689_v56 = vadd.f32 %v8687_v9, %v15354_v28  ;;  %v8701_v25 = vmul.f32 %v14813_v2, %v8697_v57  ;;  %v8693_v46 = vsub.f32 1.0, %v14813_v2 }
0x1ee4   :  { %v8690_v54 = vadd.f32 %v8688_v16, %v15360_v43  ;;  %v8702_v47 = vmul.f32 %v14815_v27, %v8698_v58  ;;  %v8694_v41 = vsub.f32 1.0, %v14815_v27 }
0x1ee5   :  { %14816 = vtanh.f32 %v8689_v56 }
0x1ee6   :  { %14818 = vtanh.f32 %v8690_v54 }
0x1eef   :  { %v14817_v51 = vpop.eup %14816 }
0x1ef0   :  { %v14819_v45 = vpop.eup %14818  ;;  %v8695_v31 = vmul.f32 %v14817_v51, %v8693_v46 }
0x1ef1   :  { %v8696_v35 = vmul.f32 %v14819_v45, %v8694_v41 }
0x1ef2   :  { %v16795_v42 = vadd.f32 %v8701_v25, %v8695_v31 }
0x1ef3   :  { %v16797_v30 = vadd.f32 %v8702_v47, %v8696_v35 }
0x1ef4   :  { %v8707_v49 = vrot.slane %v16795_v42, 4  ;;  %v8975_v47 = vrot.slane %v16795_v42, 7 }
0x1ef5   :  { %v8708_v59 = vrot.slane %v16797_v30, 3  ;;  %v8976_v41 = vrot.slane %v16797_v30, 7 }
0x1ef7   :  { %v8709_v17 = vsel %vm959_vm11, %v8708_v59, %v8707_v49 }
0x1ef8   :  { %12803 = vmatmul.mubr.msk.f32.vlgmr.msra.gmra.mrb[106].mxu0 %vm288_vm3, %v8709_v17  ;;  %12822 = vmatmul.mubr.msk.f32.vlgmr.msra.gmra.mrb[100].mxu1 %vm288_vm3, %v8709_v17 }
0x1ef9   :  { %14124 = vmatpush3.bf16.msra.mxu0 %v15214_v23  ;;  %12840 = vmatprep.mubr.msk.f32.mxu0 %vm14910_vm10, %v14911_v20 }
0x1efa   :  { %14125 = vmatprep.subr.bf16.mxu0 %v14909_v33  ;;  %14136 = vmatpush3.bf16.msra.mxu1 %v15101_v44 }
0x1efb   :  { %14137 = vmatprep.subr.bf16.mxu1 %v14909_v33  ;;  %12859 = vmatprep.mubr.msk.f32.mxu1 %vm14910_vm10, %v14911_v20 }
0x1efd   :  { %14127 = vmatpush3.bf16.msra.mxu0 %v15238_v29 }
0x1efe   :  { %14128 = vmatprep.subr.bf16.mxu0 %v14909_v33  ;;  %14139 = vmatpush3.bf16.msra.mxu1 %v15134_v62 }
0x1eff   :  { %14140 = vmatprep.subr.bf16.mxu1 %v14909_v33 }
0x1f01   :  { %14130 = vmatpush3.bf16.msra.mxu0 %v15264_v36 }
0x1f02   :  { %14131 = vmatprep.subr.bf16.mxu0 %v14909_v33  ;;  %14142 = vmatpush3.bf16.msra.mxu1 %v15166_v7 }
0x1f03   :  { %14143 = vmatprep.subr.bf16.mxu1 %v14909_v33 }
0x1f05   :  { %14133 = vmatpush3.bf16.msra.mxu0 %v15281_v40 }
0x1f06   :  { %14146 = vmatprep.subr.bf16.mxu0 %v14909_v33  ;;  %14145 = vmatpush3.bf16.msra.mxu1 %v15182_v13 }
0x1f07   :  { %14158 = vmatprep.subr.bf16.mxu1 %v14909_v33 }
0x1f08   :  { %12841 = vmatmul.mubr.msk.f32.vlgmr.msra.gmra.mrb[108].mxu0 %vm288_vm3, %v8709_v17 }
0x1f09   :  { %14148 = vmatpush3.bf16.msra.mxu0 %v15201_v19  ;;  %12878 = vmatprep.mubr.msk.f32.mxu0 %vm14910_vm10, %v14911_v20 }
0x1f0a   :  { %14149 = vmatprep.subr.bf16.mxu0 %v14909_v33 }
0x1f0d   :  { %14151 = vmatpush3.bf16.msra.mxu0 %v15226_v26 }
0x1f0e   :  { %14152 = vmatprep.subr.bf16.mxu0 %v14909_v33 }
0x1f11   :  { %14154 = vmatpush3.bf16.msra.mxu0 %v15254_v32 }
0x1f12   :  { %14155 = vmatprep.subr.bf16.mxu0 %v14909_v33 }
0x1f15   :  { %14157 = vmatpush3.bf16.msra.mxu0 %v15277_v39 }
0x1f16   :  { %14170 = vmatprep.subr.bf16.mxu0 %v14909_v33 }
0x1fcb   :  { %v8778_v55 = vpop.f32.mrb[106].mxu0  ;;  %v8848_v5 = vpop.f32.mrb[100].mxu1 }
0x1fcc   :  { %v8923_v61 = vrot.slane %v8778_v55, 3  ;;  %v8924_v34 = vrot.slane %v8778_v55, 4  ;;  %v8942_v48 = vrot.slane %v8848_v5, 3  ;;  %v8943_v14 = vrot.slane %v8848_v5, 4  ;;  %v12804_v37 = vpop.f32.mrb[107].mxu0  ;;  %v12823_v21 = vpop.f32.mrb[101].mxu1 }
0x1fce   :  { %v8927_v12 = vadd.f32 %v8923_v61, %v15323_v52  ;;  %v8928_v50 = vadd.f32 %v8924_v34, %v15335_v3  ;;  %v8946_v1 = vadd.f32 %v8942_v48, %v15325_v53  ;;  %v8947_v0 = vadd.f32 %v8943_v14, %v15337_v4 }
0x1fd0   :  { %v10064_v11 = vmul.f32 -1.442695, %v8927_v12  ;;  %v10065_v10 = vmul.f32 -1.442695, %v8928_v50  ;;  %v10066_v38 = vmul.f32 -1.442695, %v8946_v1 }
0x1fd1   :  { %v10067_v22 = vmul.f32 -1.442695, %v8947_v0 }
0x1fd2   :  { %14820 = vpow2.f32 %v10064_v11 }
0x1fd3   :  { %14822 = vpow2.f32 %v10065_v10 }
0x1fd4   :  { %14824 = vpow2.f32 %v10066_v38 }
0x1fd5   :  { %14826 = vpow2.f32 %v10067_v22 }
0x1fdb   :  { %v8918_v60 = vpop.f32.mrb[108].mxu0 }
0x1fdc   :  { %v14821_v18 = vpop.eup %14820  ;;  %v12842_v15 = vpop.f32.mrb[109].mxu0  ;;  %v8919_v16 = vadd.f32 %v16588_v63, %v8918_v60 }
0x1fdd   :  { %v14823_v24 = vpop.eup %14822  ;;  %v8935_v6 = vadd.f32 1.0, %v14821_v18 }
0x1fde   :  { %v14825_v8 = vpop.eup %14824  ;;  %v8936_v57 = vadd.f32 1.0, %v14823_v24  ;;  %v8961_v27 = vrot.slane %v8919_v16, 3  ;;  %v8962_v25 = vrot.slane %v8919_v16, 4  ;;  %v16891_v16 = vld [vmem:[%s17036_s11] ss:$0 sm:$0xff] }
0x1fdf   :  { %v14827_v9 = vpop.eup %14826  ;;  %14828 = vrcp.f32 %v8935_v6  ;;  %v8954_v2 = vadd.f32 1.0, %v14825_v8 }
0x1fe0   :  { %14830 = vrcp.f32 %v8936_v57  ;;  %v8955_v58 = vadd.f32 1.0, %v14827_v9 }
0x1fe1   :  { %14832 = vrcp.f32 %v8954_v2 }
0x1fe2   :  { %14834 = vrcp.f32 %v8955_v58 }
0x1fe9   :  { %v14829_v56 = vpop.eup %14828 }
0x1fea   :  { %v14831_v54 = vpop.eup %14830  ;;  %v8965_v46 = vmul.f32 %v14829_v56, %v8961_v27 }
0x1feb   :  { %v14833_v51 = vpop.eup %14832  ;;  %v8966_v45 = vmul.f32 %v14831_v54, %v8962_v25 }
0x1fec   :  { %v14835_v31 = vpop.eup %14834  ;;  %v8967_v35 = vadd.f32 %v8965_v46, %v15354_v28  ;;  %v8979_v49 = vmul.f32 %v14833_v51, %v8975_v47  ;;  %v8971_v63 = vsub.f32 1.0, %v14833_v51 }
0x1fed   :  { %v8968_v59 = vadd.f32 %v8966_v45, %v15360_v43  ;;  %v8980_v17 = vmul.f32 %v14835_v31, %v8976_v41  ;;  %v8972_v5 = vsub.f32 1.0, %v14835_v31 }
0x1fee   :  { %14836 = vtanh.f32 %v8967_v35 }
0x1fef   :  { %14838 = vtanh.f32 %v8968_v59 }
0x1ff8   :  { %v14837_v55 = vpop.eup %14836 }
0x1ff9   :  { %v14839_v61 = vpop.eup %14838  ;;  %v8973_v34 = vmul.f32 %v14837_v55, %v8971_v63 }
0x1ffa   :  { %v8974_v42 = vmul.f32 %v14839_v61, %v8972_v5 }
0x1ffb   :  { %v16844_v48 = vadd.f32 %v8979_v49, %v8973_v34 }
0x1ffc   :  { %v16846_v14 = vadd.f32 %v8980_v17, %v8974_v42 }
0x1ffd   :  { %v8985_v30 = vrot.slane %v16844_v48, 5  ;;  %v9253_v46 = vrot.slane %v16844_v48, 7 }
0x1ffe   :  { %v8986_v37 = vrot.slane %v16846_v14, 4  ;;  %v9254_v45 = vrot.slane %v16846_v14, 7 }
0x2000   :  { %v8987_v21 = vsel %vm959_vm11, %v8986_v37, %v8985_v30 }
0x2001   :  { %12860 = vmatmul.mubr.msk.f32.vlgmr.msra.gmra.mrb[102].mxu1 %vm288_vm3, %v8987_v21  ;;  %12879 = vmatmul.mubr.msk.f32.vlgmr.msra.gmra.mrb[110].mxu0 %vm288_vm3, %v8987_v21 }
0x2002   :  { %14160 = vmatpush3.bf16.msra.mxu1 %v15214_v23  ;;  %12897 = vmatprep.mubr.msk.f32.mxu1 %vm14910_vm10, %v14911_v20 }
0x2003   :  { %14161 = vmatprep.subr.bf16.mxu1 %v14909_v33  ;;  %14172 = vmatpush3.bf16.msra.mxu0 %v15101_v44 }
0x2004   :  { %14173 = vmatprep.subr.bf16.mxu0 %v14909_v33  ;;  %12916 = vmatprep.mubr.msk.f32.mxu0 %vm14910_vm10, %v14911_v20 }
0x2006   :  { %14163 = vmatpush3.bf16.msra.mxu1 %v15238_v29 }
0x2007   :  { %14164 = vmatprep.subr.bf16.mxu1 %v14909_v33  ;;  %14175 = vmatpush3.bf16.msra.mxu0 %v15134_v62 }
0x2008   :  { %14176 = vmatprep.subr.bf16.mxu0 %v14909_v33 }
0x200a   :  { %14166 = vmatpush3.bf16.msra.mxu1 %v15264_v36 }
0x200b   :  { %14167 = vmatprep.subr.bf16.mxu1 %v14909_v33  ;;  %14178 = vmatpush3.bf16.msra.mxu0 %v15166_v7 }
0x200c   :  { %14179 = vmatprep.subr.bf16.mxu0 %v14909_v33 }
0x200e   :  { %14169 = vmatpush3.bf16.msra.mxu1 %v15281_v40 }
0x200f   :  { %14182 = vmatprep.subr.bf16.mxu1 %v14909_v33  ;;  %14181 = vmatpush3.bf16.msra.mxu0 %v15182_v13 }
0x2010   :  { %14194 = vmatprep.subr.bf16.mxu0 %v14909_v33 }
0x2011   :  { %12898 = vmatmul.mubr.msk.f32.vlgmr.msra.gmra.mrb[104].mxu1 %vm288_vm3, %v8987_v21 }
0x2012   :  { %14184 = vmatpush3.bf16.msra.mxu1 %v15201_v19  ;;  %12935 = vmatprep.mubr.msk.f32.mxu1 %vm14910_vm10, %v14911_v20 }
0x2013   :  { %14185 = vmatprep.subr.bf16.mxu1 %v14909_v33 }
0x2016   :  { %14187 = vmatpush3.bf16.msra.mxu1 %v15226_v26 }
0x2017   :  { %14188 = vmatprep.subr.bf16.mxu1 %v14909_v33 }
0x201a   :  { %14190 = vmatpush3.bf16.msra.mxu1 %v15254_v32 }
0x201b   :  { %14191 = vmatprep.subr.bf16.mxu1 %v14909_v33 }
0x201e   :  { %14193 = vmatpush3.bf16.msra.mxu1 %v15277_v39 }
0x201f   :  { %14206 = vmatprep.subr.bf16.mxu1 %v14909_v33 }
0x20d4   :  { %v9056_v44 = vpop.f32.mrb[102].mxu1  ;;  %v9126_v62 = vpop.f32.mrb[110].mxu0 }
0x20d5   :  { %v9201_v7 = vrot.slane %v9056_v44, 2  ;;  %v9202_v13 = vrot.slane %v9056_v44, 3  ;;  %v9220_v19 = vrot.slane %v9126_v62, 2  ;;  %v9221_v12 = vrot.slane %v9126_v62, 3  ;;  %v12861_v50 = vpop.f32.mrb[103].mxu1  ;;  %v12880_v1 = vpop.f32.mrb[111].mxu0 }
0x20d6   :  { %v9542_v62 = vld [vmem:[%s17037_s12 + $0x18] sm:$0xff]  ;;  %v9545_v50 = vld [vmem:[%s17037_s12 + $0x30] sm:$0xff] }
0x20d7   :  { %v9205_v26 = vadd.f32 %v9201_v7, %v15323_v52  ;;  %v9206_v0 = vadd.f32 %v9202_v13, %v15335_v3  ;;  %v9224_v32 = vadd.f32 %v9220_v19, %v15325_v53  ;;  %v9225_v11 = vadd.f32 %v9221_v12, %v15337_v4  ;;  %v9543_v13 = vld [vmem:[%s17037_s12 + $0x20] sm:$0xff]  ;;  %v9544_v19 = vld [vmem:[%s17037_s12 + $0x28] sm:$0xff]  ;;  %v9546_v1 = vld [vmem:[%s17037_s12 + $0x38] sm:$0xff] }
0x20d8   :  { %v14213_v12 = vpack.c.bf16 %v9544_v19, %v9543_v13 }
0x20d9   :  { %v10071_v10 = vmul.f32 -1.442695, %v9205_v26  ;;  %v10072_v39 = vmul.f32 -1.442695, %v9206_v0  ;;  %v10073_v38 = vmul.f32 -1.442695, %v9224_v32  ;;  %v14216_v26 = vpack.c.bf16 %v9546_v1, %v9545_v50 }
0x20da   :  { %v10074_v22 = vmul.f32 -1.442695, %v9225_v11  ;;  %v9634_v0 = vld [vmem:[%s17039_s14] sm:$0xff]  ;;  %v9635_v32 = vld [vmem:[%s17039_s14 + $0x8] sm:$0xff]  ;;  %v9636_v11 = vld [vmem:[%s17039_s14 + $0x10] sm:$0xff] }
0x20db   :  { %14840 = vpow2.f32 %v10071_v10  ;;  %v14219_v10 = vpack.c.bf16 %v9635_v32, %v9634_v0 }
0x20dc   :  { %14842 = vpow2.f32 %v10072_v39  ;;  %v9637_v39 = vld [vmem:[%s17039_s14 + $0x18] sm:$0xff] }
0x20dd   :  { %14844 = vpow2.f32 %v10073_v38  ;;  %v14222_v38 = vpack.c.bf16 %v9637_v39, %v9636_v11  ;;  %v9725_v11 = vld [vmem:[%s17041_s16] sm:$0xff] }
0x20de   :  { %14846 = vpow2.f32 %v10074_v22  ;;  %v9638_v22 = vld [vmem:[%s17039_s14 + $0x20] sm:$0xff] }
0x20e4   :  { %v9196_v60 = vpop.f32.mrb[104].mxu1 }
0x20e5   :  { %v14841_v18 = vpop.eup %14840  ;;  %v12899_v15 = vpop.f32.mrb[105].mxu1  ;;  %v9197_v27 = vadd.f32 %v16891_v16, %v9196_v60  ;;  %v9639_v60 = vld [vmem:[%s17039_s14 + $0x28] sm:$0xff] }
0x20e6   :  { %v14843_v24 = vpop.eup %14842  ;;  %v9213_v6 = vadd.f32 1.0, %v14841_v18  ;;  %v14225_v18 = vpack.c.bf16 %v9639_v60, %v9638_v22 }
0x20e7   :  { %v14845_v8 = vpop.eup %14844  ;;  %v9214_v57 = vadd.f32 1.0, %v14843_v24  ;;  %v9239_v56 = vrot.slane %v9197_v27, 2  ;;  %v9240_v54 = vrot.slane %v9197_v27, 3 }
0x20e8   :  { %v14847_v9 = vpop.eup %14846  ;;  %14848 = vrcp.f32 %v9213_v6  ;;  %v9232_v2 = vadd.f32 1.0, %v14845_v8 }
0x20e9   :  { %14850 = vrcp.f32 %v9214_v57  ;;  %v9233_v58 = vadd.f32 1.0, %v14847_v9 }
0x20ea   :  { %14852 = vrcp.f32 %v9232_v2 }
0x20eb   :  { %14854 = vrcp.f32 %v9233_v58 }
0x20f2   :  { %v14849_v25 = vpop.eup %14848 }
0x20f3   :  { %v14851_v47 = vpop.eup %14850  ;;  %v9243_v51 = vmul.f32 %v14849_v25, %v9239_v56 }
0x20f4   :  { %v14853_v41 = vpop.eup %14852  ;;  %v9244_v31 = vmul.f32 %v14851_v47, %v9240_v54 }
0x20f5   :  { %v14855_v35 = vpop.eup %14854  ;;  %v9245_v49 = vadd.f32 %v9243_v51, %v15354_v28  ;;  %v9257_v59 = vmul.f32 %v14853_v41, %v9253_v46  ;;  %v9249_v55 = vsub.f32 1.0, %v14853_v41 }
0x20f6   :  { %v9246_v17 = vadd.f32 %v9244_v31, %v15360_v43  ;;  %v9258_v63 = vmul.f32 %v14855_v35, %v9254_v45  ;;  %v9250_v61 = vsub.f32 1.0, %v14855_v35 }
0x20f7   :  { %14856 = vtanh.f32 %v9245_v49 }
0x20f8   :  { %14858 = vtanh.f32 %v9246_v17 }
0x2101   :  { %v14857_v5 = vpop.eup %14856 }
0x2102   :  { %v14859_v34 = vpop.eup %14858  ;;  %v9251_v42 = vmul.f32 %v14857_v5, %v9249_v55 }
0x2103   :  { %v9252_v48 = vmul.f32 %v14859_v34, %v9250_v61 }
0x2104   :  { %v16898_v30 = vadd.f32 %v9257_v59, %v9251_v42 }
0x2105   :  { %v16900_v37 = vadd.f32 %v9258_v63, %v9252_v48 }
0x2106   :  { %v9263_v14 = vrot.slane %v16898_v30, 6  ;;  %v9531_v42 = vrot.slane %v16898_v30, 7 }
0x2107   :  { %v9264_v21 = vrot.slane %v16900_v37, 5 }
0x2109   :  { %v9265_v44 = vsel %vm959_vm11, %v9264_v21, %v9263_v14  ;;  %v9532_v21 = vrot.slane %v16900_v37, 7 }
0x210a   :  { %12917 = vmatmul.mubr.msk.f32.vlgmr.msra.gmra.mrb[112].mxu0 %vm288_vm3, %v9265_v44  ;;  %12936 = vmatmul.mubr.msk.f32.vlgmr.msra.gmra.mrb[106].mxu1 %vm288_vm3, %v9265_v44 }
0x210b   :  { %14196 = vmatpush3.bf16.msra.mxu0 %v15214_v23  ;;  %12954 = vmatprep.mubr.msk.f32.mxu0 %vm14910_vm10, %v14911_v20  ;;  %v9539_v23 = vld [vmem:[%s17037_s12] sm:$0xff] }
0x210c   :  { %14197 = vmatprep.subr.bf16.mxu0 %v14909_v33  ;;  %12973 = vmatprep.mubr.msk.f32.mxu1 %vm14910_vm10, %v14911_v20 }
0x210f   :  { %14199 = vmatpush3.bf16.msra.mxu0 %v15238_v29  ;;  %v9540_v29 = vld [vmem:[%s17037_s12 + $0x8] sm:$0xff] }
0x2110   :  { %14200 = vmatprep.subr.bf16.mxu0 %v14909_v33 }
0x2113   :  { %14202 = vmatpush3.bf16.msra.mxu0 %v15264_v36  ;;  %v9541_v36 = vld [vmem:[%s17037_s12 + $0x10] sm:$0xff] }
0x2114   :  { %14203 = vmatprep.subr.bf16.mxu0 %v14909_v33  ;;  %v14210_v7 = vpack.c.bf16 %v9542_v62, %v9541_v36 }
0x2117   :  { %14205 = vmatpush3.bf16.msra.mxu0 %v15281_v40  ;;  %v14207_v40 = vpack.c.bf16 %v9540_v29, %v9539_v23 }
0x2118   :  { %14218 = vmatprep.subr.bf16.mxu0 %v14909_v33 }
0x2119   :  { %14208 = vmatpush3.bf16.msra.mxu1 %v14207_v40 }
0x211a   :  { %12955 = vmatmul.mubr.msk.f32.vlgmr.msra.gmra.mrb[114].mxu0 %vm288_vm3, %v9265_v44  ;;  %14209 = vmatprep.subr.bf16.mxu1 %v14909_v33 }
0x211b   :  { %12992 = vmatprep.mubr.msk.f32.mxu0 %vm14910_vm10, %v14911_v20  ;;  %14220 = vmatpush3.bf16.msra.mxu0 %v14219_v10  ;;  %v9726_v10 = vld [vmem:[%s17041_s16 + $0x8] sm:$0xff] }
0x211c   :  { %14221 = vmatprep.subr.bf16.mxu0 %v14909_v33  ;;  %v14231_v39 = vpack.c.bf16 %v9726_v10, %v9725_v11 }
0x211d   :  { %14211 = vmatpush3.bf16.msra.mxu1 %v14210_v7 }
0x211e   :  { %14212 = vmatprep.subr.bf16.mxu1 %v14909_v33 }
0x211f   :  { %14223 = vmatpush3.bf16.msra.mxu0 %v14222_v38 }
0x2120   :  { %14224 = vmatprep.subr.bf16.mxu0 %v14909_v33 }
0x2121   :  { %14214 = vmatpush3.bf16.msra.mxu1 %v14213_v12 }
0x2122   :  { %14215 = vmatprep.subr.bf16.mxu1 %v14909_v33 }
0x2123   :  { %14226 = vmatpush3.bf16.msra.mxu0 %v14225_v18 }
0x2124   :  { %14227 = vmatprep.subr.bf16.mxu0 %v14909_v33 }
0x2125   :  { %14217 = vmatpush3.bf16.msra.mxu1 %v14216_v26 }
0x2126   :  { %14230 = vmatprep.subr.bf16.mxu1 %v14909_v33 }
0x21dd   :  { %v9334_v15 = vpop.f32.mrb[112].mxu0  ;;  %v9404_v24 = vpop.f32.mrb[106].mxu1 }
0x21de   :  { %v9479_v6 = vrot.slane %v9334_v15, 1  ;;  %v9480_v8 = vrot.slane %v9334_v15, 2  ;;  %v9498_v57 = vrot.slane %v9404_v24, 1  ;;  %v9499_v9 = vrot.slane %v9404_v24, 2  ;;  %v12918_v2 = vpop.f32.mrb[113].mxu0  ;;  %v12937_v58 = vpop.f32.mrb[107].mxu1 }
0x21df   :  { %v9727_v24 = vld [vmem:[%s17041_s16 + $0x10] sm:$0xff] }
0x21e0   :  { %v9483_v27 = vadd.f32 %v9479_v6, %v15323_v52  ;;  %v9484_v56 = vadd.f32 %v9480_v8, %v15335_v3  ;;  %v9502_v25 = vadd.f32 %v9498_v57, %v15325_v53  ;;  %v9503_v54 = vadd.f32 %v9499_v9, %v15337_v4  ;;  %v10084_v8 = vld [vmem:[%s17040_s15] ss:$0 sm:$0xff] }
0x21e2   :  { %v10078_v47 = vmul.f32 -1.442695, %v9483_v27  ;;  %v10079_v46 = vmul.f32 -1.442695, %v9484_v56  ;;  %v10080_v51 = vmul.f32 -1.442695, %v9502_v25 }
0x21e3   :  { %v10081_v41 = vmul.f32 -1.442695, %v9503_v54  ;;  %v10086_v56 = vld [vmem:[%s17042_s17] ss:$0 sm:$0xff] }
0x21e4   :  { %14860 = vpow2.f32 %v10078_v47 }
0x21e5   :  { %14862 = vpow2.f32 %v10079_v46 }
0x21e6   :  { %14864 = vpow2.f32 %v10080_v51 }
0x21e7   :  { %14866 = vpow2.f32 %v10081_v41 }
0x21ed   :  { %v9474_v45 = vpop.f32.mrb[114].mxu0 }
0x21ee   :  { %v14861_v31 = vpop.eup %14860  ;;  %v12956_v35 = vpop.f32.mrb[115].mxu0  ;;  %v9475_v63 = vadd.f32 %v16891_v16, %v9474_v45 }
0x21ef   :  { %v14863_v49 = vpop.eup %14862  ;;  %v9491_v59 = vadd.f32 1.0, %v14861_v31 }
0x21f0   :  { %v14865_v52 = vpop.eup %14864  ;;  %v9492_v17 = vadd.f32 1.0, %v14863_v49  ;;  %v9517_v55 = vrot.slane %v9475_v63, 1  ;;  %v9518_v61 = vrot.slane %v9475_v63, 2 }
0x21f1   :  { %v14867_v3 = vpop.eup %14866  ;;  %14868 = vrcp.f32 %v9491_v59  ;;  %v9510_v53 = vadd.f32 1.0, %v14865_v52 }
0x21f2   :  { %14870 = vrcp.f32 %v9492_v17  ;;  %v9511_v4 = vadd.f32 1.0, %v14867_v3 }
0x21f3   :  { %14872 = vrcp.f32 %v9510_v53 }
0x21f4   :  { %14874 = vrcp.f32 %v9511_v4 }
0x21fb   :  { %v14869_v5 = vpop.eup %14868 }
0x21fc   :  { %v14871_v34 = vpop.eup %14870  ;;  %v9521_v48 = vmul.f32 %v14869_v5, %v9517_v55 }
0x21fd   :  { %v14873_v14 = vpop.eup %14872  ;;  %v9522_v44 = vmul.f32 %v14871_v34, %v9518_v61 }
0x21fe   :  { %v14875_v23 = vpop.eup %14874  ;;  %v9523_v29 = vadd.f32 %v9521_v48, %v15354_v28  ;;  %v9535_v36 = vmul.f32 %v14873_v14, %v9531_v42  ;;  %v9527_v16 = vsub.f32 1.0, %v14873_v14  ;;  %v9640_v28 = vld [vmem:[%s17039_s14 + $0x30] sm:$0xff] }
0x21ff   :  { %v9524_v40 = vadd.f32 %v9522_v44, %v15360_v43  ;;  %v9536_v62 = vmul.f32 %v14875_v23, %v9532_v21  ;;  %v9528_v13 = vsub.f32 1.0, %v14875_v23  ;;  %v9641_v43 = vld [vmem:[%s17039_s14 + $0x38] sm:$0xff] }
0x2200   :  { %14876 = vtanh.f32 %v9523_v29  ;;  %v14228_v32 = vpack.c.bf16 %v9641_v43, %v9640_v28 }
0x2201   :  { %14878 = vtanh.f32 %v9524_v40 }
0x2202   :  { %14229 = vmatpush3.bf16.msra.mxu0 %v14228_v32 }
0x220a   :  { %v14877_v7 = vpop.eup %14876 }
0x220b   :  { %v14879_v19 = vpop.eup %14878  ;;  %v9529_v12 = vmul.f32 %v14877_v7, %v9527_v16 }
0x220c   :  { %v9530_v30 = vmul.f32 %v14879_v19, %v9528_v13 }
0x220d   :  { %v9537_v50 = vadd.f32 %v9535_v36, %v9529_v12 }
0x220e   :  { %v9538_v1 = vadd.f32 %v9536_v62, %v9530_v30 }
0x220f   :  { %v9556_v26 = vrot.slane %v9537_v50, 7 }
0x2210   :  { %v9557_v37 = vrot.slane %v9538_v1, 6 }
0x2212   :  { %v9558_v0 = vsel %vm959_vm11, %v9557_v37, %v9556_v26 }
0x2213   :  { %12974 = vmatmul.mubr.msk.f32.vlgmr.msra.gmra.mrb[108].mxu1 %vm288_vm3, %v9558_v0 }
0x2214   :  { %13003 = vmatprep.mubr.msk.f32.mxu1 %vm14910_vm10, %v14911_v20  ;;  %14232 = vmatpush3.bf16.msra.mxu1 %v14231_v39  ;;  %v10082_v20 = vld [vmem:[%s17054_s9] ss:$0 sm:$0xff] }
0x2215   :  { %14233 = vmatprep.subr.bf16.mxu1 %v14909_v33  ;;  %v9728_v33 = vld [vmem:[%s17041_s16 + $0x18] sm:$0xff]  ;;  %s9817_s16 = sshll.u32 %s14912_s5, 4  ;;  %s9818_s16 = int_to_ptr.vmem [resolvable:$true] %s9817_s16 }
0x2216   :  { %v14234_v6 = vpack.c.bf16 %v9728_v33, %v9727_v24  ;;  %s14885_s15 = scalar_lea.vmem %s9818_s16, 32  ;;  %p14890_p1 = scmp.lt.s32.totalorder %s9818_s16, %s9818_s16 }
0x2217   :  { %p14886_p0 = scmp.ne.s32.totalorder %s9818_s16, %s14885_s15  ;;  %p14891_p2 = scmp.lt.s32.totalorder %s14885_s15, %s14885_s15 }
0x2218   :  { %14235 = vmatpush3.bf16.msra.mxu1 %v14234_v6 }
0x2219   :  { %p14892_p3 = por %p14891_p2, %p14890_p1 }
0x221b   :  { %p14893_p4 = pnand %p14892_p3, %p14886_p0 }
0x22e6   :  { %v9627_v38 = vpop.f32.mrb[108].mxu1 }
0x22e7   :  { %v9628_v22 = vadd.f32 %v10082_v20, %v9627_v38  ;;  %v12975_v60 = vpop.f32.mrb[109].mxu1 }
0x22e9   :  { %vm9631_vm12 = vcmp.ge.f32.partialorder %v9628_v22, 0.0  ;;  %v9632_v18 = vmul.f32 0.1, %v9628_v22 }
0x22eb   :  { %v9633_v15 = vsel %vm9631_vm12, %v9628_v22, %v9632_v18 }
0x22ec   :  { %12993 = vmatmul.mubr.msk.f32.vlgmr.msra.gmra.mrb[116].mxu0 %vm288_vm3, %v9633_v15 }
0x23bf   :  { %v9718_v57 = vpop.f32.mrb[116].mxu0 }
0x23c0   :  { %v9719_v9 = vadd.f32 %v10084_v8, %v9718_v57  ;;  %v12994_v2 = vpop.f32.mrb[117].mxu0 }
0x23c2   :  { %vm9722_vm13 = vcmp.ge.f32.partialorder %v9719_v9, 0.0  ;;  %v9723_v58 = vmul.f32 0.1, %v9719_v9 }
0x23c4   :  { %v9724_v27 = vsel %vm9722_vm13, %v9719_v9, %v9723_v58 }
0x23c5   :  { %13004 = vmatmul.mubr.msk.f32.vlgmr.msra.gmra.mrb[110].mxu1 %vm9736_vm14, %v9724_v27 }
0x2498   :  { %v9806_v25 = vpop.f32.mrb[110].mxu1 }
0x2499   :  { %v9807_v54 = vadd.f32 %v10086_v56, %v9806_v25  ;;  %v13005_v47 = vpop.f32.mrb[111].mxu1 }
0x249b   :  { %9810 = vst [vmem:[#allocation2] sm:$0x3] %v9807_v54 }
0x249c   :  { %14896 = shalt.err (!%p14893_p4)
}
0x249d   :  { %s14897_s28 = scalar_lea.hbm %s17043_s18, 32 }
0x249e   :  { %p14898_p5 = scmp.ne.s32.totalorder %s17043_s18, %s14897_s28  ;;  %p14901_p6 = scmp.lt.u32.totalorder %s14897_s28, %s17043_s18 }
0x24a0   :  { %p14903_p7 = pnand %p14901_p6, %p14898_p5 }
0x24a2   :  { %14906 = shalt.err (!%p14903_p7)
}
0x24a3   :  { %9820 = dma.vmem_to_hbm [thread:$0]  %s9818_s16, 32, %s17043_s18, [#allocation3]  }
0x24a4   :  { %14907 = dma.done.wait [#allocation3], 32  }
0x24a5   :  { %14908 = vsyncadd [#allocation3], 4294967264 }
0x24a6   :  { %9824 = vsyncpa [#allocation3], 1 }

</bundles_post_ra>
